<compile_context>
chip_gen: v7x
topology: tpu7x:2x2x1
jax: 0.10.0
libtpu: 0.0.40
codegen_flags: <defaults>
</compile_context>

<pallas_src>
import functools

import jax
import jax.numpy as jnp
import numpy as np
from jax.experimental import pallas as pl
from jax.experimental.pallas import tpu as pltpu

_BN_EPS = 1e-5
# Large point tile: per-grid-step overhead (~0.35 us) dwarfs the per-tile MXU
# work for small tiles; 1024 keeps the f32 (tm, 1024) intermediate at 4 MiB.
_TM_TARGET = 1024
# Explicit scoped-VMEM budget: > v5e's 16 MiB default, << v7x's 64 MiB physical.
_VMEM_LIMIT_BYTES = 40 * 1024 * 1024


# ----------------------------------------------------------------------------
# In-kernel helpers
# ----------------------------------------------------------------------------

def _accumulate_max(gmax_ref, a, nt, *, n_tiles, rem):
    """Running max over point tiles into a resident (1, C) block.

    The remainder mask (zero-padded points of the last tile) is evaluated only
    on the last tile, not on every tile."""
    if rem == 0:
        gmax_ref[...] = jnp.maximum(gmax_ref[...],
                                    jnp.max(a, axis=0, keepdims=True))
    else:
        @pl.when(nt < n_tiles - 1)
        def _full():
            gmax_ref[...] = jnp.maximum(gmax_ref[...],
                                        jnp.max(a, axis=0, keepdims=True))

        @pl.when(nt == n_tiles - 1)
        def _masked():
            rows = jax.lax.broadcasted_iota(jnp.int32, (a.shape[0], 1), 0)
            am = jnp.where(rows < rem, a, -jnp.inf)
            gmax_ref[...] = jnp.maximum(gmax_ref[...],
                                        jnp.max(am, axis=0, keepdims=True))


# ----------------------------------------------------------------------------
# Pallas kernels
# ----------------------------------------------------------------------------

def _tnet_kernel(*args, pre, n_tiles, rem):
    """Fully fused TNet.

    [optional per-batch pre-conv = encoder conv1 with the input transform
     folded into its weights] -> TNet conv1(relu) -> conv2(relu) -> conv3 ->
    masked running max over points (resident VMEM scratch) -> FC head
    (fc1 relu, fc2 relu, fc3 + identity) executed on the last point tile.

    Grid = (batch, point_tiles); only the (B, 1, k*k) transform hits HBM.
    """
    if pre:
        (x_ref, w0_ref, s0_ref,
         c1w, c1s, c2w, c2s, c3w, c3s,
         f1w, f1s, f2w, f2s, f3w, f3s,
         t_ref, gmax_ref) = args
    else:
        (x_ref,
         c1w, c1s, c2w, c2s, c3w, c3s,
         f1w, f1s, f2w, f2s, f3w, f3s,
         t_ref, gmax_ref) = args

    nt = pl.program_id(1)

    @pl.when(nt == 0)
    def _init():
        gmax_ref[...] = jnp.full(gmax_ref.shape, -jnp.inf, gmax_ref.dtype)

    h = x_ref[...]                                                 # (tm, Cin) bf16
    if pre:  # recomputed encoder conv1 (input transform folded into w0)
        h = jnp.dot(h, w0_ref[...], preferred_element_type=jnp.float32)
        h = jnp.maximum(h + s0_ref[...], 0.0).astype(jnp.bfloat16)
    h = jnp.dot(h, c1w[...], preferred_element_type=jnp.float32)
    h = jnp.maximum(h + c1s[...], 0.0).astype(jnp.bfloat16)
    h = jnp.dot(h, c2w[...], preferred_element_type=jnp.float32)
    h = jnp.maximum(h + c2s[...], 0.0).astype(jnp.bfloat16)
    a = jnp.dot(h, c3w[...], preferred_element_type=jnp.float32)
    a = a + c3s[...]                                               # (tm, 1024) f32

    _accumulate_max(gmax_ref, a, nt, n_tiles=n_tiles, rem=rem)

    @pl.when(nt == n_tiles - 1)
    def _fc_head():
        g = gmax_ref[...].astype(jnp.bfloat16)                     # (1, 1024)
        z = jnp.dot(g, f1w[...], preferred_element_type=jnp.float32)
        z = jnp.maximum(z + f1s[...], 0.0).astype(jnp.bfloat16)
        z = jnp.dot(z, f2w[...], preferred_element_type=jnp.float32)
        z = jnp.maximum(z + f2s[...], 0.0).astype(jnp.bfloat16)
        z = jnp.dot(z, f3w[...], preferred_element_type=jnp.float32)
        t_ref[...] = (z + f3s[...]).astype(t_ref.dtype)            # identity folded in f3s


def _tail_global_kernel(x_ref, w1e_ref, s1_ref, w2e_ref, s2_ref, w3_ref, s3_ref,
                        g_ref, *, n_tiles, rem):
    """Global-feature path: conv1 (folded input transform, per batch) ->
    conv2 (folded feature transform, per batch) -> conv3 -> masked max.
    Only HBM write is the resident (1, 1024) max block."""
    nt = pl.program_id(1)

    @pl.when(nt == 0)
    def _init():
        g_ref[...] = jnp.full(g_ref.shape, -jnp.inf, g_ref.dtype)

    h = jnp.dot(x_ref[...], w1e_ref[...], preferred_element_type=jnp.float32)
    h = jnp.maximum(h + s1_ref[...], 0.0).astype(jnp.bfloat16)     # (tm, 64)
    a = jnp.dot(h, w2e_ref[...], preferred_element_type=jnp.float32)
    a = jnp.maximum(a + s2_ref[...], 0.0).astype(jnp.bfloat16)     # (tm, 128)
    a = jnp.dot(a, w3_ref[...], preferred_element_type=jnp.float32)
    a = a + s3_ref[...]                                            # (tm, 1024) f32
    _accumulate_max(g_ref, a, nt, n_tiles=n_tiles, rem=rem)


def _tail_pt_kernel(x_ref, w1e_ref, s1_ref, t_ref, w2_ref, s2_ref, w3_ref, s3_ref,
                    pt_ref, g_ref, *, n_tiles, rem):
    """Point-feature path: conv1 -> per-batch 64x64 feature transform
    (emitted lane-dense in channels-first (64, tm) layout) -> conv2 -> conv3
    -> masked max."""
    nt = pl.program_id(1)

    @pl.when(nt == 0)
    def _init():
        g_ref[...] = jnp.full(g_ref.shape, -jnp.inf, g_ref.dtype)

    h = jnp.dot(x_ref[...], w1e_ref[...], preferred_element_type=jnp.float32)
    h = jnp.maximum(h + s1_ref[...], 0.0).astype(jnp.bfloat16)     # (tm, 64)

    # pt_t[c, n] = sum_i T[i, c] * h[n, i]  -> (64, tm), lane-dense store that
    # already matches the module's channels-first output layout.
    pt_t = jax.lax.dot_general(t_ref[...], h,
                               dimension_numbers=(((0,), (1,)), ((), ())),
                               preferred_element_type=jnp.float32)
    pt_ref[...] = pt_t.astype(pt_ref.dtype)

    # conv2 consumes pt_t directly: a[n, c] = sum_j pt_t[j, n] * W2[j, c].
    a = jax.lax.dot_general(pt_t.astype(jnp.bfloat16), w2_ref[...],
                            dimension_numbers=(((0,), (0,)), ((), ())),
                            preferred_element_type=jnp.float32)
    a = jnp.maximum(a + s2_ref[...], 0.0).astype(jnp.bfloat16)     # (tm, 128)
    a = jnp.dot(a, w3_ref[...], preferred_element_type=jnp.float32)
    a = a + s3_ref[...]                                            # (tm, 1024) f32
    _accumulate_max(g_ref, a, nt, n_tiles=n_tiles, rem=rem)


# ----------------------------------------------------------------------------
# pallas_call wrappers
# ----------------------------------------------------------------------------

def _const2d(shape):
    """Full-array resident BlockSpec (weights / shifts)."""
    return pl.BlockSpec(shape, lambda b, n: (0, 0))


def tnet_transform(p, x, *, tm, rem, w1e=None, s1=None):
    """x: (B, Npad, Cin) bf16 channels-last -> (B, k, k) transform (f32).

    If (w1e, s1) are given, the encoder conv1 (with the per-batch input
    transform folded into w1e) is recomputed in-kernel so the (B, Np, 64)
    intermediate never touches HBM."""
    B, Npad, Cin = x.shape
    assert Npad % tm == 0
    n_tiles = Npad // tm
    k = p["k"]
    kk = k * k
    pre = w1e is not None

    ops = [x]
    specs = [pl.BlockSpec((None, tm, Cin), lambda b, n: (b, n, 0))]
    if pre:
        ops += [w1e, s1]
        specs += [pl.BlockSpec((None,) + w1e.shape[1:], lambda b, n: (b, 0, 0)),
                  _const2d(s1.shape)]
    for w, s in (p["c1"], p["c2"], p["c3"], p["f1"], p["f2"], p["f3"]):
        ops += [w, s]
        specs += [_const2d(w.shape), _const2d(s.shape)]

    kern = functools.partial(_tnet_kernel, pre=pre, n_tiles=n_tiles, rem=rem)
    t = pl.pallas_call(
        kern,
        out_shape=jax.ShapeDtypeStruct((B, 1, kk), jnp.float32),
        grid=(B, n_tiles),
        in_specs=specs,
        out_specs=pl.BlockSpec((None, 1, kk), lambda b, n: (b, 0, 0)),
        scratch_shapes=[pltpu.VMEM((1, 1024), jnp.float32)],
        compiler_params=pltpu.CompilerParams(
            dimension_semantics=("parallel", "arbitrary"),
            vmem_limit_bytes=_VMEM_LIMIT_BYTES),
    )(*ops)
    return t.reshape(B, k, k)


def encoder_tail_global(x, w1e, s1, w2e, s2, w3, s3, *, tm, rem):
    """Fused conv1 + (feature-transform-folded) conv2 + conv3 + max -> (B, 1024)."""
    B, Npad, Cin = x.shape
    assert Npad % tm == 0
    n_tiles = Npad // tm
    C3 = w3.shape[1]
    kern = functools.partial(_tail_global_kernel, n_tiles=n_tiles, rem=rem)
    g = pl.pallas_call(
        kern,
        out_shape=jax.ShapeDtypeStruct((B, 1, C3), jnp.float32),
        grid=(B, n_tiles),
        in_specs=[
            pl.BlockSpec((None, tm, Cin), lambda b, n: (b, n, 0)),
            pl.BlockSpec((None,) + w1e.shape[1:], lambda b, n: (b, 0, 0)),
            _const2d(s1.shape),
            pl.BlockSpec((None,) + w2e.shape[1:], lambda b, n: (b, 0, 0)),
            _const2d(s2.shape),
            _const2d(w3.shape),
            _const2d(s3.shape),
        ],
        out_specs=pl.BlockSpec((None, 1, C3), lambda b, n: (b, 0, 0)),
        compiler_params=pltpu.CompilerParams(
            dimension_semantics=("parallel", "arbitrary"),
            vmem_limit_bytes=_VMEM_LIMIT_BYTES),
    )(x, w1e, s1, w2e, s2, w3, s3)
    return g.reshape(B, C3)


def encoder_tail_pt(x, w1e, s1, t_feat, w2, s2, w3, s3, *, tm, rem):
    """Fused conv1 + feature transform + conv2 + conv3 + max.

    Returns (pt, g): pt (B, 64, Npad) f32 channels-first point features,
    g (B, 1024) f32 global feature."""
    B, Npad, Cin = x.shape
    assert Npad % tm == 0
    n_tiles = Npad // tm
    C0 = t_feat.shape[-1]
    C3 = w3.shape[1]
    kern = functools.partial(_tail_pt_kernel, n_tiles=n_tiles, rem=rem)
    pt, g = pl.pallas_call(
        kern,
        out_shape=(jax.ShapeDtypeStruct((B, C0, Npad), jnp.float32),
                   jax.ShapeDtypeStruct((B, 1, C3), jnp.float32)),
        grid=(B, n_tiles),
        in_specs=[
            pl.BlockSpec((None, tm, Cin), lambda b, n: (b, n, 0)),
            pl.BlockSpec((None,) + w1e.shape[1:], lambda b, n: (b, 0, 0)),
            _const2d(s1.shape),
            pl.BlockSpec((None, C0, C0), lambda b, n: (b, 0, 0)),
            _const2d(w2.shape),
            _const2d(s2.shape),
            _const2d(w3.shape),
            _const2d(s3.shape),
        ],
        out_specs=(pl.BlockSpec((None, C0, tm), lambda b, n: (b, 0, n)),
                   pl.BlockSpec((None, 1, C3), lambda b, n: (b, 0, 0))),
        compiler_params=pltpu.CompilerParams(
            dimension_semantics=("parallel", "arbitrary"),
            vmem_limit_bytes=_VMEM_LIMIT_BYTES),
    )(x, w1e, s1, t_feat, w2, s2, w3, s3)
    return pt, g.reshape(B, C3)


# ----------------------------------------------------------------------------
# Deterministic parameter construction (BatchNorm eval-mode, folded)
# ----------------------------------------------------------------------------

def make_conv_bn(key, cin, cout):
    """1x1 Conv1d/Linear + BatchNorm folded: BN scale into weight cols, rest into shift."""
    k1, k2, k3, k4, k5, k6 = jax.random.split(key, 6)
    w = jax.random.normal(k1, (cin, cout), jnp.float32) / np.sqrt(cin)
    b = 0.01 * jax.random.normal(k2, (cout,), jnp.float32)
    gamma = 1.0 + 0.1 * jax.random.normal(k3, (cout,), jnp.float32)
    beta = 0.1 * jax.random.normal(k4, (cout,), jnp.float32)
    mean = 0.05 * jax.random.normal(k5, (cout,), jnp.float32)
    var = 1.0 + 0.1 * jnp.abs(jax.random.normal(k6, (cout,), jnp.float32))
    scale = gamma / jnp.sqrt(var + _BN_EPS)
    w_folded = (w * scale[None, :]).astype(jnp.bfloat16)
    shift = ((b - mean) * scale + beta).reshape(1, cout).astype(jnp.float32)
    return w_folded, shift


def make_tnet_fc3(key, cin, k):
    """TNet fcn3 (plain Linear); the flattened identity matrix is folded into its bias."""
    k1, k2 = jax.random.split(key)
    cout = k * k
    w = jax.random.normal(k1, (cin, cout), jnp.float32) / np.sqrt(cin)
    b = 0.01 * jax.random.normal(k2, (cout,), jnp.float32)
    shift = (b + jnp.eye(k, dtype=jnp.float32).reshape(cout)).reshape(1, cout)
    return w.astype(jnp.bfloat16), shift.astype(jnp.float32)


def make_tnet_params(key, k):
    ks = jax.random.split(key, 6)
    return {
        "k": k,
        "c1": make_conv_bn(ks[0], k, 64),
        "c2": make_conv_bn(ks[1], 64, 128),
        "c3": make_conv_bn(ks[2], 128, 1024),
        "f1": make_conv_bn(ks[3], 1024, 512),
        "f2": make_conv_bn(ks[4], 512, 256),
        "f3": make_tnet_fc3(ks[5], 256, k),
    }


def make_encoder_params(key):
    ks = jax.random.split(key, 5)
    return {
        "tnet3": make_tnet_params(ks[0], 3),
        "tnet64": make_tnet_params(ks[1], 64),
        "c1": make_conv_bn(ks[2], 3, 64),
        "c2": make_conv_bn(ks[3], 64, 128),
        "c3": make_conv_bn(ks[4], 128, 1024),
    }


# ----------------------------------------------------------------------------
# Forward pass (glue in JAX, hot path in Pallas)
# ----------------------------------------------------------------------------

def pointnet_encoder_forward(params, x_b3n, *, return_point_features=False,
                             tm_target=_TM_TARGET):
    """Matches PointNetEncoder.forward: x (B, 3, N) ->
       (B, 1024), or (B, 1088, N) if return_point_features."""
    B, _, N = x_b3n.shape
    x = jnp.transpose(x_b3n, (0, 2, 1)).astype(jnp.bfloat16)        # (B, N, 3)

    # Point-tile size: full-N single tile for small clouds; else fixed tiles
    # with the (static) remainder masked out of the max reductions.
    if N > tm_target:
        tm = tm_target
        n_tiles = -(-N // tm)
        npad = n_tiles * tm
        rem = N % tm
        if npad != N:
            x = jnp.pad(x, ((0, 0), (0, npad - N), (0, 0)))
    else:
        tm, rem = N, 0

    # --- input transform net (k=3), fully fused ------------------------------
    t_in = tnet_transform(params["tnet3"], x, tm=tm, rem=rem)        # (B, 3, 3)

    # Fold the per-batch input transform + BN into conv1's weights.
    w1, s1 = params["c1"]
    w1e = jnp.einsum("bij,jk->bik", t_in,
                     w1.astype(jnp.float32)).astype(jnp.bfloat16)    # (B, 3, 64)

    # --- feature transform net (k=64), conv1 recomputed in-kernel ------------
    t_feat = tnet_transform(params["tnet64"], x, tm=tm, rem=rem,
                            w1e=w1e, s1=s1)                          # (B, 64, 64)

    w2, s2 = params["c2"]
    w3, s3 = params["c3"]

    if not return_point_features:
        # Fold the 64x64 feature transform into conv2 -> no point-feature output.
        w2e = jnp.einsum("bij,jk->bik", t_feat,
                         w2.astype(jnp.float32)).astype(jnp.bfloat16)  # (B, 64, 128)
        return encoder_tail_global(x, w1e, s1, w2e, s2, w3, s3, tm=tm, rem=rem)

    pt, g = encoder_tail_pt(x, w1e, s1, t_feat.astype(jnp.bfloat16),
                            w2, s2, w3, s3, tm=tm, rem=rem)
    pt = pt[:, :, :N]                                                # (B, 64, N), already channels-first
    g_rep = jnp.broadcast_to(g[:, :, None], (B, 1024, N))
    return jnp.concatenate([g_rep, pt], axis=1)                      # (B, 1088, N)


# ----------------------------------------------------------------------------
# Main
# ----------------------------------------------------------------------------

if __name__ == "__main__":
    B, N_POINTS = 2, 16

    root = jax.random.PRNGKey(0)
    k_params, k_input = jax.random.split(root)
    params = make_encoder_params(k_params)

    # PyTorch-style input layout: (batch, channels=3, num_points)
    x = jax.random.normal(k_input, (B, 3, N_POINTS), jnp.float32)

    fwd_feat = jax.jit(functools.partial(pointnet_encoder_forward, params,
                                         return_point_features=True))
    fwd_glob = jax.jit(functools.partial(pointnet_encoder_forward, params,
                                         return_point_features=False))

    out_feat = jax.block_until_ready(fwd_feat(x))
    out_glob = jax.block_until_ready(fwd_glob(x))

    assert out_feat.shape == (B, 1024 + 64, N_POINTS), out_feat.shape
    assert out_glob.shape == (B, 1024), out_glob.shape
    assert bool(jnp.all(jnp.isfinite(out_feat)))
    assert bool(jnp.all(jnp.isfinite(out_glob)))

    print("KERNEL_OK")
</pallas_src>

<mosaic_0001>
module attributes {stable_mosaic.version = 11 : i64} {
  func.func @_tnet_kernel(%arg0: i32, %arg1: i32, %arg2: memref<1x16x3xbf16, #tpu.memory_space<vmem>>, %arg3: memref<3x64xbf16, #tpu.memory_space<vmem>>, %arg4: memref<1x64xf32, #tpu.memory_space<vmem>>, %arg5: memref<64x128xbf16, #tpu.memory_space<vmem>>, %arg6: memref<1x128xf32, #tpu.memory_space<vmem>>, %arg7: memref<128x1024xbf16, #tpu.memory_space<vmem>>, %arg8: memref<1x1024xf32, #tpu.memory_space<vmem>>, %arg9: memref<1024x512xbf16, #tpu.memory_space<vmem>>, %arg10: memref<1x512xf32, #tpu.memory_space<vmem>>, %arg11: memref<512x256xbf16, #tpu.memory_space<vmem>>, %arg12: memref<1x256xf32, #tpu.memory_space<vmem>>, %arg13: memref<256x9xbf16, #tpu.memory_space<vmem>>, %arg14: memref<1x9xf32, #tpu.memory_space<vmem>>, %arg15: memref<1x1x9xf32, #tpu.memory_space<vmem>>, %arg16: memref<1x1024xf32, #tpu.memory_space<vmem>>) attributes {dimension_semantics = [#tpu.dimension_semantics<parallel>, #tpu.dimension_semantics<arbitrary>], iteration_bounds = array<i64: 2, 1>, scalar_prefetch = 0 : i64, scratch_operands = 1 : i64, tpu.core_type = #tpu.core_type<tc>, window_params = [{transform_indices = @transform_0, window_bounds = array<i64: 1, 16, 3>}, {pipeline_mode = #tpu.pipeline_mode<synchronous>, transform_indices = @transform_1, window_bounds = array<i64: 3, 64>}, {pipeline_mode = #tpu.pipeline_mode<synchronous>, transform_indices = @transform_2, window_bounds = array<i64: 1, 64>}, {pipeline_mode = #tpu.pipeline_mode<synchronous>, transform_indices = @transform_3, window_bounds = array<i64: 64, 128>}, {pipeline_mode = #tpu.pipeline_mode<synchronous>, transform_indices = @transform_4, window_bounds = array<i64: 1, 128>}, {pipeline_mode = #tpu.pipeline_mode<synchronous>, transform_indices = @transform_5, window_bounds = array<i64: 128, 1024>}, {pipeline_mode = #tpu.pipeline_mode<synchronous>, transform_indices = @transform_6, window_bounds = array<i64: 1, 1024>}, {pipeline_mode = #tpu.pipeline_mode<synchronous>, transform_indices = @transform_7, window_bounds = array<i64: 1024, 512>}, {pipeline_mode = #tpu.pipeline_mode<synchronous>, transform_indices = @transform_8, window_bounds = array<i64: 1, 512>}, {pipeline_mode = #tpu.pipeline_mode<synchronous>, transform_indices = @transform_9, window_bounds = array<i64: 512, 256>}, {pipeline_mode = #tpu.pipeline_mode<synchronous>, transform_indices = @transform_10, window_bounds = array<i64: 1, 256>}, {pipeline_mode = #tpu.pipeline_mode<synchronous>, transform_indices = @transform_11, window_bounds = array<i64: 256, 9>}, {pipeline_mode = #tpu.pipeline_mode<synchronous>, transform_indices = @transform_12, window_bounds = array<i64: 1, 9>}, {transform_indices = @transform_13, window_bounds = array<i64: 1, 1, 9>}]} {
    %c0_i32 = arith.constant 0 : i32
    %0 = arith.cmpi eq, %arg1, %c0_i32 : i32
    %1 = arith.extui %0 : i1 to i32
    %c0_i32_0 = arith.constant 0 : i32
    %2 = arith.cmpi ne, %1, %c0_i32_0 : i32
    scf.if %2 {
      %cst_26 = arith.constant 0xFF800000 : f32
      %34 = vector.broadcast %cst_26 : f32 to vector<1x1024xf32>
      %c0_27 = arith.constant 0 : index
      %c0_28 = arith.constant 0 : index
      %35 = vector.load %arg16[%c0_27, %c0_28] : memref<1x1024xf32, #tpu.memory_space<vmem>>, vector<1x1024xf32>
      tpu.vector_store %arg16[%c0_27, %c0_28], %34 {strides = array<i32>} : memref<1x1024xf32, #tpu.memory_space<vmem>>, vector<1x1024xf32>,
    } else {
    }
    %c0 = arith.constant 0 : index
    %c0_1 = arith.constant 0 : index
    %c0_2 = arith.constant 0 : index
    %3 = vector.load %arg2[%c0, %c0_1, %c0_2] : memref<1x16x3xbf16, #tpu.memory_space<vmem>>, vector<1x16x3xbf16>
    %4 = vector.shape_cast %3 : vector<1x16x3xbf16> to vector<16x3xbf16>
    %c0_3 = arith.constant 0 : index
    %c0_4 = arith.constant 0 : index
    %5 = vector.load %arg3[%c0_3, %c0_4] : memref<3x64xbf16, #tpu.memory_space<vmem>>, vector<3x64xbf16>
    %cst = arith.constant dense<0.000000e+00> : vector<16x64xf32>
    %6 = tpu.matmul %4, %5, %cst {dimension_numbers = #tpu.dot_dimension_numbers<[1], [0], [0], [1], [0, 0, 1, 1], [], []>} : vector<16x3xbf16>, vector<3x64xbf16>, vector<16x64xf32> -> vector<16x64xf32>
    %c0_5 = arith.constant 0 : index
    %c0_6 = arith.constant 0 : index
    %7 = vector.load %arg4[%c0_5, %c0_6] : memref<1x64xf32, #tpu.memory_space<vmem>>, vector<1x64xf32>
    %8 = vector.broadcast %7 : vector<1x64xf32> to vector<16x64xf32>
    %9 = arith.addf %6, %8 : vector<16x64xf32>
    %cst_7 = arith.constant 0.000000e+00 : f32
    %10 = vector.broadcast %cst_7 : f32 to vector<16x64xf32>
    %11 = arith.maximumf %9, %10 : vector<16x64xf32>
    %12 = arith.truncf %11 : vector<16x64xf32> to vector<16x64xbf16>
    %c0_8 = arith.constant 0 : index
    %c0_9 = arith.constant 0 : index
    %13 = vector.load %arg5[%c0_8, %c0_9] : memref<64x128xbf16, #tpu.memory_space<vmem>>, vector<64x128xbf16>
    %cst_10 = arith.constant dense<0.000000e+00> : vector<16x128xf32>
    %14 = tpu.matmul %12, %13, %cst_10 {dimension_numbers = #tpu.dot_dimension_numbers<[1], [0], [0], [1], [0, 0, 1, 1], [], []>} : vector<16x64xbf16>, vector<64x128xbf16>, vector<16x128xf32> -> vector<16x128xf32>
    %c0_11 = arith.constant 0 : index
    %c0_12 = arith.constant 0 : index
    %15 = vector.load %arg6[%c0_11, %c0_12] : memref<1x128xf32, #tpu.memory_space<vmem>>, vector<1x128xf32>
    %16 = vector.broadcast %15 : vector<1x128xf32> to vector<16x128xf32>
    %17 = arith.addf %14, %16 : vector<16x128xf32>
    %cst_13 = arith.constant 0.000000e+00 : f32
    %18 = vector.broadcast %cst_13 : f32 to vector<16x128xf32>
    %19 = arith.maximumf %17, %18 : vector<16x128xf32>
    %20 = arith.truncf %19 : vector<16x128xf32> to vector<16x128xbf16>
    %c0_14 = arith.constant 0 : index
    %c0_15 = arith.constant 0 : index
    %21 = vector.load %arg7[%c0_14, %c0_15] : memref<128x1024xbf16, #tpu.memory_space<vmem>>, vector<128x1024xbf16>
    %cst_16 = arith.constant dense<0.000000e+00> : vector<16x1024xf32>
    %22 = tpu.matmul %20, %21, %cst_16 {dimension_numbers = #tpu.dot_dimension_numbers<[1], [0], [0], [1], [0, 0, 1, 1], [], []>} : vector<16x128xbf16>, vector<128x1024xbf16>, vector<16x1024xf32> -> vector<16x1024xf32>
    %c0_17 = arith.constant 0 : index
    %c0_18 = arith.constant 0 : index
    %23 = vector.load %arg8[%c0_17, %c0_18] : memref<1x1024xf32, #tpu.memory_space<vmem>>, vector<1x1024xf32>
    %24 = vector.broadcast %23 : vector<1x1024xf32> to vector<16x1024xf32>
    %25 = arith.addf %22, %24 : vector<16x1024xf32>
    %c0_19 = arith.constant 0 : index
    %c0_20 = arith.constant 0 : index
    %26 = vector.load %arg16[%c0_19, %c0_20] : memref<1x1024xf32, #tpu.memory_space<vmem>>, vector<1x1024xf32>
    %cst_21 = arith.constant dense<0xFF800000> : vector<1024xf32>
    %27 = vector.multi_reduction <maximumf>, %25, %cst_21 [0] : vector<16x1024xf32> to vector<1024xf32>
    %28 = vector.shape_cast %27 : vector<1024xf32> to vector<1x1024xf32>
    %29 = arith.maximumf %26, %28 : vector<1x1024xf32>
    %c0_22 = arith.constant 0 : index
    %c0_23 = arith.constant 0 : index
    %30 = vector.load %arg16[%c0_22, %c0_23] : memref<1x1024xf32, #tpu.memory_space<vmem>>, vector<1x1024xf32>
    tpu.vector_store %arg16[%c0_22, %c0_23], %29 {strides = array<i32>} : memref<1x1024xf32, #tpu.memory_space<vmem>>, vector<1x1024xf32>,
    %c0_i32_24 = arith.constant 0 : i32
    %31 = arith.cmpi eq, %arg1, %c0_i32_24 : i32
    %32 = arith.extui %31 : i1 to i32
    %c0_i32_25 = arith.constant 0 : i32
    %33 = arith.cmpi ne, %32, %c0_i32_25 : i32
    scf.if %33 {
      %c0_26 = arith.constant 0 : index
      %c0_27 = arith.constant 0 : index
      %34 = vector.load %arg16[%c0_26, %c0_27] : memref<1x1024xf32, #tpu.memory_space<vmem>>, vector<1x1024xf32>
      %35 = arith.truncf %34 : vector<1x1024xf32> to vector<1x1024xbf16>
      %c0_28 = arith.constant 0 : index
      %c0_29 = arith.constant 0 : index
      %36 = vector.load %arg9[%c0_28, %c0_29] : memref<1024x512xbf16, #tpu.memory_space<vmem>>, vector<1024x512xbf16>
      %cst_30 = arith.constant dense<0.000000e+00> : vector<1x512xf32>
      %37 = tpu.matmul %35, %36, %cst_30 {dimension_numbers = #tpu.dot_dimension_numbers<[1], [0], [0], [1], [0, 0, 1, 1], [], []>} : vector<1x1024xbf16>, vector<1024x512xbf16>, vector<1x512xf32> -> vector<1x512xf32>
      %c0_31 = arith.constant 0 : index
      %c0_32 = arith.constant 0 : index
      %38 = vector.load %arg10[%c0_31, %c0_32] : memref<1x512xf32, #tpu.memory_space<vmem>>, vector<1x512xf32>
      %39 = arith.addf %37, %38 : vector<1x512xf32>
      %cst_33 = arith.constant 0.000000e+00 : f32
      %40 = vector.broadcast %cst_33 : f32 to vector<1x512xf32>
      %41 = arith.maximumf %39, %40 : vector<1x512xf32>
      %42 = arith.truncf %41 : vector<1x512xf32> to vector<1x512xbf16>
      %c0_34 = arith.constant 0 : index
      %c0_35 = arith.constant 0 : index
      %43 = vector.load %arg11[%c0_34, %c0_35] : memref<512x256xbf16, #tpu.memory_space<vmem>>, vector<512x256xbf16>
      %cst_36 = arith.constant dense<0.000000e+00> : vector<1x256xf32>
      %44 = tpu.matmul %42, %43, %cst_36 {dimension_numbers = #tpu.dot_dimension_numbers<[1], [0], [0], [1], [0, 0, 1, 1], [], []>} : vector<1x512xbf16>, vector<512x256xbf16>, vector<1x256xf32> -> vector<1x256xf32>
      %c0_37 = arith.constant 0 : index
      %c0_38 = arith.constant 0 : index
      %45 = vector.load %arg12[%c0_37, %c0_38] : memref<1x256xf32, #tpu.memory_space<vmem>>, vector<1x256xf32>
      %46 = arith.addf %44, %45 : vector<1x256xf32>
      %cst_39 = arith.constant 0.000000e+00 : f32
      %47 = vector.broadcast %cst_39 : f32 to vector<1x256xf32>
      %48 = arith.maximumf %46, %47 : vector<1x256xf32>
      %49 = arith.truncf %48 : vector<1x256xf32> to vector<1x256xbf16>
      %c0_40 = arith.constant 0 : index
      %c0_41 = arith.constant 0 : index
      %50 = vector.load %arg13[%c0_40, %c0_41] : memref<256x9xbf16, #tpu.memory_space<vmem>>, vector<256x9xbf16>
      %cst_42 = arith.constant dense<0.000000e+00> : vector<1x9xf32>
      %51 = tpu.matmul %49, %50, %cst_42 {dimension_numbers = #tpu.dot_dimension_numbers<[1], [0], [0], [1], [0, 0, 1, 1], [], []>} : vector<1x256xbf16>, vector<256x9xbf16>, vector<1x9xf32> -> vector<1x9xf32>
      %c0_43 = arith.constant 0 : index
      %c0_44 = arith.constant 0 : index
      %52 = vector.load %arg14[%c0_43, %c0_44] : memref<1x9xf32, #tpu.memory_space<vmem>>, vector<1x9xf32>
      %53 = arith.addf %51, %52 : vector<1x9xf32>
      %c0_45 = arith.constant 0 : index
      %c0_46 = arith.constant 0 : index
      %c0_47 = arith.constant 0 : index
      %54 = vector.load %arg15[%c0_45, %c0_46, %c0_47] : memref<1x1x9xf32, #tpu.memory_space<vmem>>, vector<1x1x9xf32>
      %55 = vector.shape_cast %54 : vector<1x1x9xf32> to vector<1x9xf32>
      %56 = vector.shape_cast %53 : vector<1x9xf32> to vector<1x1x9xf32>
      tpu.vector_store %arg15[%c0_45, %c0_46, %c0_47], %56 {strides = array<i32>} : memref<1x1x9xf32, #tpu.memory_space<vmem>>, vector<1x1x9xf32>,
    } else {
    }
    return
  }
  func.func @transform_0(%arg0: i32, %arg1: i32) -> (i32, i32, i32) {
    %c0_i32 = arith.constant 0 : i32
    %c0_i32_0 = arith.constant 0 : i32
    return %arg0, %arg1, %c0_i32 : i32, i32, i32
  }
  func.func @transform_1(%arg0: i32, %arg1: i32) -> (i32, i32) {
    %c0_i32 = arith.constant 0 : i32
    %c0_i32_0 = arith.constant 0 : i32
    %c0_i32_1 = arith.constant 0 : i32
    return %c0_i32, %c0_i32_0 : i32, i32
  }
  func.func @transform_2(%arg0: i32, %arg1: i32) -> (i32, i32) {
    %c0_i32 = arith.constant 0 : i32
    %c0_i32_0 = arith.constant 0 : i32
    %c0_i32_1 = arith.constant 0 : i32
    return %c0_i32, %c0_i32_0 : i32, i32
  }
  func.func @transform_3(%arg0: i32, %arg1: i32) -> (i32, i32) {
    %c0_i32 = arith.constant 0 : i32
    %c0_i32_0 = arith.constant 0 : i32
    %c0_i32_1 = arith.constant 0 : i32
    return %c0_i32, %c0_i32_0 : i32, i32
  }
  func.func @transform_4(%arg0: i32, %arg1: i32) -> (i32, i32) {
    %c0_i32 = arith.constant 0 : i32
    %c0_i32_0 = arith.constant 0 : i32
    %c0_i32_1 = arith.constant 0 : i32
    return %c0_i32, %c0_i32_0 : i32, i32
  }
  func.func @transform_5(%arg0: i32, %arg1: i32) -> (i32, i32) {
    %c0_i32 = arith.constant 0 : i32
    %c0_i32_0 = arith.constant 0 : i32
    %c0_i32_1 = arith.constant 0 : i32
    return %c0_i32, %c0_i32_0 : i32, i32
  }
  func.func @transform_6(%arg0: i32, %arg1: i32) -> (i32, i32) {
    %c0_i32 = arith.constant 0 : i32
    %c0_i32_0 = arith.constant 0 : i32
    %c0_i32_1 = arith.constant 0 : i32
    return %c0_i32, %c0_i32_0 : i32, i32
  }
  func.func @transform_7(%arg0: i32, %arg1: i32) -> (i32, i32) {
    %c0_i32 = arith.constant 0 : i32
    %c0_i32_0 = arith.constant 0 : i32
    %c0_i32_1 = arith.constant 0 : i32
    return %c0_i32, %c0_i32_0 : i32, i32
  }
  func.func @transform_8(%arg0: i32, %arg1: i32) -> (i32, i32) {
    %c0_i32 = arith.constant 0 : i32
    %c0_i32_0 = arith.constant 0 : i32
    %c0_i32_1 = arith.constant 0 : i32
    return %c0_i32, %c0_i32_0 : i32, i32
  }
  func.func @transform_9(%arg0: i32, %arg1: i32) -> (i32, i32) {
    %c0_i32 = arith.constant 0 : i32
    %c0_i32_0 = arith.constant 0 : i32
    %c0_i32_1 = arith.constant 0 : i32
    return %c0_i32, %c0_i32_0 : i32, i32
  }
  func.func @transform_10(%arg0: i32, %arg1: i32) -> (i32, i32) {
    %c0_i32 = arith.constant 0 : i32
    %c0_i32_0 = arith.constant 0 : i32
    %c0_i32_1 = arith.constant 0 : i32
    return %c0_i32, %c0_i32_0 : i32, i32
  }
  func.func @transform_11(%arg0: i32, %arg1: i32) -> (i32, i32) {
    %c0_i32 = arith.constant 0 : i32
    %c0_i32_0 = arith.constant 0 : i32
    %c0_i32_1 = arith.constant 0 : i32
    return %c0_i32, %c0_i32_0 : i32, i32
  }
  func.func @transform_12(%arg0: i32, %arg1: i32) -> (i32, i32) {
    %c0_i32 = arith.constant 0 : i32
    %c0_i32_0 = arith.constant 0 : i32
    %c0_i32_1 = arith.constant 0 : i32
    return %c0_i32, %c0_i32_0 : i32, i32
  }
  func.func @transform_13(%arg0: i32, %arg1: i32) -> (i32, i32, i32) {
    %c0_i32 = arith.constant 0 : i32
    %c0_i32_0 = arith.constant 0 : i32
    %c0_i32_1 = arith.constant 0 : i32
    return %arg0, %c0_i32, %c0_i32_0 : i32, i32, i32
  }
}

module attributes {stable_mosaic.version = 11 : i64} {
  func.func @_tnet_kernel(%arg0: i32, %arg1: i32, %arg2: memref<1x16x3xbf16, #tpu.memory_space<vmem>>, %arg3: memref<1x3x64xbf16, #tpu.memory_space<vmem>>, %arg4: memref<1x64xf32, #tpu.memory_space<vmem>>, %arg5: memref<64x64xbf16, #tpu.memory_space<vmem>>, %arg6: memref<1x64xf32, #tpu.memory_space<vmem>>, %arg7: memref<64x128xbf16, #tpu.memory_space<vmem>>, %arg8: memref<1x128xf32, #tpu.memory_space<vmem>>, %arg9: memref<128x1024xbf16, #tpu.memory_space<vmem>>, %arg10: memref<1x1024xf32, #tpu.memory_space<vmem>>, %arg11: memref<1024x512xbf16, #tpu.memory_space<vmem>>, %arg12: memref<1x512xf32, #tpu.memory_space<vmem>>, %arg13: memref<512x256xbf16, #tpu.memory_space<vmem>>, %arg14: memref<1x256xf32, #tpu.memory_space<vmem>>, %arg15: memref<256x4096xbf16, #tpu.memory_space<vmem>>, %arg16: memref<1x4096xf32, #tpu.memory_space<vmem>>, %arg17: memref<1x1x4096xf32, #tpu.memory_space<vmem>>, %arg18: memref<1x1024xf32, #tpu.memory_space<vmem>>) attributes {dimension_semantics = [#tpu.dimension_semantics<parallel>, #tpu.dimension_semantics<arbitrary>], iteration_bounds = array<i64: 2, 1>, scalar_prefetch = 0 : i64, scratch_operands = 1 : i64, tpu.core_type = #tpu.core_type<tc>, window_params = [{transform_indices = @transform_0, window_bounds = array<i64: 1, 16, 3>}, {transform_indices = @transform_1, window_bounds = array<i64: 1, 3, 64>}, {pipeline_mode = #tpu.pipeline_mode<synchronous>, transform_indices = @transform_2, window_bounds = array<i64: 1, 64>}, {pipeline_mode = #tpu.pipeline_mode<synchronous>, transform_indices = @transform_3, window_bounds = array<i64: 64, 64>}, {pipeline_mode = #tpu.pipeline_mode<synchronous>, transform_indices = @transform_4, window_bounds = array<i64: 1, 64>}, {pipeline_mode = #tpu.pipeline_mode<synchronous>, transform_indices = @transform_5, window_bounds = array<i64: 64, 128>}, {pipeline_mode = #tpu.pipeline_mode<synchronous>, transform_indices = @transform_6, window_bounds = array<i64: 1, 128>}, {pipeline_mode = #tpu.pipeline_mode<synchronous>, transform_indices = @transform_7, window_bounds = array<i64: 128, 1024>}, {pipeline_mode = #tpu.pipeline_mode<synchronous>, transform_indices = @transform_8, window_bounds = array<i64: 1, 1024>}, {pipeline_mode = #tpu.pipeline_mode<synchronous>, transform_indices = @transform_9, window_bounds = array<i64: 1024, 512>}, {pipeline_mode = #tpu.pipeline_mode<synchronous>, transform_indices = @transform_10, window_bounds = array<i64: 1, 512>}, {pipeline_mode = #tpu.pipeline_mode<synchronous>, transform_indices = @transform_11, window_bounds = array<i64: 512, 256>}, {pipeline_mode = #tpu.pipeline_mode<synchronous>, transform_indices = @transform_12, window_bounds = array<i64: 1, 256>}, {pipeline_mode = #tpu.pipeline_mode<synchronous>, transform_indices = @transform_13, window_bounds = array<i64: 256, 4096>}, {pipeline_mode = #tpu.pipeline_mode<synchronous>, transform_indices = @transform_14, window_bounds = array<i64: 1, 4096>}, {transform_indices = @transform_15, window_bounds = array<i64: 1, 1, 4096>}]} {
    %c0_i32 = arith.constant 0 : i32
    %0 = arith.cmpi eq, %arg1, %c0_i32 : i32
    %1 = arith.extui %0 : i1 to i32
    %c0_i32_0 = arith.constant 0 : i32
    %2 = arith.cmpi ne, %1, %c0_i32_0 : i32
    scf.if %2 {
      %cst_33 = arith.constant 0xFF800000 : f32
      %43 = vector.broadcast %cst_33 : f32 to vector<1x1024xf32>
      %c0_34 = arith.constant 0 : index
      %c0_35 = arith.constant 0 : index
      %44 = vector.load %arg18[%c0_34, %c0_35] : memref<1x1024xf32, #tpu.memory_space<vmem>>, vector<1x1024xf32>
      tpu.vector_store %arg18[%c0_34, %c0_35], %43 {strides = array<i32>} : memref<1x1024xf32, #tpu.memory_space<vmem>>, vector<1x1024xf32>,
    } else {
    }
    %c0 = arith.constant 0 : index
    %c0_1 = arith.constant 0 : index
    %c0_2 = arith.constant 0 : index
    %3 = vector.load %arg2[%c0, %c0_1, %c0_2] : memref<1x16x3xbf16, #tpu.memory_space<vmem>>, vector<1x16x3xbf16>
    %4 = vector.shape_cast %3 : vector<1x16x3xbf16> to vector<16x3xbf16>
    %c0_3 = arith.constant 0 : index
    %c0_4 = arith.constant 0 : index
    %c0_5 = arith.constant 0 : index
    %5 = vector.load %arg3[%c0_3, %c0_4, %c0_5] : memref<1x3x64xbf16, #tpu.memory_space<vmem>>, vector<1x3x64xbf16>
    %6 = vector.shape_cast %5 : vector<1x3x64xbf16> to vector<3x64xbf16>
    %cst = arith.constant dense<0.000000e+00> : vector<16x64xf32>
    %7 = tpu.matmul %4, %6, %cst {dimension_numbers = #tpu.dot_dimension_numbers<[1], [0], [0], [1], [0, 0, 1, 1], [], []>} : vector<16x3xbf16>, vector<3x64xbf16>, vector<16x64xf32> -> vector<16x64xf32>
    %c0_6 = arith.constant 0 : index
    %c0_7 = arith.constant 0 : index
    %8 = vector.load %arg4[%c0_6, %c0_7] : memref<1x64xf32, #tpu.memory_space<vmem>>, vector<1x64xf32>
    %9 = vector.broadcast %8 : vector<1x64xf32> to vector<16x64xf32>
    %10 = arith.addf %7, %9 : vector<16x64xf32>
    %cst_8 = arith.constant 0.000000e+00 : f32
    %11 = vector.broadcast %cst_8 : f32 to vector<16x64xf32>
    %12 = arith.maximumf %10, %11 : vector<16x64xf32>
    %13 = arith.truncf %12 : vector<16x64xf32> to vector<16x64xbf16>
    %c0_9 = arith.constant 0 : index
    %c0_10 = arith.constant 0 : index
    %14 = vector.load %arg5[%c0_9, %c0_10] : memref<64x64xbf16, #tpu.memory_space<vmem>>, vector<64x64xbf16>
    %cst_11 = arith.constant dense<0.000000e+00> : vector<16x64xf32>
    %15 = tpu.matmul %13, %14, %cst_11 {dimension_numbers = #tpu.dot_dimension_numbers<[1], [0], [0], [1], [0, 0, 1, 1], [], []>} : vector<16x64xbf16>, vector<64x64xbf16>, vector<16x64xf32> -> vector<16x64xf32>
    %c0_12 = arith.constant 0 : index
    %c0_13 = arith.constant 0 : index
    %16 = vector.load %arg6[%c0_12, %c0_13] : memref<1x64xf32, #tpu.memory_space<vmem>>, vector<1x64xf32>
    %17 = vector.broadcast %16 : vector<1x64xf32> to vector<16x64xf32>
    %18 = arith.addf %15, %17 : vector<16x64xf32>
    %cst_14 = arith.constant 0.000000e+00 : f32
    %19 = vector.broadcast %cst_14 : f32 to vector<16x64xf32>
    %20 = arith.maximumf %18, %19 : vector<16x64xf32>
    %21 = arith.truncf %20 : vector<16x64xf32> to vector<16x64xbf16>
    %c0_15 = arith.constant 0 : index
    %c0_16 = arith.constant 0 : index
    %22 = vector.load %arg7[%c0_15, %c0_16] : memref<64x128xbf16, #tpu.memory_space<vmem>>, vector<64x128xbf16>
    %cst_17 = arith.constant dense<0.000000e+00> : vector<16x128xf32>
    %23 = tpu.matmul %21, %22, %cst_17 {dimension_numbers = #tpu.dot_dimension_numbers<[1], [0], [0], [1], [0, 0, 1, 1], [], []>} : vector<16x64xbf16>, vector<64x128xbf16>, vector<16x128xf32> -> vector<16x128xf32>
    %c0_18 = arith.constant 0 : index
    %c0_19 = arith.constant 0 : index
    %24 = vector.load %arg8[%c0_18, %c0_19] : memref<1x128xf32, #tpu.memory_space<vmem>>, vector<1x128xf32>
    %25 = vector.broadcast %24 : vector<1x128xf32> to vector<16x128xf32>
    %26 = arith.addf %23, %25 : vector<16x128xf32>
    %cst_20 = arith.constant 0.000000e+00 : f32
    %27 = vector.broadcast %cst_20 : f32 to vector<16x128xf32>
    %28 = arith.maximumf %26, %27 : vector<16x128xf32>
    %29 = arith.truncf %28 : vector<16x128xf32> to vector<16x128xbf16>
    %c0_21 = arith.constant 0 : index
    %c0_22 = arith.constant 0 : index
    %30 = vector.load %arg9[%c0_21, %c0_22] : memref<128x1024xbf16, #tpu.memory_space<vmem>>, vector<128x1024xbf16>
    %cst_23 = arith.constant dense<0.000000e+00> : vector<16x1024xf32>
    %31 = tpu.matmul %29, %30, %cst_23 {dimension_numbers = #tpu.dot_dimension_numbers<[1], [0], [0], [1], [0, 0, 1, 1], [], []>} : vector<16x128xbf16>, vector<128x1024xbf16>, vector<16x1024xf32> -> vector<16x1024xf32>
    %c0_24 = arith.constant 0 : index
    %c0_25 = arith.constant 0 : index
    %32 = vector.load %arg10[%c0_24, %c0_25] : memref<1x1024xf32, #tpu.memory_space<vmem>>, vector<1x1024xf32>
    %33 = vector.broadcast %32 : vector<1x1024xf32> to vector<16x1024xf32>
    %34 = arith.addf %31, %33 : vector<16x1024xf32>
    %c0_26 = arith.constant 0 : index
    %c0_27 = arith.constant 0 : index
    %35 = vector.load %arg18[%c0_26, %c0_27] : memref<1x1024xf32, #tpu.memory_space<vmem>>, vector<1x1024xf32>
    %cst_28 = arith.constant dense<0xFF800000> : vector<1024xf32>
    %36 = vector.multi_reduction <maximumf>, %34, %cst_28 [0] : vector<16x1024xf32> to vector<1024xf32>
    %37 = vector.shape_cast %36 : vector<1024xf32> to vector<1x1024xf32>
    %38 = arith.maximumf %35, %37 : vector<1x1024xf32>
    %c0_29 = arith.constant 0 : index
    %c0_30 = arith.constant 0 : index
    %39 = vector.load %arg18[%c0_29, %c0_30] : memref<1x1024xf32, #tpu.memory_space<vmem>>, vector<1x1024xf32>
    tpu.vector_store %arg18[%c0_29, %c0_30], %38 {strides = array<i32>} : memref<1x1024xf32, #tpu.memory_space<vmem>>, vector<1x1024xf32>,
    %c0_i32_31 = arith.constant 0 : i32
    %40 = arith.cmpi eq, %arg1, %c0_i32_31 : i32
    %41 = arith.extui %40 : i1 to i32
    %c0_i32_32 = arith.constant 0 : i32
    %42 = arith.cmpi ne, %41, %c0_i32_32 : i32
    scf.if %42 {
      %c0_33 = arith.constant 0 : index
      %c0_34 = arith.constant 0 : index
      %43 = vector.load %arg18[%c0_33, %c0_34] : memref<1x1024xf32, #tpu.memory_space<vmem>>, vector<1x1024xf32>
      %44 = arith.truncf %43 : vector<1x1024xf32> to vector<1x1024xbf16>
      %c0_35 = arith.constant 0 : index
      %c0_36 = arith.constant 0 : index
      %45 = vector.load %arg11[%c0_35, %c0_36] : memref<1024x512xbf16, #tpu.memory_space<vmem>>, vector<1024x512xbf16>
      %cst_37 = arith.constant dense<0.000000e+00> : vector<1x512xf32>
      %46 = tpu.matmul %44, %45, %cst_37 {dimension_numbers = #tpu.dot_dimension_numbers<[1], [0], [0], [1], [0, 0, 1, 1], [], []>} : vector<1x1024xbf16>, vector<1024x512xbf16>, vector<1x512xf32> -> vector<1x512xf32>
      %c0_38 = arith.constant 0 : index
      %c0_39 = arith.constant 0 : index
      %47 = vector.load %arg12[%c0_38, %c0_39] : memref<1x512xf32, #tpu.memory_space<vmem>>, vector<1x512xf32>
      %48 = arith.addf %46, %47 : vector<1x512xf32>
      %cst_40 = arith.constant 0.000000e+00 : f32
      %49 = vector.broadcast %cst_40 : f32 to vector<1x512xf32>
      %50 = arith.maximumf %48, %49 : vector<1x512xf32>
      %51 = arith.truncf %50 : vector<1x512xf32> to vector<1x512xbf16>
      %c0_41 = arith.constant 0 : index
      %c0_42 = arith.constant 0 : index
      %52 = vector.load %arg13[%c0_41, %c0_42] : memref<512x256xbf16, #tpu.memory_space<vmem>>, vector<512x256xbf16>
      %cst_43 = arith.constant dense<0.000000e+00> : vector<1x256xf32>
      %53 = tpu.matmul %51, %52, %cst_43 {dimension_numbers = #tpu.dot_dimension_numbers<[1], [0], [0], [1], [0, 0, 1, 1], [], []>} : vector<1x512xbf16>, vector<512x256xbf16>, vector<1x256xf32> -> vector<1x256xf32>
      %c0_44 = arith.constant 0 : index
      %c0_45 = arith.constant 0 : index
      %54 = vector.load %arg14[%c0_44, %c0_45] : memref<1x256xf32, #tpu.memory_space<vmem>>, vector<1x256xf32>
      %55 = arith.addf %53, %54 : vector<1x256xf32>
      %cst_46 = arith.constant 0.000000e+00 : f32
      %56 = vector.broadcast %cst_46 : f32 to vector<1x256xf32>
      %57 = arith.maximumf %55, %56 : vector<1x256xf32>
      %58 = arith.truncf %57 : vector<1x256xf32> to vector<1x256xbf16>
      %c0_47 = arith.constant 0 : index
      %c0_48 = arith.constant 0 : index
      %59 = vector.load %arg15[%c0_47, %c0_48] : memref<256x4096xbf16, #tpu.memory_space<vmem>>, vector<256x4096xbf16>
      %cst_49 = arith.constant dense<0.000000e+00> : vector<1x4096xf32>
      %60 = tpu.matmul %58, %59, %cst_49 {dimension_numbers = #tpu.dot_dimension_numbers<[1], [0], [0], [1], [0, 0, 1, 1], [], []>} : vector<1x256xbf16>, vector<256x4096xbf16>, vector<1x4096xf32> -> vector<1x4096xf32>
      %c0_50 = arith.constant 0 : index
      %c0_51 = arith.constant 0 : index
      %61 = vector.load %arg16[%c0_50, %c0_51] : memref<1x4096xf32, #tpu.memory_space<vmem>>, vector<1x4096xf32>
      %62 = arith.addf %60, %61 : vector<1x4096xf32>
      %c0_52 = arith.constant 0 : index
      %c0_53 = arith.constant 0 : index
      %c0_54 = arith.constant 0 : index
      %63 = vector.load %arg17[%c0_52, %c0_53, %c0_54] : memref<1x1x4096xf32, #tpu.memory_space<vmem>>, vector<1x1x4096xf32>
      %64 = vector.shape_cast %63 : vector<1x1x4096xf32> to vector<1x4096xf32>
      %65 = vector.shape_cast %62 : vector<1x4096xf32> to vector<1x1x4096xf32>
      tpu.vector_store %arg17[%c0_52, %c0_53, %c0_54], %65 {strides = array<i32>} : memref<1x1x4096xf32, #tpu.memory_space<vmem>>, vector<1x1x4096xf32>,
    } else {
    }
    return
  }
  func.func @transform_0(%arg0: i32, %arg1: i32) -> (i32, i32, i32) {
    %c0_i32 = arith.constant 0 : i32
    %c0_i32_0 = arith.constant 0 : i32
    return %arg0, %arg1, %c0_i32 : i32, i32, i32
  }
  func.func @transform_1(%arg0: i32, %arg1: i32) -> (i32, i32, i32) {
    %c0_i32 = arith.constant 0 : i32
    %c0_i32_0 = arith.constant 0 : i32
    %c0_i32_1 = arith.constant 0 : i32
    return %arg0, %c0_i32, %c0_i32_0 : i32, i32, i32
  }
  func.func @transform_2(%arg0: i32, %arg1: i32) -> (i32, i32) {
    %c0_i32 = arith.constant 0 : i32
    %c0_i32_0 = arith.constant 0 : i32
    %c0_i32_1 = arith.constant 0 : i32
    return %c0_i32, %c0_i32_0 : i32, i32
  }
  func.func @transform_3(%arg0: i32, %arg1: i32) -> (i32, i32) {
    %c0_i32 = arith.constant 0 : i32
    %c0_i32_0 = arith.constant 0 : i32
    %c0_i32_1 = arith.constant 0 : i32
    return %c0_i32, %c0_i32_0 : i32, i32
  }
  func.func @transform_4(%arg0: i32, %arg1: i32) -> (i32, i32) {
    %c0_i32 = arith.constant 0 : i32
    %c0_i32_0 = arith.constant 0 : i32
    %c0_i32_1 = arith.constant 0 : i32
    return %c0_i32, %c0_i32_0 : i32, i32
  }
  func.func @transform_5(%arg0: i32, %arg1: i32) -> (i32, i32) {
    %c0_i32 = arith.constant 0 : i32
    %c0_i32_0 = arith.constant 0 : i32
    %c0_i32_1 = arith.constant 0 : i32
    return %c0_i32, %c0_i32_0 : i32, i32
  }
  func.func @transform_6(%arg0: i32, %arg1: i32) -> (i32, i32) {
    %c0_i32 = arith.constant 0 : i32
    %c0_i32_0 = arith.constant 0 : i32
    %c0_i32_1 = arith.constant 0 : i32
    return %c0_i32, %c0_i32_0 : i32, i32
  }
  func.func @transform_7(%arg0: i32, %arg1: i32) -> (i32, i32) {
    %c0_i32 = arith.constant 0 : i32
    %c0_i32_0 = arith.constant 0 : i32
    %c0_i32_1 = arith.constant 0 : i32
    return %c0_i32, %c0_i32_0 : i32, i32
  }
  func.func @transform_8(%arg0: i32, %arg1: i32) -> (i32, i32) {
    %c0_i32 = arith.constant 0 : i32
    %c0_i32_0 = arith.constant 0 : i32
    %c0_i32_1 = arith.constant 0 : i32
    return %c0_i32, %c0_i32_0 : i32, i32
  }
  func.func @transform_9(%arg0: i32, %arg1: i32) -> (i32, i32) {
    %c0_i32 = arith.constant 0 : i32
    %c0_i32_0 = arith.constant 0 : i32
    %c0_i32_1 = arith.constant 0 : i32
    return %c0_i32, %c0_i32_0 : i32, i32
  }
  func.func @transform_10(%arg0: i32, %arg1: i32) -> (i32, i32) {
    %c0_i32 = arith.constant 0 : i32
    %c0_i32_0 = arith.constant 0 : i32
    %c0_i32_1 = arith.constant 0 : i32
    return %c0_i32, %c0_i32_0 : i32, i32
  }
  func.func @transform_11(%arg0: i32, %arg1: i32) -> (i32, i32) {
    %c0_i32 = arith.constant 0 : i32
    %c0_i32_0 = arith.constant 0 : i32
    %c0_i32_1 = arith.constant 0 : i32
    return %c0_i32, %c0_i32_0 : i32, i32
  }
  func.func @transform_12(%arg0: i32, %arg1: i32) -> (i32, i32) {
    %c0_i32 = arith.constant 0 : i32
    %c0_i32_0 = arith.constant 0 : i32
    %c0_i32_1 = arith.constant 0 : i32
    return %c0_i32, %c0_i32_0 : i32, i32
  }
  func.func @transform_13(%arg0: i32, %arg1: i32) -> (i32, i32) {
    %c0_i32 = arith.constant 0 : i32
    %c0_i32_0 = arith.constant 0 : i32
    %c0_i32_1 = arith.constant 0 : i32
    return %c0_i32, %c0_i32_0 : i32, i32
  }
  func.func @transform_14(%arg0: i32, %arg1: i32) -> (i32, i32) {
    %c0_i32 = arith.constant 0 : i32
    %c0_i32_0 = arith.constant 0 : i32
    %c0_i32_1 = arith.constant 0 : i32
    return %c0_i32, %c0_i32_0 : i32, i32
  }
  func.func @transform_15(%arg0: i32, %arg1: i32) -> (i32, i32, i32) {
    %c0_i32 = arith.constant 0 : i32
    %c0_i32_0 = arith.constant 0 : i32
    %c0_i32_1 = arith.constant 0 : i32
    return %arg0, %c0_i32, %c0_i32_0 : i32, i32, i32
  }
}

module attributes {stable_mosaic.version = 11 : i64} {
  func.func @_tail_pt_kernel(%arg0: i32, %arg1: i32, %arg2: memref<1x16x3xbf16, #tpu.memory_space<vmem>>, %arg3: memref<1x3x64xbf16, #tpu.memory_space<vmem>>, %arg4: memref<1x64xf32, #tpu.memory_space<vmem>>, %arg5: memref<1x64x64xbf16, #tpu.memory_space<vmem>>, %arg6: memref<64x128xbf16, #tpu.memory_space<vmem>>, %arg7: memref<1x128xf32, #tpu.memory_space<vmem>>, %arg8: memref<128x1024xbf16, #tpu.memory_space<vmem>>, %arg9: memref<1x1024xf32, #tpu.memory_space<vmem>>, %arg10: memref<1x64x16xf32, #tpu.memory_space<vmem>>, %arg11: memref<1x1x1024xf32, #tpu.memory_space<vmem>>) attributes {dimension_semantics = [#tpu.dimension_semantics<parallel>, #tpu.dimension_semantics<arbitrary>], iteration_bounds = array<i64: 2, 1>, scalar_prefetch = 0 : i64, scratch_operands = 0 : i64, tpu.core_type = #tpu.core_type<tc>, window_params = [{transform_indices = @transform_0, window_bounds = array<i64: 1, 16, 3>}, {transform_indices = @transform_1, window_bounds = array<i64: 1, 3, 64>}, {pipeline_mode = #tpu.pipeline_mode<synchronous>, transform_indices = @transform_2, window_bounds = array<i64: 1, 64>}, {transform_indices = @transform_3, window_bounds = array<i64: 1, 64, 64>}, {pipeline_mode = #tpu.pipeline_mode<synchronous>, transform_indices = @transform_4, window_bounds = array<i64: 64, 128>}, {pipeline_mode = #tpu.pipeline_mode<synchronous>, transform_indices = @transform_5, window_bounds = array<i64: 1, 128>}, {pipeline_mode = #tpu.pipeline_mode<synchronous>, transform_indices = @transform_6, window_bounds = array<i64: 128, 1024>}, {pipeline_mode = #tpu.pipeline_mode<synchronous>, transform_indices = @transform_7, window_bounds = array<i64: 1, 1024>}, {transform_indices = @transform_8, window_bounds = array<i64: 1, 64, 16>}, {transform_indices = @transform_9, window_bounds = array<i64: 1, 1, 1024>}]} {
    %c0_i32 = arith.constant 0 : i32
    %0 = arith.cmpi eq, %arg1, %c0_i32 : i32
    %1 = arith.extui %0 : i1 to i32
    %c0_i32_0 = arith.constant 0 : i32
    %2 = arith.cmpi ne, %1, %c0_i32_0 : i32
    scf.if %2 {
      %cst_34 = arith.constant 0xFF800000 : f32
      %42 = vector.broadcast %cst_34 : f32 to vector<1x1024xf32>
      %c0_35 = arith.constant 0 : index
      %c0_36 = arith.constant 0 : index
      %c0_37 = arith.constant 0 : index
      %43 = vector.load %arg11[%c0_35, %c0_36, %c0_37] : memref<1x1x1024xf32, #tpu.memory_space<vmem>>, vector<1x1x1024xf32>
      %44 = vector.shape_cast %43 : vector<1x1x1024xf32> to vector<1x1024xf32>
      %45 = vector.shape_cast %42 : vector<1x1024xf32> to vector<1x1x1024xf32>
      tpu.vector_store %arg11[%c0_35, %c0_36, %c0_37], %45 {strides = array<i32>} : memref<1x1x1024xf32, #tpu.memory_space<vmem>>, vector<1x1x1024xf32>,
    } else {
    }
    %c0 = arith.constant 0 : index
    %c0_1 = arith.constant 0 : index
    %c0_2 = arith.constant 0 : index
    %3 = vector.load %arg2[%c0, %c0_1, %c0_2] : memref<1x16x3xbf16, #tpu.memory_space<vmem>>, vector<1x16x3xbf16>
    %4 = vector.shape_cast %3 : vector<1x16x3xbf16> to vector<16x3xbf16>
    %c0_3 = arith.constant 0 : index
    %c0_4 = arith.constant 0 : index
    %c0_5 = arith.constant 0 : index
    %5 = vector.load %arg3[%c0_3, %c0_4, %c0_5] : memref<1x3x64xbf16, #tpu.memory_space<vmem>>, vector<1x3x64xbf16>
    %6 = vector.shape_cast %5 : vector<1x3x64xbf16> to vector<3x64xbf16>
    %cst = arith.constant dense<0.000000e+00> : vector<16x64xf32>
    %7 = tpu.matmul %4, %6, %cst {dimension_numbers = #tpu.dot_dimension_numbers<[1], [0], [0], [1], [0, 0, 1, 1], [], []>} : vector<16x3xbf16>, vector<3x64xbf16>, vector<16x64xf32> -> vector<16x64xf32>
    %c0_6 = arith.constant 0 : index
    %c0_7 = arith.constant 0 : index
    %8 = vector.load %arg4[%c0_6, %c0_7] : memref<1x64xf32, #tpu.memory_space<vmem>>, vector<1x64xf32>
    %9 = vector.broadcast %8 : vector<1x64xf32> to vector<16x64xf32>
    %10 = arith.addf %7, %9 : vector<16x64xf32>
    %cst_8 = arith.constant 0.000000e+00 : f32
    %11 = vector.broadcast %cst_8 : f32 to vector<16x64xf32>
    %12 = arith.maximumf %10, %11 : vector<16x64xf32>
    %13 = arith.truncf %12 : vector<16x64xf32> to vector<16x64xbf16>
    %c0_9 = arith.constant 0 : index
    %c0_10 = arith.constant 0 : index
    %c0_11 = arith.constant 0 : index
    %14 = vector.load %arg5[%c0_9, %c0_10, %c0_11] : memref<1x64x64xbf16, #tpu.memory_space<vmem>>, vector<1x64x64xbf16>
    %15 = vector.shape_cast %14 : vector<1x64x64xbf16> to vector<64x64xbf16>
    %cst_12 = arith.constant dense<0.000000e+00> : vector<64x16xf32>
    %16 = tpu.matmul %15, %13, %cst_12 {dimension_numbers = #tpu.dot_dimension_numbers<[0], [1], [1], [0], [0, 1, 1, 0], [], []>} : vector<64x64xbf16>, vector<16x64xbf16>, vector<64x16xf32> -> vector<64x16xf32>
    %c0_13 = arith.constant 0 : index
    %c0_14 = arith.constant 0 : index
    %c0_15 = arith.constant 0 : index
    %17 = vector.load %arg10[%c0_13, %c0_14, %c0_15] : memref<1x64x16xf32, #tpu.memory_space<vmem>>, vector<1x64x16xf32>
    %18 = vector.shape_cast %17 : vector<1x64x16xf32> to vector<64x16xf32>
    %19 = vector.shape_cast %16 : vector<64x16xf32> to vector<1x64x16xf32>
    tpu.vector_store %arg10[%c0_13, %c0_14, %c0_15], %19 {strides = array<i32>} : memref<1x64x16xf32, #tpu.memory_space<vmem>>, vector<1x64x16xf32>,
    %20 = arith.truncf %16 : vector<64x16xf32> to vector<64x16xbf16>
    %c0_16 = arith.constant 0 : index
    %c0_17 = arith.constant 0 : index
    %21 = vector.load %arg6[%c0_16, %c0_17] : memref<64x128xbf16, #tpu.memory_space<vmem>>, vector<64x128xbf16>
    %cst_18 = arith.constant dense<0.000000e+00> : vector<16x128xf32>
    %22 = tpu.matmul %20, %21, %cst_18 {dimension_numbers = #tpu.dot_dimension_numbers<[0], [0], [1], [1], [0, 1, 1, 1], [], []>} : vector<64x16xbf16>, vector<64x128xbf16>, vector<16x128xf32> -> vector<16x128xf32>
    %c0_19 = arith.constant 0 : index
    %c0_20 = arith.constant 0 : index
    %23 = vector.load %arg7[%c0_19, %c0_20] : memref<1x128xf32, #tpu.memory_space<vmem>>, vector<1x128xf32>
    %24 = vector.broadcast %23 : vector<1x128xf32> to vector<16x128xf32>
    %25 = arith.addf %22, %24 : vector<16x128xf32>
    %cst_21 = arith.constant 0.000000e+00 : f32
    %26 = vector.broadcast %cst_21 : f32 to vector<16x128xf32>
    %27 = arith.maximumf %25, %26 : vector<16x128xf32>
    %28 = arith.truncf %27 : vector<16x128xf32> to vector<16x128xbf16>
    %c0_22 = arith.constant 0 : index
    %c0_23 = arith.constant 0 : index
    %29 = vector.load %arg8[%c0_22, %c0_23] : memref<128x1024xbf16, #tpu.memory_space<vmem>>, vector<128x1024xbf16>
    %cst_24 = arith.constant dense<0.000000e+00> : vector<16x1024xf32>
    %30 = tpu.matmul %28, %29, %cst_24 {dimension_numbers = #tpu.dot_dimension_numbers<[1], [0], [0], [1], [0, 0, 1, 1], [], []>} : vector<16x128xbf16>, vector<128x1024xbf16>, vector<16x1024xf32> -> vector<16x1024xf32>
    %c0_25 = arith.constant 0 : index
    %c0_26 = arith.constant 0 : index
    %31 = vector.load %arg9[%c0_25, %c0_26] : memref<1x1024xf32, #tpu.memory_space<vmem>>, vector<1x1024xf32>
    %32 = vector.broadcast %31 : vector<1x1024xf32> to vector<16x1024xf32>
    %33 = arith.addf %30, %32 : vector<16x1024xf32>
    %c0_27 = arith.constant 0 : index
    %c0_28 = arith.constant 0 : index
    %c0_29 = arith.constant 0 : index
    %34 = vector.load %arg11[%c0_27, %c0_28, %c0_29] : memref<1x1x1024xf32, #tpu.memory_space<vmem>>, vector<1x1x1024xf32>
    %35 = vector.shape_cast %34 : vector<1x1x1024xf32> to vector<1x1024xf32>
    %cst_30 = arith.constant dense<0xFF800000> : vector<1024xf32>
    %36 = vector.multi_reduction <maximumf>, %33, %cst_30 [0] : vector<16x1024xf32> to vector<1024xf32>
    %37 = vector.shape_cast %36 : vector<1024xf32> to vector<1x1024xf32>
    %38 = arith.maximumf %35, %37 : vector<1x1024xf32>
    %c0_31 = arith.constant 0 : index
    %c0_32 = arith.constant 0 : index
    %c0_33 = arith.constant 0 : index
    %39 = vector.load %arg11[%c0_31, %c0_32, %c0_33] : memref<1x1x1024xf32, #tpu.memory_space<vmem>>, vector<1x1x1024xf32>
    %40 = vector.shape_cast %39 : vector<1x1x1024xf32> to vector<1x1024xf32>
    %41 = vector.shape_cast %38 : vector<1x1024xf32> to vector<1x1x1024xf32>
    tpu.vector_store %arg11[%c0_31, %c0_32, %c0_33], %41 {strides = array<i32>} : memref<1x1x1024xf32, #tpu.memory_space<vmem>>, vector<1x1x1024xf32>,
    return
  }
  func.func @transform_0(%arg0: i32, %arg1: i32) -> (i32, i32, i32) {
    %c0_i32 = arith.constant 0 : i32
    %c0_i32_0 = arith.constant 0 : i32
    return %arg0, %arg1, %c0_i32 : i32, i32, i32
  }
  func.func @transform_1(%arg0: i32, %arg1: i32) -> (i32, i32, i32) {
    %c0_i32 = arith.constant 0 : i32
    %c0_i32_0 = arith.constant 0 : i32
    %c0_i32_1 = arith.constant 0 : i32
    return %arg0, %c0_i32, %c0_i32_0 : i32, i32, i32
  }
  func.func @transform_2(%arg0: i32, %arg1: i32) -> (i32, i32) {
    %c0_i32 = arith.constant 0 : i32
    %c0_i32_0 = arith.constant 0 : i32
    %c0_i32_1 = arith.constant 0 : i32
    return %c0_i32, %c0_i32_0 : i32, i32
  }
  func.func @transform_3(%arg0: i32, %arg1: i32) -> (i32, i32, i32) {
    %c0_i32 = arith.constant 0 : i32
    %c0_i32_0 = arith.constant 0 : i32
    %c0_i32_1 = arith.constant 0 : i32
    return %arg0, %c0_i32, %c0_i32_0 : i32, i32, i32
  }
  func.func @transform_4(%arg0: i32, %arg1: i32) -> (i32, i32) {
    %c0_i32 = arith.constant 0 : i32
    %c0_i32_0 = arith.constant 0 : i32
    %c0_i32_1 = arith.constant 0 : i32
    return %c0_i32, %c0_i32_0 : i32, i32
  }
  func.func @transform_5(%arg0: i32, %arg1: i32) -> (i32, i32) {
    %c0_i32 = arith.constant 0 : i32
    %c0_i32_0 = arith.constant 0 : i32
    %c0_i32_1 = arith.constant 0 : i32
    return %c0_i32, %c0_i32_0 : i32, i32
  }
  func.func @transform_6(%arg0: i32, %arg1: i32) -> (i32, i32) {
    %c0_i32 = arith.constant 0 : i32
    %c0_i32_0 = arith.constant 0 : i32
    %c0_i32_1 = arith.constant 0 : i32
    return %c0_i32, %c0_i32_0 : i32, i32
  }
  func.func @transform_7(%arg0: i32, %arg1: i32) -> (i32, i32) {
    %c0_i32 = arith.constant 0 : i32
    %c0_i32_0 = arith.constant 0 : i32
    %c0_i32_1 = arith.constant 0 : i32
    return %c0_i32, %c0_i32_0 : i32, i32
  }
  func.func @transform_8(%arg0: i32, %arg1: i32) -> (i32, i32, i32) {
    %c0_i32 = arith.constant 0 : i32
    %c0_i32_0 = arith.constant 0 : i32
    return %arg0, %c0_i32, %arg1 : i32, i32, i32
  }
  func.func @transform_9(%arg0: i32, %arg1: i32) -> (i32, i32, i32) {
    %c0_i32 = arith.constant 0 : i32
    %c0_i32_0 = arith.constant 0 : i32
    %c0_i32_1 = arith.constant 0 : i32
    return %arg0, %c0_i32, %c0_i32_0 : i32, i32, i32
  }
}

</mosaic_0001>

<bundles_post_ra>
// kernel: pointnet_encoder_forward.3
= control target key start
LH: loop header
LB: loop body
LE: loop exit
PB: predicated region body
PF: predicated region fallthrough
CT: control target
= control target key end

     0   :  { %s5133_s25 = smov 0   ;;  %s5135_s26 = smov 0   ;;  %s6497_s0 = inlined_call_operand.vmem [shape: bf16[2,16,3], index: 0, kind: input, shape index: {}]   ;;  %s6498_s1 = inlined_call_operand.vmem [shape: bf16[3,64], index: 1, kind: input, shape index: {}]   ;;  %s6499_s2 = inlined_call_operand.vmem [shape: f32[1,64], index: 2, kind: input, shape index: {}]   ;;  %s6500_s3 = inlined_call_operand.vmem [shape: bf16[64,128], index: 3, kind: input, shape index: {}]   ;;  %s6501_s4 = inlined_call_operand.vmem [shape: f32[1,128], index: 4, kind: input, shape index: {}]   ;;  %s6502_s5 = inlined_call_operand.vmem [shape: bf16[128,1024], index: 5, kind: input, shape index: {}]   ;;  %s6503_s6 = inlined_call_operand.vmem [shape: f32[1,1024], index: 6, kind: input, shape index: {}]   ;;  %s6504_s7 = inlined_call_operand.vmem [shape: bf16[1024,512], index: 7, kind: input, shape index: {}]   ;;  %s6505_s8 = inlined_call_operand.vmem [shape: f32[1,512], index: 8, kind: input, shape index: {}]   ;;  %s6506_s9 = inlined_call_operand.vmem [shape: bf16[512,256], index: 9, kind: input, shape index: {}]   ;;  %s6507_s10 = inlined_call_operand.vmem [shape: f32[1,256], index: 10, kind: input, shape index: {}]   ;;  %s6508_s11 = inlined_call_operand.vmem [shape: bf16[256,9], index: 11, kind: input, shape index: {}]   ;;  %s6509_s12 = inlined_call_operand.vmem [shape: f32[1,9], index: 12, kind: input, shape index: {}]   ;;  %s6510_s13 = inlined_call_operand.vmem [shape: f32[2,1,9], index: 13, kind: output, shape index: {}]  }
   0x1   :  { %s5137_s27 = smov 0  }
   0x2 LB: > { %s35_s28 = sadd.s32 1, %s5052_s26  ;;  %p4008_p0 = scmp.ge.s32.totalorder %s5056_s27, 1  ;;  %s5056_s27 = sphi %s5137_s27, %s23_s27   ;;  %s5052_s26 = sphi %s5135_s26, %s6512_s26   ;;  %s5048_s25 = sphi %s5133_s25, %s6511_s25  }
   0x3   : > { %p37_p1 = scmp.ge.s32.totalorder %s35_s28, 2  ;;  %p406_p2 = scmp.lt.s32.totalorder %s5056_s27, 3 }
   0x5   : > { %s6514_s28 = smov (%p37_p1, %s35_s28), 0  ;;  %p407_p3 = pnand %p4008_p0, %p406_p2 }
   0x6   : > { %v473_v0 = vld [vmem:[%s6498_s1] sm:$0x3] (!%p407_p3)  ;;  %vm490_vm0 = vcmask (!%p407_p3), 1040384   ;;  %vm491_vm1 = vcmask (!%p407_p3), 1041408   ;;  %v5058_v1 = vmov (!%p407_p3), 0.0   ;;  %v5059_v2 = vmov (!%p407_p3), 65535  }
   0x7   : > { %410 = sbr.rel (%p407_p3) target bundleno = 1682 (0x692), region = 72  ;;  %4452 = vmatprep.subr.bf16.mxu1 (!%p407_p3), %v5058_v1  ;;  %v492_v3 = vsel (!%p407_p3), %vm490_vm0, 4294967295, %v5059_v2  ;;  %p453_p4 = scmp.lt.s32.totalorder (!%p407_p3), %s5048_s25, 1  ;;  %vm5060_vm2 = vmmov (!%p407_p3), 0   ;;  %v4534_v6 = vld [vmem:[%s6500_s3] sm:$0xff] (!%p407_p3)   ;;  %vm486_vm3 = vcmask (!%p407_p3), 23552  }
   0x8   : > { %v493_v4 = vsel (!%p407_p3), %vm491_vm1, %v492_v3, 0  ;;  %4454 = vmatprep.mubr.msk.bf16.mxu1 (!%p407_p3), %vm5060_vm2, %v5058_v1  ;;  %v4535_v8 = vld [vmem:[%s6500_s3 + $0x8] sm:$0xff] (!%p407_p3)   ;;  %v4536_v9 = vld [vmem:[%s6500_s3 + $0x10] sm:$0xff] (!%p407_p3)   ;;  %v4537_v10 = vld [vmem:[%s6500_s3 + $0x18] sm:$0xff] (!%p407_p3)   ;;  %vm580_vm4 = vcmask (!%p407_p3), 523264   ;;  %vm3941_vm5 = vcmask (!%p407_p3), 65536  }
   0x9   : > { %v495_v5 = vand.u32 (!%p407_p3), %v493_v4, %v473_v0  ;;  %v628_v11 = vld [vmem:[%s6502_s5] sm:$0xff] (!%p407_p3)  ;;  %v630_v15 = vld [vmem:[%s6502_s5 + $0x10] sm:$0xff] (!%p407_p3) }
   0xa   : > { %v632_v12 = vld [vmem:[%s6502_s5 + $0x20] sm:$0xff] (!%p407_p3)  ;;  %v634_v16 = vld [vmem:[%s6502_s5 + $0x30] sm:$0xff] (!%p407_p3) }
   0xb   : > { %4453 = vmatpush3.bf16.msra.mxu1 (!%p407_p3), %v495_v5  ;;  %v4020_v13 = vcombine.low (!%p407_p3), %v628_v11, %v632_v12  ;;  %v4021_v14 = vcombine.high (!%p407_p3), %v628_v11, %v632_v12  ;;  %v4025_v17 = vcombine.high (!%p407_p3), %v630_v15, %v634_v16  ;;  %v4024_v18 = vcombine.low (!%p407_p3), %v630_v15, %v634_v16  ;;  %v638_v19 = vld [vmem:[%s6502_s5 + $0x50] sm:$0xff] (!%p407_p3)  ;;  %v4011_v39 = vld [vmem:[%s6499_s2] ss:$0 sm:$0xff] (!%p407_p3) }
   0xc   : > { %4458 = vmatprep.subr.bf16.mxu1 (!%p407_p3), %v5058_v1  ;;  %v642_v20 = vld [vmem:[%s6502_s5 + $0x70] sm:$0xff] (!%p407_p3)  ;;  %v636_v46 = vld [vmem:[%s6502_s5 + $0x40] sm:$0xff] (!%p407_p3) }
   0xd   : > { %1140 = vmatprep.subr.bf16.mxu0 (!%p407_p3), %v4025_v17  ;;  %v4033_v21 = vcombine.high (!%p407_p3), %v638_v19, %v642_v20  ;;  %v4032_v22 = vcombine.low (!%p407_p3), %v638_v19, %v642_v20  ;;  %v646_v23 = vld [vmem:[%s6502_s5 + $0x90] sm:$0xff] (!%p407_p3)  ;;  %v640_v47 = vld [vmem:[%s6502_s5 + $0x60] sm:$0xff] (!%p407_p3) }
   0xe   : > { %s6516_s25 = smov (!%p453_p4, %s5048_s25), 1  ;;  %1141 = vmatpush1.bf16.msra.mxu0 %v4024_v18  ;;  %v650_v24 = vld [vmem:[%s6502_s5 + $0xb0] sm:$0xff]  ;;  %v4029_v51 = vcombine.high %v636_v46, %v640_v47  ;;  %v644_v52 = vld [vmem:[%s6502_s5 + $0x80] sm:$0xff]  ;;  %v4028_v54 = vcombine.low %v636_v46, %v640_v47  ;;  %v661_v47 = vld [vmem:[%s6502_s5 + $0x108] sm:$0xff] }
   0xf   : > { %s4422_s16 = sshll.u32 %s6516_s25, 3  ;;  %1142 = vmatprep.subr.bf16.mxu0 %v4033_v21  ;;  %v4041_v25 = vcombine.high %v646_v23, %v650_v24  ;;  %v4040_v26 = vcombine.low %v646_v23, %v650_v24  ;;  %v654_v27 = vld [vmem:[%s6502_s5 + $0xd0] sm:$0xff]  ;;  %v648_v53 = vld [vmem:[%s6502_s5 + $0xa0] sm:$0xff]  ;;  %v629_v21 = vld [vmem:[%s6502_s5 + $0x8] sm:$0xff]  ;;  %s464_s21 = scalar_lea.vmem %s6510_s13, %s6516_s25 }
  0x10   : > { %s460_s19 = scalar_lea.vmem %s6497_s0, %s4422_s16  ;;  %v658_v28 = vld [vmem:[%s6502_s5 + $0xf0] sm:$0xff]  ;;  %v4037_v55 = vcombine.high %v644_v52, %v648_v53  ;;  %v652_v56 = vld [vmem:[%s6502_s5 + $0xc0] sm:$0xff]  ;;  %v4036_v58 = vcombine.low %v644_v52, %v648_v53  ;;  %v673_v52 = vld [vmem:[%s6502_s5 + $0x168] sm:$0xff] }
  0x11   : > { %v4533_v7 = vld [vmem:[%s460_s19] sm:$0xff]   ;;  %v4049_v29 = vcombine.high %v654_v27, %v658_v28  ;;  %v4048_v30 = vcombine.low %v654_v27, %v658_v28  ;;  %v662_v31 = vld [vmem:[%s6502_s5 + $0x110] sm:$0xff] }
  0x12   : > { %4455 = vmatmul.mubr.msk.bf16.vlgmr.msra.gmra.mrb[0].mxu1 %vm486_vm3, %v4533_v7  ;;  %1143 = vmatpush1.bf16.msra.mxu0 %v4032_v22  ;;  %v666_v32 = vld [vmem:[%s6502_s5 + $0x130] sm:$0xff]  ;;  %v656_v57 = vld [vmem:[%s6502_s5 + $0xe0] sm:$0xff]  ;;  %v633_v22 = vld [vmem:[%s6502_s5 + $0x28] sm:$0xff] }
  0x13   : > { %4459 = vmatpush3.bf16.msra.mxu1 %v4534_v6  ;;  %4466 = vmatprep.mubr.msk.bf16.mxu1 %vm5060_vm2, %v5058_v1  ;;  %v4057_v33 = vcombine.high %v662_v31, %v666_v32  ;;  %v4056_v34 = vcombine.low %v662_v31, %v666_v32  ;;  %v670_v35 = vld [vmem:[%s6502_s5 + $0x150] sm:$0xff]  ;;  %v4045_v59 = vcombine.high %v652_v56, %v656_v57  ;;  %v660_v60 = vld [vmem:[%s6502_s5 + $0x100] sm:$0xff] }
  0x14   : > { %4460 = vmatprep.subr.bf16.mxu1 %v5058_v1  ;;  %1144 = vmatprep.subr.bf16.mxu0 %v4041_v25  ;;  %v674_v36 = vld [vmem:[%s6502_s5 + $0x170] sm:$0xff]  ;;  %v664_v61 = vld [vmem:[%s6502_s5 + $0x120] sm:$0xff]  ;;  %v4044_v62 = vcombine.low %v652_v56, %v656_v57  ;;  %v4023_v23 = vcombine.high %v629_v21, %v633_v22  ;;  %v4022_v24 = vcombine.low %v629_v21, %v633_v22  ;;  %v5061_v25 = vmov 0   ;;  %v681_v56 = vld [vmem:[%s6502_s5 + $0x1a8] sm:$0xff] }
  0x15   : > { %v4065_v37 = vcombine.high %v670_v35, %v674_v36  ;;  %v4064_v38 = vcombine.low %v670_v35, %v674_v36  ;;  %v4053_v63 = vcombine.high %v660_v60, %v664_v61  ;;  %v668_v0 = vld [vmem:[%s6502_s5 + $0x140] sm:$0xff]  ;;  %v4052_v2 = vcombine.low %v660_v60, %v664_v61  ;;  %v686_v16 = vld [vmem:[%s6502_s5 + $0x1d0] sm:$0xff]  ;;  %1172 = vmatprep.mubr.bf16.mxu0 %v5061_v25  ;;  %v689_v60 = vld [vmem:[%s6502_s5 + $0x1e8] sm:$0xff] }
  0x16   : > { %1145 = vmatpush1.bf16.msra.mxu0 %v4040_v26  ;;  %v676_v5 = vld [vmem:[%s6502_s5 + $0x180] sm:$0xff]  ;;  %v690_v17 = vld [vmem:[%s6502_s5 + $0x1f0] sm:$0xff] }
  0x17   : > { %4461 = vmatpush3.bf16.msra.mxu1 %v4535_v8  ;;  %1146 = vmatprep.subr.bf16.mxu0 %v4049_v29  ;;  %v680_v6 = vld [vmem:[%s6502_s5 + $0x1a0] sm:$0xff]  ;;  %v678_v8 = vld [vmem:[%s6502_s5 + $0x190] sm:$0xff]  ;;  %v4081_v19 = vcombine.high %v686_v16, %v690_v17  ;;  %v4080_v20 = vcombine.low %v686_v16, %v690_v17  ;;  %v667_v16 = vld [vmem:[%s6502_s5 + $0x138] sm:$0xff] }
  0x18   : > { %4462 = vmatprep.subr.bf16.mxu1 %v5058_v1  ;;  %v4069_v7 = vcombine.high %v676_v5, %v680_v6  ;;  %v4014_v26 = vld [vmem:[%s6501_s4] ss:$0 sm:$0xff] }
  0x1a   : > { %1147 = vmatpush1.bf16.msra.mxu0 %v4048_v30 }
  0x1b   : > { %4463 = vmatpush3.bf16.msra.mxu1 %v4536_v9  ;;  %1148 = vmatprep.subr.bf16.mxu0 %v4057_v33  ;;  %v682_v9 = vld [vmem:[%s6502_s5 + $0x1b0] sm:$0xff]  ;;  %v637_v33 = vld [vmem:[%s6502_s5 + $0x48] sm:$0xff] }
  0x1c   : > { %4464 = vmatprep.subr.bf16.mxu1 %v5058_v1  ;;  %v672_v1 = vld [vmem:[%s6502_s5 + $0x160] sm:$0xff]  ;;  %v4073_v11 = vcombine.high %v678_v8, %v682_v9  ;;  %v4072_v12 = vcombine.low %v678_v8, %v682_v9  ;;  %v651_v8 = vld [vmem:[%s6502_s5 + $0xb8] sm:$0xff] }
  0x1d   : > { %v4061_v3 = vcombine.high %v668_v0, %v672_v1  ;;  %v4060_v4 = vcombine.low %v668_v0, %v672_v1  ;;  %v635_v0 = vld [vmem:[%s6502_s5 + $0x38] sm:$0xff] }
  0x1e   : > { %1149 = vmatpush1.bf16.msra.mxu0 %v4056_v34  ;;  %v641_v34 = vld [vmem:[%s6502_s5 + $0x68] sm:$0xff] }
  0x1f   : > { %4465 = vmatpush3.bf16.msra.mxu1 %v4537_v10  ;;  %1150 = vmatprep.subr.bf16.mxu0 %v4065_v37  ;;  %v4068_v10 = vcombine.low %v676_v5, %v680_v6 }
  0x20   : > { %1054 = vmatprep.subr.bf16.mxu1 %v4021_v14  ;;  %v688_v14 = vld [vmem:[%s6502_s5 + $0x1e0] sm:$0xff] }
  0x22   : > { %1151 = vmatpush1.bf16.msra.mxu0 %v4064_v38  ;;  %v4031_v38 = vcombine.high %v637_v33, %v641_v34 }
  0x23   : > { %1152 = vmatprep.subr.bf16.mxu0 %v4073_v11  ;;  %v655_v11 = vld [vmem:[%s6502_s5 + $0xd8] sm:$0xff] }
  0x26   : > { %1153 = vmatpush1.bf16.msra.mxu0 %v4072_v12  ;;  %v659_v12 = vld [vmem:[%s6502_s5 + $0xf8] sm:$0xff] }
  0x27   : > { %1154 = vmatprep.subr.bf16.mxu0 %v4081_v19  ;;  %v4050_v17 = vcombine.low %v655_v11, %v659_v12  ;;  %v671_v19 = vld [vmem:[%s6502_s5 + $0x158] sm:$0xff] }
  0x2a   : > { %1155 = vmatpush1.bf16.msra.mxu0 %v4080_v20  ;;  %v675_v20 = vld [vmem:[%s6502_s5 + $0x178] sm:$0xff] }
  0x2b   : > { %v4067_v22 = vcombine.high %v671_v19, %v675_v20 }
  0xe5   : > { %v531_v40 = vpop.f32.mrb[0].mxu1 }
  0xe6   : > { %v532_v41 = vadd.f32 %v4011_v39, %v531_v40  ;;  %v4456_v42 = vpop.f32.mrb[1].mxu1  ;;  %v649_v40 = vld [vmem:[%s6502_s5 + $0xa8] sm:$0xff] }
  0xe7   : > { %v534_v43 = vpop.f32.mrb[2].mxu1 }
  0xe8   : > { %v535_v44 = vadd.f32 %v4011_v39, %v534_v43  ;;  %v4457_v45 = vpop.f32.mrb[3].mxu1  ;;  %v538_v48 = vmax.f32 %v532_v41, 0.0  ;;  %v645_v39 = vld [vmem:[%s6502_s5 + $0x88] sm:$0xff]  ;;  %v4030_v41 = vcombine.low %v637_v33, %v641_v34  ;;  %v4538_v34 = vld [vmem:[%s6504_s7] ss:$16 sps:$4 sm:$0xff]  }
  0xe9   : > { %v4039_v42 = vcombine.high %v645_v39, %v649_v40  ;;  %v653_v43 = vld [vmem:[%s6502_s5 + $0xc8] sm:$0xff]  ;;  %v4038_v45 = vcombine.low %v645_v39, %v649_v40  ;;  %v4552_v40 = vld [vmem:[%s6504_s7 + $0x44] ss:$16 sps:$4 sm:$0xff]  }
  0xea   : > { %v539_v49 = vmax.f32 %v535_v44, 0.0  ;;  %v657_v44 = vld [vmem:[%s6502_s5 + $0xe8] sm:$0xff] }
  0xeb   : > { %v4047_v46 = vcombine.high %v653_v43, %v657_v44  ;;  %v4543_v33 = vld [vmem:[%s6504_s7 + $0xc] ss:$16 sps:$4 sm:$0xff]   ;;  %v4547_v39 = vld [vmem:[%s6504_s7 + $0x28] ss:$16 sps:$4 sm:$0xff]  }
  0xec   : > { %v540_v50 = vpack.c.bf16 %v539_v49, %v538_v48  ;;  %v665_v48 = vld [vmem:[%s6502_s5 + $0x128] sm:$0xff]  ;;  %v4046_v49 = vcombine.low %v653_v43, %v657_v44  ;;  %v4558_v44 = vld [vmem:[%s6504_s7 + $0x64] ss:$16 sps:$4 sm:$0xff]  }
  0xed   : > { %v4054_v53 = vcombine.low %v661_v47, %v665_v48  ;;  %v4553_v43 = vld [vmem:[%s6504_s7 + $0x48] ss:$16 sps:$4 sm:$0xff]  }
  0xee   : > { %4467 = vmatmul.mubr.msk.bf16.vlgmr.msra.gmra.mrb[4].mxu1 %vm580_vm4, %v540_v50  ;;  %v4055_v50 = vcombine.high %v661_v47, %v665_v48  ;;  %v4559_v47 = vld [vmem:[%s6504_s7 + $0x68] ss:$16 sps:$4 sm:$0xff]   ;;  %v4564_v48 = vld [vmem:[%s6504_s7 + $0x84] ss:$16 sps:$4 sm:$0xff]  }
  0xef   : > { %1055 = vmatpush1.bf16.msra.mxu1 %v4020_v13  ;;  %v684_v13 = vld [vmem:[%s6502_s5 + $0x1c0] sm:$0xff]  ;;  %1086 = vmatprep.mubr.bf16.mxu1 %v5061_v25 }
  0xf0   : > { %1056 = vmatprep.subr.bf16.mxu1 %v4029_v51  ;;  %v4077_v15 = vcombine.high %v684_v13, %v688_v14  ;;  %v4076_v18 = vcombine.low %v684_v13, %v688_v14  ;;  %v669_v51 = vld [vmem:[%s6502_s5 + $0x148] sm:$0xff]  ;;  %v4051_v14 = vcombine.high %v655_v11, %v659_v12  ;;  %v4606_v12 = vld [vmem:[%s6504_s7 + $0x164] ss:$16 sps:$4 sm:$0xff]  }
  0xf1   : > { %v4062_v57 = vcombine.low %v669_v51, %v673_v52  ;;  %v4601_v11 = vld [vmem:[%s6504_s7 + $0x148] ss:$16 sps:$4 sm:$0xff]  }
  0xf3   : > { %1057 = vmatpush1.bf16.msra.mxu1 %v4028_v54  ;;  %v4063_v54 = vcombine.high %v669_v51, %v673_v52  ;;  %v4565_v51 = vld [vmem:[%s6504_s7 + $0x88] ss:$16 sps:$4 sm:$0xff]   ;;  %v4570_v52 = vld [vmem:[%s6504_s7 + $0xa4] ss:$16 sps:$4 sm:$0xff]  }
  0xf4   : > { %1058 = vmatprep.subr.bf16.mxu1 %v4037_v55  ;;  %v677_v55 = vld [vmem:[%s6502_s5 + $0x188] sm:$0xff] }
  0xf5   : > { %v4070_v61 = vcombine.low %v677_v55, %v681_v56 }
  0xf7   : > { %1059 = vmatpush1.bf16.msra.mxu1 %v4036_v58  ;;  %v4071_v58 = vcombine.high %v677_v55, %v681_v56  ;;  %v4571_v55 = vld [vmem:[%s6504_s7 + $0xa8] ss:$16 sps:$4 sm:$0xff]   ;;  %v4576_v56 = vld [vmem:[%s6504_s7 + $0xc4] ss:$16 sps:$4 sm:$0xff]  }
  0xf8   : > { %1060 = vmatprep.subr.bf16.mxu1 %v4045_v59  ;;  %v685_v59 = vld [vmem:[%s6502_s5 + $0x1c8] sm:$0xff] }
  0xf9   : > { %v4078_v1 = vcombine.low %v685_v59, %v689_v60 }
  0xfb   : > { %1061 = vmatpush1.bf16.msra.mxu1 %v4044_v62  ;;  %v4079_v62 = vcombine.high %v685_v59, %v689_v60  ;;  %v4577_v59 = vld [vmem:[%s6504_s7 + $0xc8] ss:$16 sps:$4 sm:$0xff]   ;;  %v4582_v60 = vld [vmem:[%s6504_s7 + $0xe4] ss:$16 sps:$4 sm:$0xff]  }
  0xfc   : > { %1062 = vmatprep.subr.bf16.mxu1 %v4053_v63  ;;  %v631_v63 = vld [vmem:[%s6502_s5 + $0x18] sm:$0xff] }
  0xfd   : > { %v4026_v5 = vcombine.low %v631_v63, %v635_v0 }
  0xff   : > { %1063 = vmatpush1.bf16.msra.mxu1 %v4052_v2  ;;  %v4027_v2 = vcombine.high %v631_v63, %v635_v0  ;;  %v4585_v63 = vld [vmem:[%s6504_s7 + $0xec] ss:$16 sps:$4 sm:$0xff]   ;;  %v4588_v0 = vld [vmem:[%s6504_s7 + $0x104] ss:$16 sps:$4 sm:$0xff]  }
 0x100   : > { %1064 = vmatprep.subr.bf16.mxu1 %v4061_v3  ;;  %v639_v3 = vld [vmem:[%s6502_s5 + $0x58] sm:$0xff] }
 0x103   : > { %1065 = vmatpush1.bf16.msra.mxu1 %v4060_v4  ;;  %v643_v4 = vld [vmem:[%s6502_s5 + $0x78] sm:$0xff] }
 0x104   : > { %1066 = vmatprep.subr.bf16.mxu1 %v4069_v7  ;;  %v4035_v6 = vcombine.high %v639_v3, %v643_v4  ;;  %v647_v7 = vld [vmem:[%s6502_s5 + $0x98] sm:$0xff]  ;;  %v4034_v9 = vcombine.low %v639_v3, %v643_v4  ;;  %v4594_v4 = vld [vmem:[%s6504_s7 + $0x124] ss:$16 sps:$4 sm:$0xff]  }
 0x105   : > { %v4042_v13 = vcombine.low %v647_v7, %v651_v8  ;;  %v4589_v3 = vld [vmem:[%s6504_s7 + $0x108] ss:$16 sps:$4 sm:$0xff]  }
 0x107   : > { %1067 = vmatpush1.bf16.msra.mxu1 %v4068_v10  ;;  %v4043_v10 = vcombine.high %v647_v7, %v651_v8  ;;  %v4595_v7 = vld [vmem:[%s6504_s7 + $0x128] ss:$16 sps:$4 sm:$0xff]   ;;  %v4600_v8 = vld [vmem:[%s6504_s7 + $0x144] ss:$16 sps:$4 sm:$0xff]  }
 0x108   : > { %1068 = vmatprep.subr.bf16.mxu1 %v4077_v15  ;;  %v663_v15 = vld [vmem:[%s6502_s5 + $0x118] sm:$0xff] }
 0x109   : > { %v4058_v21 = vcombine.low %v663_v15, %v667_v16 }
 0x10b   : > { %1069 = vmatpush1.bf16.msra.mxu1 %v4076_v18  ;;  %v4059_v18 = vcombine.high %v663_v15, %v667_v16  ;;  %v4607_v15 = vld [vmem:[%s6504_s7 + $0x168] ss:$16 sps:$4 sm:$0xff]   ;;  %v4612_v16 = vld [vmem:[%s6504_s7 + $0x184] ss:$16 sps:$4 sm:$0xff]  }
 0x10c   : > { %1097 = vmatprep.subr.bf16.mxu1 %v4023_v23  ;;  %v679_v23 = vld [vmem:[%s6502_s5 + $0x198] sm:$0xff] }
 0x1c1   : > { %v618_v27 = vpop.f32.mrb[4].mxu1 }
 0x1c2   : > { %v619_v28 = vadd.f32 %v4014_v26, %v618_v27  ;;  %v4468_v29 = vpop.f32.mrb[5].mxu1  ;;  %v687_v27 = vld [vmem:[%s6502_s5 + $0x1d8] sm:$0xff] }
 0x1c3   : > { %v621_v30 = vpop.f32.mrb[6].mxu1 }
 0x1c4   : > { %v622_v31 = vadd.f32 %v4014_v26, %v621_v30  ;;  %v4469_v32 = vpop.f32.mrb[7].mxu1  ;;  %v625_v35 = vmax.f32 %v619_v28, 0.0  ;;  %v691_v28 = vld [vmem:[%s6502_s5 + $0x1f8] sm:$0xff] }
 0x1c5   : > { %v4083_v30 = vcombine.high %v687_v27, %v691_v28  ;;  %v4540_v32 = vld [vmem:[%s6504_s7 + $0x4] ss:$16 sps:$4 sm:$0xff]  }
 0x1c6   : > { %v626_v36 = vmax.f32 %v622_v31, 0.0  ;;  %v4082_v31 = vcombine.low %v687_v27, %v691_v28  ;;  %2954 = vmatprep.subr.bf16.mxu0 %v4540_v32  ;;  %v4625_v27 = vld [vmem:[%s6504_s7 + $0x1c8] ss:$16 sps:$4 sm:$0xff]   ;;  %v4628_v28 = vld [vmem:[%s6504_s7 + $0x1e0] ss:$16 sps:$4 sm:$0xff]  }
 0x1c7   : > { %v4636_v32 = vld [vmem:[%s6504_s7 + $0x204] ss:$16 sps:$4 sm:$0xff]  }
 0x1c8   : > { %v5288_v37 = vpack.c.bf16 %v626_v36, %v625_v35  ;;  %v4541_v35 = vld [vmem:[%s6504_s7 + $0x8] ss:$16 sps:$4 sm:$0xff]   ;;  %v4546_v36 = vld [vmem:[%s6504_s7 + $0x24] ss:$16 sps:$4 sm:$0xff]  }
 0x1ca   : > { %1087 = vmatmul.mubr.bf16.vlgmr.msra.gmra.mrb[8].mxu1 %v5288_v37  ;;  %1173 = vmatmul.mubr.bf16.vlgmr.msra.gmra.mrb[0].mxu0 %v5288_v37 }
 0x1cb   : > { %1098 = vmatpush1.bf16.msra.mxu1 %v4022_v24  ;;  %1129 = vmatprep.mubr.bf16.mxu1 %v5061_v25  ;;  %v683_v24 = vld [vmem:[%s6502_s5 + $0x1b8] sm:$0xff] }
 0x1cc   : > { %1099 = vmatprep.subr.bf16.mxu1 %v4031_v38  ;;  %v4075_v26 = vcombine.high %v679_v23, %v683_v24  ;;  %v4074_v29 = vcombine.low %v679_v23, %v683_v24  ;;  %2955 = vmatpush1.bf16.msra.mxu0 %v4538_v34  ;;  %v4544_v38 = vld [vmem:[%s6504_s7 + $0x20] ss:$16 sps:$4 sm:$0xff]   ;;  %v4619_v23 = vld [vmem:[%s6504_s7 + $0x1a8] ss:$16 sps:$4 sm:$0xff]   ;;  %v4624_v24 = vld [vmem:[%s6504_s7 + $0x1c4] ss:$16 sps:$4 sm:$0xff]   ;;  %v694_v34 = vlaneseq }
 0x1cd   : > { %2956 = vmatprep.subr.bf16.mxu0 %v4546_v36 }
 0x1cf   : > { %1100 = vmatpush1.bf16.msra.mxu1 %v4030_v41  ;;  %v4555_v41 = vld [vmem:[%s6504_s7 + $0x4c] ss:$16 sps:$4 sm:$0xff]  }
 0x1d0   : > { %1101 = vmatprep.subr.bf16.mxu1 %v4039_v42  ;;  %2957 = vmatpush1.bf16.msra.mxu0 %v4544_v38  ;;  %v4550_v42 = vld [vmem:[%s6504_s7 + $0x40] ss:$16 sps:$4 sm:$0xff]  }
 0x1d1   : > { %2958 = vmatprep.subr.bf16.mxu0 %v4552_v40  ;;  %v5587_v38 = vld [vmem:[%s6503_s6] sm:$0xff] }
 0x1d3   : > { %1102 = vmatpush1.bf16.msra.mxu1 %v4038_v45  ;;  %v4561_v45 = vld [vmem:[%s6504_s7 + $0x6c] ss:$16 sps:$4 sm:$0xff]  }
 0x1d4   : > { %1103 = vmatprep.subr.bf16.mxu1 %v4047_v46  ;;  %2959 = vmatpush1.bf16.msra.mxu0 %v4550_v42  ;;  %v4556_v46 = vld [vmem:[%s6504_s7 + $0x60] ss:$16 sps:$4 sm:$0xff]  }
 0x1d5   : > { %2960 = vmatprep.subr.bf16.mxu0 %v4558_v44 }
 0x1d7   : > { %1104 = vmatpush1.bf16.msra.mxu1 %v4046_v49  ;;  %v4567_v49 = vld [vmem:[%s6504_s7 + $0x8c] ss:$16 sps:$4 sm:$0xff]  }
 0x1d8   : > { %1105 = vmatprep.subr.bf16.mxu1 %v4055_v50  ;;  %2961 = vmatpush1.bf16.msra.mxu0 %v4556_v46  ;;  %v4562_v50 = vld [vmem:[%s6504_s7 + $0x80] ss:$16 sps:$4 sm:$0xff]  }
 0x1d9   : > { %2962 = vmatprep.subr.bf16.mxu0 %v4564_v48 }
 0x1db   : > { %1106 = vmatpush1.bf16.msra.mxu1 %v4054_v53  ;;  %v4573_v53 = vld [vmem:[%s6504_s7 + $0xac] ss:$16 sps:$4 sm:$0xff]  }
 0x1dc   : > { %1107 = vmatprep.subr.bf16.mxu1 %v4063_v54  ;;  %2963 = vmatpush1.bf16.msra.mxu0 %v4562_v50  ;;  %v4568_v54 = vld [vmem:[%s6504_s7 + $0xa0] ss:$16 sps:$4 sm:$0xff]  }
 0x1dd   : > { %2964 = vmatprep.subr.bf16.mxu0 %v4570_v52 }
 0x1df   : > { %1108 = vmatpush1.bf16.msra.mxu1 %v4062_v57  ;;  %v4579_v57 = vld [vmem:[%s6504_s7 + $0xcc] ss:$16 sps:$4 sm:$0xff]  }
 0x1e0   : > { %1109 = vmatprep.subr.bf16.mxu1 %v4071_v58  ;;  %2965 = vmatpush1.bf16.msra.mxu0 %v4568_v54  ;;  %v4574_v58 = vld [vmem:[%s6504_s7 + $0xc0] ss:$16 sps:$4 sm:$0xff]  }
 0x1e1   : > { %2966 = vmatprep.subr.bf16.mxu0 %v4576_v56 }
 0x1e3   : > { %1110 = vmatpush1.bf16.msra.mxu1 %v4070_v61  ;;  %v4580_v61 = vld [vmem:[%s6504_s7 + $0xe0] ss:$16 sps:$4 sm:$0xff]  }
 0x1e4   : > { %1111 = vmatprep.subr.bf16.mxu1 %v4079_v62  ;;  %2967 = vmatpush1.bf16.msra.mxu0 %v4574_v58  ;;  %v4583_v62 = vld [vmem:[%s6504_s7 + $0xe8] ss:$16 sps:$4 sm:$0xff]  }
 0x1e5   : > { %2968 = vmatprep.subr.bf16.mxu0 %v4582_v60 }
 0x1e7   : > { %1112 = vmatpush1.bf16.msra.mxu1 %v4078_v1  ;;  %v4591_v1 = vld [vmem:[%s6504_s7 + $0x10c] ss:$16 sps:$4 sm:$0xff]  }
 0x1e8   : > { %1183 = vmatprep.subr.bf16.mxu1 %v4027_v2  ;;  %2969 = vmatpush1.bf16.msra.mxu0 %v4580_v61  ;;  %v4586_v2 = vld [vmem:[%s6504_s7 + $0x100] ss:$16 sps:$4 sm:$0xff]  }
 0x1e9   : > { %2970 = vmatprep.subr.bf16.mxu0 %v4588_v0 }
 0x1ea   : > { %1130 = vmatmul.mubr.bf16.vlgmr.msra.gmra.mrb[12].mxu1 %v5288_v37 }
 0x1eb   : > { %1184 = vmatpush1.bf16.msra.mxu1 %v4026_v5  ;;  %1215 = vmatprep.mubr.bf16.mxu1 %v5061_v25  ;;  %v4066_v25 = vcombine.low %v671_v19, %v675_v20  ;;  %v4597_v5 = vld [vmem:[%s6504_s7 + $0x12c] ss:$16 sps:$4 sm:$0xff]   ;;  %v4613_v19 = vld [vmem:[%s6504_s7 + $0x188] ss:$16 sps:$4 sm:$0xff]   ;;  %v4618_v20 = vld [vmem:[%s6504_s7 + $0x1a4] ss:$16 sps:$4 sm:$0xff]  }
 0x1ec   : > { %1185 = vmatprep.subr.bf16.mxu1 %v4035_v6  ;;  %2971 = vmatpush1.bf16.msra.mxu0 %v4586_v2  ;;  %v4592_v6 = vld [vmem:[%s6504_s7 + $0x120] ss:$16 sps:$4 sm:$0xff]  }
 0x1ed   : > { %2972 = vmatprep.subr.bf16.mxu0 %v4594_v4 }
 0x1ef   : > { %1186 = vmatpush1.bf16.msra.mxu1 %v4034_v9  ;;  %v4603_v9 = vld [vmem:[%s6504_s7 + $0x14c] ss:$16 sps:$4 sm:$0xff]  }
 0x1f0   : > { %1187 = vmatprep.subr.bf16.mxu1 %v4043_v10  ;;  %2973 = vmatpush1.bf16.msra.mxu0 %v4592_v6  ;;  %v4598_v10 = vld [vmem:[%s6504_s7 + $0x140] ss:$16 sps:$4 sm:$0xff]  }
 0x1f1   : > { %2974 = vmatprep.subr.bf16.mxu0 %v4600_v8 }
 0x1f3   : > { %1188 = vmatpush1.bf16.msra.mxu1 %v4042_v13  ;;  %v4609_v13 = vld [vmem:[%s6504_s7 + $0x16c] ss:$16 sps:$4 sm:$0xff]  }
 0x1f4   : > { %1189 = vmatprep.subr.bf16.mxu1 %v4051_v14  ;;  %2975 = vmatpush1.bf16.msra.mxu0 %v4598_v10  ;;  %v4604_v14 = vld [vmem:[%s6504_s7 + $0x160] ss:$16 sps:$4 sm:$0xff]  }
 0x1f5   : > { %2976 = vmatprep.subr.bf16.mxu0 %v4606_v12 }
 0x1f7   : > { %1190 = vmatpush1.bf16.msra.mxu1 %v4050_v17  ;;  %v4615_v17 = vld [vmem:[%s6504_s7 + $0x18c] ss:$16 sps:$4 sm:$0xff]  }
 0x1f8   : > { %1191 = vmatprep.subr.bf16.mxu1 %v4059_v18  ;;  %2977 = vmatpush1.bf16.msra.mxu0 %v4604_v14  ;;  %v4610_v18 = vld [vmem:[%s6504_s7 + $0x180] ss:$16 sps:$4 sm:$0xff]  }
 0x1f9   : > { %2978 = vmatprep.subr.bf16.mxu0 %v4612_v16 }
 0x1fb   : > { %1192 = vmatpush1.bf16.msra.mxu1 %v4058_v21  ;;  %v4621_v21 = vld [vmem:[%s6504_s7 + $0x1ac] ss:$16 sps:$4 sm:$0xff]  }
 0x1fc   : > { %1193 = vmatprep.subr.bf16.mxu1 %v4067_v22  ;;  %2979 = vmatpush1.bf16.msra.mxu0 %v4610_v18  ;;  %v4616_v22 = vld [vmem:[%s6504_s7 + $0x1a0] ss:$16 sps:$4 sm:$0xff]  }
 0x1fd   : > { %2980 = vmatprep.subr.bf16.mxu0 %v4618_v20 }
 0x1ff   : > { %1194 = vmatpush1.bf16.msra.mxu1 %v4066_v25  ;;  %v4627_v25 = vld [vmem:[%s6504_s7 + $0x1cc] ss:$16 sps:$4 sm:$0xff]  }
 0x200   : > { %1195 = vmatprep.subr.bf16.mxu1 %v4075_v26  ;;  %2981 = vmatpush1.bf16.msra.mxu0 %v4616_v22  ;;  %v4622_v26 = vld [vmem:[%s6504_s7 + $0x1c0] ss:$16 sps:$4 sm:$0xff]  }
 0x201   : > { %2982 = vmatprep.subr.bf16.mxu0 %v4624_v24 }
 0x203   : > { %1196 = vmatpush1.bf16.msra.mxu1 %v4074_v29  ;;  %v4630_v29 = vld [vmem:[%s6504_s7 + $0x1e4] ss:$16 sps:$4 sm:$0xff]  }
 0x204   : > { %1197 = vmatprep.subr.bf16.mxu1 %v4083_v30  ;;  %2983 = vmatpush1.bf16.msra.mxu0 %v4622_v26  ;;  %v4631_v30 = vld [vmem:[%s6504_s7 + $0x1e8] ss:$16 sps:$4 sm:$0xff]  }
 0x205   : > { %2984 = vmatprep.subr.bf16.mxu0 %v4630_v29 }
 0x207   : > { %1198 = vmatpush1.bf16.msra.mxu1 %v4082_v31  ;;  %v4633_v31 = vld [vmem:[%s6504_s7 + $0x1ec] ss:$16 sps:$4 sm:$0xff]  }
 0x208   : > { %3118 = vmatprep.subr.bf16.mxu1 %v4543_v33  ;;  %2985 = vmatpush1.bf16.msra.mxu0 %v4628_v28  ;;  %v4639_v33 = vld [vmem:[%s6504_s7 + $0x20c] ss:$16 sps:$4 sm:$0xff]  }
 0x209   : > { %2995 = vmatprep.subr.bf16.mxu0 %v4636_v32 }
 0x20a   : > { %1216 = vmatmul.mubr.bf16.vlgmr.msra.gmra.mrb[16].mxu1 %v5288_v37  ;;  %v4549_v37 = vld [vmem:[%s6504_s7 + $0x2c] ss:$16 sps:$4 sm:$0xff]  }
 0x20b   : > { %3119 = vmatpush1.bf16.msra.mxu1 %v4541_v35  ;;  %v5578_v35 = vshrl.u32 %v694_v34, 7 }
 0x20c   : > { %3120 = vmatprep.subr.bf16.mxu1 %v4549_v37 }
 0x20d   : > { %v5581_v36 = vsub.s32 0, %v5578_v35  ;;  %v712_v37 = vsub.s32 4, %v5578_v35  ;;  %v716_v40 = vsub.s32 5, %v5578_v35  ;;  %v5613_v28 = vsub.s32 3, %v5578_v35 }
 0x20f   : > { %3121 = vmatpush1.bf16.msra.mxu1 %v4547_v39  ;;  %v5590_v39 = vsub.s32 1, %v5578_v35  ;;  %v713_v42 = vrot.slane %v5587_v38, %v712_v37  ;;  %v717_v46 = vrot.slane %v5587_v38, %v716_v40 }
 0x210   : > { %3122 = vmatprep.subr.bf16.mxu1 %v4555_v41  ;;  %v697_v41 = vrot.slane %v5587_v38, %v5581_v36 }
 0x213   : > { %3123 = vmatpush1.bf16.msra.mxu1 %v4553_v43 }
 0x214   : > { %3124 = vmatprep.subr.bf16.mxu1 %v4561_v45  ;;  %v701_v45 = vrot.slane %v5587_v38, %v5590_v39 }
 0x217   : > { %3125 = vmatpush1.bf16.msra.mxu1 %v4559_v47 }
 0x218   : > { %3126 = vmatprep.subr.bf16.mxu1 %v4567_v49 }
 0x21b   : > { %3127 = vmatpush1.bf16.msra.mxu1 %v4565_v51 }
 0x21c   : > { %3128 = vmatprep.subr.bf16.mxu1 %v4573_v53 }
 0x21f   : > { %3129 = vmatpush1.bf16.msra.mxu1 %v4571_v55 }
 0x220   : > { %3130 = vmatprep.subr.bf16.mxu1 %v4579_v57 }
 0x223   : > { %3131 = vmatpush1.bf16.msra.mxu1 %v4577_v59 }
 0x224   : > { %3132 = vmatprep.subr.bf16.mxu1 %v4585_v63 }
 0x227   : > { %3133 = vmatpush1.bf16.msra.mxu1 %v4583_v62 }
 0x228   : > { %3134 = vmatprep.subr.bf16.mxu1 %v4591_v1 }
 0x22b   : > { %3135 = vmatpush1.bf16.msra.mxu1 %v4589_v3 }
 0x22c   : > { %3136 = vmatprep.subr.bf16.mxu1 %v4597_v5 }
 0x22f   : > { %3137 = vmatpush1.bf16.msra.mxu1 %v4595_v7 }
 0x230   : > { %3138 = vmatprep.subr.bf16.mxu1 %v4603_v9 }
 0x233   : > { %3139 = vmatpush1.bf16.msra.mxu1 %v4601_v11 }
 0x234   : > { %3140 = vmatprep.subr.bf16.mxu1 %v4609_v13 }
 0x237   : > { %3141 = vmatpush1.bf16.msra.mxu1 %v4607_v15 }
 0x238   : > { %3142 = vmatprep.subr.bf16.mxu1 %v4615_v17 }
 0x23b   : > { %3143 = vmatpush1.bf16.msra.mxu1 %v4613_v19 }
 0x23c   : > { %3144 = vmatprep.subr.bf16.mxu1 %v4621_v21 }
 0x23f   : > { %3145 = vmatpush1.bf16.msra.mxu1 %v4619_v23 }
 0x240   : > { %3146 = vmatprep.subr.bf16.mxu1 %v4627_v25 }
 0x243   : > { %3147 = vmatpush1.bf16.msra.mxu1 %v4625_v27  ;;  %v5610_v27 = vsub.s32 2, %v5578_v35 }
 0x244   : > { %3148 = vmatprep.subr.bf16.mxu1 %v4633_v31  ;;  %v709_v31 = vrot.slane %v5587_v38, %v5613_v28 }
 0x245   : > { %v705_v29 = vrot.slane %v5587_v38, %v5610_v27 }
 0x247   : > { %3149 = vmatpush1.bf16.msra.mxu1 %v4631_v30 }
 0x248   : > { %3159 = vmatprep.subr.bf16.mxu1 %v4639_v33 }
 0x29d   : > { %v1088_v43 = vpop.f32.mrb[8].mxu1  ;;  %v1174_v44 = vpop.f32.mrb[0].mxu0 }
 0x29e   : > { %v1090_v47 = vpop.f32.mrb[9].mxu1  ;;  %v1176_v48 = vpop.f32.mrb[1].mxu0  ;;  %v1089_v51 = vadd.f32 %v1088_v43, %v697_v41  ;;  %v1175_v52 = vadd.f32 %v1174_v44, %v713_v42 }
 0x29f   : > { %v1092_v49 = vpop.f32.mrb[10].mxu1  ;;  %v1178_v50 = vpop.f32.mrb[2].mxu0  ;;  %v1091_v57 = vadd.f32 %v1090_v47, %v701_v45  ;;  %v1177_v58 = vadd.f32 %v1176_v48, %v717_v46 }
 0x2a0   : > { %v1093_v53 = vadd.f32 %v1092_v49, %v697_v41  ;;  %v1179_v54 = vadd.f32 %v1178_v50, %v713_v42  ;;  %v1094_v55 = vpop.f32.mrb[11].mxu1  ;;  %v1180_v56 = vpop.f32.mrb[3].mxu0  ;;  %v5062_v50 = vmov 1966171168  }
 0x2a1   : > { %v1095_v59 = vadd.f32 %v1094_v55, %v701_v45  ;;  %v1181_v60 = vadd.f32 %v1180_v56, %v717_v46 }
 0x2a2   : > { %v1227_v61 = vmax.f32 %v1089_v51, %v1093_v53  ;;  %v1255_v62 = vmax.f32 %v1175_v52, %v1179_v54  ;;  %v1296_v51 = vunpack.c.l.s4 %v5062_v50  ;;  %v4642_v50 = vld [vmem:[%s6504_s7 + $0x224] ss:$16 sps:$4 sm:$0xff]  }
 0x2a3   : > { %v1234_v63 = vmax.f32 %v1091_v57, %v1095_v59  ;;  %v1262_v0 = vmax.f32 %v1177_v58, %v1181_v60 }
 0x2a4   : > { %v1228_v1 = vrot.slane %v1227_v61, 4  ;;  %v1256_v2 = vrot.slane %v1255_v62, 4  ;;  %v1297_v56 = vunpack.c.0.s8 %v1296_v51  ;;  %v4645_v51 = vld [vmem:[%s6504_s7 + $0x22c] ss:$16 sps:$4 sm:$0xff]  }
 0x2a5   : > { %v1235_v3 = vrot.slane %v1234_v63, 4  ;;  %v1263_v4 = vrot.slane %v1262_v0, 4 }
 0x2a6   : > { %v1229_v5 = vmax.f32 %v1227_v61, %v1228_v1  ;;  %v1257_v6 = vmax.f32 %v1255_v62, %v1256_v2  ;;  %v1300_v61 = vsub.s32 %v1297_v56, %v5578_v35  ;;  %v4651_v56 = vld [vmem:[%s6504_s7 + $0x24c] ss:$16 sps:$4 sm:$0xff]  }
 0x2a7   : > { %v1236_v7 = vmax.f32 %v1234_v63, %v1235_v3  ;;  %v1264_v8 = vmax.f32 %v1262_v0, %v1263_v4  ;;  %v720_v3 = vsub.s32 6, %v5578_v35  ;;  %v724_v4 = vsub.s32 7, %v5578_v35  ;;  %v4925_v35 = vld [vmem:[%s6506_s9 + $0x10] ss:$8 sps:$4 sm:$0xff]  }
 0x2a8   : > { %v1230_v9 = vrot.slane %v1229_v5, 2  ;;  %v1258_v10 = vrot.slane %v1257_v6, 2 }
 0x2a9   : > { %v1237_v11 = vrot.slane %v1236_v7, 2  ;;  %v1265_v12 = vrot.slane %v1264_v8, 2 }
 0x2aa   : > { %v1231_v13 = vmax.f32 %v1229_v5, %v1230_v9  ;;  %v1259_v14 = vmax.f32 %v1257_v6, %v1258_v10  ;;  %v721_v5 = vrot.slane %v5587_v38, %v720_v3 }
 0x2ab   : > { %v1238_v15 = vmax.f32 %v1236_v7, %v1237_v11  ;;  %v1266_v16 = vmax.f32 %v1264_v8, %v1265_v12  ;;  %v725_v7 = vrot.slane %v5587_v38, %v724_v4 }
 0x2ac   : > { %v1232_v17 = vrot.slane %v1231_v13, 1  ;;  %v1260_v18 = vrot.slane %v1259_v14, 1 }
 0x2ad   : > { %v1239_v19 = vrot.slane %v1238_v15, 1  ;;  %v1267_v20 = vrot.slane %v1266_v16, 1 }
 0x2ae   : > { %v1233_v21 = vmax.f32 %v1231_v13, %v1232_v17  ;;  %v5603_v22 = vmax.f32 %v1259_v14, %v1260_v18 }
 0x2af   : > { %v1240_v23 = vmax.f32 %v1238_v15, %v1239_v19  ;;  %v5605_v24 = vmax.f32 %v1266_v16, %v1267_v20 }
 0x2b1   : > { %v1291_v25 = vcombine.low %v1233_v21, %v1240_v23  ;;  %v1293_v26 = vcombine.low %v5603_v22, %v5605_v24 }
 0x2b3   : > { %v1301_v0 = vrot.slane %v1291_v25, %v1300_v61 }
 0x2bd   : > { %v1131_v30 = vpop.f32.mrb[12].mxu1 }
 0x2be   : > { %v1133_v32 = vpop.f32.mrb[13].mxu1  ;;  %v1132_v34 = vadd.f32 %v1131_v30, %v705_v29 }
 0x2bf   : > { %v1135_v33 = vpop.f32.mrb[14].mxu1  ;;  %v1134_v43 = vadd.f32 %v1133_v32, %v709_v31  ;;  %v1315_v32 = vrot.slane %v1293_v26, %v1300_v61  ;;  %v4634_v26 = vld [vmem:[%s6504_s7 + $0x200] ss:$16 sps:$4 sm:$0xff]  }
 0x2c0   : > { %v1136_v41 = vadd.f32 %v1135_v33, %v705_v29  ;;  %v1137_v42 = vpop.f32.mrb[15].mxu1 }
 0x2c1   : > { %v1138_v44 = vadd.f32 %v1137_v42, %v709_v31 }
 0x2c2   : > { %v1241_v45 = vmax.f32 %v1132_v34, %v1136_v41 }
 0x2c3   : > { %v1248_v46 = vmax.f32 %v1134_v43, %v1138_v44 }
 0x2c4   : > { %v1242_v47 = vrot.slane %v1241_v45, 4 }
 0x2c5   : > { %v1249_v48 = vrot.slane %v1248_v46, 4 }
 0x2c6   : > { %v1243_v49 = vmax.f32 %v1241_v45, %v1242_v47 }
 0x2c7   : > { %v1250_v52 = vmax.f32 %v1248_v46, %v1249_v48  ;;  %v4637_v48 = vld [vmem:[%s6504_s7 + $0x208] ss:$16 sps:$4 sm:$0xff]  }
 0x2c8   : > { %v1244_v53 = vrot.slane %v1243_v49, 2 }
 0x2c9   : > { %v1251_v54 = vrot.slane %v1250_v52, 2 }
 0x2ca   : > { %v1245_v55 = vmax.f32 %v1243_v49, %v1244_v53  ;;  %v4640_v53 = vld [vmem:[%s6504_s7 + $0x220] ss:$16 sps:$4 sm:$0xff]  }
 0x2cb   : > { %v1252_v57 = vmax.f32 %v1250_v52, %v1251_v54  ;;  %v4643_v54 = vld [vmem:[%s6504_s7 + $0x228] ss:$16 sps:$4 sm:$0xff]  }
 0x2cc   : > { %v1246_v58 = vrot.slane %v1245_v55, 1 }
 0x2cd   : > { %v1253_v59 = vrot.slane %v1252_v57, 1 }
 0x2ce   : > { %v1247_v60 = vmax.f32 %v1245_v55, %v1246_v58  ;;  %v4648_v55 = vld [vmem:[%s6504_s7 + $0x244] ss:$16 sps:$4 sm:$0xff]   ;;  %v4649_v58 = vld [vmem:[%s6504_s7 + $0x248] ss:$16 sps:$4 sm:$0xff]  }
 0x2cf   : > { %v1254_v62 = vmax.f32 %v1252_v57, %v1253_v59  ;;  %v4646_v57 = vld [vmem:[%s6504_s7 + $0x240] ss:$16 sps:$4 sm:$0xff]   ;;  %v4654_v59 = vld [vmem:[%s6504_s7 + $0x264] ss:$16 sps:$4 sm:$0xff]  }
 0x2d1   : > { %v1292_v63 = vcombine.low %v1247_v60, %v1254_v62  ;;  %v4657_v60 = vld [vmem:[%s6504_s7 + $0x26c] ss:$16 sps:$4 sm:$0xff]   ;;  %v4655_v62 = vld [vmem:[%s6504_s7 + $0x268] ss:$16 sps:$4 sm:$0xff]  }
 0x2d3   : > { %v1308_v1 = vrot.slane %v1292_v63, %v1300_v61  ;;  %v4660_v63 = vld [vmem:[%s6504_s7 + $0x284] ss:$16 sps:$4 sm:$0xff]  }
 0x2d5   : > { %v1323_v2 = vcombine.low %v1301_v0, %v1308_v1  ;;  %v4663_v0 = vld [vmem:[%s6504_s7 + $0x28c] ss:$16 sps:$4 sm:$0xff]   ;;  %v4658_v1 = vld [vmem:[%s6504_s7 + $0x280] ss:$16 sps:$4 sm:$0xff]  }
 0x2d7   : > { %v1331_v41 = vrot.slane %v1323_v2, %v1300_v61  ;;  %v4661_v2 = vld [vmem:[%s6504_s7 + $0x288] ss:$16 sps:$4 sm:$0xff]  }
 0x2dd   : > { %v1217_v6 = vpop.f32.mrb[16].mxu1 }
 0x2de   : > { %v1219_v8 = vpop.f32.mrb[17].mxu1  ;;  %v1218_v10 = vadd.f32 %v1217_v6, %v721_v5  ;;  %v4669_v6 = vld [vmem:[%s6504_s7 + $0x2ac] ss:$16 sps:$4 sm:$0xff]  }
 0x2df   : > { %v1221_v9 = vpop.f32.mrb[18].mxu1  ;;  %v1220_v13 = vadd.f32 %v1219_v8, %v725_v7  ;;  %v4667_v8 = vld [vmem:[%s6504_s7 + $0x2a8] ss:$16 sps:$4 sm:$0xff]  }
 0x2e0   : > { %v1222_v11 = vadd.f32 %v1221_v9, %v721_v5  ;;  %v1223_v12 = vpop.f32.mrb[19].mxu1  ;;  %v4666_v5 = vld [vmem:[%s6504_s7 + $0x2a4] ss:$16 sps:$4 sm:$0xff]  }
 0x2e1   : > { %v1224_v14 = vadd.f32 %v1223_v12, %v725_v7  ;;  %v4664_v7 = vld [vmem:[%s6504_s7 + $0x2a0] ss:$16 sps:$4 sm:$0xff]   ;;  %v4672_v9 = vld [vmem:[%s6504_s7 + $0x2c4] ss:$16 sps:$4 sm:$0xff]   ;;  %v4673_v12 = vld [vmem:[%s6504_s7 + $0x2c8] ss:$16 sps:$4 sm:$0xff]  }
 0x2e2   : > { %v1269_v15 = vmax.f32 %v1218_v10, %v1222_v11  ;;  %v4675_v10 = vld [vmem:[%s6504_s7 + $0x2cc] ss:$16 sps:$4 sm:$0xff]   ;;  %v4670_v11 = vld [vmem:[%s6504_s7 + $0x2c0] ss:$16 sps:$4 sm:$0xff]  }
 0x2e3   : > { %v1276_v16 = vmax.f32 %v1220_v13, %v1224_v14  ;;  %v4678_v13 = vld [vmem:[%s6504_s7 + $0x2e4] ss:$16 sps:$4 sm:$0xff]   ;;  %v4681_v14 = vld [vmem:[%s6504_s7 + $0x2ec] ss:$16 sps:$4 sm:$0xff]  }
 0x2e4   : > { %v1270_v17 = vrot.slane %v1269_v15, 4 }
 0x2e5   : > { %v1277_v18 = vrot.slane %v1276_v16, 4 }
 0x2e6   : > { %v1271_v19 = vmax.f32 %v1269_v15, %v1270_v17  ;;  %v4676_v15 = vld [vmem:[%s6504_s7 + $0x2e0] ss:$16 sps:$4 sm:$0xff]   ;;  %v4684_v17 = vld [vmem:[%s6504_s7 + $0x304] ss:$16 sps:$4 sm:$0xff]  }
 0x2e7   : > { %v1278_v20 = vmax.f32 %v1276_v16, %v1277_v18  ;;  %v4679_v16 = vld [vmem:[%s6504_s7 + $0x2e8] ss:$16 sps:$4 sm:$0xff]   ;;  %v4687_v18 = vld [vmem:[%s6504_s7 + $0x30c] ss:$16 sps:$4 sm:$0xff]  }
 0x2e8   : > { %v1272_v21 = vrot.slane %v1271_v19, 2 }
 0x2e9   : > { %v1279_v22 = vrot.slane %v1278_v20, 2 }
 0x2ea   : > { %v1273_v23 = vmax.f32 %v1271_v19, %v1272_v21  ;;  %v4682_v19 = vld [vmem:[%s6504_s7 + $0x300] ss:$16 sps:$4 sm:$0xff]   ;;  %v4690_v21 = vld [vmem:[%s6504_s7 + $0x324] ss:$16 sps:$4 sm:$0xff]  }
 0x2eb   : > { %v1280_v24 = vmax.f32 %v1278_v20, %v1279_v22  ;;  %v4685_v20 = vld [vmem:[%s6504_s7 + $0x308] ss:$16 sps:$4 sm:$0xff]   ;;  %v4693_v22 = vld [vmem:[%s6504_s7 + $0x32c] ss:$16 sps:$4 sm:$0xff]  }
 0x2ec   : > { %v1274_v25 = vrot.slane %v1273_v23, 1 }
 0x2ed   : > { %v1281_v29 = vrot.slane %v1280_v24, 1 }
 0x2ee   : > { %v1275_v38 = vmax.f32 %v1273_v23, %v1274_v25  ;;  %v4688_v23 = vld [vmem:[%s6504_s7 + $0x320] ss:$16 sps:$4 sm:$0xff]   ;;  %v4696_v25 = vld [vmem:[%s6504_s7 + $0x344] ss:$16 sps:$4 sm:$0xff]  }
 0x2ef   : > { %v1282_v30 = vmax.f32 %v1280_v24, %v1281_v29  ;;  %v4691_v24 = vld [vmem:[%s6504_s7 + $0x328] ss:$16 sps:$4 sm:$0xff]   ;;  %v4699_v29 = vld [vmem:[%s6504_s7 + $0x34c] ss:$16 sps:$4 sm:$0xff]  }
 0x2f1   : > { %v1294_v31 = vcombine.low %v1275_v38, %v1282_v30  ;;  %v4694_v38 = vld [vmem:[%s6504_s7 + $0x340] ss:$16 sps:$4 sm:$0xff]   ;;  %v4697_v30 = vld [vmem:[%s6504_s7 + $0x348] ss:$16 sps:$4 sm:$0xff]  }
 0x2f3   : > { %v1322_v33 = vrot.slane %v1294_v31, %v1300_v61  ;;  %v4702_v31 = vld [vmem:[%s6504_s7 + $0x364] ss:$16 sps:$4 sm:$0xff]  }
 0x2f5   : > { %v1324_v34 = vcombine.low %v1315_v32, %v1322_v33  ;;  %v4705_v32 = vld [vmem:[%s6504_s7 + $0x36c] ss:$16 sps:$4 sm:$0xff]   ;;  %v4700_v33 = vld [vmem:[%s6504_s7 + $0x360] ss:$16 sps:$4 sm:$0xff]  }
 0x2f7   : > { %v1338_v42 = vrot.slane %v1324_v34, %v1300_v61  ;;  %v4652_v61 = vld [vmem:[%s6504_s7 + $0x260] ss:$16 sps:$4 sm:$0xff]   ;;  %v4703_v34 = vld [vmem:[%s6504_s7 + $0x368] ss:$16 sps:$4 sm:$0xff]  }
 0x2f9   : > { %v5628_v43 = vcombine.low %v1331_v41, %v1338_v42  ;;  %v4708_v41 = vld [vmem:[%s6504_s7 + $0x384] ss:$16 sps:$4 sm:$0xff]   ;;  %v4711_v42 = vld [vmem:[%s6504_s7 + $0x38c] ss:$16 sps:$4 sm:$0xff]  }
 0x2fb   : > { %v1355_v44 = vrot.slane %v5628_v43, %v5590_v39  ;;  %v1351_v45 = vrot.slane %v5628_v43, %v5581_v36  ;;  %v1363_v46 = vrot.slane %v5628_v43, %v5613_v28 }
 0x2fd   : > { %v1389_v47 = vpack.c.bf16 %v1355_v44, %v1355_v44  ;;  %v1388_v49 = vpack.c.bf16 %v1351_v45, %v1351_v45  ;;  %v1391_v52 = vpack.c.bf16 %v1363_v46, %v1363_v46  ;;  %v4706_v44 = vld [vmem:[%s6504_s7 + $0x380] ss:$16 sps:$4 sm:$0xff]   ;;  %v4709_v45 = vld [vmem:[%s6504_s7 + $0x388] ss:$16 sps:$4 sm:$0xff]   ;;  %v4714_v46 = vld [vmem:[%s6504_s7 + $0x3a4] ss:$16 sps:$4 sm:$0xff]  }
 0x2ff   : > { %2986 = vmatprep.mubr.bf16.mxu0 %v1389_v47  ;;  %3150 = vmatprep.mubr.bf16.mxu1 %v1389_v47  ;;  %v4717_v47 = vld [vmem:[%s6504_s7 + $0x3ac] ss:$16 sps:$4 sm:$0xff]  }
 0x300   : > { %2987 = vmatmul.mubr.bf16.vlgmr.msra.gmra.mrb[4].mxu0 %v1388_v49  ;;  %3151 = vmatmul.mubr.bf16.vlgmr.msra.gmra.mrb[20].mxu1 %v1388_v49  ;;  %v4720_v49 = vld [vmem:[%s6504_s7 + $0x3c4] ss:$16 sps:$4 sm:$0xff]  }
 0x301   : > { %2996 = vmatpush1.bf16.msra.mxu0 %v4634_v26  ;;  %3160 = vmatpush1.bf16.msra.mxu1 %v4637_v48  ;;  %v4712_v26 = vld [vmem:[%s6504_s7 + $0x3a0] ss:$16 sps:$4 sm:$0xff]   ;;  %v4715_v48 = vld [vmem:[%s6504_s7 + $0x3a8] ss:$16 sps:$4 sm:$0xff]  }
 0x302   : > { %3027 = vmatprep.mubr.bf16.mxu0 %v1391_v52  ;;  %3191 = vmatprep.mubr.bf16.mxu1 %v1391_v52  ;;  %v4721_v52 = vld [vmem:[%s6504_s7 + $0x3c8] ss:$16 sps:$4 sm:$0xff]  }
 0x303   : > { %2997 = vmatprep.subr.bf16.mxu0 %v4642_v50  ;;  %3161 = vmatprep.subr.bf16.mxu1 %v4645_v51  ;;  %v4723_v50 = vld [vmem:[%s6504_s7 + $0x3cc] ss:$16 sps:$4 sm:$0xff]   ;;  %v4718_v51 = vld [vmem:[%s6504_s7 + $0x3c0] ss:$16 sps:$4 sm:$0xff]  }
 0x305   : > { %2998 = vmatpush1.bf16.msra.mxu0 %v4640_v53  ;;  %3162 = vmatpush1.bf16.msra.mxu1 %v4643_v54  ;;  %v4726_v53 = vld [vmem:[%s6504_s7 + $0x3e4] ss:$16 sps:$4 sm:$0xff]   ;;  %v4729_v54 = vld [vmem:[%s6504_s7 + $0x3ec] ss:$16 sps:$4 sm:$0xff]  }
 0x306   : > { %2999 = vmatprep.subr.bf16.mxu0 %v4648_v55  ;;  %3163 = vmatprep.subr.bf16.mxu1 %v4651_v56  ;;  %v4724_v55 = vld [vmem:[%s6504_s7 + $0x3e0] ss:$16 sps:$4 sm:$0xff]   ;;  %v4727_v56 = vld [vmem:[%s6504_s7 + $0x3e8] ss:$16 sps:$4 sm:$0xff]  }
 0x309   : > { %3000 = vmatpush1.bf16.msra.mxu0 %v4646_v57  ;;  %3164 = vmatpush1.bf16.msra.mxu1 %v4649_v58  ;;  %v1359_v57 = vrot.slane %v5628_v43, %v5610_v27  ;;  %v4732_v58 = vld [vmem:[%s6504_s7 + $0x404] ss:$16 sps:$4 sm:$0xff]  }
 0x30a   : > { %3001 = vmatprep.subr.bf16.mxu0 %v4654_v59  ;;  %3165 = vmatprep.subr.bf16.mxu1 %v4657_v60  ;;  %v4735_v59 = vld [vmem:[%s6504_s7 + $0x40c] ss:$16 sps:$4 sm:$0xff]   ;;  %v1371_v60 = vrot.slane %v5628_v43, %v716_v40 }
 0x30b   : > { %v4741_v40 = vld [vmem:[%s6504_s7 + $0x42c] ss:$16 sps:$4 sm:$0xff]  }
 0x30d   : > { %3002 = vmatpush1.bf16.msra.mxu0 %v4652_v61  ;;  %3166 = vmatpush1.bf16.msra.mxu1 %v4655_v62  ;;  %v4730_v61 = vld [vmem:[%s6504_s7 + $0x400] ss:$16 sps:$4 sm:$0xff]   ;;  %v1390_v62 = vpack.c.bf16 %v1359_v57, %v1359_v57  ;;  %v4805_v57 = vld [vmem:[%s6504_s7 + $0x588] ss:$16 sps:$4 sm:$0xff]  }
 0x30e   : > { %3003 = vmatprep.subr.bf16.mxu0 %v4660_v63  ;;  %3167 = vmatprep.subr.bf16.mxu1 %v4663_v0  ;;  %v4733_v63 = vld [vmem:[%s6504_s7 + $0x408] ss:$16 sps:$4 sm:$0xff]   ;;  %v1393_v0 = vpack.c.bf16 %v1371_v60, %v1371_v60  ;;  %v4808_v60 = vld [vmem:[%s6504_s7 + $0x5a0] ss:$16 sps:$4 sm:$0xff]  }
 0x311   : > { %3004 = vmatpush1.bf16.msra.mxu0 %v4658_v1  ;;  %3168 = vmatpush1.bf16.msra.mxu1 %v4661_v2  ;;  %v4738_v1 = vld [vmem:[%s6504_s7 + $0x424] ss:$16 sps:$4 sm:$0xff]   ;;  %v4736_v2 = vld [vmem:[%s6504_s7 + $0x420] ss:$16 sps:$4 sm:$0xff]  }
 0x312   : > { %3005 = vmatprep.subr.bf16.mxu0 %v4666_v5  ;;  %3169 = vmatprep.subr.bf16.mxu1 %v4669_v6  ;;  %v4739_v5 = vld [vmem:[%s6504_s7 + $0x428] ss:$16 sps:$4 sm:$0xff]   ;;  %v4744_v6 = vld [vmem:[%s6504_s7 + $0x444] ss:$16 sps:$4 sm:$0xff]  }
 0x315   : > { %3006 = vmatpush1.bf16.msra.mxu0 %v4664_v7  ;;  %3170 = vmatpush1.bf16.msra.mxu1 %v4667_v8  ;;  %v4747_v7 = vld [vmem:[%s6504_s7 + $0x44c] ss:$16 sps:$4 sm:$0xff]   ;;  %v4742_v8 = vld [vmem:[%s6504_s7 + $0x440] ss:$16 sps:$4 sm:$0xff]  }
 0x316   : > { %3007 = vmatprep.subr.bf16.mxu0 %v4672_v9  ;;  %3171 = vmatprep.subr.bf16.mxu1 %v4675_v10  ;;  %v4745_v9 = vld [vmem:[%s6504_s7 + $0x448] ss:$16 sps:$4 sm:$0xff]   ;;  %v4750_v10 = vld [vmem:[%s6504_s7 + $0x464] ss:$16 sps:$4 sm:$0xff]  }
 0x319   : > { %3008 = vmatpush1.bf16.msra.mxu0 %v4670_v11  ;;  %3172 = vmatpush1.bf16.msra.mxu1 %v4673_v12  ;;  %v4753_v11 = vld [vmem:[%s6504_s7 + $0x46c] ss:$16 sps:$4 sm:$0xff]   ;;  %v4748_v12 = vld [vmem:[%s6504_s7 + $0x460] ss:$16 sps:$4 sm:$0xff]  }
 0x31a   : > { %3009 = vmatprep.subr.bf16.mxu0 %v4678_v13  ;;  %3173 = vmatprep.subr.bf16.mxu1 %v4681_v14  ;;  %v4751_v13 = vld [vmem:[%s6504_s7 + $0x468] ss:$16 sps:$4 sm:$0xff]   ;;  %v4756_v14 = vld [vmem:[%s6504_s7 + $0x484] ss:$16 sps:$4 sm:$0xff]  }
 0x31d   : > { %3010 = vmatpush1.bf16.msra.mxu0 %v4676_v15  ;;  %3174 = vmatpush1.bf16.msra.mxu1 %v4679_v16  ;;  %v4759_v15 = vld [vmem:[%s6504_s7 + $0x48c] ss:$16 sps:$4 sm:$0xff]   ;;  %v4754_v16 = vld [vmem:[%s6504_s7 + $0x480] ss:$16 sps:$4 sm:$0xff]  }
 0x31e   : > { %3011 = vmatprep.subr.bf16.mxu0 %v4684_v17  ;;  %3175 = vmatprep.subr.bf16.mxu1 %v4687_v18  ;;  %v4757_v17 = vld [vmem:[%s6504_s7 + $0x488] ss:$16 sps:$4 sm:$0xff]   ;;  %v4762_v18 = vld [vmem:[%s6504_s7 + $0x4a4] ss:$16 sps:$4 sm:$0xff]  }
 0x321   : > { %3012 = vmatpush1.bf16.msra.mxu0 %v4682_v19  ;;  %3176 = vmatpush1.bf16.msra.mxu1 %v4685_v20  ;;  %v4765_v19 = vld [vmem:[%s6504_s7 + $0x4ac] ss:$16 sps:$4 sm:$0xff]   ;;  %v4760_v20 = vld [vmem:[%s6504_s7 + $0x4a0] ss:$16 sps:$4 sm:$0xff]  }
 0x322   : > { %3013 = vmatprep.subr.bf16.mxu0 %v4690_v21  ;;  %3177 = vmatprep.subr.bf16.mxu1 %v4693_v22  ;;  %v4763_v21 = vld [vmem:[%s6504_s7 + $0x4a8] ss:$16 sps:$4 sm:$0xff]   ;;  %v4768_v22 = vld [vmem:[%s6504_s7 + $0x4c4] ss:$16 sps:$4 sm:$0xff]  }
 0x325   : > { %3014 = vmatpush1.bf16.msra.mxu0 %v4688_v23  ;;  %3178 = vmatpush1.bf16.msra.mxu1 %v4691_v24  ;;  %v4771_v23 = vld [vmem:[%s6504_s7 + $0x4cc] ss:$16 sps:$4 sm:$0xff]   ;;  %v4766_v24 = vld [vmem:[%s6504_s7 + $0x4c0] ss:$16 sps:$4 sm:$0xff]  }
 0x326   : > { %3015 = vmatprep.subr.bf16.mxu0 %v4696_v25  ;;  %3179 = vmatprep.subr.bf16.mxu1 %v4699_v29  ;;  %v4769_v25 = vld [vmem:[%s6504_s7 + $0x4c8] ss:$16 sps:$4 sm:$0xff]   ;;  %v4774_v29 = vld [vmem:[%s6504_s7 + $0x4e4] ss:$16 sps:$4 sm:$0xff]  }
 0x329   : > { %3016 = vmatpush1.bf16.msra.mxu0 %v4694_v38  ;;  %3180 = vmatpush1.bf16.msra.mxu1 %v4697_v30  ;;  %v4777_v38 = vld [vmem:[%s6504_s7 + $0x4ec] ss:$16 sps:$4 sm:$0xff]   ;;  %v4772_v30 = vld [vmem:[%s6504_s7 + $0x4e0] ss:$16 sps:$4 sm:$0xff]  }
 0x32a   : > { %3017 = vmatprep.subr.bf16.mxu0 %v4702_v31  ;;  %3181 = vmatprep.subr.bf16.mxu1 %v4705_v32  ;;  %v4775_v31 = vld [vmem:[%s6504_s7 + $0x4e8] ss:$16 sps:$4 sm:$0xff]   ;;  %v4780_v32 = vld [vmem:[%s6504_s7 + $0x504] ss:$16 sps:$4 sm:$0xff]  }
 0x32d   : > { %3018 = vmatpush1.bf16.msra.mxu0 %v4700_v33  ;;  %3182 = vmatpush1.bf16.msra.mxu1 %v4703_v34  ;;  %v4783_v33 = vld [vmem:[%s6504_s7 + $0x50c] ss:$16 sps:$4 sm:$0xff]   ;;  %v4778_v34 = vld [vmem:[%s6504_s7 + $0x500] ss:$16 sps:$4 sm:$0xff]  }
 0x32e   : > { %3019 = vmatprep.subr.bf16.mxu0 %v4708_v41  ;;  %3183 = vmatprep.subr.bf16.mxu1 %v4711_v42  ;;  %v4781_v41 = vld [vmem:[%s6504_s7 + $0x508] ss:$16 sps:$4 sm:$0xff]   ;;  %v4786_v42 = vld [vmem:[%s6504_s7 + $0x524] ss:$16 sps:$4 sm:$0xff]  }
 0x331   : > { %3020 = vmatpush1.bf16.msra.mxu0 %v4706_v44  ;;  %3184 = vmatpush1.bf16.msra.mxu1 %v4709_v45  ;;  %v4789_v44 = vld [vmem:[%s6504_s7 + $0x52c] ss:$16 sps:$4 sm:$0xff]   ;;  %v4784_v45 = vld [vmem:[%s6504_s7 + $0x520] ss:$16 sps:$4 sm:$0xff]  }
 0x332   : > { %3021 = vmatprep.subr.bf16.mxu0 %v4714_v46  ;;  %3185 = vmatprep.subr.bf16.mxu1 %v4717_v47  ;;  %v4787_v46 = vld [vmem:[%s6504_s7 + $0x528] ss:$16 sps:$4 sm:$0xff]   ;;  %v4792_v47 = vld [vmem:[%s6504_s7 + $0x544] ss:$16 sps:$4 sm:$0xff]  }
 0x335   : > { %3022 = vmatpush1.bf16.msra.mxu0 %v4712_v26  ;;  %3186 = vmatpush1.bf16.msra.mxu1 %v4715_v48  ;;  %v4795_v26 = vld [vmem:[%s6504_s7 + $0x54c] ss:$16 sps:$4 sm:$0xff]   ;;  %v4790_v48 = vld [vmem:[%s6504_s7 + $0x540] ss:$16 sps:$4 sm:$0xff]  }
 0x336   : > { %3023 = vmatprep.subr.bf16.mxu0 %v4720_v49  ;;  %3187 = vmatprep.subr.bf16.mxu1 %v4723_v50  ;;  %v4793_v49 = vld [vmem:[%s6504_s7 + $0x548] ss:$16 sps:$4 sm:$0xff]   ;;  %v4798_v50 = vld [vmem:[%s6504_s7 + $0x564] ss:$16 sps:$4 sm:$0xff]  }
 0x339   : > { %3024 = vmatpush1.bf16.msra.mxu0 %v4718_v51  ;;  %3188 = vmatpush1.bf16.msra.mxu1 %v4721_v52  ;;  %v4801_v51 = vld [vmem:[%s6504_s7 + $0x56c] ss:$16 sps:$4 sm:$0xff]   ;;  %v4796_v52 = vld [vmem:[%s6504_s7 + $0x560] ss:$16 sps:$4 sm:$0xff]  }
 0x33a   : > { %3025 = vmatprep.subr.bf16.mxu0 %v4726_v53  ;;  %3189 = vmatprep.subr.bf16.mxu1 %v4729_v54  ;;  %v4799_v53 = vld [vmem:[%s6504_s7 + $0x568] ss:$16 sps:$4 sm:$0xff]   ;;  %v4804_v54 = vld [vmem:[%s6504_s7 + $0x584] ss:$16 sps:$4 sm:$0xff]  }
 0x33d   : > { %3026 = vmatpush1.bf16.msra.mxu0 %v4724_v55  ;;  %3190 = vmatpush1.bf16.msra.mxu1 %v4727_v56  ;;  %v4807_v55 = vld [vmem:[%s6504_s7 + $0x58c] ss:$16 sps:$4 sm:$0xff]   ;;  %v4802_v56 = vld [vmem:[%s6504_s7 + $0x580] ss:$16 sps:$4 sm:$0xff]  }
 0x33e   : > { %3036 = vmatprep.subr.bf16.mxu0 %v4732_v58  ;;  %3200 = vmatprep.subr.bf16.mxu1 %v4735_v59  ;;  %v4810_v58 = vld [vmem:[%s6504_s7 + $0x5a4] ss:$16 sps:$4 sm:$0xff]   ;;  %v4813_v59 = vld [vmem:[%s6504_s7 + $0x5ac] ss:$16 sps:$4 sm:$0xff]  }
 0x340   : > { %3028 = vmatmul.mubr.bf16.vlgmr.msra.gmra.mrb[4].mxu0 %v1390_v62  ;;  %3192 = vmatmul.mubr.bf16.vlgmr.msra.gmra.mrb[20].mxu1 %v1390_v62  ;;  %v4816_v62 = vld [vmem:[%s6504_s7 + $0x5c4] ss:$16 sps:$4 sm:$0xff]  }
 0x341   : > { %3037 = vmatpush1.bf16.msra.mxu0 %v4730_v61  ;;  %3068 = vmatprep.mubr.bf16.mxu0 %v1393_v0  ;;  %v4811_v61 = vld [vmem:[%s6504_s7 + $0x5a8] ss:$16 sps:$4 sm:$0xff]  }
 0x342   : > { %3201 = vmatpush1.bf16.msra.mxu1 %v4733_v63  ;;  %3232 = vmatprep.mubr.bf16.mxu1 %v1393_v0  ;;  %v4819_v63 = vld [vmem:[%s6504_s7 + $0x5cc] ss:$16 sps:$4 sm:$0xff]   ;;  %v4814_v0 = vld [vmem:[%s6504_s7 + $0x5c0] ss:$16 sps:$4 sm:$0xff]  }
 0x343   : > { %3038 = vmatprep.subr.bf16.mxu0 %v4738_v1  ;;  %3202 = vmatprep.subr.bf16.mxu1 %v4741_v40  ;;  %v4817_v1 = vld [vmem:[%s6504_s7 + $0x5c8] ss:$16 sps:$4 sm:$0xff]   ;;  %v4822_v40 = vld [vmem:[%s6504_s7 + $0x5e4] ss:$16 sps:$4 sm:$0xff]  }
 0x345   : > { %3039 = vmatpush1.bf16.msra.mxu0 %v4736_v2  ;;  %v4825_v2 = vld [vmem:[%s6504_s7 + $0x5ec] ss:$16 sps:$4 sm:$0xff]  }
 0x346   : > { %3203 = vmatpush1.bf16.msra.mxu1 %v4739_v5  ;;  %3040 = vmatprep.subr.bf16.mxu0 %v4744_v6  ;;  %v4820_v5 = vld [vmem:[%s6504_s7 + $0x5e0] ss:$16 sps:$4 sm:$0xff]   ;;  %v4823_v6 = vld [vmem:[%s6504_s7 + $0x5e8] ss:$16 sps:$4 sm:$0xff]  }
 0x347   : > { %3204 = vmatprep.subr.bf16.mxu1 %v4747_v7  ;;  %v1367_v7 = vrot.slane %v5628_v43, %v712_v37 }
 0x349   : > { %3041 = vmatpush1.bf16.msra.mxu0 %v4742_v8  ;;  %v4828_v8 = vld [vmem:[%s6504_s7 + $0x604] ss:$16 sps:$4 sm:$0xff]   ;;  %v1392_v37 = vpack.c.bf16 %v1367_v7, %v1367_v7  ;;  %v4909_v7 = vld [vmem:[%s6504_s7 + $0x7ac] ss:$16 sps:$4 sm:$0xff]  }
 0x34a   : > { %3205 = vmatpush1.bf16.msra.mxu1 %v4745_v9  ;;  %3042 = vmatprep.subr.bf16.mxu0 %v4750_v10  ;;  %v4831_v9 = vld [vmem:[%s6504_s7 + $0x60c] ss:$16 sps:$4 sm:$0xff]   ;;  %v1379_v10 = vrot.slane %v5628_v43, %v724_v4 }
 0x34b   : > { %3206 = vmatprep.subr.bf16.mxu1 %v4753_v11  ;;  %v4826_v11 = vld [vmem:[%s6504_s7 + $0x600] ss:$16 sps:$4 sm:$0xff]   ;;  %v4837_v4 = vld [vmem:[%s6504_s7 + $0x62c] ss:$16 sps:$4 sm:$0xff]  }
 0x34d   : > { %3043 = vmatpush1.bf16.msra.mxu0 %v4748_v12  ;;  %v4829_v12 = vld [vmem:[%s6504_s7 + $0x608] ss:$16 sps:$4 sm:$0xff]  }
 0x34e   : > { %3207 = vmatpush1.bf16.msra.mxu1 %v4751_v13  ;;  %3044 = vmatprep.subr.bf16.mxu0 %v4756_v14  ;;  %v4834_v13 = vld [vmem:[%s6504_s7 + $0x624] ss:$16 sps:$4 sm:$0xff]   ;;  %v1395_v14 = vpack.c.bf16 %v1379_v10, %v1379_v10 }
 0x34f   : > { %3208 = vmatprep.subr.bf16.mxu1 %v4759_v15  ;;  %v4832_v15 = vld [vmem:[%s6504_s7 + $0x620] ss:$16 sps:$4 sm:$0xff]   ;;  %v4912_v10 = vld [vmem:[%s6504_s7 + $0x7c4] ss:$16 sps:$4 sm:$0xff]  }
 0x351   : > { %3045 = vmatpush1.bf16.msra.mxu0 %v4754_v16  ;;  %v4835_v16 = vld [vmem:[%s6504_s7 + $0x628] ss:$16 sps:$4 sm:$0xff]  }
 0x352   : > { %3209 = vmatpush1.bf16.msra.mxu1 %v4757_v17  ;;  %3046 = vmatprep.subr.bf16.mxu0 %v4762_v18  ;;  %v4840_v17 = vld [vmem:[%s6504_s7 + $0x644] ss:$16 sps:$4 sm:$0xff]   ;;  %v4843_v18 = vld [vmem:[%s6504_s7 + $0x64c] ss:$16 sps:$4 sm:$0xff]  }
 0x353   : > { %3210 = vmatprep.subr.bf16.mxu1 %v4765_v19  ;;  %v4838_v19 = vld [vmem:[%s6504_s7 + $0x640] ss:$16 sps:$4 sm:$0xff]  }
 0x355   : > { %3047 = vmatpush1.bf16.msra.mxu0 %v4760_v20  ;;  %v4841_v20 = vld [vmem:[%s6504_s7 + $0x648] ss:$16 sps:$4 sm:$0xff]  }
 0x356   : > { %3211 = vmatpush1.bf16.msra.mxu1 %v4763_v21  ;;  %3048 = vmatprep.subr.bf16.mxu0 %v4768_v22  ;;  %v4846_v21 = vld [vmem:[%s6504_s7 + $0x664] ss:$16 sps:$4 sm:$0xff]   ;;  %v4849_v22 = vld [vmem:[%s6504_s7 + $0x66c] ss:$16 sps:$4 sm:$0xff]  }
 0x357   : > { %3212 = vmatprep.subr.bf16.mxu1 %v4771_v23  ;;  %v4844_v23 = vld [vmem:[%s6504_s7 + $0x660] ss:$16 sps:$4 sm:$0xff]  }
 0x359   : > { %3049 = vmatpush1.bf16.msra.mxu0 %v4766_v24  ;;  %v4847_v24 = vld [vmem:[%s6504_s7 + $0x668] ss:$16 sps:$4 sm:$0xff]  }
 0x35a   : > { %3213 = vmatpush1.bf16.msra.mxu1 %v4769_v25  ;;  %3050 = vmatprep.subr.bf16.mxu0 %v4774_v29  ;;  %v4852_v25 = vld [vmem:[%s6504_s7 + $0x684] ss:$16 sps:$4 sm:$0xff]   ;;  %v4855_v29 = vld [vmem:[%s6504_s7 + $0x68c] ss:$16 sps:$4 sm:$0xff]  }
 0x35b   : > { %3214 = vmatprep.subr.bf16.mxu1 %v4777_v38  ;;  %v4850_v38 = vld [vmem:[%s6504_s7 + $0x680] ss:$16 sps:$4 sm:$0xff]  }
 0x35d   : > { %3051 = vmatpush1.bf16.msra.mxu0 %v4772_v30  ;;  %v4853_v30 = vld [vmem:[%s6504_s7 + $0x688] ss:$16 sps:$4 sm:$0xff]  }
 0x35e   : > { %3215 = vmatpush1.bf16.msra.mxu1 %v4775_v31  ;;  %3052 = vmatprep.subr.bf16.mxu0 %v4780_v32  ;;  %v4858_v31 = vld [vmem:[%s6504_s7 + $0x6a4] ss:$16 sps:$4 sm:$0xff]   ;;  %v4861_v32 = vld [vmem:[%s6504_s7 + $0x6ac] ss:$16 sps:$4 sm:$0xff]  }
 0x35f   : > { %3216 = vmatprep.subr.bf16.mxu1 %v4783_v33  ;;  %v4856_v33 = vld [vmem:[%s6504_s7 + $0x6a0] ss:$16 sps:$4 sm:$0xff]  }
 0x361   : > { %3053 = vmatpush1.bf16.msra.mxu0 %v4778_v34  ;;  %v4859_v34 = vld [vmem:[%s6504_s7 + $0x6a8] ss:$16 sps:$4 sm:$0xff]  }
 0x362   : > { %3217 = vmatpush1.bf16.msra.mxu1 %v4781_v41  ;;  %3054 = vmatprep.subr.bf16.mxu0 %v4786_v42  ;;  %v4864_v41 = vld [vmem:[%s6504_s7 + $0x6c4] ss:$16 sps:$4 sm:$0xff]   ;;  %v4867_v42 = vld [vmem:[%s6504_s7 + $0x6cc] ss:$16 sps:$4 sm:$0xff]  }
 0x363   : > { %3218 = vmatprep.subr.bf16.mxu1 %v4789_v44  ;;  %v4862_v44 = vld [vmem:[%s6504_s7 + $0x6c0] ss:$16 sps:$4 sm:$0xff]  }
 0x365   : > { %3055 = vmatpush1.bf16.msra.mxu0 %v4784_v45  ;;  %v4865_v45 = vld [vmem:[%s6504_s7 + $0x6c8] ss:$16 sps:$4 sm:$0xff]  }
 0x366   : > { %3219 = vmatpush1.bf16.msra.mxu1 %v4787_v46  ;;  %3056 = vmatprep.subr.bf16.mxu0 %v4792_v47  ;;  %v4870_v46 = vld [vmem:[%s6504_s7 + $0x6e4] ss:$16 sps:$4 sm:$0xff]   ;;  %v4873_v47 = vld [vmem:[%s6504_s7 + $0x6ec] ss:$16 sps:$4 sm:$0xff]  }
 0x367   : > { %3220 = vmatprep.subr.bf16.mxu1 %v4795_v26  ;;  %v4868_v26 = vld [vmem:[%s6504_s7 + $0x6e0] ss:$16 sps:$4 sm:$0xff]  }
 0x369   : > { %3057 = vmatpush1.bf16.msra.mxu0 %v4790_v48  ;;  %v4871_v48 = vld [vmem:[%s6504_s7 + $0x6e8] ss:$16 sps:$4 sm:$0xff]  }
 0x36a   : > { %3221 = vmatpush1.bf16.msra.mxu1 %v4793_v49  ;;  %3058 = vmatprep.subr.bf16.mxu0 %v4798_v50  ;;  %v4876_v49 = vld [vmem:[%s6504_s7 + $0x704] ss:$16 sps:$4 sm:$0xff]   ;;  %v4879_v50 = vld [vmem:[%s6504_s7 + $0x70c] ss:$16 sps:$4 sm:$0xff]  }
 0x36b   : > { %3222 = vmatprep.subr.bf16.mxu1 %v4801_v51  ;;  %v4874_v51 = vld [vmem:[%s6504_s7 + $0x700] ss:$16 sps:$4 sm:$0xff]  }
 0x36d   : > { %3059 = vmatpush1.bf16.msra.mxu0 %v4796_v52  ;;  %v4877_v52 = vld [vmem:[%s6504_s7 + $0x708] ss:$16 sps:$4 sm:$0xff]  }
 0x36e   : > { %3223 = vmatpush1.bf16.msra.mxu1 %v4799_v53  ;;  %3060 = vmatprep.subr.bf16.mxu0 %v4804_v54  ;;  %v4882_v53 = vld [vmem:[%s6504_s7 + $0x724] ss:$16 sps:$4 sm:$0xff]   ;;  %v4885_v54 = vld [vmem:[%s6504_s7 + $0x72c] ss:$16 sps:$4 sm:$0xff]  }
 0x36f   : > { %3224 = vmatprep.subr.bf16.mxu1 %v4807_v55  ;;  %v4880_v55 = vld [vmem:[%s6504_s7 + $0x720] ss:$16 sps:$4 sm:$0xff]  }
 0x371   : > { %3061 = vmatpush1.bf16.msra.mxu0 %v4802_v56  ;;  %v4883_v56 = vld [vmem:[%s6504_s7 + $0x728] ss:$16 sps:$4 sm:$0xff]  }
 0x372   : > { %3225 = vmatpush1.bf16.msra.mxu1 %v4805_v57  ;;  %3062 = vmatprep.subr.bf16.mxu0 %v4810_v58  ;;  %v4888_v57 = vld [vmem:[%s6504_s7 + $0x744] ss:$16 sps:$4 sm:$0xff]   ;;  %v4891_v58 = vld [vmem:[%s6504_s7 + $0x74c] ss:$16 sps:$4 sm:$0xff]  }
 0x373   : > { %3226 = vmatprep.subr.bf16.mxu1 %v4813_v59  ;;  %v4886_v59 = vld [vmem:[%s6504_s7 + $0x740] ss:$16 sps:$4 sm:$0xff]  }
 0x375   : > { %3063 = vmatpush1.bf16.msra.mxu0 %v4808_v60  ;;  %v4889_v60 = vld [vmem:[%s6504_s7 + $0x748] ss:$16 sps:$4 sm:$0xff]  }
 0x376   : > { %3227 = vmatpush1.bf16.msra.mxu1 %v4811_v61  ;;  %3064 = vmatprep.subr.bf16.mxu0 %v4816_v62  ;;  %v4894_v61 = vld [vmem:[%s6504_s7 + $0x764] ss:$16 sps:$4 sm:$0xff]   ;;  %v4897_v62 = vld [vmem:[%s6504_s7 + $0x76c] ss:$16 sps:$4 sm:$0xff]  }
 0x377   : > { %3228 = vmatprep.subr.bf16.mxu1 %v4819_v63  ;;  %v4892_v63 = vld [vmem:[%s6504_s7 + $0x760] ss:$16 sps:$4 sm:$0xff]  }
 0x379   : > { %3065 = vmatpush1.bf16.msra.mxu0 %v4814_v0  ;;  %v4895_v0 = vld [vmem:[%s6504_s7 + $0x768] ss:$16 sps:$4 sm:$0xff]  }
 0x37a   : > { %3229 = vmatpush1.bf16.msra.mxu1 %v4817_v1  ;;  %3066 = vmatprep.subr.bf16.mxu0 %v4822_v40  ;;  %v4900_v1 = vld [vmem:[%s6504_s7 + $0x784] ss:$16 sps:$4 sm:$0xff]   ;;  %v4903_v40 = vld [vmem:[%s6504_s7 + $0x78c] ss:$16 sps:$4 sm:$0xff]  }
 0x37b   : > { %3230 = vmatprep.subr.bf16.mxu1 %v4825_v2  ;;  %v4898_v2 = vld [vmem:[%s6504_s7 + $0x780] ss:$16 sps:$4 sm:$0xff]  }
 0x37d   : > { %3067 = vmatpush1.bf16.msra.mxu0 %v4820_v5  ;;  %v4901_v5 = vld [vmem:[%s6504_s7 + $0x788] ss:$16 sps:$4 sm:$0xff]  }
 0x37e   : > { %3231 = vmatpush1.bf16.msra.mxu1 %v4823_v6  ;;  %3077 = vmatprep.subr.bf16.mxu0 %v4828_v8  ;;  %v4906_v6 = vld [vmem:[%s6504_s7 + $0x7a4] ss:$16 sps:$4 sm:$0xff]   ;;  %v4904_v8 = vld [vmem:[%s6504_s7 + $0x7a0] ss:$16 sps:$4 sm:$0xff]  }
 0x37f   : > { %3241 = vmatprep.subr.bf16.mxu1 %v4831_v9  ;;  %v4907_v9 = vld [vmem:[%s6504_s7 + $0x7a8] ss:$16 sps:$4 sm:$0xff]  }
 0x380   : > { %3069 = vmatmul.mubr.bf16.vlgmr.msra.gmra.mrb[4].mxu0 %v1392_v37 }
 0x381   : > { %3233 = vmatmul.mubr.bf16.vlgmr.msra.gmra.mrb[20].mxu1 %v1392_v37  ;;  %3078 = vmatpush1.bf16.msra.mxu0 %v4826_v11  ;;  %v4915_v11 = vld [vmem:[%s6504_s7 + $0x7cc] ss:$16 sps:$4 sm:$0xff]   ;;  %v4910_v37 = vld [vmem:[%s6504_s7 + $0x7c0] ss:$16 sps:$4 sm:$0xff]  }
 0x382   : > { %3109 = vmatprep.mubr.bf16.mxu0 %v1395_v14  ;;  %3242 = vmatpush1.bf16.msra.mxu1 %v4829_v12  ;;  %v4913_v12 = vld [vmem:[%s6504_s7 + $0x7c8] ss:$16 sps:$4 sm:$0xff]  }
 0x383   : > { %3273 = vmatprep.mubr.bf16.mxu1 %v1395_v14  ;;  %3079 = vmatprep.subr.bf16.mxu0 %v4834_v13  ;;  %v4918_v13 = vld [vmem:[%s6504_s7 + $0x7e4] ss:$16 sps:$4 sm:$0xff]   ;;  %v4921_v14 = vld [vmem:[%s6504_s7 + $0x7ec] ss:$16 sps:$4 sm:$0xff]  }
 0x384   : > { %3243 = vmatprep.subr.bf16.mxu1 %v4837_v4  ;;  %v4916_v4 = vld [vmem:[%s6504_s7 + $0x7e0] ss:$16 sps:$4 sm:$0xff]  }
 0x385   : > { %3080 = vmatpush1.bf16.msra.mxu0 %v4832_v15  ;;  %v4919_v15 = vld [vmem:[%s6504_s7 + $0x7e8] ss:$16 sps:$4 sm:$0xff]  }
 0x386   : > { %3244 = vmatpush1.bf16.msra.mxu1 %v4835_v16  ;;  %3081 = vmatprep.subr.bf16.mxu0 %v4840_v17  ;;  %v1375_v16 = vrot.slane %v5628_v43, %v720_v3  ;;  %v4924_v17 = vld [vmem:[%s6506_s9 + $0x4] ss:$8 sps:$4 sm:$0xff]   ;;  %v4928_v43 = vld [vmem:[%s6506_s9 + $0x20] ss:$8 sps:$4 sm:$0xff]  }
 0x387   : > { %3245 = vmatprep.subr.bf16.mxu1 %v4843_v18  ;;  %v4922_v18 = vld [vmem:[%s6506_s9] ss:$8 sps:$4 sm:$0xff]   ;;  %v4930_v3 = vld [vmem:[%s6506_s9 + $0x24] ss:$8 sps:$4 sm:$0xff]  }
 0x389   : > { %3082 = vmatpush1.bf16.msra.mxu0 %v4838_v19  ;;  %v1394_v19 = vpack.c.bf16 %v1375_v16, %v1375_v16 }
 0x38a   : > { %3246 = vmatpush1.bf16.msra.mxu1 %v4841_v20  ;;  %3083 = vmatprep.subr.bf16.mxu0 %v4846_v21  ;;  %v4927_v20 = vld [vmem:[%s6506_s9 + $0x14] ss:$8 sps:$4 sm:$0xff]  }
 0x38b   : > { %3247 = vmatprep.subr.bf16.mxu1 %v4849_v22  ;;  %v4933_v21 = vld [vmem:[%s6506_s9 + $0x34] ss:$8 sps:$4 sm:$0xff]   ;;  %v4931_v22 = vld [vmem:[%s6506_s9 + $0x30] ss:$8 sps:$4 sm:$0xff]  }
 0x38d   : > { %3084 = vmatpush1.bf16.msra.mxu0 %v4844_v23  ;;  %v4936_v23 = vld [vmem:[%s6506_s9 + $0x44] ss:$8 sps:$4 sm:$0xff]  }
 0x38e   : > { %3248 = vmatpush1.bf16.msra.mxu1 %v4847_v24  ;;  %3085 = vmatprep.subr.bf16.mxu0 %v4852_v25  ;;  %v4934_v24 = vld [vmem:[%s6506_s9 + $0x40] ss:$8 sps:$4 sm:$0xff]   ;;  %v4939_v25 = vld [vmem:[%s6506_s9 + $0x54] ss:$8 sps:$4 sm:$0xff]  }
 0x38f   : > { %3249 = vmatprep.subr.bf16.mxu1 %v4855_v29  ;;  %v4937_v29 = vld [vmem:[%s6506_s9 + $0x50] ss:$8 sps:$4 sm:$0xff]  }
 0x391   : > { %3086 = vmatpush1.bf16.msra.mxu0 %v4850_v38  ;;  %v4942_v38 = vld [vmem:[%s6506_s9 + $0x64] ss:$8 sps:$4 sm:$0xff]  }
 0x392   : > { %3250 = vmatpush1.bf16.msra.mxu1 %v4853_v30  ;;  %3087 = vmatprep.subr.bf16.mxu0 %v4858_v31  ;;  %v4940_v30 = vld [vmem:[%s6506_s9 + $0x60] ss:$8 sps:$4 sm:$0xff]   ;;  %v4945_v31 = vld [vmem:[%s6506_s9 + $0x74] ss:$8 sps:$4 sm:$0xff]  }
 0x393   : > { %3251 = vmatprep.subr.bf16.mxu1 %v4861_v32  ;;  %v4943_v32 = vld [vmem:[%s6506_s9 + $0x70] ss:$8 sps:$4 sm:$0xff]  }
 0x395   : > { %3088 = vmatpush1.bf16.msra.mxu0 %v4856_v33  ;;  %v4948_v33 = vld [vmem:[%s6506_s9 + $0x84] ss:$8 sps:$4 sm:$0xff]  }
 0x396   : > { %3252 = vmatpush1.bf16.msra.mxu1 %v4859_v34  ;;  %3089 = vmatprep.subr.bf16.mxu0 %v4864_v41  ;;  %v4946_v34 = vld [vmem:[%s6506_s9 + $0x80] ss:$8 sps:$4 sm:$0xff]   ;;  %v4951_v41 = vld [vmem:[%s6506_s9 + $0x94] ss:$8 sps:$4 sm:$0xff]  }
 0x397   : > { %3253 = vmatprep.subr.bf16.mxu1 %v4867_v42  ;;  %v4949_v42 = vld [vmem:[%s6506_s9 + $0x90] ss:$8 sps:$4 sm:$0xff]  }
 0x399   : > { %3090 = vmatpush1.bf16.msra.mxu0 %v4862_v44  ;;  %v4954_v44 = vld [vmem:[%s6506_s9 + $0xa4] ss:$8 sps:$4 sm:$0xff]  }
 0x39a   : > { %3254 = vmatpush1.bf16.msra.mxu1 %v4865_v45  ;;  %3091 = vmatprep.subr.bf16.mxu0 %v4870_v46  ;;  %v4952_v45 = vld [vmem:[%s6506_s9 + $0xa0] ss:$8 sps:$4 sm:$0xff]   ;;  %v4957_v46 = vld [vmem:[%s6506_s9 + $0xb4] ss:$8 sps:$4 sm:$0xff]  }
 0x39b   : > { %3255 = vmatprep.subr.bf16.mxu1 %v4873_v47  ;;  %v4955_v47 = vld [vmem:[%s6506_s9 + $0xb0] ss:$8 sps:$4 sm:$0xff]  }
 0x39d   : > { %3092 = vmatpush1.bf16.msra.mxu0 %v4868_v26  ;;  %v4960_v26 = vld [vmem:[%s6506_s9 + $0xc4] ss:$8 sps:$4 sm:$0xff]  }
 0x39e   : > { %3256 = vmatpush1.bf16.msra.mxu1 %v4871_v48  ;;  %3093 = vmatprep.subr.bf16.mxu0 %v4876_v49  ;;  %v4958_v48 = vld [vmem:[%s6506_s9 + $0xc0] ss:$8 sps:$4 sm:$0xff]   ;;  %v4963_v49 = vld [vmem:[%s6506_s9 + $0xd4] ss:$8 sps:$4 sm:$0xff]  }
 0x39f   : > { %3257 = vmatprep.subr.bf16.mxu1 %v4879_v50  ;;  %v4961_v50 = vld [vmem:[%s6506_s9 + $0xd0] ss:$8 sps:$4 sm:$0xff]  }
 0x3a1   : > { %3094 = vmatpush1.bf16.msra.mxu0 %v4874_v51  ;;  %v4966_v51 = vld [vmem:[%s6506_s9 + $0xe4] ss:$8 sps:$4 sm:$0xff]  }
 0x3a2   : > { %3258 = vmatpush1.bf16.msra.mxu1 %v4877_v52  ;;  %3095 = vmatprep.subr.bf16.mxu0 %v4882_v53  ;;  %v4964_v52 = vld [vmem:[%s6506_s9 + $0xe0] ss:$8 sps:$4 sm:$0xff]   ;;  %v4969_v53 = vld [vmem:[%s6506_s9 + $0xf4] ss:$8 sps:$4 sm:$0xff]  }
 0x3a3   : > { %3259 = vmatprep.subr.bf16.mxu1 %v4885_v54  ;;  %v4967_v54 = vld [vmem:[%s6506_s9 + $0xf0] ss:$8 sps:$4 sm:$0xff]  }
 0x3a5   : > { %3096 = vmatpush1.bf16.msra.mxu0 %v4880_v55  ;;  %v4972_v55 = vld [vmem:[%s6506_s9 + $0x104] ss:$8 sps:$4 sm:$0xff]  }
 0x3a6   : > { %3260 = vmatpush1.bf16.msra.mxu1 %v4883_v56  ;;  %3097 = vmatprep.subr.bf16.mxu0 %v4888_v57  ;;  %v5018_v56 = vld [vmem:[%s6508_s11 + $0x40] sm:$0xff]  }
 0x3a7   : > { %3261 = vmatprep.subr.bf16.mxu1 %v4891_v58  ;;  %v5019_v57 = vld [vmem:[%s6508_s11] sm:$0xff]   ;;  %v5020_v58 = vld [vmem:[%s6508_s11 + $0x48] sm:$0xff]  }
 0x3a9   : > { %3098 = vmatpush1.bf16.msra.mxu0 %v4886_v59  ;;  %v5021_v59 = vld [vmem:[%s6508_s11 + $0x8] sm:$0xff]  }
 0x3aa   : > { %3262 = vmatpush1.bf16.msra.mxu1 %v4889_v60  ;;  %3099 = vmatprep.subr.bf16.mxu0 %v4894_v61  ;;  %v5022_v60 = vld [vmem:[%s6508_s11 + $0x50] sm:$0xff]  }
 0x3ab   : > { %3263 = vmatprep.subr.bf16.mxu1 %v4897_v62  ;;  %v5023_v61 = vld [vmem:[%s6508_s11 + $0x10] sm:$0xff]   ;;  %v5024_v62 = vld [vmem:[%s6508_s11 + $0x58] sm:$0xff]  }
 0x3ad   : > { %3100 = vmatpush1.bf16.msra.mxu0 %v4892_v63  ;;  %v5025_v63 = vld [vmem:[%s6508_s11 + $0x18] sm:$0xff]  }
 0x3ae   : > { %3264 = vmatpush1.bf16.msra.mxu1 %v4895_v0  ;;  %3101 = vmatprep.subr.bf16.mxu0 %v4900_v1  ;;  %v5026_v0 = vld [vmem:[%s6508_s11 + $0x60] sm:$0xff]  }
 0x3af   : > { %3265 = vmatprep.subr.bf16.mxu1 %v4903_v40  ;;  %v5027_v1 = vld [vmem:[%s6508_s11 + $0x20] sm:$0xff]   ;;  %v5028_v40 = vld [vmem:[%s6508_s11 + $0x68] sm:$0xff]  }
 0x3b1   : > { %3102 = vmatpush1.bf16.msra.mxu0 %v4898_v2  ;;  %v5029_v2 = vld [vmem:[%s6508_s11 + $0x28] sm:$0xff]  }
 0x3b2   : > { %3266 = vmatpush1.bf16.msra.mxu1 %v4901_v5  ;;  %3103 = vmatprep.subr.bf16.mxu0 %v4906_v6  ;;  %v6358_v5 = vld [vmem:[%s6505_s8] sm:$0xf] }
 0x3b3   : > { %3267 = vmatprep.subr.bf16.mxu1 %v4909_v7  ;;  %v2937_v6 = vrot.slane %v6358_v5, %v5581_v36  ;;  %v2941_v7 = vrot.slane %v6358_v5, %v5590_v39 }
 0x3b5   : > { %3104 = vmatpush1.bf16.msra.mxu0 %v4904_v8  ;;  %v2949_v8 = vrot.slane %v6358_v5, %v5613_v28  ;;  %v4970_v28 = vld [vmem:[%s6506_s9 + $0x100] ss:$8 sps:$4 sm:$0xff]  }
 0x3b6   : > { %3268 = vmatpush1.bf16.msra.mxu1 %v4907_v9  ;;  %3105 = vmatprep.subr.bf16.mxu0 %v4912_v10 }
 0x3b7   : > { %3269 = vmatprep.subr.bf16.mxu1 %v4915_v11 }
 0x3b9   : > { %3106 = vmatpush1.bf16.msra.mxu0 %v4910_v37 }
 0x3ba   : > { %3270 = vmatpush1.bf16.msra.mxu1 %v4913_v12  ;;  %3107 = vmatprep.subr.bf16.mxu0 %v4918_v13 }
 0x3bb   : > { %3271 = vmatprep.subr.bf16.mxu1 %v4921_v14 }
 0x3bd   : > { %3108 = vmatpush1.bf16.msra.mxu0 %v4916_v4 }
 0x3be   : > { %3272 = vmatpush1.bf16.msra.mxu1 %v4919_v15  ;;  %3686 = vmatprep.subr.bf16.mxu0 %v4924_v17 }
 0x3bf   : > { %4430 = vmatprep.subr.bf16.mxu1 %v5018_v56  ;;  %v5014_v56 = vld [vmem:[%s6506_s9 + $0x1e4] ss:$8 sps:$4 sm:$0xff]  }
 0x3c0   : > { %3110 = vmatmul.mubr.bf16.vlgmr.msra.gmra.mrb[4].mxu0 %v1394_v19 }
 0x3c1   : > { %3274 = vmatmul.mubr.bf16.vlgmr.msra.gmra.mrb[20].mxu1 %v1394_v19  ;;  %3687 = vmatpush1.bf16.msra.mxu0 %v4922_v18 }
 0x3c2   : > { %3688 = vmatprep.subr.bf16.mxu0 %v4927_v20  ;;  %4431 = vmatpush3.bf16.msra.mxu1 %v5019_v57  ;;  %v5012_v57 = vld [vmem:[%s6506_s9 + $0x1e0] ss:$8 sps:$4 sm:$0xff]  }
 0x3c3   : > { %4432 = vmatprep.subr.bf16.mxu1 %v5020_v58 }
 0x3c5   : > { %3689 = vmatpush1.bf16.msra.mxu0 %v4925_v35 }
 0x3c6   : > { %3690 = vmatprep.subr.bf16.mxu0 %v4930_v3  ;;  %4433 = vmatpush3.bf16.msra.mxu1 %v5021_v59  ;;  %v5017_v59 = vld [vmem:[%s6506_s9 + $0x1f4] ss:$8 sps:$4 sm:$0xff]  }
 0x3c7   : > { %4434 = vmatprep.subr.bf16.mxu1 %v5022_v60 }
 0x3c9   : > { %3691 = vmatpush1.bf16.msra.mxu0 %v4928_v43  ;;  %v4975_v43 = vld [vmem:[%s6506_s9 + $0x114] ss:$8 sps:$4 sm:$0xff]  }
 0x3ca   : > { %3692 = vmatprep.subr.bf16.mxu0 %v4933_v21  ;;  %4435 = vmatpush3.bf16.msra.mxu1 %v5023_v61 }
 0x3cb   : > { %4436 = vmatprep.subr.bf16.mxu1 %v5024_v62  ;;  %v5030_v62 = vld [vmem:[%s6508_s11 + $0x70] sm:$0xff]  }
 0x3cd   : > { %3693 = vmatpush1.bf16.msra.mxu0 %v4931_v22  ;;  %v4973_v22 = vld [vmem:[%s6506_s9 + $0x110] ss:$8 sps:$4 sm:$0xff]  }
 0x3ce   : > { %3694 = vmatprep.subr.bf16.mxu0 %v4936_v23  ;;  %4437 = vmatpush3.bf16.msra.mxu1 %v5025_v63  ;;  %v4978_v23 = vld [vmem:[%s6506_s9 + $0x124] ss:$8 sps:$4 sm:$0xff]   ;;  %v5031_v63 = vld [vmem:[%s6508_s11 + $0x30] sm:$0xff]  }
 0x3cf   : > { %4438 = vmatprep.subr.bf16.mxu1 %v5026_v0  ;;  %v5032_v0 = vld [vmem:[%s6508_s11 + $0x78] sm:$0xff]  }
 0x3d1   : > { %3695 = vmatpush1.bf16.msra.mxu0 %v4934_v24  ;;  %v4976_v24 = vld [vmem:[%s6506_s9 + $0x120] ss:$8 sps:$4 sm:$0xff]  }
 0x3d2   : > { %3696 = vmatprep.subr.bf16.mxu0 %v4939_v25  ;;  %4439 = vmatpush3.bf16.msra.mxu1 %v5027_v1  ;;  %v4981_v25 = vld [vmem:[%s6506_s9 + $0x134] ss:$8 sps:$4 sm:$0xff]  }
 0x3d3   : > { %4440 = vmatprep.subr.bf16.mxu1 %v5028_v40  ;;  %v5033_v1 = vld [vmem:[%s6508_s11 + $0x38] sm:$0xff]   ;;  %v3354_v40 = vld [vmem:[%s6507_s10] sm:$0x3] }
 0x3d5   : > { %3697 = vmatpush1.bf16.msra.mxu0 %v4937_v29  ;;  %v4979_v29 = vld [vmem:[%s6506_s9 + $0x130] ss:$8 sps:$4 sm:$0xff]  }
 0x3d6   : > { %3698 = vmatprep.subr.bf16.mxu0 %v4942_v38  ;;  %4441 = vmatpush3.bf16.msra.mxu1 %v5029_v2  ;;  %v4984_v38 = vld [vmem:[%s6506_s9 + $0x144] ss:$8 sps:$4 sm:$0xff]   ;;  %v3679_v2 = vrot.slane %v3354_v40, %v5581_v36  ;;  %v3804_v36 = vld [vmem:[%s6509_s12] sm:$0x1] }
 0x3d7   : > { %4442 = vmatprep.subr.bf16.mxu1 %v5030_v62 }
 0x3d9   : > { %3699 = vmatpush1.bf16.msra.mxu0 %v4940_v30  ;;  %v4982_v30 = vld [vmem:[%s6506_s9 + $0x140] ss:$8 sps:$4 sm:$0xff]  }
 0x3da   : > { %3700 = vmatprep.subr.bf16.mxu0 %v4945_v31  ;;  %v4987_v31 = vld [vmem:[%s6506_s9 + $0x154] ss:$8 sps:$4 sm:$0xff]   ;;  %4443 = vmatpush3.bf16.msra.mxu1 %v5031_v63 }
 0x3db   : > { %4444 = vmatprep.subr.bf16.mxu1 %v5032_v0 }
 0x3dd   : > { %3701 = vmatpush1.bf16.msra.mxu0 %v4943_v32  ;;  %v4985_v32 = vld [vmem:[%s6506_s9 + $0x150] ss:$8 sps:$4 sm:$0xff]  }
 0x3de   : > { %3702 = vmatprep.subr.bf16.mxu0 %v4948_v33  ;;  %v4990_v33 = vld [vmem:[%s6506_s9 + $0x164] ss:$8 sps:$4 sm:$0xff]   ;;  %4445 = vmatpush3.bf16.msra.mxu1 %v5033_v1 }
 0x3e1   : > { %3703 = vmatpush1.bf16.msra.mxu0 %v4946_v34  ;;  %v4988_v34 = vld [vmem:[%s6506_s9 + $0x160] ss:$8 sps:$4 sm:$0xff]  }
 0x3e2   : > { %3704 = vmatprep.subr.bf16.mxu0 %v4951_v41  ;;  %v4993_v41 = vld [vmem:[%s6506_s9 + $0x174] ss:$8 sps:$4 sm:$0xff]  }
 0x3e5   : > { %3705 = vmatpush1.bf16.msra.mxu0 %v4949_v42  ;;  %v4991_v42 = vld [vmem:[%s6506_s9 + $0x170] ss:$8 sps:$4 sm:$0xff]  }
 0x3e6   : > { %3706 = vmatprep.subr.bf16.mxu0 %v4954_v44  ;;  %v4996_v44 = vld [vmem:[%s6506_s9 + $0x184] ss:$8 sps:$4 sm:$0xff]  }
 0x3e9   : > { %3707 = vmatpush1.bf16.msra.mxu0 %v4952_v45  ;;  %v4994_v45 = vld [vmem:[%s6506_s9 + $0x180] ss:$8 sps:$4 sm:$0xff]  }
 0x3ea   : > { %3708 = vmatprep.subr.bf16.mxu0 %v4957_v46  ;;  %v4999_v46 = vld [vmem:[%s6506_s9 + $0x194] ss:$8 sps:$4 sm:$0xff]  }
 0x3ed   : > { %3709 = vmatpush1.bf16.msra.mxu0 %v4955_v47  ;;  %v4997_v47 = vld [vmem:[%s6506_s9 + $0x190] ss:$8 sps:$4 sm:$0xff]  }
 0x3ee   : > { %3710 = vmatprep.subr.bf16.mxu0 %v4960_v26  ;;  %v5002_v26 = vld [vmem:[%s6506_s9 + $0x1a4] ss:$8 sps:$4 sm:$0xff]  }
 0x3f1   : > { %3711 = vmatpush1.bf16.msra.mxu0 %v4958_v48  ;;  %v5000_v48 = vld [vmem:[%s6506_s9 + $0x1a0] ss:$8 sps:$4 sm:$0xff]  }
 0x3f2   : > { %3712 = vmatprep.subr.bf16.mxu0 %v4963_v49  ;;  %v5005_v49 = vld [vmem:[%s6506_s9 + $0x1b4] ss:$8 sps:$4 sm:$0xff]  }
 0x3f5   : > { %3713 = vmatpush1.bf16.msra.mxu0 %v4961_v50  ;;  %v5003_v50 = vld [vmem:[%s6506_s9 + $0x1b0] ss:$8 sps:$4 sm:$0xff]  }
 0x3f6   : > { %3714 = vmatprep.subr.bf16.mxu0 %v4966_v51  ;;  %v5008_v51 = vld [vmem:[%s6506_s9 + $0x1c4] ss:$8 sps:$4 sm:$0xff]  }
 0x3f9   : > { %3715 = vmatpush1.bf16.msra.mxu0 %v4964_v52  ;;  %v5006_v52 = vld [vmem:[%s6506_s9 + $0x1c0] ss:$8 sps:$4 sm:$0xff]  }
 0x3fa   : > { %3716 = vmatprep.subr.bf16.mxu0 %v4969_v53  ;;  %v5011_v53 = vld [vmem:[%s6506_s9 + $0x1d4] ss:$8 sps:$4 sm:$0xff]  }
 0x3fd   : > { %3717 = vmatpush1.bf16.msra.mxu0 %v4967_v54  ;;  %v5009_v54 = vld [vmem:[%s6506_s9 + $0x1d0] ss:$8 sps:$4 sm:$0xff]  }
 0x3fe   : > { %3727 = vmatprep.subr.bf16.mxu0 %v4972_v55  ;;  %v2945_v55 = vrot.slane %v6358_v5, %v5610_v27  ;;  %v5015_v27 = vld [vmem:[%s6506_s9 + $0x1f0] ss:$8 sps:$4 sm:$0xff]   ;;  %v3683_v5 = vrot.slane %v3354_v40, %v5590_v39 }
 0x493   : > { %v3111_v9 = vpop.f32.mrb[4].mxu0 }
 0x494   : > { %v4470_v10 = vadd.f32 %v3111_v9, %v2937_v6  ;;  %v6366_v11 = vpop.f32.mrb[20].mxu1  ;;  %v3113_v37 = vpop.f32.mrb[5].mxu0 }
 0x495   : > { %v4471_v12 = vadd.f32 %v3113_v37, %v2941_v7  ;;  %v3277_v13 = vpop.f32.mrb[21].mxu1  ;;  %v3115_v14 = vpop.f32.mrb[6].mxu0  ;;  %v4472_v58 = vadd.f32 %v6366_v11, %v2945_v55 }
 0x496   : > { %v3282_v4 = vmax.f32 %v4470_v10, 0.0  ;;  %v4473_v15 = vadd.f32 %v3277_v13, %v2949_v8  ;;  %v3279_v16 = vpop.f32.mrb[22].mxu1  ;;  %v3116_v17 = vpop.f32.mrb[7].mxu0 }
 0x497   : > { %v3283_v18 = vmax.f32 %v4471_v12, 0.0  ;;  %v3280_v19 = vpop.f32.mrb[23].mxu1  ;;  %v3284_v60 = vmax.f32 %v4472_v58, 0.0 }
 0x498   : > { %v3285_v20 = vmax.f32 %v4473_v15, 0.0  ;;  %v3286_v3 = vpack.c.bf16 %v3282_v4, %v3282_v4 }
 0x499   : > { %v3287_v35 = vpack.c.bf16 %v3283_v18, %v3283_v18  ;;  %v3288_v61 = vpack.c.bf16 %v3284_v60, %v3284_v60 }
 0x49a   : > { %v3289_v21 = vpack.c.bf16 %v3285_v20, %v3285_v20 }
 0x49b   : > { %3718 = vmatprep.mubr.bf16.mxu0 %v3287_v35 }
 0x49c   : > { %3719 = vmatmul.mubr.bf16.vlgmr.msra.gmra.mrb[8].mxu0 %v3286_v3 }
 0x49d   : > { %3728 = vmatpush1.bf16.msra.mxu0 %v4970_v28  ;;  %3759 = vmatprep.mubr.bf16.mxu0 %v3289_v21 }
 0x49e   : > { %3729 = vmatprep.subr.bf16.mxu0 %v4975_v43 }
 0x4a1   : > { %3730 = vmatpush1.bf16.msra.mxu0 %v4973_v22 }
 0x4a2   : > { %3731 = vmatprep.subr.bf16.mxu0 %v4978_v23 }
 0x4a5   : > { %3732 = vmatpush1.bf16.msra.mxu0 %v4976_v24 }
 0x4a6   : > { %3733 = vmatprep.subr.bf16.mxu0 %v4981_v25 }
 0x4a9   : > { %3734 = vmatpush1.bf16.msra.mxu0 %v4979_v29 }
 0x4aa   : > { %3735 = vmatprep.subr.bf16.mxu0 %v4984_v38 }
 0x4ad   : > { %3736 = vmatpush1.bf16.msra.mxu0 %v4982_v30 }
 0x4ae   : > { %3737 = vmatprep.subr.bf16.mxu0 %v4987_v31 }
 0x4b1   : > { %3738 = vmatpush1.bf16.msra.mxu0 %v4985_v32 }
 0x4b2   : > { %3739 = vmatprep.subr.bf16.mxu0 %v4990_v33 }
 0x4b5   : > { %3740 = vmatpush1.bf16.msra.mxu0 %v4988_v34 }
 0x4b6   : > { %3741 = vmatprep.subr.bf16.mxu0 %v4993_v41 }
 0x4b9   : > { %3742 = vmatpush1.bf16.msra.mxu0 %v4991_v42 }
 0x4ba   : > { %3743 = vmatprep.subr.bf16.mxu0 %v4996_v44 }
 0x4bd   : > { %3744 = vmatpush1.bf16.msra.mxu0 %v4994_v45 }
 0x4be   : > { %3745 = vmatprep.subr.bf16.mxu0 %v4999_v46 }
 0x4c1   : > { %3746 = vmatpush1.bf16.msra.mxu0 %v4997_v47 }
 0x4c2   : > { %3747 = vmatprep.subr.bf16.mxu0 %v5002_v26 }
 0x4c5   : > { %3748 = vmatpush1.bf16.msra.mxu0 %v5000_v48 }
 0x4c6   : > { %3749 = vmatprep.subr.bf16.mxu0 %v5005_v49 }
 0x4c9   : > { %3750 = vmatpush1.bf16.msra.mxu0 %v5003_v50 }
 0x4ca   : > { %3751 = vmatprep.subr.bf16.mxu0 %v5008_v51 }
 0x4cd   : > { %3752 = vmatpush1.bf16.msra.mxu0 %v5006_v52 }
 0x4ce   : > { %3753 = vmatprep.subr.bf16.mxu0 %v5011_v53 }
 0x4d1   : > { %3754 = vmatpush1.bf16.msra.mxu0 %v5009_v54 }
 0x4d2   : > { %3755 = vmatprep.subr.bf16.mxu0 %v5014_v56 }
 0x4d5   : > { %3756 = vmatpush1.bf16.msra.mxu0 %v5012_v57 }
 0x4d6   : > { %3757 = vmatprep.subr.bf16.mxu0 %v5017_v59 }
 0x4d9   : > { %3758 = vmatpush1.bf16.msra.mxu0 %v5015_v27 }
 0x4dc   : > { %3760 = vmatmul.mubr.bf16.vlgmr.msra.gmra.mrb[8].mxu0 %v3288_v61 }
 0x5af   : > { %v3761_v6 = vpop.f32.mrb[8].mxu0 }
 0x5b0   : > { %v4474_v7 = vadd.f32 %v3761_v6, %v3679_v2  ;;  %v3763_v8 = vpop.f32.mrb[9].mxu0 }
 0x5b1   : > { %v4475_v9 = vadd.f32 %v3763_v8, %v3683_v5  ;;  %v3765_v10 = vpop.f32.mrb[10].mxu0 }
 0x5b2   : > { %v3768_v11 = vmax.f32 %v4474_v7, 0.0  ;;  %v3766_v37 = vpop.f32.mrb[11].mxu0 }
 0x5b3   : > { %v3769_v12 = vmax.f32 %v4475_v9, 0.0 }
 0x5b4   : > { %v3770_v14 = vpack.c.bf16 %v3768_v11, %v3768_v11 }
 0x5b5   : > { %v3771_v13 = vpack.c.bf16 %v3769_v12, %v3769_v12 }
 0x5b7   : > { %3933 = vmatprep.mubr.bf16.mxu1 %v3771_v13 }
 0x5b8   : > { %3934 = vmatmul.mubr.bf16.vlgmr.msra.gmra.mrb[24].mxu1 %v3770_v14 }
 0x68b   : > { %v4446_v4 = vpop.f32.mrb[24].mxu1 }
 0x68c   : > { %v4447_v15 = vpop.f32.mrb[25].mxu1 }
 0x68d   : > { %v4448_v39 = vadd.f32 %v4447_v15, %v4446_v4  ;;  %v4449_v16 = vpop.f32.mrb[26].mxu1 }
 0x68e   : > { %v4450_v17 = vpop.f32.mrb[27].mxu1 }
 0x68f   : > { %v3936_v18 = vadd.f32 %v4448_v39, %v3804_v36 }
 0x691   : > { %3942 = vst.msk [vmem:[%s464_s21] sm:$0x1] %vm3941_vm5, %v3936_v18 }
 0x692 PF: > { %s23_s27 = sadd.s32 1, %s5056_s27   ;;  %s6511_s25 = smov %s5052_s26 }
 0x693   : > { %p20_p5 = scmp.ge.s32.totalorder %s23_s27, 4   ;;  %s6512_s26 = smov %s6514_s28 }
 0x695   :  { %22 = sbr.rel (!%p20_p5) target bundleno = 2 (0x2), region = 110 }

// kernel: pointnet_encoder_forward.5
= control target key start
LH: loop header
LB: loop body
LE: loop exit
PB: predicated region body
PF: predicated region fallthrough
CT: control target
= control target key end

     0   :  { %s1848_s30 = smov 0   ;;  %s1850_s10 = smov 0   ;;  %s2174_s0 = inlined_call_operand.vmem [shape: bf16[2,16,3], index: 0, kind: input, shape index: {}]   ;;  %s2175_s1 = inlined_call_operand.vmem [shape: bf16[2,3,64], index: 1, kind: input, shape index: {}]   ;;  %s2176_s2 = inlined_call_operand.vmem [shape: f32[1,64], index: 2, kind: input, shape index: {}]   ;;  %s2177_s3 = inlined_call_operand.vmem [shape: bf16[2,64,64], index: 3, kind: input, shape index: {}]   ;;  %s2178_s4 = inlined_call_operand.vmem [shape: bf16[64,128], index: 4, kind: input, shape index: {}]   ;;  %s2179_s5 = inlined_call_operand.vmem [shape: f32[1,128], index: 5, kind: input, shape index: {}]   ;;  %s2180_s6 = inlined_call_operand.vmem [shape: bf16[128,1024], index: 6, kind: input, shape index: {}]   ;;  %s2181_s7 = inlined_call_operand.vmem [shape: f32[1,1024], index: 7, kind: input, shape index: {}]   ;;  %s2182_s8 = inlined_call_operand.vmem [shape: f32[2,64,16], index: 8, kind: output, shape index: {0}]   ;;  %s2183_s9 = inlined_call_operand.vmem [shape: f32[2,1,1024], index: 9, kind: output, shape index: {1}]  }
   0x1   :  { %s1852_s11 = smov 0  }
   0x2 LB: > { %s32_s12 = sadd.s32 1, %s1787_s10  ;;  %p1594_p0 = scmp.ge.s32.totalorder %s1791_s11, 1  ;;  %s1791_s11 = sphi %s1852_s11, %s20_s11   ;;  %s1787_s10 = sphi %s1850_s10, %s2185_s10   ;;  %s1783_s30 = sphi %s1848_s30, %s2184_s30  }
   0x3   : > { %p34_p1 = scmp.ge.s32.totalorder %s32_s12, 2  ;;  %p330_p2 = scmp.lt.s32.totalorder %s1791_s11, 3 }
   0x5   : > { %s2187_s12 = smov (%p34_p1, %s32_s12), 0  ;;  %p331_p3 = pnand %p1594_p0, %p330_p2 }
   0x6   : > { %p387_p4 = scmp.lt.s32.totalorder (!%p331_p3), %s1783_s30, 1  ;;  %vm442_vm0 = vcmask (!%p331_p3), 1040384   ;;  %vm443_vm1 = vcmask (!%p331_p3), 1041408   ;;  %v1793_v0 = vmov (!%p331_p3), 0.0   ;;  %v1794_v1 = vmov (!%p331_p3), 65535   ;;  %v1765_v26 = vld [vmem:[%s2178_s4] sm:$0xff] (!%p331_p3)  }
   0x7   : > { %334 = sbr.rel (%p331_p3) target bundleno = 1065 (0x429), region = 52  ;;  %1701 = vmatprep.subr.bf16.mxu1 (!%p331_p3), %v1793_v0  ;;  %v444_v2 = vsel (!%p331_p3), %vm442_vm0, 4294967295, %v1794_v1  ;;  %1717 = vmatprep.subr.bf16.mxu0 (!%p331_p3), %v1793_v0  ;;  %vm1795_vm2 = vmmov (!%p331_p3), 0   ;;  %vm438_vm3 = vcmask (!%p331_p3), 23552   ;;  %vm541_vm4 = vcmask (!%p331_p3), 523264   ;;  %v1766_v27 = vld [vmem:[%s2178_s4 + $0x8] sm:$0xff] (!%p331_p3)  }
   0x8   : > { %v445_v3 = vsel (!%p331_p3), %vm443_vm1, %v444_v2, 0  ;;  %1703 = vmatprep.mubr.msk.bf16.mxu1 (!%p331_p3), %vm1795_vm2, %v1793_v0  ;;  %1725 = vmatprep.mubr.msk.bf16.mxu0 (!%p331_p3), %vm1795_vm2, %v1793_v0  ;;  %v1603_v12 = vld [vmem:[%s2176_s2] ss:$0 sm:$0xff] (!%p331_p3)  ;;  %v1767_v28 = vld [vmem:[%s2178_s4 + $0x10] sm:$0xff] (!%p331_p3)   ;;  %v1768_v29 = vld [vmem:[%s2178_s4 + $0x18] sm:$0xff] (!%p331_p3)   ;;  %vm622_vm5 = vcmask (!%p331_p3), 130048  }
   0x9   : > { %1718 = vmatpush3.bf16.msra.mxu0 (!%p331_p3), %v1765_v26  ;;  %v737_v30 = vld [vmem:[%s2180_s6] sm:$0xff] (!%p331_p3)  ;;  %v1912_v32 = vld [vmem:[%s2180_s6 + $0x8] sm:$0xff] (!%p331_p3) }
   0xa   : > { %1719 = vmatprep.subr.bf16.mxu0 (!%p331_p3), %v1793_v0  ;;  %v741_v31 = vld [vmem:[%s2180_s6 + $0x20] sm:$0xff] (!%p331_p3)  ;;  %v1917_v35 = vld [vmem:[%s2180_s6 + $0x28] sm:$0xff] (!%p331_p3) }
   0xb   : > { %v1620_v33 = vcombine.low (!%p331_p3), %v737_v30, %v741_v31  ;;  %v1621_v34 = vcombine.high (!%p331_p3), %v737_v30, %v741_v31  ;;  %v745_v36 = vld [vmem:[%s2180_s6 + $0x40] sm:$0xff] (!%p331_p3)  ;;  %v1622_v38 = vcombine.low (!%p331_p3), %v1912_v32, %v1917_v35  ;;  %v1623_v39 = vcombine.high (!%p331_p3), %v1912_v32, %v1917_v35  ;;  %v790_v31 = vld [vmem:[%s2180_s6 + $0x1a8] sm:$0xff] (!%p331_p3) }
   0xc   : > { %v749_v37 = vld [vmem:[%s2180_s6 + $0x60] sm:$0xff] (!%p331_p3) }
   0xd   : > { %1720 = vmatpush3.bf16.msra.mxu0 (!%p331_p3), %v1766_v27  ;;  %v1629_v40 = vcombine.high (!%p331_p3), %v745_v36, %v749_v37  ;;  %v1628_v41 = vcombine.low (!%p331_p3), %v745_v36, %v749_v37  ;;  %v753_v42 = vld [vmem:[%s2180_s6 + $0x80] sm:$0xff] (!%p331_p3)  ;;  %v794_v37 = vld [vmem:[%s2180_s6 + $0x1c8] sm:$0xff] (!%p331_p3) }
   0xe   : > { %s2189_s30 = smov (!%p387_p4, %s1783_s30), 1  ;;  %1721 = vmatprep.subr.bf16.mxu0 %v1793_v0  ;;  %v757_v43 = vld [vmem:[%s2180_s6 + $0xa0] sm:$0xff] }
   0xf   : > { %s1597_s13 = sshll.u32 %s2189_s30, 1  ;;  %s1686_s14 = sshll.u32 %s2189_s30, 3  ;;  %v1637_v44 = vcombine.high %v753_v42, %v757_v43  ;;  %v1636_v45 = vcombine.low %v753_v42, %v757_v43  ;;  %v761_v46 = vld [vmem:[%s2180_s6 + $0xc0] sm:$0xff]  ;;  %v739_v43 = vld [vmem:[%s2180_s6 + $0x10] sm:$0xff] }
  0x10   : > { %s399_s17 = scalar_lea.vmem %s2175_s1, %s1597_s13  ;;  %s394_s20 = scalar_lea.vmem %s2174_s0, %s1686_s14  ;;  %v765_v47 = vld [vmem:[%s2180_s6 + $0xe0] sm:$0xff] }
  0x11   : > { %v425_v4 = vld [vmem:[%s399_s17] sm:$0x3]  ;;  %s1687_s21 = sshll.u32 %s2189_s30, 5  ;;  %1722 = vmatpush3.bf16.msra.mxu0 %v1767_v28  ;;  %v1645_v48 = vcombine.high %v761_v46, %v765_v47  ;;  %v1644_v49 = vcombine.low %v761_v46, %v765_v47  ;;  %s1688_s27 = sshll.u32 %s2189_s30, 6  ;;  %v744_v47 = vld [vmem:[%s2180_s6 + $0x38] sm:$0xff] }
  0x12   : > { %v447_v5 = vand.u32 %v445_v3, %v425_v4  ;;  %v1760_v6 = vld [vmem:[%s394_s20] sm:$0xff]   ;;  %s404_s24 = scalar_lea.vmem %s2177_s3, %s1687_s21  ;;  %1723 = vmatprep.subr.bf16.mxu0 %v1793_v0  ;;  %s412_s13 = scalar_lea.vmem %s2182_s8, %s1688_s27 }
  0x13   : > { %v1761_v7 = vld [vmem:[%s404_s24] sm:$0xff]   ;;  %v1762_v8 = vld [vmem:[%s404_s24 + $0x8] sm:$0xff]   ;;  %v1763_v9 = vld [vmem:[%s404_s24 + $0x10] sm:$0xff]   ;;  %s416_s29 = scalar_lea.vmem %s2183_s9, %s1686_s14 }
  0x14   : > { %1702 = vmatpush3.bf16.msra.mxu1 %v447_v5  ;;  %525 = vxpose.xlu0.c.b16.start [1/4] (short) (narrow) %v1761_v7, 64  ;;  %v1764_v10 = vld [vmem:[%s404_s24 + $0x18] sm:$0xff]   ;;  %v769_v50 = vld [vmem:[%s2180_s6 + $0x100] sm:$0xff]  ;;  %v750_v7 = vld [vmem:[%s2180_s6 + $0x68] sm:$0xff] }
  0x15   : > { %1724 = vmatpush3.bf16.msra.mxu0 %v1768_v29  ;;  %v773_v51 = vld [vmem:[%s2180_s6 + $0x120] sm:$0xff]  ;;  %v786_v29 = vld [vmem:[%s2180_s6 + $0x188] sm:$0xff] }
  0x16   : > { %1206 = vmatprep.subr.bf16.mxu0 %v1623_v39  ;;  %v1653_v52 = vcombine.high %v769_v50, %v773_v51  ;;  %v1652_v53 = vcombine.low %v769_v50, %v773_v51  ;;  %v777_v54 = vld [vmem:[%s2180_s6 + $0x140] sm:$0xff]  ;;  %v798_v39 = vld [vmem:[%s2180_s6 + $0x1e8] sm:$0xff]  ;;  %v1796_v51 = vmov 0  }
  0x17   : > { %1704 = vmatmul.mubr.msk.bf16.vlgmr.msra.gmra.mrb[0].mxu1 %vm438_vm3, %v1760_v6  ;;  %v781_v55 = vld [vmem:[%s2180_s6 + $0x160] sm:$0xff]  ;;  %v746_v6 = vld [vmem:[%s2180_s6 + $0x48] sm:$0xff]  ;;  %v1679_v42 = vcombine.high %v794_v37, %v798_v39 }
  0x18   : > { %526 = vxpose.xlu0.c.b16.cont [2/4] (short) (narrow) %v1762_v8, 64  ;;  %v1661_v56 = vcombine.high %v777_v54, %v781_v55  ;;  %v1660_v59 = vcombine.low %v777_v54, %v781_v55  ;;  %v1631_v8 = vcombine.high %v746_v6, %v750_v7  ;;  %v785_v27 = vld [vmem:[%s2180_s6 + $0x180] sm:$0xff] }
  0x19   : > { %v789_v28 = vld [vmem:[%s2180_s6 + $0x1a0] sm:$0xff] }
  0x1a   : > { %v1669_v30 = vcombine.high %v785_v27, %v789_v28  ;;  %v1668_v32 = vcombine.low %v785_v27, %v789_v28  ;;  %v793_v35 = vld [vmem:[%s2180_s6 + $0x1c0] sm:$0xff]  ;;  %v779_v28 = vld [vmem:[%s2180_s6 + $0x150] sm:$0xff] }
  0x1b   : > { %v797_v36 = vld [vmem:[%s2180_s6 + $0x1e0] sm:$0xff] }
  0x1c   : > { %527 = vxpose.xlu0.c.b16.cont [3/4] (short) (narrow) %v1763_v9, 64 }
  0x20   : > { %528 = vxpose.xlu0.c.b16.end [4/4] (short) (narrow) %v1764_v10, 64  ;;  %v754_v10 = vld [vmem:[%s2180_s6 + $0x88] sm:$0xff] }
  0x7a   : > { %v533_v11 = vpop.trf.xlu0 }
  0x7b   : > { %1709 = vmatprep.mubr.msk.bf16.mxu1 %vm541_vm4, %v533_v11  ;;  %v758_v11 = vld [vmem:[%s2180_s6 + $0xa8] sm:$0xff] }
  0x7e   : > { %v534_v23 = vpop.trf.xlu0 }
  0x82   : > { %v535_v24 = vpop.trf.xlu0 }
  0x86   : > { %v536_v25 = vpop.trf.xlu0 }
  0xea   : > { %v483_v13 = vpop.f32.mrb[0].mxu1 }
  0xeb   : > { %v484_v14 = vadd.f32 %v1603_v12, %v483_v13  ;;  %v1705_v15 = vpop.f32.mrb[1].mxu1  ;;  %v1639_v13 = vcombine.high %v754_v10, %v758_v11 }
  0xec   : > { %v486_v16 = vpop.f32.mrb[2].mxu1  ;;  %v766_v15 = vld [vmem:[%s2180_s6 + $0xe8] sm:$0xff] }
  0xed   : > { %v487_v17 = vadd.f32 %v1603_v12, %v486_v16  ;;  %v1706_v18 = vpop.f32.mrb[3].mxu1  ;;  %v490_v19 = vmax.f32 %v484_v14, 0.0  ;;  %v1630_v12 = vcombine.low %v746_v6, %v750_v7  ;;  %v762_v14 = vld [vmem:[%s2180_s6 + $0xc8] sm:$0xff]  ;;  %v1638_v16 = vcombine.low %v754_v10, %v758_v11  ;;  %v756_v6 = vld [vmem:[%s2180_s6 + $0x98] sm:$0xff] }
  0xee   : > { %v770_v18 = vld [vmem:[%s2180_s6 + $0x108] sm:$0xff]  ;;  %v760_v7 = vld [vmem:[%s2180_s6 + $0xb8] sm:$0xff] }
  0xef   : > { %v491_v20 = vmax.f32 %v487_v17, 0.0  ;;  %v1647_v17 = vcombine.high %v762_v14, %v766_v15  ;;  %v1643_v11 = vcombine.high %v756_v6, %v760_v7 }
  0xf1   : > { %v492_v21 = vpack.c.bf16 %v491_v20, %v490_v19  ;;  %v774_v19 = vld [vmem:[%s2180_s6 + $0x128] sm:$0xff]  ;;  %v1646_v20 = vcombine.low %v762_v14, %v766_v15  ;;  %v764_v14 = vld [vmem:[%s2180_s6 + $0xd8] sm:$0xff] }
  0xf2   : > { %v768_v15 = vld [vmem:[%s2180_s6 + $0xf8] sm:$0xff] }
  0xf3   : > { %1729 = vmatprep.subr.msk.bf16.mxu1 %vm541_vm4, %v492_v21  ;;  %v555_v22 = vsel %vm541_vm4, %v492_v21, 0  ;;  %v1655_v21 = vcombine.high %v770_v18, %v774_v19 }
  0xf4   : > { %1708 = vmatpush3.bf16.xpose.msra.mxu1 %v555_v22  ;;  %v778_v22 = vld [vmem:[%s2180_s6 + $0x148] sm:$0xff] }
  0xf5   : > { %1163 = vmatprep.subr.bf16.mxu1 %v1621_v34  ;;  %v1671_v34 = vcombine.high %v786_v29, %v790_v31 }
  0xfb   : > { %1710 = vmatmul.mubr.msk.bf16.vlgmr.msra.gmra.mrb[4].mxu1 %vm541_vm4, %v534_v23  ;;  %v782_v23 = vld [vmem:[%s2180_s6 + $0x168] sm:$0xff] }
  0xfc   : > { %1713 = vmatprep.mubr.msk.bf16.mxu1 %vm541_vm4, %v535_v24  ;;  %1164 = vmatpush1.bf16.msra.mxu1 %v1620_v33  ;;  %v1654_v24 = vcombine.low %v770_v18, %v774_v19  ;;  %v1662_v26 = vcombine.low %v778_v22, %v782_v23  ;;  %v1670_v33 = vcombine.low %v786_v29, %v790_v31  ;;  %v783_v29 = vld [vmem:[%s2180_s6 + $0x170] sm:$0xff]  ;;  %v784_v31 = vld [vmem:[%s2180_s6 + $0x178] sm:$0xff] }
  0xfd   : > { %1165 = vmatprep.subr.bf16.mxu1 %v1629_v40  ;;  %v1676_v40 = vcombine.low %v793_v35, %v797_v36  ;;  %v1651_v19 = vcombine.high %v764_v14, %v768_v15 }
 0x100   : > { %1166 = vmatpush1.bf16.msra.mxu1 %v1628_v41  ;;  %v1678_v41 = vcombine.low %v794_v37, %v798_v39  ;;  %v791_v37 = vld [vmem:[%s2180_s6 + $0x1b0] sm:$0xff]  ;;  %v792_v39 = vld [vmem:[%s2180_s6 + $0x1b8] sm:$0xff] }
 0x101   : > { %1167 = vmatprep.subr.bf16.mxu1 %v1637_v44  ;;  %v743_v44 = vld [vmem:[%s2180_s6 + $0x30] sm:$0xff] }
 0x102   : > { %v1625_v46 = vcombine.high %v739_v43, %v743_v44 }
 0x103   : > { %1714 = vmatmul.mubr.msk.bf16.gmra.mrb[8].mxu1 %vm541_vm4, %v536_v25  ;;  %v1663_v25 = vcombine.high %v778_v22, %v782_v23  ;;  %v772_v22 = vld [vmem:[%s2180_s6 + $0x118] sm:$0xff] }
 0x104   : > { %1168 = vmatpush1.bf16.msra.mxu1 %v1636_v45  ;;  %v740_v45 = vld [vmem:[%s2180_s6 + $0x18] sm:$0xff]  ;;  %1195 = vmatprep.mubr.bf16.mxu1 %v1796_v51 }
 0x105   : > { %1169 = vmatprep.subr.bf16.mxu1 %v1645_v48  ;;  %v1624_v48 = vcombine.low %v739_v43, %v743_v44  ;;  %v1627_v50 = vcombine.high %v740_v45, %v744_v47  ;;  %v776_v23 = vld [vmem:[%s2180_s6 + $0x138] sm:$0xff]  ;;  %v795_v44 = vld [vmem:[%s2180_s6 + $0x1d0] sm:$0xff] }
 0x106   : > { %v1659_v27 = vcombine.high %v772_v22, %v776_v23 }
 0x108   : > { %1170 = vmatpush1.bf16.msra.mxu1 %v1644_v49  ;;  %v1626_v49 = vcombine.low %v740_v45, %v744_v47  ;;  %v799_v45 = vld [vmem:[%s2180_s6 + $0x1f0] sm:$0xff]  ;;  %v800_v47 = vld [vmem:[%s2180_s6 + $0x1f8] sm:$0xff] }
 0x109   : > { %1171 = vmatprep.subr.bf16.mxu1 %v1653_v52  ;;  %v1614_v52 = vld [vmem:[%s2179_s5] ss:$0 sm:$0xff] }
 0x10c   : > { %1172 = vmatpush1.bf16.msra.mxu1 %v1652_v53 }
 0x10d   : > { %1173 = vmatprep.subr.bf16.mxu1 %v1661_v56 }
 0x110   : > { %1174 = vmatpush1.bf16.msra.mxu1 %v1660_v59  ;;  %v747_v59 = vld [vmem:[%s2180_s6 + $0x50] sm:$0xff] }
 0x111   : > { %1175 = vmatprep.subr.bf16.mxu1 %v1669_v30  ;;  %v780_v30 = vld [vmem:[%s2180_s6 + $0x158] sm:$0xff] }
 0x114   : > { %1176 = vmatpush1.bf16.msra.mxu1 %v1668_v32 }
 0x1ce   : > { %v1711_v57 = vpop.f32.mrb[4].mxu1 }
 0x1cf   : > { %625 = vst.msk [vmem:[%s412_s13 + $0x10] sm:$0xff] %vm622_vm5, %v1711_v57  ;;  %v591_v58 = vpop.f32.mrb[5].mxu1 }
 0x1d0   : > { %623 = vst.msk [vmem:[%s412_s13] sm:$0xff] %vm622_vm5, %v591_v58  ;;  %v1712_v60 = vpop.f32.mrb[6].mxu1 }
 0x1d1   : > { %626 = vst.msk [vmem:[%s412_s13 + $0x18] sm:$0xff] %vm622_vm5, %v1712_v60  ;;  %v594_v61 = vpop.f32.mrb[7].mxu1  ;;  %v632_v62 = vpack.c.bf16 %v1712_v60, %v1711_v57  ;;  %v751_v60 = vld [vmem:[%s2180_s6 + $0x70] sm:$0xff] }
 0x1d2   : > { %624 = vst.msk [vmem:[%s412_s13 + $0x8] sm:$0xff] %vm622_vm5, %v594_v61  ;;  %v631_v63 = vpack.c.bf16 %v594_v61, %v591_v58  ;;  %v748_v61 = vld [vmem:[%s2180_s6 + $0x58] sm:$0xff] }
 0x1d4   : > { %650 = vxpose.xlu1.c.b16.start [1/4] (short) (narrow) %v631_v63, 16 }
 0x1d6   : > { %v1715_v0 = vpop.f32.mrb[8].mxu1 }
 0x1d7   : > { %629 = vst.msk [vmem:[%s412_s13 + $0x30] sm:$0xff] %vm622_vm5, %v1715_v0  ;;  %v607_v1 = vpop.f32.mrb[9].mxu1 }
 0x1d8   : > { %627 = vst.msk [vmem:[%s412_s13 + $0x20] sm:$0xff] %vm622_vm5, %v607_v1  ;;  %651 = vxpose.xlu1.c.b16.cont [2/4] (short) (narrow) %v632_v62, 16  ;;  %v1716_v2 = vpop.f32.mrb[10].mxu1  ;;  %v752_v62 = vld [vmem:[%s2180_s6 + $0x78] sm:$0xff] }
 0x1d9   : > { %630 = vst.msk [vmem:[%s412_s13 + $0x38] sm:$0xff] %vm622_vm5, %v1716_v2  ;;  %v610_v3 = vpop.f32.mrb[11].mxu1  ;;  %v634_v4 = vpack.c.bf16 %v1716_v2, %v1715_v0  ;;  %v1633_v2 = vcombine.high %v747_v59, %v751_v60 }
 0x1da   : > { %628 = vst.msk [vmem:[%s412_s13 + $0x28] sm:$0xff] %vm622_vm5, %v610_v3  ;;  %v633_v5 = vpack.c.bf16 %v610_v3, %v607_v1  ;;  %v1635_v3 = vcombine.high %v748_v61, %v752_v62 }
 0x1dc   : > { %652 = vxpose.xlu1.c.b16.cont [3/4] (short) (narrow) %v633_v5, 16  ;;  %v759_v5 = vld [vmem:[%s2180_s6 + $0xb0] sm:$0xff] }
 0x1e0   : > { %653 = vxpose.xlu1.c.b16.end [4/4] (short) (narrow) %v634_v4, 16  ;;  %v755_v4 = vld [vmem:[%s2180_s6 + $0x90] sm:$0xff] }
 0x1e1   : > { %v1641_v10 = vcombine.high %v755_v4, %v759_v5 }
 0x23a   : > { %v658_v9 = vpop.trf.xlu1 }
 0x23b   : > { %1726 = vmatmul.mubr.msk.bf16.vlgmr.msra.gmra.mrb[0].mxu0 %vm541_vm4, %v658_v9  ;;  %v1634_v9 = vcombine.low %v748_v61, %v752_v62 }
 0x23c   : > { %1207 = vmatpush1.bf16.msra.mxu0 %v1622_v38  ;;  %v1677_v38 = vcombine.high %v793_v35, %v797_v36  ;;  %1238 = vmatprep.mubr.bf16.mxu0 %v1796_v51  ;;  %v1667_v35 = vcombine.high %v780_v30, %v784_v31  ;;  %v787_v36 = vld [vmem:[%s2180_s6 + $0x190] sm:$0xff] }
 0x23d   : > { %1208 = vmatprep.subr.bf16.mxu0 %v1631_v8  ;;  %v1632_v8 = vcombine.low %v747_v59, %v751_v60 }
 0x23e   : > { %1177 = vmatprep.subr.bf16.mxu1 %v1677_v38  ;;  %v788_v38 = vld [vmem:[%s2180_s6 + $0x198] sm:$0xff] }
 0x23f   : > { %1178 = vmatpush1.bf16.msra.mxu1 %v1676_v40  ;;  %v1664_v40 = vcombine.low %v779_v28, %v783_v29  ;;  %v1675_v43 = vcombine.high %v788_v38, %v792_v39 }
 0x240   : > { %1209 = vmatpush1.bf16.msra.mxu0 %v1630_v12  ;;  %1249 = vmatprep.subr.bf16.mxu1 %v1625_v46  ;;  %v763_v12 = vld [vmem:[%s2180_s6 + $0xd0] sm:$0xff]  ;;  %v796_v46 = vld [vmem:[%s2180_s6 + $0x1d8] sm:$0xff] }
 0x241   : > { %1210 = vmatprep.subr.bf16.mxu0 %v1639_v13  ;;  %v767_v13 = vld [vmem:[%s2180_s6 + $0xf0] sm:$0xff] }
 0x242   : > { %v1649_v18 = vcombine.high %v763_v12, %v767_v13 }
 0x244   : > { %1211 = vmatpush1.bf16.msra.mxu0 %v1638_v16  ;;  %v1640_v16 = vcombine.low %v755_v4, %v759_v5 }
 0x245   : > { %1212 = vmatprep.subr.bf16.mxu0 %v1647_v17  ;;  %v1642_v17 = vcombine.low %v756_v6, %v760_v7 }
 0x248   : > { %1213 = vmatpush1.bf16.msra.mxu0 %v1646_v20  ;;  %v771_v20 = vld [vmem:[%s2180_s6 + $0x110] sm:$0xff] }
 0x249   : > { %1214 = vmatprep.subr.bf16.mxu0 %v1655_v21  ;;  %v775_v21 = vld [vmem:[%s2180_s6 + $0x130] sm:$0xff] }
 0x24a   : > { %v1656_v32 = vcombine.low %v771_v20, %v775_v21 }
 0x24c   : > { %1215 = vmatpush1.bf16.msra.mxu0 %v1654_v24  ;;  %v1648_v24 = vcombine.low %v763_v12, %v767_v13 }
 0x24d   : > { %1216 = vmatprep.subr.bf16.mxu0 %v1663_v25  ;;  %v1650_v25 = vcombine.low %v764_v14, %v768_v15 }
 0x250   : > { %1217 = vmatpush1.bf16.msra.mxu0 %v1662_v26  ;;  %v1657_v26 = vcombine.high %v771_v20, %v775_v21 }
 0x251   : > { %1218 = vmatprep.subr.bf16.mxu0 %v1671_v34  ;;  %v1665_v34 = vcombine.high %v779_v28, %v783_v29  ;;  %v1797_v28 = vmov 1966171168  }
 0x252   : > { %v1405_v29 = vunpack.c.l.s4 %v1797_v28 }
 0x254   : > { %1219 = vmatpush1.bf16.msra.mxu0 %v1670_v33  ;;  %v1658_v33 = vcombine.low %v772_v22, %v776_v23 }
 0x255   : > { %1220 = vmatprep.subr.bf16.mxu0 %v1679_v42  ;;  %v1673_v42 = vcombine.high %v787_v36, %v791_v37 }
 0x258   : > { %1221 = vmatpush1.bf16.msra.mxu0 %v1678_v41  ;;  %v1666_v41 = vcombine.low %v780_v30, %v784_v31 }
 0x259   : > { %1292 = vmatprep.subr.bf16.mxu0 %v1627_v50  ;;  %v1681_v50 = vcombine.high %v795_v44, %v799_v45 }
 0x30e   : > { %v727_v53 = vpop.f32.mrb[0].mxu0 }
 0x30f   : > { %v728_v54 = vadd.f32 %v1614_v52, %v727_v53  ;;  %v1727_v55 = vpop.f32.mrb[1].mxu0  ;;  %v1682_v53 = vcombine.low %v796_v46, %v800_v47 }
 0x310   : > { %v730_v56 = vpop.f32.mrb[2].mxu0 }
 0x311   : > { %v731_v57 = vadd.f32 %v1614_v52, %v730_v56  ;;  %v1728_v58 = vpop.f32.mrb[3].mxu0  ;;  %v734_v63 = vmax.f32 %v728_v54, 0.0  ;;  %v1680_v52 = vcombine.low %v795_v44, %v799_v45  ;;  %v803_v54 = vlaneseq }
 0x312   : > { %v2135_v58 = vld [vmem:[%s2181_s7] sm:$0xff] }
 0x313   : > { %v735_v0 = vmax.f32 %v731_v57, 0.0  ;;  %v2128_v55 = vshrl.u32 %v803_v54, 7 }
 0x315   : > { %v2050_v1 = vpack.c.bf16 %v735_v0, %v734_v63  ;;  %v805_v56 = vsub.s32 0, %v2128_v55  ;;  %v813_v57 = vsub.s32 2, %v2128_v55  ;;  %v809_v59 = vsub.s32 1, %v2128_v55 }
 0x316   : > { %v817_v60 = vsub.s32 3, %v2128_v55  ;;  %v821_v54 = vsub.s32 4, %v2128_v55 }
 0x317   : > { %1196 = vmatmul.mubr.bf16.vlgmr.msra.gmra.mrb[12].mxu1 %v2050_v1  ;;  %1239 = vmatmul.mubr.bf16.vlgmr.msra.gmra.mrb[4].mxu0 %v2050_v1  ;;  %v806_v61 = vrot.slane %v2135_v58, %v805_v56  ;;  %v814_v62 = vrot.slane %v2135_v58, %v813_v57  ;;  %v829_v56 = vsub.s32 6, %v2128_v55  ;;  %v825_v57 = vsub.s32 5, %v2128_v55 }
 0x318   : > { %1250 = vmatpush1.bf16.msra.mxu1 %v1624_v48  ;;  %1293 = vmatpush1.bf16.msra.mxu0 %v1626_v49  ;;  %v1672_v48 = vcombine.low %v787_v36, %v791_v37  ;;  %v1674_v49 = vcombine.low %v788_v38, %v792_v39  ;;  %v1406_v38 = vunpack.c.0.s8 %v1405_v29 }
 0x319   : > { %1251 = vmatprep.subr.bf16.mxu1 %v1633_v2  ;;  %1294 = vmatprep.subr.bf16.mxu0 %v1635_v3  ;;  %v818_v2 = vrot.slane %v2135_v58, %v817_v60  ;;  %v822_v60 = vrot.slane %v2135_v58, %v821_v54 }
 0x31a   : > { %1281 = vmatprep.mubr.bf16.mxu1 %v1796_v51  ;;  %1324 = vmatprep.mubr.bf16.mxu0 %v1796_v51  ;;  %v1683_v51 = vcombine.high %v796_v46, %v800_v47  ;;  %v2144_v47 = vsub.s32 %v1406_v38, %v2128_v55 }
 0x31c   : > { %1252 = vmatpush1.bf16.msra.mxu1 %v1632_v8  ;;  %1295 = vmatpush1.bf16.msra.mxu0 %v1634_v9 }
 0x31d   : > { %1253 = vmatprep.subr.bf16.mxu1 %v1641_v10  ;;  %1296 = vmatprep.subr.bf16.mxu0 %v1643_v11 }
 0x320   : > { %1254 = vmatpush1.bf16.msra.mxu1 %v1640_v16  ;;  %1297 = vmatpush1.bf16.msra.mxu0 %v1642_v17 }
 0x321   : > { %1255 = vmatprep.subr.bf16.mxu1 %v1649_v18  ;;  %1298 = vmatprep.subr.bf16.mxu0 %v1651_v19 }
 0x324   : > { %1256 = vmatpush1.bf16.msra.mxu1 %v1648_v24  ;;  %1299 = vmatpush1.bf16.msra.mxu0 %v1650_v25 }
 0x325   : > { %1257 = vmatprep.subr.bf16.mxu1 %v1657_v26  ;;  %1300 = vmatprep.subr.bf16.mxu0 %v1659_v27 }
 0x328   : > { %1258 = vmatpush1.bf16.msra.mxu1 %v1656_v32  ;;  %1301 = vmatpush1.bf16.msra.mxu0 %v1658_v33 }
 0x329   : > { %1259 = vmatprep.subr.bf16.mxu1 %v1665_v34  ;;  %1302 = vmatprep.subr.bf16.mxu0 %v1667_v35 }
 0x32c   : > { %1260 = vmatpush1.bf16.msra.mxu1 %v1664_v40  ;;  %1303 = vmatpush1.bf16.msra.mxu0 %v1666_v41 }
 0x32d   : > { %1261 = vmatprep.subr.bf16.mxu1 %v1673_v42  ;;  %1304 = vmatprep.subr.bf16.mxu0 %v1675_v43 }
 0x330   : > { %1262 = vmatpush1.bf16.msra.mxu1 %v1672_v48  ;;  %1305 = vmatpush1.bf16.msra.mxu0 %v1674_v49 }
 0x331   : > { %1263 = vmatprep.subr.bf16.mxu1 %v1681_v50  ;;  %1306 = vmatprep.subr.bf16.mxu0 %v1683_v51 }
 0x334   : > { %1264 = vmatpush1.bf16.msra.mxu1 %v1680_v52  ;;  %1307 = vmatpush1.bf16.msra.mxu0 %v1682_v53 }
 0x337   : > { %1282 = vmatmul.mubr.bf16.vlgmr.msra.gmra.mrb[16].mxu1 %v2050_v1  ;;  %1325 = vmatmul.mubr.bf16.vlgmr.msra.gmra.mrb[8].mxu0 %v2050_v1  ;;  %v810_v1 = vrot.slane %v2135_v58, %v809_v59  ;;  %v833_v59 = vsub.s32 7, %v2128_v55 }
 0x3ea   : > { %v1197_v63 = vpop.f32.mrb[12].mxu1  ;;  %v1240_v0 = vpop.f32.mrb[4].mxu0 }
 0x3eb   : > { %v1199_v3 = vpop.f32.mrb[13].mxu1  ;;  %v1242_v4 = vpop.f32.mrb[5].mxu0  ;;  %v1198_v7 = vadd.f32 %v1197_v63, %v806_v61  ;;  %v1241_v8 = vadd.f32 %v1240_v0, %v814_v62  ;;  %v826_v0 = vrot.slane %v2135_v58, %v825_v57 }
 0x3ec   : > { %v1201_v5 = vpop.f32.mrb[14].mxu1  ;;  %v1244_v6 = vpop.f32.mrb[6].mxu0  ;;  %v1200_v13 = vadd.f32 %v1199_v3, %v810_v1  ;;  %v1243_v14 = vadd.f32 %v1242_v4, %v818_v2 }
 0x3ed   : > { %v1202_v9 = vadd.f32 %v1201_v5, %v806_v61  ;;  %v1245_v10 = vadd.f32 %v1244_v6, %v814_v62  ;;  %v1203_v11 = vpop.f32.mrb[15].mxu1  ;;  %v1246_v12 = vpop.f32.mrb[7].mxu0  ;;  %v830_v61 = vrot.slane %v2135_v58, %v829_v56 }
 0x3ee   : > { %v1204_v15 = vadd.f32 %v1203_v11, %v810_v1  ;;  %v1247_v16 = vadd.f32 %v1246_v12, %v818_v2  ;;  %v834_v1 = vrot.slane %v2135_v58, %v833_v59 }
 0x3ef   : > { %v1336_v17 = vmax.f32 %v1198_v7, %v1202_v9  ;;  %v1350_v18 = vmax.f32 %v1241_v8, %v1245_v10 }
 0x3f0   : > { %v1343_v19 = vmax.f32 %v1200_v13, %v1204_v15  ;;  %v1357_v20 = vmax.f32 %v1243_v14, %v1247_v16 }
 0x3f1   : > { %v1337_v21 = vrot.slane %v1336_v17, 4  ;;  %v1351_v22 = vrot.slane %v1350_v18, 4 }
 0x3f2   : > { %v1344_v23 = vrot.slane %v1343_v19, 4  ;;  %v1358_v24 = vrot.slane %v1357_v20, 4 }
 0x3f3   : > { %v1338_v25 = vmax.f32 %v1336_v17, %v1337_v21  ;;  %v1352_v26 = vmax.f32 %v1350_v18, %v1351_v22 }
 0x3f4   : > { %v1345_v27 = vmax.f32 %v1343_v19, %v1344_v23  ;;  %v1359_v30 = vmax.f32 %v1357_v20, %v1358_v24 }
 0x3f5   : > { %v1339_v31 = vrot.slane %v1338_v25, 2  ;;  %v1353_v32 = vrot.slane %v1352_v26, 2 }
 0x3f6   : > { %v1346_v33 = vrot.slane %v1345_v27, 2  ;;  %v1360_v34 = vrot.slane %v1359_v30, 2 }
 0x3f7   : > { %v1340_v35 = vmax.f32 %v1338_v25, %v1339_v31  ;;  %v1354_v36 = vmax.f32 %v1352_v26, %v1353_v32 }
 0x3f8   : > { %v1347_v37 = vmax.f32 %v1345_v27, %v1346_v33  ;;  %v1361_v39 = vmax.f32 %v1359_v30, %v1360_v34 }
 0x3f9   : > { %v1341_v40 = vrot.slane %v1340_v35, 1  ;;  %v1355_v41 = vrot.slane %v1354_v36, 1 }
 0x3fa   : > { %v1348_v42 = vrot.slane %v1347_v37, 1  ;;  %v1362_v43 = vrot.slane %v1361_v39, 1 }
 0x3fb   : > { %v1342_v44 = vmax.f32 %v1340_v35, %v1341_v40  ;;  %v1356_v45 = vmax.f32 %v1354_v36, %v1355_v41 }
 0x3fc   : > { %v1349_v46 = vmax.f32 %v1347_v37, %v1348_v42  ;;  %v1363_v48 = vmax.f32 %v1361_v39, %v1362_v43 }
 0x3fe   : > { %v1400_v49 = vcombine.low %v1342_v44, %v1349_v46  ;;  %v1401_v50 = vcombine.low %v1356_v45, %v1363_v48 }
 0x400   : > { %v1410_v51 = vrot.slane %v1400_v49, %v2144_v47  ;;  %v1417_v52 = vrot.slane %v1401_v50, %v2144_v47 }
 0x402   : > { %v1432_v53 = vcombine.low %v1410_v51, %v1417_v52 }
 0x404   : > { %v1440_v48 = vrot.slane %v1432_v53, %v2144_v47 }
 0x40a   : > { %v1283_v62 = vpop.f32.mrb[16].mxu1  ;;  %v1326_v63 = vpop.f32.mrb[8].mxu0 }
 0x40b   : > { %v1285_v2 = vpop.f32.mrb[17].mxu1  ;;  %v1328_v3 = vpop.f32.mrb[9].mxu0  ;;  %v1284_v6 = vadd.f32 %v1283_v62, %v822_v60  ;;  %v1327_v7 = vadd.f32 %v1326_v63, %v830_v61 }
 0x40c   : > { %v1287_v4 = vpop.f32.mrb[18].mxu1  ;;  %v1330_v5 = vpop.f32.mrb[10].mxu0  ;;  %v1286_v11 = vadd.f32 %v1285_v2, %v826_v0  ;;  %v1329_v12 = vadd.f32 %v1328_v3, %v834_v1 }
 0x40d   : > { %v1288_v8 = vadd.f32 %v1287_v4, %v822_v60  ;;  %v1331_v9 = vadd.f32 %v1330_v5, %v830_v61  ;;  %v1289_v10 = vpop.f32.mrb[19].mxu1  ;;  %v1332_v55 = vpop.f32.mrb[11].mxu0 }
 0x40e   : > { %v1290_v13 = vadd.f32 %v1289_v10, %v826_v0  ;;  %v1333_v14 = vadd.f32 %v1332_v55, %v834_v1 }
 0x40f   : > { %v1364_v15 = vmax.f32 %v1284_v6, %v1288_v8  ;;  %v1378_v16 = vmax.f32 %v1327_v7, %v1331_v9 }
 0x410   : > { %v1371_v17 = vmax.f32 %v1286_v11, %v1290_v13  ;;  %v1385_v18 = vmax.f32 %v1329_v12, %v1333_v14 }
 0x411   : > { %v1365_v19 = vrot.slane %v1364_v15, 4  ;;  %v1379_v58 = vrot.slane %v1378_v16, 4 }
 0x412   : > { %v1372_v20 = vrot.slane %v1371_v17, 4  ;;  %v1386_v21 = vrot.slane %v1385_v18, 4 }
 0x413   : > { %v1366_v22 = vmax.f32 %v1364_v15, %v1365_v19  ;;  %v1380_v23 = vmax.f32 %v1378_v16, %v1379_v58 }
 0x414   : > { %v1373_v24 = vmax.f32 %v1371_v17, %v1372_v20  ;;  %v1387_v25 = vmax.f32 %v1385_v18, %v1386_v21 }
 0x415   : > { %v1367_v26 = vrot.slane %v1366_v22, 2  ;;  %v1381_v27 = vrot.slane %v1380_v23, 2 }
 0x416   : > { %v1374_v28 = vrot.slane %v1373_v24, 2  ;;  %v1388_v29 = vrot.slane %v1387_v25, 2 }
 0x417   : > { %v1368_v30 = vmax.f32 %v1366_v22, %v1367_v26  ;;  %v1382_v31 = vmax.f32 %v1380_v23, %v1381_v27 }
 0x418   : > { %v1375_v32 = vmax.f32 %v1373_v24, %v1374_v28  ;;  %v1389_v33 = vmax.f32 %v1387_v25, %v1388_v29 }
 0x419   : > { %v1369_v34 = vrot.slane %v1368_v30, 1  ;;  %v1383_v35 = vrot.slane %v1382_v31, 1 }
 0x41a   : > { %v1376_v36 = vrot.slane %v1375_v32, 1  ;;  %v1390_v37 = vrot.slane %v1389_v33, 1 }
 0x41b   : > { %v1370_v38 = vmax.f32 %v1368_v30, %v1369_v34  ;;  %v1384_v39 = vmax.f32 %v1382_v31, %v1383_v35 }
 0x41c   : > { %v1377_v40 = vmax.f32 %v1375_v32, %v1376_v36  ;;  %v1391_v41 = vmax.f32 %v1389_v33, %v1390_v37 }
 0x41e   : > { %v1402_v42 = vcombine.low %v1370_v38, %v1377_v40  ;;  %v1403_v43 = vcombine.low %v1384_v39, %v1391_v41 }
 0x420   : > { %v1424_v44 = vrot.slane %v1402_v42, %v2144_v47  ;;  %v1431_v45 = vrot.slane %v1403_v43, %v2144_v47 }
 0x422   : > { %v1433_v46 = vcombine.low %v1424_v44, %v1431_v45 }
 0x424   : > { %v1447_v49 = vrot.slane %v1433_v46, %v2144_v47 }
 0x426   : > { %v1448_v50 = vcombine.low %v1440_v48, %v1447_v49 }
 0x428   : > { %1451 = vst [vmem:[%s416_s29] sm:$0xff] %v1448_v50 }
 0x429 PF: > { %s20_s11 = sadd.s32 1, %s1791_s11   ;;  %s2184_s30 = smov %s1787_s10 }
 0x42a   : > { %p17_p5 = scmp.ge.s32.totalorder %s20_s11, 4   ;;  %s2185_s10 = smov %s2187_s12 }
 0x42c   :  { %19 = sbr.rel (!%p17_p5) target bundleno = 2 (0x2), region = 104 }

// kernel: pointnet_encoder_forward.4
= control target key start
LH: loop header
LB: loop body
LE: loop exit
PB: predicated region body
PF: predicated region fallthrough
CT: control target
= control target key end

     0   :  { %s9769_s18 = smov 0   ;;  %s9771_s19 = smov 0   ;;  %s12860_s0 = inlined_call_operand.vmem [shape: bf16[2,16,3], index: 0, kind: input, shape index: {}]   ;;  %s12861_s1 = inlined_call_operand.vmem [shape: bf16[2,3,64], index: 1, kind: input, shape index: {}]   ;;  %s12862_s2 = inlined_call_operand.vmem [shape: f32[1,64], index: 2, kind: input, shape index: {}]   ;;  %s12863_s3 = inlined_call_operand.vmem [shape: bf16[64,64], index: 3, kind: input, shape index: {}]   ;;  %s12864_s4 = inlined_call_operand.vmem [shape: f32[1,64], index: 4, kind: input, shape index: {}]   ;;  %s12865_s5 = inlined_call_operand.vmem [shape: bf16[64,128], index: 5, kind: input, shape index: {}]   ;;  %s12866_s6 = inlined_call_operand.vmem [shape: f32[1,128], index: 6, kind: input, shape index: {}]   ;;  %s12867_s7 = inlined_call_operand.vmem [shape: bf16[128,1024], index: 7, kind: input, shape index: {}]   ;;  %s12868_s8 = inlined_call_operand.vmem [shape: f32[1,1024], index: 8, kind: input, shape index: {}]   ;;  %s12869_s9 = inlined_call_operand.vmem [shape: bf16[1024,512], index: 9, kind: input, shape index: {}]   ;;  %s12870_s10 = inlined_call_operand.vmem [shape: f32[1,512], index: 10, kind: input, shape index: {}]   ;;  %s12871_s11 = inlined_call_operand.vmem [shape: bf16[512,256], index: 11, kind: input, shape index: {}]   ;;  %s12872_s12 = inlined_call_operand.vmem [shape: f32[1,256], index: 12, kind: input, shape index: {}]   ;;  %s12873_s13 = inlined_call_operand.vmem [shape: bf16[256,4096], index: 13, kind: input, shape index: {}]   ;;  %s12874_s14 = inlined_call_operand.vmem [shape: f32[1,4096], index: 14, kind: input, shape index: {}]   ;;  %s12875_s15 = inlined_call_operand.vmem [shape: f32[2,1,4096], index: 15, kind: output, shape index: {}]  }
   0x1   :  { %s9773_s20 = smov 0  }
   0x2 LB: > { %s37_s21 = sadd.s32 1, %s9678_s19  ;;  %p8146_p0 = scmp.ge.s32.totalorder %s9682_s20, 1  ;;  %s9682_s20 = sphi %s9773_s20, %s25_s20   ;;  %s9678_s19 = sphi %s9771_s19, %s12877_s19   ;;  %s9674_s18 = sphi %s9769_s18, %s12876_s18  }
   0x3   : > { %p39_p1 = scmp.ge.s32.totalorder %s37_s21, 2  ;;  %p465_p2 = scmp.lt.s32.totalorder %s9682_s20, 3 }
   0x5   : > { %s12879_s21 = smov (%p39_p1, %s37_s21), 0  ;;  %p466_p3 = pnand %p8146_p0, %p465_p2 }
   0x6   : > { %p521_p4 = scmp.lt.s32.totalorder (!%p466_p3), %s9674_s18, 1  ;;  %vm563_vm0 = vcmask (!%p466_p3), 1040384   ;;  %v9171_v0 = vld [vmem:[%s12863_s3] sm:$0xff] (!%p466_p3)   ;;  %v9684_v1 = vmov (!%p466_p3), 0.0   ;;  %vm564_vm1 = vcmask (!%p466_p3), 1041408   ;;  %v9685_v2 = vmov (!%p466_p3), 65535  }
   0x7   : > { %469 = sbr.rel (%p466_p3) target bundleno = 2395 (0x95b), region = 80  ;;  %9077 = vmatprep.subr.bf16.mxu0 (!%p466_p3), %v9684_v1  ;;  %v565_v3 = vsel (!%p466_p3), %vm563_vm0, 4294967295, %v9685_v2  ;;  %9083 = vmatprep.subr.bf16.mxu1 (!%p466_p3), %v9684_v1  ;;  %vm9686_vm2 = vmmov (!%p466_p3), 0   ;;  %v9172_v4 = vld [vmem:[%s12863_s3 + $0x8] sm:$0xff] (!%p466_p3)   ;;  %vm559_vm3 = vcmask (!%p466_p3), 23552   ;;  %v9173_v9 = vld [vmem:[%s12863_s3 + $0x10] sm:$0xff] (!%p466_p3)  }
   0x8   : > { %9079 = vmatprep.mubr.msk.bf16.mxu0 (!%p466_p3), %vm9686_vm2, %v9684_v1  ;;  %9084 = vmatpush3.bf16.msra.mxu1 (!%p466_p3), %v9171_v0  ;;  %v566_v5 = vsel (!%p466_p3), %vm564_vm1, %v565_v3, 0  ;;  %v9174_v10 = vld [vmem:[%s12863_s3 + $0x18] sm:$0xff] (!%p466_p3)   ;;  %v9175_v11 = vld [vmem:[%s12865_s5] sm:$0xff] (!%p466_p3)   ;;  %v9176_v12 = vld [vmem:[%s12865_s5 + $0x8] sm:$0xff] (!%p466_p3)   ;;  %vm653_vm4 = vcmask (!%p466_p3), 523264  }
   0x9   : > { %9085 = vmatprep.subr.bf16.mxu1 (!%p466_p3), %v9684_v1  ;;  %9091 = vmatprep.mubr.msk.bf16.mxu1 (!%p466_p3), %vm9686_vm2, %v9684_v1  ;;  %v8151_v13 = vld [vmem:[%s12862_s2] ss:$0 sm:$0xff] (!%p466_p3)  ;;  %v9177_v23 = vld [vmem:[%s12865_s5 + $0x10] sm:$0xff] (!%p466_p3)   ;;  %v9178_v24 = vld [vmem:[%s12865_s5 + $0x18] sm:$0xff] (!%p466_p3)  }
   0xa   : > { %v787_v25 = vld [vmem:[%s12867_s7] sm:$0xff] (!%p466_p3)  ;;  %v788_v27 = vld [vmem:[%s12867_s7 + $0x8] sm:$0xff] (!%p466_p3) }
   0xb   : > { %v791_v26 = vld [vmem:[%s12867_s7 + $0x20] sm:$0xff] (!%p466_p3)  ;;  %v792_v30 = vld [vmem:[%s12867_s7 + $0x28] sm:$0xff] (!%p466_p3) }
   0xc   : > { %9086 = vmatpush3.bf16.msra.mxu1 (!%p466_p3), %v9172_v4  ;;  %v8166_v28 = vcombine.low (!%p466_p3), %v787_v25, %v791_v26  ;;  %v8167_v29 = vcombine.high (!%p466_p3), %v787_v25, %v791_v26  ;;  %v795_v31 = vld [vmem:[%s12867_s7 + $0x40] sm:$0xff] (!%p466_p3)  ;;  %v8168_v33 = vcombine.low (!%p466_p3), %v788_v27, %v792_v30  ;;  %v8169_v34 = vcombine.high (!%p466_p3), %v788_v27, %v792_v30  ;;  %v796_v60 = vld [vmem:[%s12867_s7 + $0x48] sm:$0xff] (!%p466_p3) }
   0xd   : > { %9087 = vmatprep.subr.bf16.mxu1 (!%p466_p3), %v9684_v1  ;;  %v799_v32 = vld [vmem:[%s12867_s7 + $0x60] sm:$0xff] (!%p466_p3)  ;;  %v800_v61 = vld [vmem:[%s12867_s7 + $0x68] sm:$0xff] (!%p466_p3) }
   0xe   : > { %s12881_s18 = smov (!%p521_p4, %s9674_s18), 1  ;;  %v8175_v35 = vcombine.high %v795_v31, %v799_v32  ;;  %v8174_v36 = vcombine.low %v795_v31, %v799_v32  ;;  %v803_v37 = vld [vmem:[%s12867_s7 + $0x80] sm:$0xff]  ;;  %v804_v2 = vld [vmem:[%s12867_s7 + $0x88] sm:$0xff]  ;;  %v8176_v4 = vcombine.low %v796_v60, %v800_v61 }
   0xf   : > { %s8149_s26 = sshll.u32 %s12881_s18, 1  ;;  %s9064_s30 = sshll.u32 %s12881_s18, 3  ;;  %v807_v38 = vld [vmem:[%s12867_s7 + $0xa0] sm:$0xff]  ;;  %v808_v3 = vld [vmem:[%s12867_s7 + $0xa8] sm:$0xff] }
  0x10   : > { %s533_s29 = scalar_lea.vmem %s12861_s1, %s8149_s26  ;;  %s528_s22 = scalar_lea.vmem %s12860_s0, %s9064_s30  ;;  %9088 = vmatpush3.bf16.msra.mxu1 %v9173_v9  ;;  %v8183_v39 = vcombine.high %v803_v37, %v807_v38  ;;  %v8182_v40 = vcombine.low %v803_v37, %v807_v38  ;;  %v811_v41 = vld [vmem:[%s12867_s7 + $0xc0] sm:$0xff]  ;;  %v848_v31 = vld [vmem:[%s12867_s7 + $0x1e8] sm:$0xff]  ;;  %v790_v37 = vld [vmem:[%s12867_s7 + $0x18] sm:$0xff] }
  0x11   : > { %v546_v6 = vld [vmem:[%s533_s29] sm:$0x3]  ;;  %9089 = vmatprep.subr.bf16.mxu1 %v9684_v1  ;;  %s8150_s16 = sshll.u32 %s12881_s18, 5 }
  0x12   : > { %v568_v7 = vand.u32 %v566_v5, %v546_v6  ;;  %v9170_v8 = vld [vmem:[%s528_s22] sm:$0xff]   ;;  %v8185_v5 = vcombine.high %v804_v2, %v808_v3  ;;  %v812_v6 = vld [vmem:[%s12867_s7 + $0xc8] sm:$0xff]  ;;  %s12473_s30 = scalar_lea.vmem %s12875_s15, %s8150_s16 }
  0x13   : > { %v815_v42 = vld [vmem:[%s12867_s7 + $0xe0] sm:$0xff] }
  0x14   : > { %9078 = vmatpush3.bf16.msra.mxu0 %v568_v7  ;;  %9090 = vmatpush3.bf16.msra.mxu1 %v9174_v10  ;;  %v8191_v43 = vcombine.high %v811_v41, %v815_v42  ;;  %v8190_v44 = vcombine.low %v811_v41, %v815_v42  ;;  %v819_v45 = vld [vmem:[%s12867_s7 + $0x100] sm:$0xff]  ;;  %v816_v7 = vld [vmem:[%s12867_s7 + $0xe8] sm:$0xff] }
  0x15   : > { %9095 = vmatprep.subr.bf16.mxu0 %v9684_v1  ;;  %1213 = vmatprep.subr.bf16.mxu1 %v8167_v29  ;;  %v823_v46 = vld [vmem:[%s12867_s7 + $0x120] sm:$0xff]  ;;  %v8193_v9 = vcombine.high %v812_v6, %v816_v7  ;;  %v820_v10 = vld [vmem:[%s12867_s7 + $0x108] sm:$0xff] }
  0x16   : > { %v8199_v47 = vcombine.high %v819_v45, %v823_v46  ;;  %v8198_v48 = vcombine.low %v819_v45, %v823_v46  ;;  %v827_v49 = vld [vmem:[%s12867_s7 + $0x140] sm:$0xff]  ;;  %v844_v29 = vld [vmem:[%s12867_s7 + $0x1c8] sm:$0xff] }
  0x17   : > { %9080 = vmatmul.mubr.msk.bf16.vlgmr.msra.gmra.mrb[0].mxu0 %vm559_vm3, %v9170_v8  ;;  %v831_v50 = vld [vmem:[%s12867_s7 + $0x160] sm:$0xff]  ;;  %v8184_v8 = vcombine.low %v804_v2, %v808_v3 }
  0x18   : > { %9103 = vmatprep.mubr.msk.bf16.mxu0 %vm9686_vm2, %v9684_v1  ;;  %9096 = vmatpush3.bf16.msra.mxu0 %v9175_v11  ;;  %v8207_v51 = vcombine.high %v827_v49, %v831_v50  ;;  %v8206_v52 = vcombine.low %v827_v49, %v831_v50  ;;  %v8154_v53 = vld [vmem:[%s12864_s4] ss:$0 sm:$0xff]  ;;  %v824_v11 = vld [vmem:[%s12867_s7 + $0x128] sm:$0xff] }
  0x19   : > { %9097 = vmatprep.subr.bf16.mxu0 %v9684_v1  ;;  %v843_v27 = vld [vmem:[%s12867_s7 + $0x1c0] sm:$0xff] }
  0x1c   : > { %9098 = vmatpush3.bf16.msra.mxu0 %v9176_v12  ;;  %v8192_v12 = vcombine.low %v812_v6, %v816_v7  ;;  %v814_v6 = vld [vmem:[%s12867_s7 + $0xd8] sm:$0xff] }
  0x1d   : > { %9099 = vmatprep.subr.bf16.mxu0 %v9684_v1  ;;  %v818_v7 = vld [vmem:[%s12867_s7 + $0xf8] sm:$0xff] }
  0x20   : > { %9100 = vmatpush3.bf16.msra.mxu0 %v9177_v23  ;;  %v840_v23 = vld [vmem:[%s12867_s7 + $0x1a8] sm:$0xff] }
  0x21   : > { %9101 = vmatprep.subr.bf16.mxu0 %v9684_v1  ;;  %v8177_v1 = vcombine.high %v796_v60, %v800_v61  ;;  %v805_v60 = vld [vmem:[%s12867_s7 + $0x90] sm:$0xff] }
  0x22   : > { %v809_v61 = vld [vmem:[%s12867_s7 + $0xb0] sm:$0xff] }
  0x23   : > { %v8187_v2 = vcombine.high %v805_v60, %v809_v61 }
  0x24   : > { %9102 = vmatpush3.bf16.msra.mxu0 %v9178_v24 }
  0x25   : > { %1256 = vmatprep.subr.bf16.mxu0 %v8169_v34  ;;  %v8225_v34 = vcombine.high %v844_v29, %v848_v31 }
  0xea   : > { %v604_v14 = vpop.f32.mrb[0].mxu0 }
  0xeb   : > { %v605_v15 = vadd.f32 %v8151_v13, %v604_v14  ;;  %v9081_v16 = vpop.f32.mrb[1].mxu0  ;;  %v828_v14 = vld [vmem:[%s12867_s7 + $0x148] sm:$0xff] }
  0xec   : > { %v607_v17 = vpop.f32.mrb[2].mxu0  ;;  %v8200_v16 = vcombine.low %v820_v10, %v824_v11 }
  0xed   : > { %v608_v18 = vadd.f32 %v8151_v13, %v607_v17  ;;  %v9082_v19 = vpop.f32.mrb[3].mxu0  ;;  %v611_v20 = vmax.f32 %v605_v15, 0.0  ;;  %v8201_v13 = vcombine.high %v820_v10, %v824_v11  ;;  %v832_v15 = vld [vmem:[%s12867_s7 + $0x168] sm:$0xff]  ;;  %v8197_v11 = vcombine.high %v814_v6, %v818_v7 }
  0xee   : > { %v8209_v17 = vcombine.high %v828_v14, %v832_v15  ;;  %v835_v19 = vld [vmem:[%s12867_s7 + $0x180] sm:$0xff] }
  0xef   : > { %v612_v21 = vmax.f32 %v608_v18, 0.0  ;;  %v8208_v18 = vcombine.low %v828_v14, %v832_v15  ;;  %v822_v14 = vld [vmem:[%s12867_s7 + $0x118] sm:$0xff] }
  0xf0   : > { %v826_v15 = vld [vmem:[%s12867_s7 + $0x138] sm:$0xff] }
  0xf1   : > { %v613_v22 = vpack.c.bf16 %v612_v21, %v611_v20  ;;  %v839_v20 = vld [vmem:[%s12867_s7 + $0x1a0] sm:$0xff]  ;;  %v836_v21 = vld [vmem:[%s12867_s7 + $0x188] sm:$0xff] }
  0xf2   : > { %v8214_v24 = vcombine.low %v835_v19, %v839_v20  ;;  %v8216_v25 = vcombine.low %v836_v21, %v840_v23  ;;  %v8217_v26 = vcombine.high %v836_v21, %v840_v23  ;;  %v833_v21 = vld [vmem:[%s12867_s7 + $0x170] sm:$0xff]  ;;  %v834_v23 = vld [vmem:[%s12867_s7 + $0x178] sm:$0xff] }
  0xf3   : > { %9092 = vmatmul.mubr.msk.bf16.vlgmr.msra.gmra.mrb[0].mxu1 %vm653_vm4, %v613_v22  ;;  %v8215_v22 = vcombine.high %v835_v19, %v839_v20  ;;  %v8205_v19 = vcombine.high %v822_v14, %v826_v15  ;;  %v829_v20 = vld [vmem:[%s12867_s7 + $0x150] sm:$0xff] }
  0xf4   : > { %1214 = vmatpush1.bf16.msra.mxu1 %v8166_v28  ;;  %v847_v28 = vld [vmem:[%s12867_s7 + $0x1e0] sm:$0xff] }
  0xf5   : > { %1215 = vmatprep.subr.bf16.mxu1 %v8175_v35  ;;  %v8223_v30 = vcombine.high %v843_v27, %v847_v28  ;;  %v8222_v32 = vcombine.low %v843_v27, %v847_v28  ;;  %v789_v35 = vld [vmem:[%s12867_s7 + $0x10] sm:$0xff] }
  0xf6   : > { %v837_v28 = vld [vmem:[%s12867_s7 + $0x190] sm:$0xff] }
  0xf8   : > { %1216 = vmatpush1.bf16.msra.mxu1 %v8174_v36  ;;  %v793_v36 = vld [vmem:[%s12867_s7 + $0x30] sm:$0xff] }
  0xf9   : > { %1217 = vmatprep.subr.bf16.mxu1 %v8183_v39  ;;  %v8171_v38 = vcombine.high %v789_v35, %v793_v36  ;;  %v794_v39 = vld [vmem:[%s12867_s7 + $0x38] sm:$0xff] }
  0xfa   : > { %v8172_v41 = vcombine.low %v790_v37, %v794_v39  ;;  %v8173_v42 = vcombine.high %v790_v37, %v794_v39  ;;  %v849_v37 = vld [vmem:[%s12867_s7 + $0x1f0] sm:$0xff]  ;;  %v850_v39 = vld [vmem:[%s12867_s7 + $0x1f8] sm:$0xff] }
  0xfc   : > { %1218 = vmatpush1.bf16.msra.mxu1 %v8182_v40  ;;  %v8170_v40 = vcombine.low %v789_v35, %v793_v36  ;;  %v845_v36 = vld [vmem:[%s12867_s7 + $0x1d0] sm:$0xff] }
  0xfd   : > { %1219 = vmatprep.subr.bf16.mxu1 %v8191_v43  ;;  %v9687_v43 = vmov 0  }
  0xfe   : > { %1245 = vmatprep.mubr.bf16.mxu1 %v9687_v43 }
 0x100   : > { %1220 = vmatpush1.bf16.msra.mxu1 %v8190_v44  ;;  %v8160_v44 = vld [vmem:[%s12866_s6] ss:$0 sm:$0xff] }
 0x101   : > { %1221 = vmatprep.subr.bf16.mxu1 %v8199_v47 }
 0x104   : > { %1222 = vmatpush1.bf16.msra.mxu1 %v8198_v48 }
 0x105   : > { %1223 = vmatprep.subr.bf16.mxu1 %v8207_v51  ;;  %v797_v51 = vld [vmem:[%s12867_s7 + $0x50] sm:$0xff] }
 0x108   : > { %1224 = vmatpush1.bf16.msra.mxu1 %v8206_v52  ;;  %v801_v52 = vld [vmem:[%s12867_s7 + $0x70] sm:$0xff] }
 0x109   : > { %1225 = vmatprep.subr.bf16.mxu1 %v8215_v22  ;;  %v830_v22 = vld [vmem:[%s12867_s7 + $0x158] sm:$0xff] }
 0x10a   : > { %v8213_v27 = vcombine.high %v830_v22, %v834_v23 }
 0x10c   : > { %1226 = vmatpush1.bf16.msra.mxu1 %v8214_v24 }
 0x10d   : > { %1227 = vmatprep.subr.bf16.mxu1 %v8223_v30  ;;  %v838_v30 = vld [vmem:[%s12867_s7 + $0x198] sm:$0xff] }
 0x110   : > { %1228 = vmatpush1.bf16.msra.mxu1 %v8222_v32  ;;  %v8210_v32 = vcombine.low %v829_v20, %v833_v21 }
 0x111   : > { %1299 = vmatprep.subr.bf16.mxu1 %v8171_v38  ;;  %v846_v38 = vld [vmem:[%s12867_s7 + $0x1d8] sm:$0xff] }
 0x1c6   : > { %v691_v54 = vpop.f32.mrb[0].mxu1 }
 0x1c7   : > { %v692_v55 = vadd.f32 %v8154_v53, %v691_v54  ;;  %v9093_v56 = vpop.f32.mrb[1].mxu1  ;;  %v802_v54 = vld [vmem:[%s12867_s7 + $0x78] sm:$0xff] }
 0x1c8   : > { %v694_v57 = vpop.f32.mrb[2].mxu1 }
 0x1c9   : > { %v695_v58 = vadd.f32 %v8154_v53, %v694_v57  ;;  %v9094_v59 = vpop.f32.mrb[3].mxu1  ;;  %v698_v62 = vmax.f32 %v692_v55, 0.0  ;;  %v798_v53 = vld [vmem:[%s12867_s7 + $0x58] sm:$0xff] }
 0x1ca   : > { %v8181_v59 = vcombine.high %v798_v53, %v802_v54 }
 0x1cb   : > { %v699_v63 = vmax.f32 %v695_v58, 0.0  ;;  %v8179_v58 = vcombine.high %v797_v51, %v801_v52 }
 0x1cd   : > { %v700_v0 = vpack.c.bf16 %v699_v63, %v698_v62  ;;  %v806_v62 = vld [vmem:[%s12867_s7 + $0x98] sm:$0xff] }
 0x1ce   : > { %v810_v63 = vld [vmem:[%s12867_s7 + $0xb8] sm:$0xff] }
 0x1cf   : > { %9104 = vmatmul.mubr.msk.bf16.vlgmr.msra.gmra.mrb[4].mxu0 %vm653_vm4, %v700_v0  ;;  %v8178_v0 = vcombine.low %v797_v51, %v801_v52  ;;  %v8189_v3 = vcombine.high %v806_v62, %v810_v63  ;;  %v9190_v51 = vld [vmem:[%s12869_s9 + $0x2c] ss:$16 sps:$4 sm:$0xff]   ;;  %v9185_v52 = vld [vmem:[%s12869_s9 + $0x20] ss:$16 sps:$4 sm:$0xff]  }
 0x1d0   : > { %1257 = vmatpush1.bf16.msra.mxu0 %v8168_v33  ;;  %v8224_v33 = vcombine.low %v844_v29, %v848_v31  ;;  %1288 = vmatprep.mubr.bf16.mxu0 %v9687_v43  ;;  %v841_v29 = vld [vmem:[%s12867_s7 + $0x1b0] sm:$0xff]  ;;  %v842_v31 = vld [vmem:[%s12867_s7 + $0x1b8] sm:$0xff] }
 0x1d1   : > { %1258 = vmatprep.subr.bf16.mxu0 %v8177_v1  ;;  %v8180_v1 = vcombine.low %v798_v53, %v802_v54  ;;  %v8221_v35 = vcombine.high %v838_v30, %v842_v31  ;;  %v9188_v53 = vld [vmem:[%s12869_s9 + $0x28] ss:$16 sps:$4 sm:$0xff]   ;;  %v9193_v54 = vld [vmem:[%s12869_s9 + $0x44] ss:$16 sps:$4 sm:$0xff]  }
 0x1d4   : > { %1259 = vmatpush1.bf16.msra.mxu0 %v8176_v4  ;;  %v813_v4 = vld [vmem:[%s12867_s7 + $0xd0] sm:$0xff] }
 0x1d5   : > { %1260 = vmatprep.subr.bf16.mxu0 %v8185_v5  ;;  %v817_v5 = vld [vmem:[%s12867_s7 + $0xf0] sm:$0xff] }
 0x1d6   : > { %v8195_v10 = vcombine.high %v813_v4, %v817_v5 }
 0x1d8   : > { %1261 = vmatpush1.bf16.msra.mxu0 %v8184_v8  ;;  %v8186_v8 = vcombine.low %v805_v60, %v809_v61  ;;  %v9197_v60 = vld [vmem:[%s12869_s9 + $0x60] ss:$16 sps:$4 sm:$0xff]   ;;  %v9200_v61 = vld [vmem:[%s12869_s9 + $0x68] ss:$16 sps:$4 sm:$0xff]  }
 0x1d9   : > { %1262 = vmatprep.subr.bf16.mxu0 %v8193_v9  ;;  %v8188_v9 = vcombine.low %v806_v62, %v810_v63  ;;  %v9205_v62 = vld [vmem:[%s12869_s9 + $0x84] ss:$16 sps:$4 sm:$0xff]   ;;  %v9208_v63 = vld [vmem:[%s12869_s9 + $0x8c] ss:$16 sps:$4 sm:$0xff]  }
 0x1dc   : > { %1263 = vmatpush1.bf16.msra.mxu0 %v8192_v12  ;;  %v821_v12 = vld [vmem:[%s12867_s7 + $0x110] sm:$0xff] }
 0x1dd   : > { %1264 = vmatprep.subr.bf16.mxu0 %v8201_v13  ;;  %v825_v13 = vld [vmem:[%s12867_s7 + $0x130] sm:$0xff] }
 0x1de   : > { %v8202_v24 = vcombine.low %v821_v12, %v825_v13 }
 0x1e0   : > { %1265 = vmatpush1.bf16.msra.mxu0 %v8200_v16  ;;  %v8194_v16 = vcombine.low %v813_v4, %v817_v5  ;;  %v9209_v4 = vld [vmem:[%s12869_s9 + $0xa0] ss:$16 sps:$4 sm:$0xff]   ;;  %v9212_v5 = vld [vmem:[%s12869_s9 + $0xa8] ss:$16 sps:$4 sm:$0xff]  }
 0x1e1   : > { %1266 = vmatprep.subr.bf16.mxu0 %v8209_v17  ;;  %v8196_v17 = vcombine.low %v814_v6, %v818_v7  ;;  %v9217_v6 = vld [vmem:[%s12869_s9 + $0xc4] ss:$16 sps:$4 sm:$0xff]   ;;  %v9220_v7 = vld [vmem:[%s12869_s9 + $0xcc] ss:$16 sps:$4 sm:$0xff]  }
 0x1e4   : > { %1267 = vmatpush1.bf16.msra.mxu0 %v8208_v18  ;;  %v8203_v18 = vcombine.high %v821_v12, %v825_v13  ;;  %v9224_v12 = vld [vmem:[%s12869_s9 + $0xe8] ss:$16 sps:$4 sm:$0xff]   ;;  %v9226_v13 = vld [vmem:[%s12869_s9 + $0xec] ss:$16 sps:$4 sm:$0xff]  }
 0x1e5   : > { %1268 = vmatprep.subr.bf16.mxu0 %v8217_v26  ;;  %v8211_v26 = vcombine.high %v829_v20, %v833_v21  ;;  %v9233_v20 = vld [vmem:[%s12869_s9 + $0x120] ss:$16 sps:$4 sm:$0xff]   ;;  %v9236_v21 = vld [vmem:[%s12869_s9 + $0x128] ss:$16 sps:$4 sm:$0xff]  }
 0x1e8   : > { %1269 = vmatpush1.bf16.msra.mxu0 %v8216_v25  ;;  %v8204_v25 = vcombine.low %v822_v14, %v826_v15  ;;  %v9229_v14 = vld [vmem:[%s12869_s9 + $0x104] ss:$16 sps:$4 sm:$0xff]   ;;  %v9232_v15 = vld [vmem:[%s12869_s9 + $0x10c] ss:$16 sps:$4 sm:$0xff]  }
 0x1e9   : > { %1270 = vmatprep.subr.bf16.mxu0 %v8225_v34  ;;  %v8219_v34 = vcombine.high %v837_v28, %v841_v29 }
 0x1ec   : > { %1271 = vmatpush1.bf16.msra.mxu0 %v8224_v33  ;;  %v8212_v33 = vcombine.low %v830_v22, %v834_v23  ;;  %v9241_v22 = vld [vmem:[%s12869_s9 + $0x144] ss:$16 sps:$4 sm:$0xff]   ;;  %v9244_v23 = vld [vmem:[%s12869_s9 + $0x14c] ss:$16 sps:$4 sm:$0xff]  }
 0x1ed   : > { %1342 = vmatprep.subr.bf16.mxu0 %v8173_v42  ;;  %v8227_v42 = vcombine.high %v845_v36, %v849_v37 }
 0x2a2   : > { %v777_v45 = vpop.f32.mrb[4].mxu0 }
 0x2a3   : > { %v778_v46 = vadd.f32 %v8160_v44, %v777_v45  ;;  %v9105_v47 = vpop.f32.mrb[5].mxu0  ;;  %v8228_v45 = vcombine.low %v846_v38, %v850_v39 }
 0x2a4   : > { %v780_v48 = vpop.f32.mrb[6].mxu0  ;;  %v9184_v47 = vld [vmem:[%s12869_s9 + $0xc] ss:$16 sps:$4 sm:$0xff]  }
 0x2a5   : > { %v781_v49 = vadd.f32 %v8160_v44, %v780_v48  ;;  %v9106_v50 = vpop.f32.mrb[7].mxu0  ;;  %v784_v55 = vmax.f32 %v778_v46, 0.0  ;;  %v8226_v44 = vcombine.low %v845_v36, %v849_v37  ;;  %v9181_v46 = vld [vmem:[%s12869_s9 + $0x4] ss:$16 sps:$4 sm:$0xff]   ;;  %v9179_v48 = vld [vmem:[%s12869_s9] ss:$16 sps:$4 sm:$0xff]  }
 0x2a6   : > { %v9187_v50 = vld [vmem:[%s12869_s9 + $0x24] ss:$16 sps:$4 sm:$0xff]   ;;  %v9257_v36 = vld [vmem:[%s12869_s9 + $0x1a0] ss:$16 sps:$4 sm:$0xff]   ;;  %v9260_v37 = vld [vmem:[%s12869_s9 + $0x1a8] ss:$16 sps:$4 sm:$0xff]  }
 0x2a7   : > { %v785_v56 = vmax.f32 %v781_v49, 0.0  ;;  %v9182_v49 = vld [vmem:[%s12869_s9 + $0x8] ss:$16 sps:$4 sm:$0xff]  }
 0x2a9   : > { %v9955_v57 = vpack.c.bf16 %v785_v56, %v784_v55  ;;  %v9196_v55 = vld [vmem:[%s12869_s9 + $0x4c] ss:$16 sps:$4 sm:$0xff]   ;;  %v9191_v56 = vld [vmem:[%s12869_s9 + $0x40] ss:$16 sps:$4 sm:$0xff]  }
 0x2ab   : > { %1246 = vmatmul.mubr.bf16.vlgmr.msra.gmra.mrb[4].mxu1 %v9955_v57  ;;  %1289 = vmatmul.mubr.bf16.vlgmr.msra.gmra.mrb[8].mxu0 %v9955_v57 }
 0x2ac   : > { %1300 = vmatpush1.bf16.msra.mxu1 %v8170_v40  ;;  %1343 = vmatpush1.bf16.msra.mxu0 %v8172_v41  ;;  %v8218_v40 = vcombine.low %v837_v28, %v841_v29  ;;  %v8220_v41 = vcombine.low %v838_v30, %v842_v31  ;;  %v9245_v28 = vld [vmem:[%s12869_s9 + $0x160] ss:$16 sps:$4 sm:$0xff]   ;;  %v9248_v29 = vld [vmem:[%s12869_s9 + $0x168] ss:$16 sps:$4 sm:$0xff]   ;;  %v9253_v30 = vld [vmem:[%s12869_s9 + $0x184] ss:$16 sps:$4 sm:$0xff]  }
 0x2ad   : > { %1301 = vmatprep.subr.bf16.mxu1 %v8179_v58  ;;  %1344 = vmatprep.subr.bf16.mxu0 %v8181_v59  ;;  %v9199_v58 = vld [vmem:[%s12869_s9 + $0x64] ss:$16 sps:$4 sm:$0xff]   ;;  %v9202_v59 = vld [vmem:[%s12869_s9 + $0x6c] ss:$16 sps:$4 sm:$0xff]  }
 0x2ae   : > { %1331 = vmatprep.mubr.bf16.mxu1 %v9687_v43  ;;  %1374 = vmatprep.mubr.bf16.mxu0 %v9687_v43  ;;  %v8229_v43 = vcombine.high %v846_v38, %v850_v39  ;;  %v9256_v31 = vld [vmem:[%s12869_s9 + $0x18c] ss:$16 sps:$4 sm:$0xff]   ;;  %v9265_v38 = vld [vmem:[%s12869_s9 + $0x1c4] ss:$16 sps:$4 sm:$0xff]  }
 0x2af   : > { %v9268_v39 = vld [vmem:[%s12869_s9 + $0x1cc] ss:$16 sps:$4 sm:$0xff]  }
 0x2b0   : > { %1302 = vmatpush1.bf16.msra.mxu1 %v8178_v0  ;;  %1345 = vmatpush1.bf16.msra.mxu0 %v8180_v1  ;;  %v9203_v0 = vld [vmem:[%s12869_s9 + $0x80] ss:$16 sps:$4 sm:$0xff]   ;;  %v9206_v1 = vld [vmem:[%s12869_s9 + $0x88] ss:$16 sps:$4 sm:$0xff]  }
 0x2b1   : > { %1303 = vmatprep.subr.bf16.mxu1 %v8187_v2  ;;  %1346 = vmatprep.subr.bf16.mxu0 %v8189_v3  ;;  %v9211_v2 = vld [vmem:[%s12869_s9 + $0xa4] ss:$16 sps:$4 sm:$0xff]   ;;  %v9214_v3 = vld [vmem:[%s12869_s9 + $0xac] ss:$16 sps:$4 sm:$0xff]  }
 0x2b4   : > { %1304 = vmatpush1.bf16.msra.mxu1 %v8186_v8  ;;  %1347 = vmatpush1.bf16.msra.mxu0 %v8188_v9  ;;  %v9215_v8 = vld [vmem:[%s12869_s9 + $0xc0] ss:$16 sps:$4 sm:$0xff]   ;;  %v9218_v9 = vld [vmem:[%s12869_s9 + $0xc8] ss:$16 sps:$4 sm:$0xff]  }
 0x2b5   : > { %1305 = vmatprep.subr.bf16.mxu1 %v8195_v10  ;;  %1348 = vmatprep.subr.bf16.mxu0 %v8197_v11  ;;  %v9223_v10 = vld [vmem:[%s12869_s9 + $0xe4] ss:$16 sps:$4 sm:$0xff]   ;;  %v9221_v11 = vld [vmem:[%s12869_s9 + $0xe0] ss:$16 sps:$4 sm:$0xff]  }
 0x2b8   : > { %1306 = vmatpush1.bf16.msra.mxu1 %v8194_v16  ;;  %1349 = vmatpush1.bf16.msra.mxu0 %v8196_v17  ;;  %v9227_v16 = vld [vmem:[%s12869_s9 + $0x100] ss:$16 sps:$4 sm:$0xff]   ;;  %v9230_v17 = vld [vmem:[%s12869_s9 + $0x108] ss:$16 sps:$4 sm:$0xff]  }
 0x2b9   : > { %1307 = vmatprep.subr.bf16.mxu1 %v8203_v18  ;;  %1350 = vmatprep.subr.bf16.mxu0 %v8205_v19  ;;  %v9235_v18 = vld [vmem:[%s12869_s9 + $0x124] ss:$16 sps:$4 sm:$0xff]   ;;  %v9238_v19 = vld [vmem:[%s12869_s9 + $0x12c] ss:$16 sps:$4 sm:$0xff]  }
 0x2bc   : > { %1308 = vmatpush1.bf16.msra.mxu1 %v8202_v24  ;;  %1351 = vmatpush1.bf16.msra.mxu0 %v8204_v25  ;;  %v9239_v24 = vld [vmem:[%s12869_s9 + $0x140] ss:$16 sps:$4 sm:$0xff]   ;;  %v9242_v25 = vld [vmem:[%s12869_s9 + $0x148] ss:$16 sps:$4 sm:$0xff]  }
 0x2bd   : > { %1309 = vmatprep.subr.bf16.mxu1 %v8211_v26  ;;  %1352 = vmatprep.subr.bf16.mxu0 %v8213_v27  ;;  %v9247_v26 = vld [vmem:[%s12869_s9 + $0x164] ss:$16 sps:$4 sm:$0xff]   ;;  %v9250_v27 = vld [vmem:[%s12869_s9 + $0x16c] ss:$16 sps:$4 sm:$0xff]  }
 0x2c0   : > { %1310 = vmatpush1.bf16.msra.mxu1 %v8210_v32  ;;  %1353 = vmatpush1.bf16.msra.mxu0 %v8212_v33  ;;  %v9251_v32 = vld [vmem:[%s12869_s9 + $0x180] ss:$16 sps:$4 sm:$0xff]   ;;  %v9254_v33 = vld [vmem:[%s12869_s9 + $0x188] ss:$16 sps:$4 sm:$0xff]  }
 0x2c1   : > { %1311 = vmatprep.subr.bf16.mxu1 %v8219_v34  ;;  %1354 = vmatprep.subr.bf16.mxu0 %v8221_v35  ;;  %v9259_v34 = vld [vmem:[%s12869_s9 + $0x1a4] ss:$16 sps:$4 sm:$0xff]   ;;  %v9262_v35 = vld [vmem:[%s12869_s9 + $0x1ac] ss:$16 sps:$4 sm:$0xff]  }
 0x2c4   : > { %1312 = vmatpush1.bf16.msra.mxu1 %v8218_v40  ;;  %1355 = vmatpush1.bf16.msra.mxu0 %v8220_v41  ;;  %v9263_v40 = vld [vmem:[%s12869_s9 + $0x1c0] ss:$16 sps:$4 sm:$0xff]   ;;  %v9266_v41 = vld [vmem:[%s12869_s9 + $0x1c8] ss:$16 sps:$4 sm:$0xff]  }
 0x2c5   : > { %1313 = vmatprep.subr.bf16.mxu1 %v8227_v42  ;;  %1356 = vmatprep.subr.bf16.mxu0 %v8229_v43  ;;  %v9269_v42 = vld [vmem:[%s12869_s9 + $0x1e0] ss:$16 sps:$4 sm:$0xff]   ;;  %v9271_v43 = vld [vmem:[%s12869_s9 + $0x1e4] ss:$16 sps:$4 sm:$0xff]  }
 0x2c8   : > { %1314 = vmatpush1.bf16.msra.mxu1 %v8226_v44  ;;  %1357 = vmatpush1.bf16.msra.mxu0 %v8228_v45  ;;  %v9272_v44 = vld [vmem:[%s12869_s9 + $0x1e8] ss:$16 sps:$4 sm:$0xff]   ;;  %v9274_v45 = vld [vmem:[%s12869_s9 + $0x1ec] ss:$16 sps:$4 sm:$0xff]  }
 0x2c9   : > { %3113 = vmatprep.subr.bf16.mxu1 %v9181_v46  ;;  %3277 = vmatprep.subr.bf16.mxu0 %v9184_v47  ;;  %v9277_v46 = vld [vmem:[%s12869_s9 + $0x204] ss:$16 sps:$4 sm:$0xff]   ;;  %v9280_v47 = vld [vmem:[%s12869_s9 + $0x20c] ss:$16 sps:$4 sm:$0xff]  }
 0x2cb   : > { %1332 = vmatmul.mubr.bf16.vlgmr.msra.gmra.mrb[8].mxu1 %v9955_v57  ;;  %1375 = vmatmul.mubr.bf16.vlgmr.msra.gmra.mrb[12].mxu0 %v9955_v57  ;;  %v9194_v57 = vld [vmem:[%s12869_s9 + $0x48] ss:$16 sps:$4 sm:$0xff]  }
 0x2cc   : > { %3114 = vmatpush1.bf16.msra.mxu1 %v9179_v48  ;;  %3278 = vmatpush1.bf16.msra.mxu0 %v9182_v49  ;;  %v853_v48 = vlaneseq }
 0x2cd   : > { %3115 = vmatprep.subr.bf16.mxu1 %v9187_v50  ;;  %3279 = vmatprep.subr.bf16.mxu0 %v9190_v51 }
 0x2ce   : > { %v10231_v49 = vshrl.u32 %v853_v48, 7 }
 0x2d0   : > { %3116 = vmatpush1.bf16.msra.mxu1 %v9185_v52  ;;  %3280 = vmatpush1.bf16.msra.mxu0 %v9188_v53  ;;  %v10234_v50 = vsub.s32 0, %v10231_v49  ;;  %v10237_v51 = vsub.s32 2, %v10231_v49  ;;  %v10242_v52 = vld [vmem:[%s12868_s8] sm:$0xff]  ;;  %v10245_v53 = vsub.s32 1, %v10231_v49  ;;  %v10264_v48 = vsub.s32 4, %v10231_v49 }
 0x2d1   : > { %3117 = vmatprep.subr.bf16.mxu1 %v9193_v54  ;;  %3281 = vmatprep.subr.bf16.mxu0 %v9196_v55  ;;  %v10248_v54 = vsub.s32 3, %v10231_v49 }
 0x2d2   : > { %v856_v55 = vrot.slane %v10242_v52, %v10234_v50 }
 0x2d4   : > { %3118 = vmatpush1.bf16.msra.mxu1 %v9191_v56  ;;  %3282 = vmatpush1.bf16.msra.mxu0 %v9194_v57  ;;  %v864_v56 = vrot.slane %v10242_v52, %v10237_v51 }
 0x2d5   : > { %3119 = vmatprep.subr.bf16.mxu1 %v9199_v58  ;;  %3283 = vmatprep.subr.bf16.mxu0 %v9202_v59  ;;  %v860_v59 = vrot.slane %v10242_v52, %v10245_v53 }
 0x2d8   : > { %3120 = vmatpush1.bf16.msra.mxu1 %v9197_v60  ;;  %3284 = vmatpush1.bf16.msra.mxu0 %v9200_v61  ;;  %v868_v60 = vrot.slane %v10242_v52, %v10248_v54 }
 0x2d9   : > { %3121 = vmatprep.subr.bf16.mxu1 %v9205_v62  ;;  %3285 = vmatprep.subr.bf16.mxu0 %v9208_v63 }
 0x2dc   : > { %3122 = vmatpush1.bf16.msra.mxu1 %v9203_v0  ;;  %3286 = vmatpush1.bf16.msra.mxu0 %v9206_v1 }
 0x2dd   : > { %3123 = vmatprep.subr.bf16.mxu1 %v9211_v2  ;;  %3287 = vmatprep.subr.bf16.mxu0 %v9214_v3 }
 0x2e0   : > { %3124 = vmatpush1.bf16.msra.mxu1 %v9209_v4  ;;  %3288 = vmatpush1.bf16.msra.mxu0 %v9212_v5 }
 0x2e1   : > { %3125 = vmatprep.subr.bf16.mxu1 %v9217_v6  ;;  %3289 = vmatprep.subr.bf16.mxu0 %v9220_v7 }
 0x2e4   : > { %3126 = vmatpush1.bf16.msra.mxu1 %v9215_v8  ;;  %3290 = vmatpush1.bf16.msra.mxu0 %v9218_v9 }
 0x2e5   : > { %3127 = vmatprep.subr.bf16.mxu1 %v9223_v10  ;;  %3291 = vmatprep.subr.bf16.mxu0 %v9226_v13 }
 0x2e8   : > { %3128 = vmatpush1.bf16.msra.mxu1 %v9221_v11  ;;  %3292 = vmatpush1.bf16.msra.mxu0 %v9224_v12 }
 0x2e9   : > { %3129 = vmatprep.subr.bf16.mxu1 %v9229_v14  ;;  %3293 = vmatprep.subr.bf16.mxu0 %v9232_v15 }
 0x2ec   : > { %3130 = vmatpush1.bf16.msra.mxu1 %v9227_v16  ;;  %3294 = vmatpush1.bf16.msra.mxu0 %v9230_v17 }
 0x2ed   : > { %3131 = vmatprep.subr.bf16.mxu1 %v9235_v18  ;;  %3295 = vmatprep.subr.bf16.mxu0 %v9238_v19 }
 0x2f0   : > { %3132 = vmatpush1.bf16.msra.mxu1 %v9233_v20  ;;  %3296 = vmatpush1.bf16.msra.mxu0 %v9236_v21  ;;  %v9688_v21 = vmov 1966171168  }
 0x2f1   : > { %3133 = vmatprep.subr.bf16.mxu1 %v9241_v22  ;;  %3297 = vmatprep.subr.bf16.mxu0 %v9244_v23  ;;  %v1455_v22 = vunpack.c.l.s4 %v9688_v21 }
 0x2f4   : > { %3134 = vmatpush1.bf16.msra.mxu1 %v9239_v24  ;;  %3298 = vmatpush1.bf16.msra.mxu0 %v9242_v25 }
 0x2f5   : > { %3135 = vmatprep.subr.bf16.mxu1 %v9247_v26  ;;  %3299 = vmatprep.subr.bf16.mxu0 %v9250_v27 }
 0x2f8   : > { %3136 = vmatpush1.bf16.msra.mxu1 %v9245_v28  ;;  %3300 = vmatpush1.bf16.msra.mxu0 %v9248_v29 }
 0x2f9   : > { %3137 = vmatprep.subr.bf16.mxu1 %v9253_v30  ;;  %3301 = vmatprep.subr.bf16.mxu0 %v9256_v31  ;;  %v1456_v31 = vunpack.c.0.s8 %v1455_v22 }
 0x2fc   : > { %3138 = vmatpush1.bf16.msra.mxu1 %v9251_v32  ;;  %3302 = vmatpush1.bf16.msra.mxu0 %v9254_v33 }
 0x2fd   : > { %3139 = vmatprep.subr.bf16.mxu1 %v9259_v34  ;;  %3303 = vmatprep.subr.bf16.mxu0 %v9262_v35 }
 0x300   : > { %3140 = vmatpush1.bf16.msra.mxu1 %v9257_v36  ;;  %3304 = vmatpush1.bf16.msra.mxu0 %v9260_v37 }
 0x301   : > { %3141 = vmatprep.subr.bf16.mxu1 %v9265_v38  ;;  %3305 = vmatprep.subr.bf16.mxu0 %v9268_v39 }
 0x304   : > { %3142 = vmatpush1.bf16.msra.mxu1 %v9263_v40  ;;  %3306 = vmatpush1.bf16.msra.mxu0 %v9266_v41  ;;  %v10259_v40 = vsub.s32 %v1456_v31, %v10231_v49 }
 0x305   : > { %3143 = vmatprep.subr.bf16.mxu1 %v9271_v43  ;;  %3307 = vmatprep.subr.bf16.mxu0 %v9274_v45 }
 0x308   : > { %3144 = vmatpush1.bf16.msra.mxu1 %v9269_v42  ;;  %3308 = vmatpush1.bf16.msra.mxu0 %v9272_v44 }
 0x309   : > { %3154 = vmatprep.subr.bf16.mxu1 %v9277_v46  ;;  %3318 = vmatprep.subr.bf16.mxu0 %v9280_v47 }
 0x37e   : > { %v1247_v57 = vpop.f32.mrb[4].mxu1  ;;  %v1290_v58 = vpop.f32.mrb[8].mxu0 }
 0x37f   : > { %v1249_v61 = vpop.f32.mrb[5].mxu1  ;;  %v1292_v62 = vpop.f32.mrb[9].mxu0  ;;  %v1248_v1 = vadd.f32 %v1247_v57, %v856_v55  ;;  %v1291_v2 = vadd.f32 %v1290_v58, %v864_v56  ;;  %v10273_v57 = vsub.s32 7, %v10231_v49  ;;  %v872_v58 = vrot.slane %v10242_v52, %v10264_v48 }
 0x380   : > { %v1251_v63 = vpop.f32.mrb[6].mxu1  ;;  %v1294_v0 = vpop.f32.mrb[10].mxu0  ;;  %v1250_v7 = vadd.f32 %v1249_v61, %v860_v59  ;;  %v1293_v8 = vadd.f32 %v1292_v62, %v868_v60 }
 0x381   : > { %v1252_v3 = vadd.f32 %v1251_v63, %v856_v55  ;;  %v1295_v4 = vadd.f32 %v1294_v0, %v864_v56  ;;  %v1253_v5 = vpop.f32.mrb[7].mxu1  ;;  %v1296_v6 = vpop.f32.mrb[11].mxu0  ;;  %v10267_v55 = vsub.s32 6, %v10231_v49  ;;  %v10270_v56 = vsub.s32 5, %v10231_v49 }
 0x382   : > { %v1254_v9 = vadd.f32 %v1253_v5, %v860_v59  ;;  %v1297_v10 = vadd.f32 %v1296_v6, %v868_v60  ;;  %v884_v63 = vrot.slane %v10242_v52, %v10273_v57 }
 0x383   : > { %v1386_v11 = vmax.f32 %v1248_v1, %v1252_v3  ;;  %v1400_v12 = vmax.f32 %v1291_v2, %v1295_v4  ;;  %v880_v59 = vrot.slane %v10242_v52, %v10267_v55  ;;  %v876_v62 = vrot.slane %v10242_v52, %v10270_v56 }
 0x384   : > { %v1393_v13 = vmax.f32 %v1250_v7, %v1254_v9  ;;  %v1407_v14 = vmax.f32 %v1293_v8, %v1297_v10 }
 0x385   : > { %v1387_v15 = vrot.slane %v1386_v11, 4  ;;  %v1401_v16 = vrot.slane %v1400_v12, 4 }
 0x386   : > { %v1394_v17 = vrot.slane %v1393_v13, 4  ;;  %v1408_v18 = vrot.slane %v1407_v14, 4 }
 0x387   : > { %v1388_v19 = vmax.f32 %v1386_v11, %v1387_v15  ;;  %v1402_v20 = vmax.f32 %v1400_v12, %v1401_v16 }
 0x388   : > { %v1395_v23 = vmax.f32 %v1393_v13, %v1394_v17  ;;  %v1409_v24 = vmax.f32 %v1407_v14, %v1408_v18 }
 0x389   : > { %v1389_v25 = vrot.slane %v1388_v19, 2  ;;  %v1403_v26 = vrot.slane %v1402_v20, 2 }
 0x38a   : > { %v1396_v27 = vrot.slane %v1395_v23, 2  ;;  %v1410_v28 = vrot.slane %v1409_v24, 2 }
 0x38b   : > { %v1390_v29 = vmax.f32 %v1388_v19, %v1389_v25  ;;  %v1404_v30 = vmax.f32 %v1402_v20, %v1403_v26 }
 0x38c   : > { %v1397_v32 = vmax.f32 %v1395_v23, %v1396_v27  ;;  %v1411_v33 = vmax.f32 %v1409_v24, %v1410_v28 }
 0x38d   : > { %v1391_v34 = vrot.slane %v1390_v29, 1  ;;  %v1405_v35 = vrot.slane %v1404_v30, 1 }
 0x38e   : > { %v1398_v36 = vrot.slane %v1397_v32, 1  ;;  %v1412_v37 = vrot.slane %v1411_v33, 1 }
 0x38f   : > { %v1392_v38 = vmax.f32 %v1390_v29, %v1391_v34  ;;  %v1406_v39 = vmax.f32 %v1404_v30, %v1405_v35 }
 0x390   : > { %v1399_v41 = vmax.f32 %v1397_v32, %v1398_v36  ;;  %v1413_v42 = vmax.f32 %v1411_v33, %v1412_v37 }
 0x392   : > { %v1450_v43 = vcombine.low %v1392_v38, %v1399_v41  ;;  %v1451_v44 = vcombine.low %v1406_v39, %v1413_v42 }
 0x394   : > { %v1460_v45 = vrot.slane %v1450_v43, %v10259_v40  ;;  %v1467_v46 = vrot.slane %v1451_v44, %v10259_v40 }
 0x396   : > { %v1482_v47 = vcombine.low %v1460_v45, %v1467_v46 }
 0x398   : > { %v1490_v46 = vrot.slane %v1482_v47, %v10259_v40  ;;  %v9278_v47 = vld [vmem:[%s12869_s9 + $0x208] ss:$16 sps:$4 sm:$0xff]  }
 0x39e   : > { %v1333_v60 = vpop.f32.mrb[8].mxu1  ;;  %v1376_v61 = vpop.f32.mrb[12].mxu0 }
 0x39f   : > { %v1335_v0 = vpop.f32.mrb[9].mxu1  ;;  %v1378_v1 = vpop.f32.mrb[13].mxu0  ;;  %v1334_v49 = vadd.f32 %v1333_v60, %v872_v58  ;;  %v1377_v4 = vadd.f32 %v1376_v61, %v880_v59 }
 0x3a0   : > { %v1337_v2 = vpop.f32.mrb[10].mxu1  ;;  %v1380_v3 = vpop.f32.mrb[14].mxu0  ;;  %v1336_v9 = vadd.f32 %v1335_v0, %v876_v62  ;;  %v1379_v10 = vadd.f32 %v1378_v1, %v884_v63  ;;  %v9275_v0 = vld [vmem:[%s12869_s9 + $0x200] ss:$16 sps:$4 sm:$0xff]  }
 0x3a1   : > { %v1338_v5 = vadd.f32 %v1337_v2, %v872_v58  ;;  %v1381_v6 = vadd.f32 %v1380_v3, %v880_v59  ;;  %v1339_v7 = vpop.f32.mrb[11].mxu1  ;;  %v1382_v8 = vpop.f32.mrb[15].mxu0  ;;  %v9283_v2 = vld [vmem:[%s12869_s9 + $0x224] ss:$16 sps:$4 sm:$0xff]   ;;  %v9286_v3 = vld [vmem:[%s12869_s9 + $0x22c] ss:$16 sps:$4 sm:$0xff]  }
 0x3a2   : > { %v1340_v11 = vadd.f32 %v1339_v7, %v876_v62  ;;  %v1383_v12 = vadd.f32 %v1382_v8, %v884_v63  ;;  %v9292_v7 = vld [vmem:[%s12869_s9 + $0x24c] ss:$16 sps:$4 sm:$0xff]   ;;  %v9287_v8 = vld [vmem:[%s12869_s9 + $0x240] ss:$16 sps:$4 sm:$0xff]  }
 0x3a3   : > { %v1414_v13 = vmax.f32 %v1334_v49, %v1338_v5  ;;  %v1428_v14 = vmax.f32 %v1377_v4, %v1381_v6  ;;  %v9281_v4 = vld [vmem:[%s12869_s9 + $0x220] ss:$16 sps:$4 sm:$0xff]   ;;  %v9284_v5 = vld [vmem:[%s12869_s9 + $0x228] ss:$16 sps:$4 sm:$0xff]   ;;  %v9289_v6 = vld [vmem:[%s12869_s9 + $0x244] ss:$16 sps:$4 sm:$0xff]  }
 0x3a4   : > { %v1421_v15 = vmax.f32 %v1336_v9, %v1340_v11  ;;  %v1435_v16 = vmax.f32 %v1379_v10, %v1383_v12  ;;  %v9290_v9 = vld [vmem:[%s12869_s9 + $0x248] ss:$16 sps:$4 sm:$0xff]   ;;  %v9295_v10 = vld [vmem:[%s12869_s9 + $0x264] ss:$16 sps:$4 sm:$0xff]   ;;  %v9298_v11 = vld [vmem:[%s12869_s9 + $0x26c] ss:$16 sps:$4 sm:$0xff]  }
 0x3a5   : > { %v1415_v17 = vrot.slane %v1414_v13, 4  ;;  %v1429_v52 = vrot.slane %v1428_v14, 4  ;;  %v9293_v12 = vld [vmem:[%s12869_s9 + $0x260] ss:$16 sps:$4 sm:$0xff]  }
 0x3a6   : > { %v1422_v18 = vrot.slane %v1421_v15, 4  ;;  %v1436_v19 = vrot.slane %v1435_v16, 4 }
 0x3a7   : > { %v1416_v20 = vmax.f32 %v1414_v13, %v1415_v17  ;;  %v1430_v21 = vmax.f32 %v1428_v14, %v1429_v52  ;;  %v9296_v13 = vld [vmem:[%s12869_s9 + $0x268] ss:$16 sps:$4 sm:$0xff]   ;;  %v9301_v14 = vld [vmem:[%s12869_s9 + $0x284] ss:$16 sps:$4 sm:$0xff]  }
 0x3a8   : > { %v1423_v22 = vmax.f32 %v1421_v15, %v1422_v18  ;;  %v1437_v23 = vmax.f32 %v1435_v16, %v1436_v19  ;;  %v9304_v15 = vld [vmem:[%s12869_s9 + $0x28c] ss:$16 sps:$4 sm:$0xff]   ;;  %v9299_v16 = vld [vmem:[%s12869_s9 + $0x280] ss:$16 sps:$4 sm:$0xff]   ;;  %v9302_v17 = vld [vmem:[%s12869_s9 + $0x288] ss:$16 sps:$4 sm:$0xff]  }
 0x3a9   : > { %v1417_v24 = vrot.slane %v1416_v20, 2  ;;  %v1431_v25 = vrot.slane %v1430_v21, 2  ;;  %v9307_v52 = vld [vmem:[%s12869_s9 + $0x2a4] ss:$16 sps:$4 sm:$0xff]   ;;  %v9310_v18 = vld [vmem:[%s12869_s9 + $0x2ac] ss:$16 sps:$4 sm:$0xff]  }
 0x3aa   : > { %v1424_v26 = vrot.slane %v1423_v22, 2  ;;  %v1438_v27 = vrot.slane %v1437_v23, 2  ;;  %v9305_v19 = vld [vmem:[%s12869_s9 + $0x2a0] ss:$16 sps:$4 sm:$0xff]  }
 0x3ab   : > { %v1418_v28 = vmax.f32 %v1416_v20, %v1417_v24  ;;  %v1432_v29 = vmax.f32 %v1430_v21, %v1431_v25  ;;  %v9308_v20 = vld [vmem:[%s12869_s9 + $0x2a8] ss:$16 sps:$4 sm:$0xff]   ;;  %v9313_v21 = vld [vmem:[%s12869_s9 + $0x2c4] ss:$16 sps:$4 sm:$0xff]  }
 0x3ac   : > { %v1425_v30 = vmax.f32 %v1423_v22, %v1424_v26  ;;  %v1439_v31 = vmax.f32 %v1437_v23, %v1438_v27  ;;  %v9316_v22 = vld [vmem:[%s12869_s9 + $0x2cc] ss:$16 sps:$4 sm:$0xff]   ;;  %v9311_v23 = vld [vmem:[%s12869_s9 + $0x2c0] ss:$16 sps:$4 sm:$0xff]   ;;  %v9314_v24 = vld [vmem:[%s12869_s9 + $0x2c8] ss:$16 sps:$4 sm:$0xff]  }
 0x3ad   : > { %v1419_v32 = vrot.slane %v1418_v28, 1  ;;  %v1433_v33 = vrot.slane %v1432_v29, 1  ;;  %v9319_v25 = vld [vmem:[%s12869_s9 + $0x2e4] ss:$16 sps:$4 sm:$0xff]   ;;  %v9322_v26 = vld [vmem:[%s12869_s9 + $0x2ec] ss:$16 sps:$4 sm:$0xff]  }
 0x3ae   : > { %v1426_v34 = vrot.slane %v1425_v30, 1  ;;  %v1440_v35 = vrot.slane %v1439_v31, 1  ;;  %v9317_v27 = vld [vmem:[%s12869_s9 + $0x2e0] ss:$16 sps:$4 sm:$0xff]  }
 0x3af   : > { %v1420_v36 = vmax.f32 %v1418_v28, %v1419_v32  ;;  %v1434_v37 = vmax.f32 %v1432_v29, %v1433_v33  ;;  %v9320_v28 = vld [vmem:[%s12869_s9 + $0x2e8] ss:$16 sps:$4 sm:$0xff]   ;;  %v9325_v29 = vld [vmem:[%s12869_s9 + $0x304] ss:$16 sps:$4 sm:$0xff]  }
 0x3b0   : > { %v1427_v38 = vmax.f32 %v1425_v30, %v1426_v34  ;;  %v1441_v39 = vmax.f32 %v1439_v31, %v1440_v35  ;;  %v9328_v30 = vld [vmem:[%s12869_s9 + $0x30c] ss:$16 sps:$4 sm:$0xff]   ;;  %v9323_v31 = vld [vmem:[%s12869_s9 + $0x300] ss:$16 sps:$4 sm:$0xff]   ;;  %v9326_v32 = vld [vmem:[%s12869_s9 + $0x308] ss:$16 sps:$4 sm:$0xff]  }
 0x3b1   : > { %v9331_v33 = vld [vmem:[%s12869_s9 + $0x324] ss:$16 sps:$4 sm:$0xff]   ;;  %v9334_v34 = vld [vmem:[%s12869_s9 + $0x32c] ss:$16 sps:$4 sm:$0xff]   ;;  %v9329_v35 = vld [vmem:[%s12869_s9 + $0x320] ss:$16 sps:$4 sm:$0xff]  }
 0x3b2   : > { %v1452_v41 = vcombine.low %v1420_v36, %v1427_v38  ;;  %v1453_v42 = vcombine.low %v1434_v37, %v1441_v39  ;;  %v9332_v36 = vld [vmem:[%s12869_s9 + $0x328] ss:$16 sps:$4 sm:$0xff]   ;;  %v9337_v37 = vld [vmem:[%s12869_s9 + $0x344] ss:$16 sps:$4 sm:$0xff]   ;;  %v9340_v38 = vld [vmem:[%s12869_s9 + $0x34c] ss:$16 sps:$4 sm:$0xff]  }
 0x3b3   : > { %v9335_v39 = vld [vmem:[%s12869_s9 + $0x340] ss:$16 sps:$4 sm:$0xff]  }
 0x3b4   : > { %v1474_v43 = vrot.slane %v1452_v41, %v10259_v40  ;;  %v1481_v44 = vrot.slane %v1453_v42, %v10259_v40  ;;  %v9338_v41 = vld [vmem:[%s12869_s9 + $0x348] ss:$16 sps:$4 sm:$0xff]   ;;  %v9343_v42 = vld [vmem:[%s12869_s9 + $0x364] ss:$16 sps:$4 sm:$0xff]  }
 0x3b6   : > { %v1483_v45 = vcombine.low %v1474_v43, %v1481_v44  ;;  %v9346_v43 = vld [vmem:[%s12869_s9 + $0x36c] ss:$16 sps:$4 sm:$0xff]   ;;  %v9341_v44 = vld [vmem:[%s12869_s9 + $0x360] ss:$16 sps:$4 sm:$0xff]  }
 0x3b8   : > { %v1497_v58 = vrot.slane %v1483_v45, %v10259_v40  ;;  %v9344_v45 = vld [vmem:[%s12869_s9 + $0x368] ss:$16 sps:$4 sm:$0xff]  }
 0x3ba   : > { %v10287_v59 = vcombine.low %v1490_v46, %v1497_v58  ;;  %v9349_v46 = vld [vmem:[%s12869_s9 + $0x384] ss:$16 sps:$4 sm:$0xff]   ;;  %v9352_v58 = vld [vmem:[%s12869_s9 + $0x38c] ss:$16 sps:$4 sm:$0xff]  }
 0x3bc   : > { %v1514_v60 = vrot.slane %v10287_v59, %v10245_v53  ;;  %v1510_v61 = vrot.slane %v10287_v59, %v10234_v50  ;;  %v1522_v62 = vrot.slane %v10287_v59, %v10248_v54 }
 0x3be   : > { %v1548_v63 = vpack.c.bf16 %v1514_v60, %v1514_v60  ;;  %v1547_v1 = vpack.c.bf16 %v1510_v61, %v1510_v61  ;;  %v1550_v49 = vpack.c.bf16 %v1522_v62, %v1522_v62  ;;  %v9347_v60 = vld [vmem:[%s12869_s9 + $0x380] ss:$16 sps:$4 sm:$0xff]   ;;  %v9350_v61 = vld [vmem:[%s12869_s9 + $0x388] ss:$16 sps:$4 sm:$0xff]   ;;  %v9355_v62 = vld [vmem:[%s12869_s9 + $0x3a4] ss:$16 sps:$4 sm:$0xff]  }
 0x3c0   : > { %3145 = vmatprep.mubr.bf16.mxu1 %v1548_v63  ;;  %3309 = vmatprep.mubr.bf16.mxu0 %v1548_v63  ;;  %v9358_v63 = vld [vmem:[%s12869_s9 + $0x3ac] ss:$16 sps:$4 sm:$0xff]  }
 0x3c1   : > { %3146 = vmatmul.mubr.bf16.vlgmr.msra.gmra.mrb[12].mxu1 %v1547_v1  ;;  %3310 = vmatmul.mubr.bf16.vlgmr.msra.gmra.mrb[16].mxu0 %v1547_v1  ;;  %v9361_v1 = vld [vmem:[%s12869_s9 + $0x3c4] ss:$16 sps:$4 sm:$0xff]  }
 0x3c2   : > { %3155 = vmatpush1.bf16.msra.mxu1 %v9275_v0  ;;  %3319 = vmatpush1.bf16.msra.mxu0 %v9278_v47  ;;  %v9353_v0 = vld [vmem:[%s12869_s9 + $0x3a0] ss:$16 sps:$4 sm:$0xff]   ;;  %v9356_v47 = vld [vmem:[%s12869_s9 + $0x3a8] ss:$16 sps:$4 sm:$0xff]  }
 0x3c3   : > { %3186 = vmatprep.mubr.bf16.mxu1 %v1550_v49  ;;  %3350 = vmatprep.mubr.bf16.mxu0 %v1550_v49  ;;  %v9362_v49 = vld [vmem:[%s12869_s9 + $0x3c8] ss:$16 sps:$4 sm:$0xff]  }
 0x3c4   : > { %3156 = vmatprep.subr.bf16.mxu1 %v9283_v2  ;;  %3320 = vmatprep.subr.bf16.mxu0 %v9286_v3  ;;  %v9364_v2 = vld [vmem:[%s12869_s9 + $0x3cc] ss:$16 sps:$4 sm:$0xff]   ;;  %v9359_v3 = vld [vmem:[%s12869_s9 + $0x3c0] ss:$16 sps:$4 sm:$0xff]  }
 0x3c6   : > { %3157 = vmatpush1.bf16.msra.mxu1 %v9281_v4  ;;  %3321 = vmatpush1.bf16.msra.mxu0 %v9284_v5  ;;  %v9367_v4 = vld [vmem:[%s12869_s9 + $0x3e4] ss:$16 sps:$4 sm:$0xff]   ;;  %v9370_v5 = vld [vmem:[%s12869_s9 + $0x3ec] ss:$16 sps:$4 sm:$0xff]  }
 0x3c7   : > { %3158 = vmatprep.subr.bf16.mxu1 %v9289_v6  ;;  %3322 = vmatprep.subr.bf16.mxu0 %v9292_v7  ;;  %v9365_v6 = vld [vmem:[%s12869_s9 + $0x3e0] ss:$16 sps:$4 sm:$0xff]   ;;  %v9368_v7 = vld [vmem:[%s12869_s9 + $0x3e8] ss:$16 sps:$4 sm:$0xff]  }
 0x3ca   : > { %3159 = vmatpush1.bf16.msra.mxu1 %v9287_v8  ;;  %3323 = vmatpush1.bf16.msra.mxu0 %v9290_v9  ;;  %v1518_v8 = vrot.slane %v10287_v59, %v10237_v51  ;;  %v9373_v9 = vld [vmem:[%s12869_s9 + $0x404] ss:$16 sps:$4 sm:$0xff]  }
 0x3cb   : > { %3160 = vmatprep.subr.bf16.mxu1 %v9295_v10  ;;  %3324 = vmatprep.subr.bf16.mxu0 %v9298_v11  ;;  %v9376_v10 = vld [vmem:[%s12869_s9 + $0x40c] ss:$16 sps:$4 sm:$0xff]   ;;  %v1530_v11 = vrot.slane %v10287_v59, %v10270_v56 }
 0x3ce   : > { %3161 = vmatpush1.bf16.msra.mxu1 %v9293_v12  ;;  %3325 = vmatpush1.bf16.msra.mxu0 %v9296_v13  ;;  %v9371_v12 = vld [vmem:[%s12869_s9 + $0x400] ss:$16 sps:$4 sm:$0xff]   ;;  %v1549_v13 = vpack.c.bf16 %v1518_v8, %v1518_v8 }
 0x3cf   : > { %3162 = vmatprep.subr.bf16.mxu1 %v9301_v14  ;;  %3326 = vmatprep.subr.bf16.mxu0 %v9304_v15  ;;  %v9374_v14 = vld [vmem:[%s12869_s9 + $0x408] ss:$16 sps:$4 sm:$0xff]   ;;  %v1552_v15 = vpack.c.bf16 %v1530_v11, %v1530_v11  ;;  %v9443_v8 = vld [vmem:[%s12869_s9 + $0x580] ss:$16 sps:$4 sm:$0xff]   ;;  %v9454_v11 = vld [vmem:[%s12869_s9 + $0x5ac] ss:$16 sps:$4 sm:$0xff]  }
 0x3d2   : > { %3163 = vmatpush1.bf16.msra.mxu1 %v9299_v16  ;;  %3327 = vmatpush1.bf16.msra.mxu0 %v9302_v17  ;;  %v9379_v16 = vld [vmem:[%s12869_s9 + $0x424] ss:$16 sps:$4 sm:$0xff]   ;;  %v9382_v17 = vld [vmem:[%s12869_s9 + $0x42c] ss:$16 sps:$4 sm:$0xff]  }
 0x3d3   : > { %3164 = vmatprep.subr.bf16.mxu1 %v9307_v52  ;;  %3328 = vmatprep.subr.bf16.mxu0 %v9310_v18  ;;  %v9377_v52 = vld [vmem:[%s12869_s9 + $0x420] ss:$16 sps:$4 sm:$0xff]   ;;  %v9380_v18 = vld [vmem:[%s12869_s9 + $0x428] ss:$16 sps:$4 sm:$0xff]  }
 0x3d6   : > { %3165 = vmatpush1.bf16.msra.mxu1 %v9305_v19  ;;  %3329 = vmatpush1.bf16.msra.mxu0 %v9308_v20  ;;  %v9385_v19 = vld [vmem:[%s12869_s9 + $0x444] ss:$16 sps:$4 sm:$0xff]   ;;  %v9388_v20 = vld [vmem:[%s12869_s9 + $0x44c] ss:$16 sps:$4 sm:$0xff]  }
 0x3d7   : > { %3166 = vmatprep.subr.bf16.mxu1 %v9313_v21  ;;  %3330 = vmatprep.subr.bf16.mxu0 %v9316_v22  ;;  %v9383_v21 = vld [vmem:[%s12869_s9 + $0x440] ss:$16 sps:$4 sm:$0xff]   ;;  %v9386_v22 = vld [vmem:[%s12869_s9 + $0x448] ss:$16 sps:$4 sm:$0xff]  }
 0x3da   : > { %3167 = vmatpush1.bf16.msra.mxu1 %v9311_v23  ;;  %3331 = vmatpush1.bf16.msra.mxu0 %v9314_v24  ;;  %v9391_v23 = vld [vmem:[%s12869_s9 + $0x464] ss:$16 sps:$4 sm:$0xff]   ;;  %v9394_v24 = vld [vmem:[%s12869_s9 + $0x46c] ss:$16 sps:$4 sm:$0xff]  }
 0x3db   : > { %3168 = vmatprep.subr.bf16.mxu1 %v9319_v25  ;;  %3332 = vmatprep.subr.bf16.mxu0 %v9322_v26  ;;  %v9389_v25 = vld [vmem:[%s12869_s9 + $0x460] ss:$16 sps:$4 sm:$0xff]   ;;  %v9392_v26 = vld [vmem:[%s12869_s9 + $0x468] ss:$16 sps:$4 sm:$0xff]  }
 0x3de   : > { %3169 = vmatpush1.bf16.msra.mxu1 %v9317_v27  ;;  %3333 = vmatpush1.bf16.msra.mxu0 %v9320_v28  ;;  %v9397_v27 = vld [vmem:[%s12869_s9 + $0x484] ss:$16 sps:$4 sm:$0xff]   ;;  %v9400_v28 = vld [vmem:[%s12869_s9 + $0x48c] ss:$16 sps:$4 sm:$0xff]  }
 0x3df   : > { %3170 = vmatprep.subr.bf16.mxu1 %v9325_v29  ;;  %3334 = vmatprep.subr.bf16.mxu0 %v9328_v30  ;;  %v9395_v29 = vld [vmem:[%s12869_s9 + $0x480] ss:$16 sps:$4 sm:$0xff]   ;;  %v9398_v30 = vld [vmem:[%s12869_s9 + $0x488] ss:$16 sps:$4 sm:$0xff]  }
 0x3e2   : > { %3171 = vmatpush1.bf16.msra.mxu1 %v9323_v31  ;;  %3335 = vmatpush1.bf16.msra.mxu0 %v9326_v32  ;;  %v9403_v31 = vld [vmem:[%s12869_s9 + $0x4a4] ss:$16 sps:$4 sm:$0xff]   ;;  %v9406_v32 = vld [vmem:[%s12869_s9 + $0x4ac] ss:$16 sps:$4 sm:$0xff]  }
 0x3e3   : > { %3172 = vmatprep.subr.bf16.mxu1 %v9331_v33  ;;  %3336 = vmatprep.subr.bf16.mxu0 %v9334_v34  ;;  %v9401_v33 = vld [vmem:[%s12869_s9 + $0x4a0] ss:$16 sps:$4 sm:$0xff]   ;;  %v9404_v34 = vld [vmem:[%s12869_s9 + $0x4a8] ss:$16 sps:$4 sm:$0xff]  }
 0x3e6   : > { %3173 = vmatpush1.bf16.msra.mxu1 %v9329_v35  ;;  %3337 = vmatpush1.bf16.msra.mxu0 %v9332_v36  ;;  %v9409_v35 = vld [vmem:[%s12869_s9 + $0x4c4] ss:$16 sps:$4 sm:$0xff]   ;;  %v9412_v36 = vld [vmem:[%s12869_s9 + $0x4cc] ss:$16 sps:$4 sm:$0xff]  }
 0x3e7   : > { %3174 = vmatprep.subr.bf16.mxu1 %v9337_v37  ;;  %3338 = vmatprep.subr.bf16.mxu0 %v9340_v38  ;;  %v9407_v37 = vld [vmem:[%s12869_s9 + $0x4c0] ss:$16 sps:$4 sm:$0xff]   ;;  %v9410_v38 = vld [vmem:[%s12869_s9 + $0x4c8] ss:$16 sps:$4 sm:$0xff]  }
 0x3ea   : > { %3175 = vmatpush1.bf16.msra.mxu1 %v9335_v39  ;;  %3339 = vmatpush1.bf16.msra.mxu0 %v9338_v41  ;;  %v9415_v39 = vld [vmem:[%s12869_s9 + $0x4e4] ss:$16 sps:$4 sm:$0xff]   ;;  %v9418_v41 = vld [vmem:[%s12869_s9 + $0x4ec] ss:$16 sps:$4 sm:$0xff]  }
 0x3eb   : > { %3176 = vmatprep.subr.bf16.mxu1 %v9343_v42  ;;  %3340 = vmatprep.subr.bf16.mxu0 %v9346_v43  ;;  %v9413_v42 = vld [vmem:[%s12869_s9 + $0x4e0] ss:$16 sps:$4 sm:$0xff]   ;;  %v9416_v43 = vld [vmem:[%s12869_s9 + $0x4e8] ss:$16 sps:$4 sm:$0xff]  }
 0x3ee   : > { %3177 = vmatpush1.bf16.msra.mxu1 %v9341_v44  ;;  %3341 = vmatpush1.bf16.msra.mxu0 %v9344_v45  ;;  %v9421_v44 = vld [vmem:[%s12869_s9 + $0x504] ss:$16 sps:$4 sm:$0xff]   ;;  %v9424_v45 = vld [vmem:[%s12869_s9 + $0x50c] ss:$16 sps:$4 sm:$0xff]  }
 0x3ef   : > { %3178 = vmatprep.subr.bf16.mxu1 %v9349_v46  ;;  %3342 = vmatprep.subr.bf16.mxu0 %v9352_v58  ;;  %v9419_v46 = vld [vmem:[%s12869_s9 + $0x500] ss:$16 sps:$4 sm:$0xff]   ;;  %v9422_v58 = vld [vmem:[%s12869_s9 + $0x508] ss:$16 sps:$4 sm:$0xff]  }
 0x3f2   : > { %3179 = vmatpush1.bf16.msra.mxu1 %v9347_v60  ;;  %3343 = vmatpush1.bf16.msra.mxu0 %v9350_v61  ;;  %v9427_v60 = vld [vmem:[%s12869_s9 + $0x524] ss:$16 sps:$4 sm:$0xff]   ;;  %v9430_v61 = vld [vmem:[%s12869_s9 + $0x52c] ss:$16 sps:$4 sm:$0xff]  }
 0x3f3   : > { %3180 = vmatprep.subr.bf16.mxu1 %v9355_v62  ;;  %3344 = vmatprep.subr.bf16.mxu0 %v9358_v63  ;;  %v9425_v62 = vld [vmem:[%s12869_s9 + $0x520] ss:$16 sps:$4 sm:$0xff]   ;;  %v9428_v63 = vld [vmem:[%s12869_s9 + $0x528] ss:$16 sps:$4 sm:$0xff]  }
 0x3f6   : > { %3181 = vmatpush1.bf16.msra.mxu1 %v9353_v0  ;;  %3345 = vmatpush1.bf16.msra.mxu0 %v9356_v47  ;;  %v9433_v0 = vld [vmem:[%s12869_s9 + $0x544] ss:$16 sps:$4 sm:$0xff]   ;;  %v9436_v47 = vld [vmem:[%s12869_s9 + $0x54c] ss:$16 sps:$4 sm:$0xff]  }
 0x3f7   : > { %3182 = vmatprep.subr.bf16.mxu1 %v9361_v1  ;;  %3346 = vmatprep.subr.bf16.mxu0 %v9364_v2  ;;  %v9431_v1 = vld [vmem:[%s12869_s9 + $0x540] ss:$16 sps:$4 sm:$0xff]   ;;  %v9434_v2 = vld [vmem:[%s12869_s9 + $0x548] ss:$16 sps:$4 sm:$0xff]  }
 0x3fa   : > { %3183 = vmatpush1.bf16.msra.mxu1 %v9359_v3  ;;  %3347 = vmatpush1.bf16.msra.mxu0 %v9362_v49  ;;  %v9439_v3 = vld [vmem:[%s12869_s9 + $0x564] ss:$16 sps:$4 sm:$0xff]   ;;  %v9442_v49 = vld [vmem:[%s12869_s9 + $0x56c] ss:$16 sps:$4 sm:$0xff]  }
 0x3fb   : > { %3184 = vmatprep.subr.bf16.mxu1 %v9367_v4  ;;  %3348 = vmatprep.subr.bf16.mxu0 %v9370_v5  ;;  %v9437_v4 = vld [vmem:[%s12869_s9 + $0x560] ss:$16 sps:$4 sm:$0xff]   ;;  %v9440_v5 = vld [vmem:[%s12869_s9 + $0x568] ss:$16 sps:$4 sm:$0xff]  }
 0x3fe   : > { %3185 = vmatpush1.bf16.msra.mxu1 %v9365_v6  ;;  %3349 = vmatpush1.bf16.msra.mxu0 %v9368_v7  ;;  %v9445_v6 = vld [vmem:[%s12869_s9 + $0x584] ss:$16 sps:$4 sm:$0xff]   ;;  %v9448_v7 = vld [vmem:[%s12869_s9 + $0x58c] ss:$16 sps:$4 sm:$0xff]  }
 0x3ff   : > { %3195 = vmatprep.subr.bf16.mxu1 %v9373_v9  ;;  %3359 = vmatprep.subr.bf16.mxu0 %v9376_v10  ;;  %v9446_v9 = vld [vmem:[%s12869_s9 + $0x588] ss:$16 sps:$4 sm:$0xff]   ;;  %v9451_v10 = vld [vmem:[%s12869_s9 + $0x5a4] ss:$16 sps:$4 sm:$0xff]  }
 0x401   : > { %3187 = vmatmul.mubr.bf16.vlgmr.msra.gmra.mrb[12].mxu1 %v1549_v13  ;;  %3351 = vmatmul.mubr.bf16.vlgmr.msra.gmra.mrb[16].mxu0 %v1549_v13  ;;  %v9452_v13 = vld [vmem:[%s12869_s9 + $0x5a8] ss:$16 sps:$4 sm:$0xff]  }
 0x402   : > { %3196 = vmatpush1.bf16.msra.mxu1 %v9371_v12  ;;  %3227 = vmatprep.mubr.bf16.mxu1 %v1552_v15  ;;  %v9449_v12 = vld [vmem:[%s12869_s9 + $0x5a0] ss:$16 sps:$4 sm:$0xff]  }
 0x403   : > { %3360 = vmatpush1.bf16.msra.mxu0 %v9374_v14  ;;  %3391 = vmatprep.mubr.bf16.mxu0 %v1552_v15  ;;  %v9457_v14 = vld [vmem:[%s12869_s9 + $0x5c4] ss:$16 sps:$4 sm:$0xff]   ;;  %v9460_v15 = vld [vmem:[%s12869_s9 + $0x5cc] ss:$16 sps:$4 sm:$0xff]  }
 0x404   : > { %3197 = vmatprep.subr.bf16.mxu1 %v9379_v16  ;;  %3361 = vmatprep.subr.bf16.mxu0 %v9382_v17  ;;  %v9455_v16 = vld [vmem:[%s12869_s9 + $0x5c0] ss:$16 sps:$4 sm:$0xff]   ;;  %v9458_v17 = vld [vmem:[%s12869_s9 + $0x5c8] ss:$16 sps:$4 sm:$0xff]  }
 0x406   : > { %3198 = vmatpush1.bf16.msra.mxu1 %v9377_v52  ;;  %v9463_v52 = vld [vmem:[%s12869_s9 + $0x5e4] ss:$16 sps:$4 sm:$0xff]  }
 0x407   : > { %3362 = vmatpush1.bf16.msra.mxu0 %v9380_v18  ;;  %3199 = vmatprep.subr.bf16.mxu1 %v9385_v19  ;;  %v9466_v18 = vld [vmem:[%s12869_s9 + $0x5ec] ss:$16 sps:$4 sm:$0xff]   ;;  %v9461_v19 = vld [vmem:[%s12869_s9 + $0x5e0] ss:$16 sps:$4 sm:$0xff]  }
 0x408   : > { %3363 = vmatprep.subr.bf16.mxu0 %v9388_v20  ;;  %v9464_v20 = vld [vmem:[%s12869_s9 + $0x5e8] ss:$16 sps:$4 sm:$0xff]  }
 0x40a   : > { %3200 = vmatpush1.bf16.msra.mxu1 %v9383_v21  ;;  %v1526_v21 = vrot.slane %v10287_v59, %v10264_v48 }
 0x40b   : > { %3364 = vmatpush1.bf16.msra.mxu0 %v9386_v22  ;;  %3201 = vmatprep.subr.bf16.mxu1 %v9391_v23  ;;  %v9469_v22 = vld [vmem:[%s12869_s9 + $0x604] ss:$16 sps:$4 sm:$0xff]   ;;  %v9472_v23 = vld [vmem:[%s12869_s9 + $0x60c] ss:$16 sps:$4 sm:$0xff]  }
 0x40c   : > { %3365 = vmatprep.subr.bf16.mxu0 %v9394_v24  ;;  %v1538_v24 = vrot.slane %v10287_v59, %v10273_v57 }
 0x40e   : > { %3202 = vmatpush1.bf16.msra.mxu1 %v9389_v25  ;;  %v9467_v25 = vld [vmem:[%s12869_s9 + $0x600] ss:$16 sps:$4 sm:$0xff]  }
 0x40f   : > { %3366 = vmatpush1.bf16.msra.mxu0 %v9392_v26  ;;  %3203 = vmatprep.subr.bf16.mxu1 %v9397_v27  ;;  %v1551_v26 = vpack.c.bf16 %v1526_v21, %v1526_v21  ;;  %v9470_v27 = vld [vmem:[%s12869_s9 + $0x608] ss:$16 sps:$4 sm:$0xff]   ;;  %v9539_v21 = vld [vmem:[%s12869_s9 + $0x780] ss:$16 sps:$4 sm:$0xff]  }
 0x410   : > { %3367 = vmatprep.subr.bf16.mxu0 %v9400_v28  ;;  %v9475_v28 = vld [vmem:[%s12869_s9 + $0x624] ss:$16 sps:$4 sm:$0xff]  }
 0x412   : > { %3204 = vmatpush1.bf16.msra.mxu1 %v9395_v29  ;;  %v1554_v29 = vpack.c.bf16 %v1538_v24, %v1538_v24  ;;  %v9550_v24 = vld [vmem:[%s12869_s9 + $0x7ac] ss:$16 sps:$4 sm:$0xff]  }
 0x413   : > { %3368 = vmatpush1.bf16.msra.mxu0 %v9398_v30  ;;  %3205 = vmatprep.subr.bf16.mxu1 %v9403_v31  ;;  %v9478_v30 = vld [vmem:[%s12869_s9 + $0x62c] ss:$16 sps:$4 sm:$0xff]   ;;  %v9473_v31 = vld [vmem:[%s12869_s9 + $0x620] ss:$16 sps:$4 sm:$0xff]  }
 0x414   : > { %3369 = vmatprep.subr.bf16.mxu0 %v9406_v32  ;;  %v9476_v32 = vld [vmem:[%s12869_s9 + $0x628] ss:$16 sps:$4 sm:$0xff]  }
 0x416   : > { %3206 = vmatpush1.bf16.msra.mxu1 %v9401_v33  ;;  %v9481_v33 = vld [vmem:[%s12869_s9 + $0x644] ss:$16 sps:$4 sm:$0xff]  }
 0x417   : > { %3370 = vmatpush1.bf16.msra.mxu0 %v9404_v34  ;;  %3207 = vmatprep.subr.bf16.mxu1 %v9409_v35  ;;  %v9484_v34 = vld [vmem:[%s12869_s9 + $0x64c] ss:$16 sps:$4 sm:$0xff]   ;;  %v9479_v35 = vld [vmem:[%s12869_s9 + $0x640] ss:$16 sps:$4 sm:$0xff]  }
 0x418   : > { %3371 = vmatprep.subr.bf16.mxu0 %v9412_v36  ;;  %v9482_v36 = vld [vmem:[%s12869_s9 + $0x648] ss:$16 sps:$4 sm:$0xff]  }
 0x41a   : > { %3208 = vmatpush1.bf16.msra.mxu1 %v9407_v37  ;;  %v9487_v37 = vld [vmem:[%s12869_s9 + $0x664] ss:$16 sps:$4 sm:$0xff]  }
 0x41b   : > { %3372 = vmatpush1.bf16.msra.mxu0 %v9410_v38  ;;  %3209 = vmatprep.subr.bf16.mxu1 %v9415_v39  ;;  %v9490_v38 = vld [vmem:[%s12869_s9 + $0x66c] ss:$16 sps:$4 sm:$0xff]   ;;  %v9485_v39 = vld [vmem:[%s12869_s9 + $0x660] ss:$16 sps:$4 sm:$0xff]  }
 0x41c   : > { %3373 = vmatprep.subr.bf16.mxu0 %v9418_v41  ;;  %v9488_v41 = vld [vmem:[%s12869_s9 + $0x668] ss:$16 sps:$4 sm:$0xff]  }
 0x41e   : > { %3210 = vmatpush1.bf16.msra.mxu1 %v9413_v42  ;;  %v9493_v42 = vld [vmem:[%s12869_s9 + $0x684] ss:$16 sps:$4 sm:$0xff]  }
 0x41f   : > { %3374 = vmatpush1.bf16.msra.mxu0 %v9416_v43  ;;  %3211 = vmatprep.subr.bf16.mxu1 %v9421_v44  ;;  %v9496_v43 = vld [vmem:[%s12869_s9 + $0x68c] ss:$16 sps:$4 sm:$0xff]   ;;  %v9491_v44 = vld [vmem:[%s12869_s9 + $0x680] ss:$16 sps:$4 sm:$0xff]  }
 0x420   : > { %3375 = vmatprep.subr.bf16.mxu0 %v9424_v45  ;;  %v9494_v45 = vld [vmem:[%s12869_s9 + $0x688] ss:$16 sps:$4 sm:$0xff]  }
 0x422   : > { %3212 = vmatpush1.bf16.msra.mxu1 %v9419_v46  ;;  %v9499_v46 = vld [vmem:[%s12869_s9 + $0x6a4] ss:$16 sps:$4 sm:$0xff]  }
 0x423   : > { %3376 = vmatpush1.bf16.msra.mxu0 %v9422_v58  ;;  %3213 = vmatprep.subr.bf16.mxu1 %v9427_v60  ;;  %v9502_v58 = vld [vmem:[%s12869_s9 + $0x6ac] ss:$16 sps:$4 sm:$0xff]   ;;  %v9497_v60 = vld [vmem:[%s12869_s9 + $0x6a0] ss:$16 sps:$4 sm:$0xff]  }
 0x424   : > { %3377 = vmatprep.subr.bf16.mxu0 %v9430_v61  ;;  %v9500_v61 = vld [vmem:[%s12869_s9 + $0x6a8] ss:$16 sps:$4 sm:$0xff]  }
 0x426   : > { %3214 = vmatpush1.bf16.msra.mxu1 %v9425_v62  ;;  %v9505_v62 = vld [vmem:[%s12869_s9 + $0x6c4] ss:$16 sps:$4 sm:$0xff]  }
 0x427   : > { %3378 = vmatpush1.bf16.msra.mxu0 %v9428_v63  ;;  %3215 = vmatprep.subr.bf16.mxu1 %v9433_v0  ;;  %v9508_v63 = vld [vmem:[%s12869_s9 + $0x6cc] ss:$16 sps:$4 sm:$0xff]   ;;  %v9503_v0 = vld [vmem:[%s12869_s9 + $0x6c0] ss:$16 sps:$4 sm:$0xff]  }
 0x428   : > { %3379 = vmatprep.subr.bf16.mxu0 %v9436_v47  ;;  %v9506_v47 = vld [vmem:[%s12869_s9 + $0x6c8] ss:$16 sps:$4 sm:$0xff]  }
 0x42a   : > { %3216 = vmatpush1.bf16.msra.mxu1 %v9431_v1  ;;  %v9511_v1 = vld [vmem:[%s12869_s9 + $0x6e4] ss:$16 sps:$4 sm:$0xff]  }
 0x42b   : > { %3380 = vmatpush1.bf16.msra.mxu0 %v9434_v2  ;;  %3217 = vmatprep.subr.bf16.mxu1 %v9439_v3  ;;  %v9514_v2 = vld [vmem:[%s12869_s9 + $0x6ec] ss:$16 sps:$4 sm:$0xff]   ;;  %v9509_v3 = vld [vmem:[%s12869_s9 + $0x6e0] ss:$16 sps:$4 sm:$0xff]  }
 0x42c   : > { %3381 = vmatprep.subr.bf16.mxu0 %v9442_v49  ;;  %v9512_v49 = vld [vmem:[%s12869_s9 + $0x6e8] ss:$16 sps:$4 sm:$0xff]  }
 0x42e   : > { %3218 = vmatpush1.bf16.msra.mxu1 %v9437_v4  ;;  %v9517_v4 = vld [vmem:[%s12869_s9 + $0x704] ss:$16 sps:$4 sm:$0xff]  }
 0x42f   : > { %3382 = vmatpush1.bf16.msra.mxu0 %v9440_v5  ;;  %3219 = vmatprep.subr.bf16.mxu1 %v9445_v6  ;;  %v9520_v5 = vld [vmem:[%s12869_s9 + $0x70c] ss:$16 sps:$4 sm:$0xff]   ;;  %v9515_v6 = vld [vmem:[%s12869_s9 + $0x700] ss:$16 sps:$4 sm:$0xff]  }
 0x430   : > { %3383 = vmatprep.subr.bf16.mxu0 %v9448_v7  ;;  %v9518_v7 = vld [vmem:[%s12869_s9 + $0x708] ss:$16 sps:$4 sm:$0xff]  }
 0x432   : > { %3220 = vmatpush1.bf16.msra.mxu1 %v9443_v8  ;;  %v9523_v8 = vld [vmem:[%s12869_s9 + $0x724] ss:$16 sps:$4 sm:$0xff]  }
 0x433   : > { %3384 = vmatpush1.bf16.msra.mxu0 %v9446_v9  ;;  %3221 = vmatprep.subr.bf16.mxu1 %v9451_v10  ;;  %v9526_v9 = vld [vmem:[%s12869_s9 + $0x72c] ss:$16 sps:$4 sm:$0xff]   ;;  %v9521_v10 = vld [vmem:[%s12869_s9 + $0x720] ss:$16 sps:$4 sm:$0xff]  }
 0x434   : > { %3385 = vmatprep.subr.bf16.mxu0 %v9454_v11  ;;  %v9524_v11 = vld [vmem:[%s12869_s9 + $0x728] ss:$16 sps:$4 sm:$0xff]  }
 0x436   : > { %3222 = vmatpush1.bf16.msra.mxu1 %v9449_v12  ;;  %v9529_v12 = vld [vmem:[%s12869_s9 + $0x744] ss:$16 sps:$4 sm:$0xff]  }
 0x437   : > { %3386 = vmatpush1.bf16.msra.mxu0 %v9452_v13  ;;  %3223 = vmatprep.subr.bf16.mxu1 %v9457_v14  ;;  %v9532_v13 = vld [vmem:[%s12869_s9 + $0x74c] ss:$16 sps:$4 sm:$0xff]   ;;  %v9527_v14 = vld [vmem:[%s12869_s9 + $0x740] ss:$16 sps:$4 sm:$0xff]  }
 0x438   : > { %3387 = vmatprep.subr.bf16.mxu0 %v9460_v15  ;;  %v9530_v15 = vld [vmem:[%s12869_s9 + $0x748] ss:$16 sps:$4 sm:$0xff]  }
 0x43a   : > { %3224 = vmatpush1.bf16.msra.mxu1 %v9455_v16  ;;  %v9535_v16 = vld [vmem:[%s12869_s9 + $0x764] ss:$16 sps:$4 sm:$0xff]  }
 0x43b   : > { %3388 = vmatpush1.bf16.msra.mxu0 %v9458_v17  ;;  %3225 = vmatprep.subr.bf16.mxu1 %v9463_v52  ;;  %v9538_v17 = vld [vmem:[%s12869_s9 + $0x76c] ss:$16 sps:$4 sm:$0xff]   ;;  %v9533_v52 = vld [vmem:[%s12869_s9 + $0x760] ss:$16 sps:$4 sm:$0xff]  }
 0x43c   : > { %3389 = vmatprep.subr.bf16.mxu0 %v9466_v18  ;;  %v9536_v18 = vld [vmem:[%s12869_s9 + $0x768] ss:$16 sps:$4 sm:$0xff]  }
 0x43e   : > { %3226 = vmatpush1.bf16.msra.mxu1 %v9461_v19  ;;  %v9541_v19 = vld [vmem:[%s12869_s9 + $0x784] ss:$16 sps:$4 sm:$0xff]  }
 0x43f   : > { %3390 = vmatpush1.bf16.msra.mxu0 %v9464_v20  ;;  %3236 = vmatprep.subr.bf16.mxu1 %v9469_v22  ;;  %v9544_v20 = vld [vmem:[%s12869_s9 + $0x78c] ss:$16 sps:$4 sm:$0xff]   ;;  %v9542_v22 = vld [vmem:[%s12869_s9 + $0x788] ss:$16 sps:$4 sm:$0xff]  }
 0x440   : > { %3400 = vmatprep.subr.bf16.mxu0 %v9472_v23  ;;  %v9547_v23 = vld [vmem:[%s12869_s9 + $0x7a4] ss:$16 sps:$4 sm:$0xff]  }
 0x441   : > { %3228 = vmatmul.mubr.bf16.vlgmr.msra.gmra.mrb[12].mxu1 %v1551_v26 }
 0x442   : > { %3392 = vmatmul.mubr.bf16.vlgmr.msra.gmra.mrb[16].mxu0 %v1551_v26  ;;  %3237 = vmatpush1.bf16.msra.mxu1 %v9467_v25  ;;  %v9545_v25 = vld [vmem:[%s12869_s9 + $0x7a0] ss:$16 sps:$4 sm:$0xff]   ;;  %v9548_v26 = vld [vmem:[%s12869_s9 + $0x7a8] ss:$16 sps:$4 sm:$0xff]  }
 0x443   : > { %3268 = vmatprep.mubr.bf16.mxu1 %v1554_v29  ;;  %3401 = vmatpush1.bf16.msra.mxu0 %v9470_v27  ;;  %v9553_v27 = vld [vmem:[%s12869_s9 + $0x7c4] ss:$16 sps:$4 sm:$0xff]  }
 0x444   : > { %3432 = vmatprep.mubr.bf16.mxu0 %v1554_v29  ;;  %3238 = vmatprep.subr.bf16.mxu1 %v9475_v28  ;;  %v9556_v28 = vld [vmem:[%s12869_s9 + $0x7cc] ss:$16 sps:$4 sm:$0xff]   ;;  %v9551_v29 = vld [vmem:[%s12869_s9 + $0x7c0] ss:$16 sps:$4 sm:$0xff]  }
 0x445   : > { %3402 = vmatprep.subr.bf16.mxu0 %v9478_v30  ;;  %v9554_v30 = vld [vmem:[%s12869_s9 + $0x7c8] ss:$16 sps:$4 sm:$0xff]  }
 0x446   : > { %3239 = vmatpush1.bf16.msra.mxu1 %v9473_v31  ;;  %v9559_v31 = vld [vmem:[%s12869_s9 + $0x7e4] ss:$16 sps:$4 sm:$0xff]  }
 0x447   : > { %3403 = vmatpush1.bf16.msra.mxu0 %v9476_v32  ;;  %3240 = vmatprep.subr.bf16.mxu1 %v9481_v33  ;;  %v9562_v32 = vld [vmem:[%s12869_s9 + $0x7ec] ss:$16 sps:$4 sm:$0xff]   ;;  %v9557_v33 = vld [vmem:[%s12869_s9 + $0x7e0] ss:$16 sps:$4 sm:$0xff]  }
 0x448   : > { %3404 = vmatprep.subr.bf16.mxu0 %v9484_v34  ;;  %v9560_v34 = vld [vmem:[%s12869_s9 + $0x7e8] ss:$16 sps:$4 sm:$0xff]  }
 0x44a   : > { %3241 = vmatpush1.bf16.msra.mxu1 %v9479_v35  ;;  %v1534_v35 = vrot.slane %v10287_v59, %v10267_v55  ;;  %v9566_v59 = vld [vmem:[%s12871_s11 + $0x10] ss:$8 sps:$4 sm:$0xff]  }
 0x44b   : > { %3405 = vmatpush1.bf16.msra.mxu0 %v9482_v36  ;;  %3242 = vmatprep.subr.bf16.mxu1 %v9487_v37  ;;  %v9565_v36 = vld [vmem:[%s12871_s11 + $0x4] ss:$8 sps:$4 sm:$0xff]   ;;  %v9563_v37 = vld [vmem:[%s12871_s11] ss:$8 sps:$4 sm:$0xff]  }
 0x44c   : > { %3406 = vmatprep.subr.bf16.mxu0 %v9490_v38  ;;  %v1553_v38 = vpack.c.bf16 %v1534_v35, %v1534_v35  ;;  %v4091_v35 = vld [vmem:[%s12873_s13 + $0x500] sm:$0xff] }
 0x44e   : > { %3243 = vmatpush1.bf16.msra.mxu1 %v9485_v39  ;;  %v9568_v39 = vld [vmem:[%s12871_s11 + $0x14] ss:$8 sps:$4 sm:$0xff]  }
 0x44f   : > { %3407 = vmatpush1.bf16.msra.mxu0 %v9488_v41  ;;  %3244 = vmatprep.subr.bf16.mxu1 %v9493_v42  ;;  %v9571_v41 = vld [vmem:[%s12871_s11 + $0x24] ss:$8 sps:$4 sm:$0xff]   ;;  %v9569_v42 = vld [vmem:[%s12871_s11 + $0x20] ss:$8 sps:$4 sm:$0xff]  }
 0x450   : > { %3408 = vmatprep.subr.bf16.mxu0 %v9496_v43  ;;  %v9574_v43 = vld [vmem:[%s12871_s11 + $0x34] ss:$8 sps:$4 sm:$0xff]  }
 0x452   : > { %3245 = vmatpush1.bf16.msra.mxu1 %v9491_v44  ;;  %v9572_v44 = vld [vmem:[%s12871_s11 + $0x30] ss:$8 sps:$4 sm:$0xff]  }
 0x453   : > { %3409 = vmatpush1.bf16.msra.mxu0 %v9494_v45  ;;  %3246 = vmatprep.subr.bf16.mxu1 %v9499_v46  ;;  %v9577_v45 = vld [vmem:[%s12871_s11 + $0x44] ss:$8 sps:$4 sm:$0xff]   ;;  %v9575_v46 = vld [vmem:[%s12871_s11 + $0x40] ss:$8 sps:$4 sm:$0xff]  }
 0x454   : > { %3410 = vmatprep.subr.bf16.mxu0 %v9502_v58  ;;  %v9580_v58 = vld [vmem:[%s12871_s11 + $0x54] ss:$8 sps:$4 sm:$0xff]  }
 0x456   : > { %3247 = vmatpush1.bf16.msra.mxu1 %v9497_v60  ;;  %v9578_v60 = vld [vmem:[%s12871_s11 + $0x50] ss:$8 sps:$4 sm:$0xff]  }
 0x457   : > { %3411 = vmatpush1.bf16.msra.mxu0 %v9500_v61  ;;  %3248 = vmatprep.subr.bf16.mxu1 %v9505_v62  ;;  %v9583_v61 = vld [vmem:[%s12871_s11 + $0x64] ss:$8 sps:$4 sm:$0xff]   ;;  %v9581_v62 = vld [vmem:[%s12871_s11 + $0x60] ss:$8 sps:$4 sm:$0xff]  }
 0x458   : > { %3412 = vmatprep.subr.bf16.mxu0 %v9508_v63  ;;  %v9586_v63 = vld [vmem:[%s12871_s11 + $0x74] ss:$8 sps:$4 sm:$0xff]  }
 0x45a   : > { %3249 = vmatpush1.bf16.msra.mxu1 %v9503_v0  ;;  %v9584_v0 = vld [vmem:[%s12871_s11 + $0x70] ss:$8 sps:$4 sm:$0xff]  }
 0x45b   : > { %3413 = vmatpush1.bf16.msra.mxu0 %v9506_v47  ;;  %3250 = vmatprep.subr.bf16.mxu1 %v9511_v1  ;;  %v9589_v47 = vld [vmem:[%s12871_s11 + $0x84] ss:$8 sps:$4 sm:$0xff]   ;;  %v9587_v1 = vld [vmem:[%s12871_s11 + $0x80] ss:$8 sps:$4 sm:$0xff]  }
 0x45c   : > { %3414 = vmatprep.subr.bf16.mxu0 %v9514_v2  ;;  %v9592_v2 = vld [vmem:[%s12871_s11 + $0x94] ss:$8 sps:$4 sm:$0xff]  }
 0x45e   : > { %3251 = vmatpush1.bf16.msra.mxu1 %v9509_v3  ;;  %v9590_v3 = vld [vmem:[%s12871_s11 + $0x90] ss:$8 sps:$4 sm:$0xff]  }
 0x45f   : > { %3415 = vmatpush1.bf16.msra.mxu0 %v9512_v49  ;;  %3252 = vmatprep.subr.bf16.mxu1 %v9517_v4  ;;  %v9595_v49 = vld [vmem:[%s12871_s11 + $0xa4] ss:$8 sps:$4 sm:$0xff]   ;;  %v9593_v4 = vld [vmem:[%s12871_s11 + $0xa0] ss:$8 sps:$4 sm:$0xff]  }
 0x460   : > { %3416 = vmatprep.subr.bf16.mxu0 %v9520_v5  ;;  %v9598_v5 = vld [vmem:[%s12871_s11 + $0xb4] ss:$8 sps:$4 sm:$0xff]  }
 0x462   : > { %3253 = vmatpush1.bf16.msra.mxu1 %v9515_v6  ;;  %v9596_v6 = vld [vmem:[%s12871_s11 + $0xb0] ss:$8 sps:$4 sm:$0xff]  }
 0x463   : > { %3417 = vmatpush1.bf16.msra.mxu0 %v9518_v7  ;;  %3254 = vmatprep.subr.bf16.mxu1 %v9523_v8  ;;  %v9601_v7 = vld [vmem:[%s12871_s11 + $0xc4] ss:$8 sps:$4 sm:$0xff]   ;;  %v9599_v8 = vld [vmem:[%s12871_s11 + $0xc0] ss:$8 sps:$4 sm:$0xff]  }
 0x464   : > { %3418 = vmatprep.subr.bf16.mxu0 %v9526_v9  ;;  %v9604_v9 = vld [vmem:[%s12871_s11 + $0xd4] ss:$8 sps:$4 sm:$0xff]  }
 0x466   : > { %3255 = vmatpush1.bf16.msra.mxu1 %v9521_v10  ;;  %v9602_v10 = vld [vmem:[%s12871_s11 + $0xd0] ss:$8 sps:$4 sm:$0xff]  }
 0x467   : > { %3419 = vmatpush1.bf16.msra.mxu0 %v9524_v11  ;;  %3256 = vmatprep.subr.bf16.mxu1 %v9529_v12  ;;  %v9607_v11 = vld [vmem:[%s12871_s11 + $0xe4] ss:$8 sps:$4 sm:$0xff]   ;;  %v9605_v12 = vld [vmem:[%s12871_s11 + $0xe0] ss:$8 sps:$4 sm:$0xff]  }
 0x468   : > { %3420 = vmatprep.subr.bf16.mxu0 %v9532_v13  ;;  %v9610_v13 = vld [vmem:[%s12871_s11 + $0xf4] ss:$8 sps:$4 sm:$0xff]  }
 0x46a   : > { %3257 = vmatpush1.bf16.msra.mxu1 %v9527_v14  ;;  %v9608_v14 = vld [vmem:[%s12871_s11 + $0xf0] ss:$8 sps:$4 sm:$0xff]  }
 0x46b   : > { %3421 = vmatpush1.bf16.msra.mxu0 %v9530_v15  ;;  %3258 = vmatprep.subr.bf16.mxu1 %v9535_v16  ;;  %v9613_v15 = vld [vmem:[%s12871_s11 + $0x104] ss:$8 sps:$4 sm:$0xff]  }
 0x46c   : > { %3422 = vmatprep.subr.bf16.mxu0 %v9538_v17  ;;  %v3931_v16 = vld [vmem:[%s12873_s13] sm:$0xff] }
 0x46d   : > { %v3947_v17 = vld [vmem:[%s12873_s13 + $0x80] sm:$0xff] }
 0x46e   : > { %3259 = vmatpush1.bf16.msra.mxu1 %v9533_v52  ;;  %v8550_v52 = vcombine.low %v3931_v16, %v3947_v17 }
 0x46f   : > { %3423 = vmatpush1.bf16.msra.mxu0 %v9536_v18  ;;  %3260 = vmatprep.subr.bf16.mxu1 %v9541_v19  ;;  %v8551_v18 = vcombine.high %v3931_v16, %v3947_v17  ;;  %v3963_v19 = vld [vmem:[%s12873_s13 + $0x100] sm:$0xff] }
 0x470   : > { %3424 = vmatprep.subr.bf16.mxu0 %v9544_v20  ;;  %v3979_v20 = vld [vmem:[%s12873_s13 + $0x180] sm:$0xff] }
 0x472   : > { %3261 = vmatpush1.bf16.msra.mxu1 %v9539_v21  ;;  %v8583_v21 = vcombine.high %v3963_v19, %v3979_v20 }
 0x473   : > { %3425 = vmatpush1.bf16.msra.mxu0 %v9542_v22  ;;  %3262 = vmatprep.subr.bf16.mxu1 %v9547_v23  ;;  %v8582_v22 = vcombine.low %v3963_v19, %v3979_v20  ;;  %v3995_v23 = vld [vmem:[%s12873_s13 + $0x200] sm:$0xff] }
 0x474   : > { %3426 = vmatprep.subr.bf16.mxu0 %v9550_v24  ;;  %v4011_v24 = vld [vmem:[%s12873_s13 + $0x280] sm:$0xff] }
 0x476   : > { %3263 = vmatpush1.bf16.msra.mxu1 %v9545_v25  ;;  %v8615_v25 = vcombine.high %v3995_v23, %v4011_v24 }
 0x477   : > { %3427 = vmatpush1.bf16.msra.mxu0 %v9548_v26  ;;  %3264 = vmatprep.subr.bf16.mxu1 %v9553_v27  ;;  %v8614_v26 = vcombine.low %v3995_v23, %v4011_v24  ;;  %v4027_v27 = vld [vmem:[%s12873_s13 + $0x300] sm:$0xff] }
 0x478   : > { %3428 = vmatprep.subr.bf16.mxu0 %v9556_v28  ;;  %v4043_v28 = vld [vmem:[%s12873_s13 + $0x380] sm:$0xff] }
 0x47a   : > { %3265 = vmatpush1.bf16.msra.mxu1 %v9551_v29  ;;  %v8647_v29 = vcombine.high %v4027_v27, %v4043_v28 }
 0x47b   : > { %3429 = vmatpush1.bf16.msra.mxu0 %v9554_v30  ;;  %3266 = vmatprep.subr.bf16.mxu1 %v9559_v31  ;;  %v8646_v30 = vcombine.low %v4027_v27, %v4043_v28  ;;  %v4059_v31 = vld [vmem:[%s12873_s13 + $0x400] sm:$0xff] }
 0x47c   : > { %3430 = vmatprep.subr.bf16.mxu0 %v9562_v32  ;;  %v4075_v32 = vld [vmem:[%s12873_s13 + $0x480] sm:$0xff] }
 0x47e   : > { %3267 = vmatpush1.bf16.msra.mxu1 %v9557_v33  ;;  %v8679_v33 = vcombine.high %v4059_v31, %v4075_v32 }
 0x47f   : > { %3431 = vmatpush1.bf16.msra.mxu0 %v9560_v34  ;;  %3845 = vmatprep.subr.bf16.mxu1 %v9565_v36  ;;  %v8678_v34 = vcombine.low %v4059_v31, %v4075_v32  ;;  %v4107_v36 = vld [vmem:[%s12873_s13 + $0x580] sm:$0xff] }
 0x480   : > { %7171 = vmatprep.subr.bf16.mxu0 %v8551_v18 }
 0x481   : > { %3269 = vmatmul.mubr.bf16.vlgmr.msra.gmra.mrb[12].mxu1 %v1553_v38 }
 0x482   : > { %3433 = vmatmul.mubr.bf16.vlgmr.msra.gmra.mrb[16].mxu0 %v1553_v38  ;;  %3846 = vmatpush1.bf16.msra.mxu1 %v9563_v37  ;;  %v8711_v37 = vcombine.high %v4091_v35, %v4107_v36  ;;  %v8710_v38 = vcombine.low %v4091_v35, %v4107_v36  ;;  %v9611_v35 = vld [vmem:[%s12871_s11 + $0x100] ss:$8 sps:$4 sm:$0xff]  }
 0x483   : > { %3847 = vmatprep.subr.bf16.mxu1 %v9568_v39  ;;  %7172 = vmatpush1.bf16.msra.mxu0 %v8550_v52  ;;  %v4123_v39 = vld [vmem:[%s12873_s13 + $0x600] sm:$0xff] }
 0x484   : > { %7173 = vmatprep.subr.bf16.mxu0 %v8583_v21 }
 0x486   : > { %3848 = vmatpush1.bf16.msra.mxu1 %v9566_v59  ;;  %v4139_v59 = vld [vmem:[%s12873_s13 + $0x680] sm:$0xff] }
 0x487   : > { %3849 = vmatprep.subr.bf16.mxu1 %v9571_v41  ;;  %7174 = vmatpush1.bf16.msra.mxu0 %v8582_v22  ;;  %v8743_v41 = vcombine.high %v4123_v39, %v4139_v59 }
 0x488   : > { %7175 = vmatprep.subr.bf16.mxu0 %v8615_v25 }
 0x48a   : > { %3850 = vmatpush1.bf16.msra.mxu1 %v9569_v42  ;;  %v8742_v42 = vcombine.low %v4123_v39, %v4139_v59  ;;  %v9614_v39 = vld [vmem:[%s12871_s11 + $0x110] ss:$8 sps:$4 sm:$0xff]   ;;  %v9619_v59 = vld [vmem:[%s12871_s11 + $0x124] ss:$8 sps:$4 sm:$0xff]  }
 0x48b   : > { %3851 = vmatprep.subr.bf16.mxu1 %v9574_v43  ;;  %7176 = vmatpush1.bf16.msra.mxu0 %v8614_v26  ;;  %v4155_v43 = vld [vmem:[%s12873_s13 + $0x700] sm:$0xff] }
 0x48c   : > { %7177 = vmatprep.subr.bf16.mxu0 %v8647_v29 }
 0x48e   : > { %3852 = vmatpush1.bf16.msra.mxu1 %v9572_v44  ;;  %v4171_v44 = vld [vmem:[%s12873_s13 + $0x780] sm:$0xff] }
 0x48f   : > { %3853 = vmatprep.subr.bf16.mxu1 %v9577_v45  ;;  %7178 = vmatpush1.bf16.msra.mxu0 %v8646_v30  ;;  %v8775_v45 = vcombine.high %v4155_v43, %v4171_v44 }
 0x490   : > { %7179 = vmatprep.subr.bf16.mxu0 %v8679_v33 }
 0x492   : > { %3854 = vmatpush1.bf16.msra.mxu1 %v9575_v46  ;;  %v8774_v46 = vcombine.low %v4155_v43, %v4171_v44  ;;  %v9620_v43 = vld [vmem:[%s12871_s11 + $0x130] ss:$8 sps:$4 sm:$0xff]   ;;  %v9625_v44 = vld [vmem:[%s12871_s11 + $0x144] ss:$8 sps:$4 sm:$0xff]  }
 0x493   : > { %3855 = vmatprep.subr.bf16.mxu1 %v9580_v58  ;;  %7180 = vmatpush1.bf16.msra.mxu0 %v8678_v34  ;;  %v4187_v58 = vld [vmem:[%s12873_s13 + $0x800] sm:$0xff] }
 0x494   : > { %7181 = vmatprep.subr.bf16.mxu0 %v8711_v37  ;;  %v9616_v37 = vld [vmem:[%s12871_s11 + $0x114] ss:$8 sps:$4 sm:$0xff]  }
 0x496   : > { %3856 = vmatpush1.bf16.msra.mxu1 %v9578_v60  ;;  %v4203_v60 = vld [vmem:[%s12873_s13 + $0x880] sm:$0xff] }
 0x497   : > { %3857 = vmatprep.subr.bf16.mxu1 %v9583_v61  ;;  %7182 = vmatpush1.bf16.msra.mxu0 %v8710_v38  ;;  %v8807_v61 = vcombine.high %v4187_v58, %v4203_v60 }
 0x498   : > { %7183 = vmatprep.subr.bf16.mxu0 %v8743_v41  ;;  %v9617_v41 = vld [vmem:[%s12871_s11 + $0x120] ss:$8 sps:$4 sm:$0xff]  }
 0x49a   : > { %3858 = vmatpush1.bf16.msra.mxu1 %v9581_v62  ;;  %v8806_v62 = vcombine.low %v4187_v58, %v4203_v60  ;;  %v9626_v58 = vld [vmem:[%s12871_s11 + $0x150] ss:$8 sps:$4 sm:$0xff]   ;;  %v9631_v60 = vld [vmem:[%s12871_s11 + $0x164] ss:$8 sps:$4 sm:$0xff]  }
 0x49b   : > { %3859 = vmatprep.subr.bf16.mxu1 %v9586_v63  ;;  %7184 = vmatpush1.bf16.msra.mxu0 %v8742_v42  ;;  %v4219_v63 = vld [vmem:[%s12873_s13 + $0x900] sm:$0xff]  ;;  %v9622_v42 = vld [vmem:[%s12871_s11 + $0x134] ss:$8 sps:$4 sm:$0xff]  }
 0x49c   : > { %7185 = vmatprep.subr.bf16.mxu0 %v8775_v45  ;;  %v9623_v45 = vld [vmem:[%s12871_s11 + $0x140] ss:$8 sps:$4 sm:$0xff]  }
 0x49e   : > { %3860 = vmatpush1.bf16.msra.mxu1 %v9584_v0  ;;  %v4235_v0 = vld [vmem:[%s12873_s13 + $0x980] sm:$0xff] }
 0x49f   : > { %3861 = vmatprep.subr.bf16.mxu1 %v9589_v47  ;;  %7186 = vmatpush1.bf16.msra.mxu0 %v8774_v46  ;;  %v8839_v47 = vcombine.high %v4219_v63, %v4235_v0  ;;  %v9628_v46 = vld [vmem:[%s12871_s11 + $0x154] ss:$8 sps:$4 sm:$0xff]  }
 0x4a0   : > { %7187 = vmatprep.subr.bf16.mxu0 %v8807_v61  ;;  %v9629_v61 = vld [vmem:[%s12871_s11 + $0x160] ss:$8 sps:$4 sm:$0xff]  }
 0x4a2   : > { %3862 = vmatpush1.bf16.msra.mxu1 %v9587_v1  ;;  %v8838_v1 = vcombine.low %v4219_v63, %v4235_v0  ;;  %v9632_v63 = vld [vmem:[%s12871_s11 + $0x170] ss:$8 sps:$4 sm:$0xff]   ;;  %v9637_v0 = vld [vmem:[%s12871_s11 + $0x184] ss:$8 sps:$4 sm:$0xff]  }
 0x4a3   : > { %3863 = vmatprep.subr.bf16.mxu1 %v9592_v2  ;;  %7188 = vmatpush1.bf16.msra.mxu0 %v8806_v62  ;;  %v4251_v2 = vld [vmem:[%s12873_s13 + $0xa00] sm:$0xff]  ;;  %v9634_v62 = vld [vmem:[%s12871_s11 + $0x174] ss:$8 sps:$4 sm:$0xff]  }
 0x4a4   : > { %7189 = vmatprep.subr.bf16.mxu0 %v8839_v47  ;;  %v9635_v47 = vld [vmem:[%s12871_s11 + $0x180] ss:$8 sps:$4 sm:$0xff]  }
 0x4a6   : > { %3864 = vmatpush1.bf16.msra.mxu1 %v9590_v3  ;;  %v4267_v3 = vld [vmem:[%s12873_s13 + $0xa80] sm:$0xff] }
 0x4a7   : > { %3865 = vmatprep.subr.bf16.mxu1 %v9595_v49  ;;  %v8871_v49 = vcombine.high %v4251_v2, %v4267_v3  ;;  %7190 = vmatpush1.bf16.msra.mxu0 %v8838_v1  ;;  %v9640_v1 = vld [vmem:[%s12871_s11 + $0x194] ss:$8 sps:$4 sm:$0xff]  }
 0x4a9   : > { %7191 = vmatprep.subr.bf16.mxu0 %v8871_v49  ;;  %v9641_v49 = vld [vmem:[%s12871_s11 + $0x1a0] ss:$8 sps:$4 sm:$0xff]  }
 0x4aa   : > { %3866 = vmatpush1.bf16.msra.mxu1 %v9593_v4  ;;  %v8870_v4 = vcombine.low %v4251_v2, %v4267_v3  ;;  %v9638_v2 = vld [vmem:[%s12871_s11 + $0x190] ss:$8 sps:$4 sm:$0xff]   ;;  %v9643_v3 = vld [vmem:[%s12871_s11 + $0x1a4] ss:$8 sps:$4 sm:$0xff]  }
 0x4ab   : > { %3867 = vmatprep.subr.bf16.mxu1 %v9598_v5  ;;  %v4283_v5 = vld [vmem:[%s12873_s13 + $0xb00] sm:$0xff] }
 0x4ac   : > { %7192 = vmatpush1.bf16.msra.mxu0 %v8870_v4  ;;  %v9646_v4 = vld [vmem:[%s12871_s11 + $0x1b4] ss:$8 sps:$4 sm:$0xff]  }
 0x4ae   : > { %3868 = vmatpush1.bf16.msra.mxu1 %v9596_v6  ;;  %v4299_v6 = vld [vmem:[%s12873_s13 + $0xb80] sm:$0xff] }
 0x4af   : > { %3869 = vmatprep.subr.bf16.mxu1 %v9601_v7  ;;  %v8903_v7 = vcombine.high %v4283_v5, %v4299_v6 }
 0x4b1   : > { %7193 = vmatprep.subr.bf16.mxu0 %v8903_v7  ;;  %v9647_v7 = vld [vmem:[%s12871_s11 + $0x1c0] ss:$8 sps:$4 sm:$0xff]  }
 0x4b2   : > { %3870 = vmatpush1.bf16.msra.mxu1 %v9599_v8  ;;  %v8902_v8 = vcombine.low %v4283_v5, %v4299_v6  ;;  %v9644_v5 = vld [vmem:[%s12871_s11 + $0x1b0] ss:$8 sps:$4 sm:$0xff]   ;;  %v9649_v6 = vld [vmem:[%s12871_s11 + $0x1c4] ss:$8 sps:$4 sm:$0xff]  }
 0x4b3   : > { %3871 = vmatprep.subr.bf16.mxu1 %v9604_v9  ;;  %v4315_v9 = vld [vmem:[%s12873_s13 + $0xc00] sm:$0xff] }
 0x4b4   : > { %7194 = vmatpush1.bf16.msra.mxu0 %v8902_v8  ;;  %v9652_v8 = vld [vmem:[%s12871_s11 + $0x1d4] ss:$8 sps:$4 sm:$0xff]  }
 0x4b6   : > { %3872 = vmatpush1.bf16.msra.mxu1 %v9602_v10  ;;  %v4331_v10 = vld [vmem:[%s12873_s13 + $0xc80] sm:$0xff] }
 0x4b7   : > { %3873 = vmatprep.subr.bf16.mxu1 %v9607_v11  ;;  %v8935_v11 = vcombine.high %v4315_v9, %v4331_v10 }
 0x4b9   : > { %7195 = vmatprep.subr.bf16.mxu0 %v8935_v11  ;;  %v9655_v11 = vld [vmem:[%s12871_s11 + $0x1e4] ss:$8 sps:$4 sm:$0xff]  }
 0x4ba   : > { %3874 = vmatpush1.bf16.msra.mxu1 %v9605_v12  ;;  %v8934_v12 = vcombine.low %v4315_v9, %v4331_v10  ;;  %v9650_v9 = vld [vmem:[%s12871_s11 + $0x1d0] ss:$8 sps:$4 sm:$0xff]  }
 0x4bb   : > { %3875 = vmatprep.subr.bf16.mxu1 %v9610_v13  ;;  %v11055_v13 = vld [vmem:[%s12870_s10] sm:$0xf] }
 0x4bc   : > { %v3096_v17 = vrot.slane %v11055_v13, %v10234_v50  ;;  %7196 = vmatpush1.bf16.msra.mxu0 %v8934_v12  ;;  %v3100_v18 = vrot.slane %v11055_v13, %v10245_v53  ;;  %v3108_v19 = vrot.slane %v11055_v13, %v10248_v54  ;;  %v3104_v10 = vrot.slane %v11055_v13, %v10237_v51  ;;  %v9653_v12 = vld [vmem:[%s12871_s11 + $0x1e0] ss:$8 sps:$4 sm:$0xff]   ;;  %v3933_v13 = vld [vmem:[%s12873_s13 + $0x10] sm:$0xff] }
 0x4be   : > { %3876 = vmatpush1.bf16.msra.mxu1 %v9608_v14  ;;  %v4347_v14 = vld [vmem:[%s12873_s13 + $0xd00] sm:$0xff] }
 0x4bf   : > { %3886 = vmatprep.subr.bf16.mxu1 %v9613_v15  ;;  %v4363_v15 = vld [vmem:[%s12873_s13 + $0xd80] sm:$0xff] }
 0x4c0   : > { %v8967_v16 = vcombine.high %v4347_v14, %v4363_v15  ;;  %v8966_v52 = vcombine.low %v4347_v14, %v4363_v15  ;;  %v9658_v15 = vld [vmem:[%s12871_s11 + $0x1f4] ss:$8 sps:$4 sm:$0xff]  }
 0x4c2   : > { %7197 = vmatprep.subr.bf16.mxu0 %v8967_v16  ;;  %v3949_v16 = vld [vmem:[%s12873_s13 + $0x90] sm:$0xff] }
 0x4c3   : > { %7198 = vmatpush1.bf16.msra.mxu0 %v8966_v52 }
 0x554   : > { %v3270_v20 = vpop.f32.mrb[12].mxu1 }
 0x555   : > { %v9107_v21 = vadd.f32 %v3270_v20, %v3096_v17  ;;  %v11069_v22 = vpop.f32.mrb[16].mxu0  ;;  %v3272_v23 = vpop.f32.mrb[13].mxu1  ;;  %v9656_v17 = vld [vmem:[%s12871_s11 + $0x1f0] ss:$8 sps:$4 sm:$0xff]  }
 0x556   : > { %v9108_v24 = vadd.f32 %v3272_v23, %v3100_v18  ;;  %v3436_v25 = vpop.f32.mrb[17].mxu0  ;;  %v3274_v26 = vpop.f32.mrb[14].mxu1  ;;  %v9109_v14 = vadd.f32 %v11069_v22, %v3104_v10  ;;  %v8555_v18 = vcombine.high %v3933_v13, %v3949_v16  ;;  %v3981_v20 = vld [vmem:[%s12873_s13 + $0x190] sm:$0xff] }
 0x557   : > { %v3441_v27 = vmax.f32 %v9107_v21, 0.0  ;;  %v9110_v28 = vadd.f32 %v3436_v25, %v3108_v19  ;;  %v3438_v29 = vpop.f32.mrb[18].mxu0  ;;  %v3275_v30 = vpop.f32.mrb[15].mxu1  ;;  %v3965_v19 = vld [vmem:[%s12873_s13 + $0x110] sm:$0xff]  ;;  %v8554_v21 = vcombine.low %v3933_v13, %v3949_v16 }
 0x558   : > { %v3442_v31 = vmax.f32 %v9108_v24, 0.0  ;;  %v3439_v32 = vpop.f32.mrb[19].mxu0  ;;  %v3443_v52 = vmax.f32 %v9109_v14, 0.0  ;;  %v8587_v23 = vcombine.high %v3965_v19, %v3981_v20  ;;  %v3997_v24 = vld [vmem:[%s12873_s13 + $0x210] sm:$0xff]  ;;  %v8586_v26 = vcombine.low %v3965_v19, %v3981_v20  ;;  %v4395_v19 = vld [vmem:[%s12873_s13 + $0xe80] sm:$0xff] }
 0x559   : > { %v3444_v33 = vmax.f32 %v9110_v28, 0.0  ;;  %v3445_v36 = vpack.c.bf16 %v3441_v27, %v3441_v27  ;;  %v4013_v25 = vld [vmem:[%s12873_s13 + $0x290] sm:$0xff] }
 0x55a   : > { %v3446_v34 = vpack.c.bf16 %v3442_v31, %v3442_v31  ;;  %v3447_v22 = vpack.c.bf16 %v3443_v52, %v3443_v52  ;;  %v8619_v27 = vcombine.high %v3997_v24, %v4013_v25  ;;  %v4029_v28 = vld [vmem:[%s12873_s13 + $0x310] sm:$0xff]  ;;  %v8618_v30 = vcombine.low %v3997_v24, %v4013_v25 }
 0x55b   : > { %v3448_v38 = vpack.c.bf16 %v3444_v33, %v3444_v33  ;;  %v4045_v29 = vld [vmem:[%s12873_s13 + $0x390] sm:$0xff] }
 0x55c   : > { %3877 = vmatprep.mubr.bf16.mxu1 %v3446_v34  ;;  %v8651_v31 = vcombine.high %v4029_v28, %v4045_v29  ;;  %v4061_v32 = vld [vmem:[%s12873_s13 + $0x410] sm:$0xff]  ;;  %v8650_v34 = vcombine.low %v4029_v28, %v4045_v29 }
 0x55d   : > { %3878 = vmatmul.mubr.bf16.vlgmr.msra.gmra.mrb[16].mxu1 %v3445_v36  ;;  %v4077_v33 = vld [vmem:[%s12873_s13 + $0x490] sm:$0xff] }
 0x55e   : > { %3887 = vmatpush1.bf16.msra.mxu1 %v9611_v35  ;;  %3918 = vmatprep.mubr.bf16.mxu1 %v3448_v38  ;;  %v8683_v35 = vcombine.high %v4061_v32, %v4077_v33  ;;  %v4093_v36 = vld [vmem:[%s12873_s13 + $0x510] sm:$0xff]  ;;  %v8682_v38 = vcombine.low %v4061_v32, %v4077_v33 }
 0x55f   : > { %3888 = vmatprep.subr.bf16.mxu1 %v9616_v37  ;;  %v4109_v37 = vld [vmem:[%s12873_s13 + $0x590] sm:$0xff] }
 0x560   : > { %v4317_v10 = vld [vmem:[%s12873_s13 + $0xc10] sm:$0xff] }
 0x561   : > { %v4365_v13 = vld [vmem:[%s12873_s13 + $0xd90] sm:$0xff] }
 0x562   : > { %3889 = vmatpush1.bf16.msra.mxu1 %v9614_v39  ;;  %v8715_v39 = vcombine.high %v4093_v36, %v4109_v37  ;;  %v4381_v20 = vld [vmem:[%s12873_s13 + $0xe10] sm:$0xff] }
 0x563   : > { %3890 = vmatprep.subr.bf16.mxu1 %v9619_v59  ;;  %v4125_v59 = vld [vmem:[%s12873_s13 + $0x610] sm:$0xff] }
 0x564   : > { %v4413_v28 = vld [vmem:[%s12873_s13 + $0xf10] sm:$0xff] }
 0x566   : > { %3891 = vmatpush1.bf16.msra.mxu1 %v9617_v41  ;;  %v4141_v41 = vld [vmem:[%s12873_s13 + $0x690] sm:$0xff] }
 0x567   : > { %3892 = vmatprep.subr.bf16.mxu1 %v9622_v42  ;;  %v8714_v42 = vcombine.low %v4093_v36, %v4109_v37  ;;  %v3935_v36 = vld [vmem:[%s12873_s13 + $0x20] sm:$0xff] }
 0x56a   : > { %3893 = vmatpush1.bf16.msra.mxu1 %v9620_v43  ;;  %v8747_v43 = vcombine.high %v4125_v59, %v4141_v41 }
 0x56b   : > { %3894 = vmatprep.subr.bf16.mxu1 %v9625_v44  ;;  %v4157_v44 = vld [vmem:[%s12873_s13 + $0x710] sm:$0xff] }
 0x56e   : > { %3895 = vmatpush1.bf16.msra.mxu1 %v9623_v45  ;;  %v4173_v45 = vld [vmem:[%s12873_s13 + $0x790] sm:$0xff] }
 0x56f   : > { %3896 = vmatprep.subr.bf16.mxu1 %v9628_v46  ;;  %v8746_v46 = vcombine.low %v4125_v59, %v4141_v41 }
 0x572   : > { %3897 = vmatpush1.bf16.msra.mxu1 %v9626_v58  ;;  %v8779_v58 = vcombine.high %v4157_v44, %v4173_v45 }
 0x573   : > { %3898 = vmatprep.subr.bf16.mxu1 %v9631_v60  ;;  %v4189_v60 = vld [vmem:[%s12873_s13 + $0x810] sm:$0xff] }
 0x576   : > { %3899 = vmatpush1.bf16.msra.mxu1 %v9629_v61  ;;  %v4205_v61 = vld [vmem:[%s12873_s13 + $0x890] sm:$0xff] }
 0x577   : > { %3900 = vmatprep.subr.bf16.mxu1 %v9634_v62  ;;  %v8778_v62 = vcombine.low %v4157_v44, %v4173_v45 }
 0x57a   : > { %3901 = vmatpush1.bf16.msra.mxu1 %v9632_v63  ;;  %v8811_v63 = vcombine.high %v4189_v60, %v4205_v61 }
 0x57b   : > { %3902 = vmatprep.subr.bf16.mxu1 %v9637_v0  ;;  %v4221_v0 = vld [vmem:[%s12873_s13 + $0x910] sm:$0xff] }
 0x57e   : > { %3903 = vmatpush1.bf16.msra.mxu1 %v9635_v47  ;;  %v4237_v47 = vld [vmem:[%s12873_s13 + $0x990] sm:$0xff] }
 0x57f   : > { %3904 = vmatprep.subr.bf16.mxu1 %v9640_v1  ;;  %v8810_v1 = vcombine.low %v4189_v60, %v4205_v61 }
 0x582   : > { %3905 = vmatpush1.bf16.msra.mxu1 %v9638_v2  ;;  %v8843_v2 = vcombine.high %v4221_v0, %v4237_v47 }
 0x583   : > { %3906 = vmatprep.subr.bf16.mxu1 %v9643_v3  ;;  %v4253_v3 = vld [vmem:[%s12873_s13 + $0xa10] sm:$0xff] }
 0x586   : > { %3907 = vmatpush1.bf16.msra.mxu1 %v9641_v49  ;;  %v4269_v49 = vld [vmem:[%s12873_s13 + $0xa90] sm:$0xff] }
 0x587   : > { %3908 = vmatprep.subr.bf16.mxu1 %v9646_v4  ;;  %v8842_v4 = vcombine.low %v4221_v0, %v4237_v47  ;;  %v3964_v47 = vld [vmem:[%s12873_s13 + $0x108] sm:$0xff] }
 0x58a   : > { %3909 = vmatpush1.bf16.msra.mxu1 %v9644_v5  ;;  %v8875_v5 = vcombine.high %v4253_v3, %v4269_v49 }
 0x58b   : > { %3910 = vmatprep.subr.bf16.mxu1 %v9649_v6  ;;  %v4285_v6 = vld [vmem:[%s12873_s13 + $0xb10] sm:$0xff] }
 0x58e   : > { %3911 = vmatpush1.bf16.msra.mxu1 %v9647_v7  ;;  %v4301_v7 = vld [vmem:[%s12873_s13 + $0xb90] sm:$0xff] }
 0x58f   : > { %3912 = vmatprep.subr.bf16.mxu1 %v9652_v8  ;;  %v8874_v8 = vcombine.low %v4253_v3, %v4269_v49  ;;  %v3983_v3 = vld [vmem:[%s12873_s13 + $0x1a0] sm:$0xff] }
 0x592   : > { %3913 = vmatpush1.bf16.msra.mxu1 %v9650_v9  ;;  %v8907_v9 = vcombine.high %v4285_v6, %v4301_v7 }
 0x593   : > { %3914 = vmatprep.subr.bf16.mxu1 %v9655_v11  ;;  %v4333_v11 = vld [vmem:[%s12873_s13 + $0xc90] sm:$0xff] }
 0x594   : > { %v8939_v14 = vcombine.high %v4317_v10, %v4333_v11  ;;  %v8938_v16 = vcombine.low %v4317_v10, %v4333_v11  ;;  %v4015_v10 = vld [vmem:[%s12873_s13 + $0x2a0] sm:$0xff] }
 0x596   : > { %3915 = vmatpush1.bf16.msra.mxu1 %v9653_v12  ;;  %v8906_v12 = vcombine.low %v4285_v6, %v4301_v7 }
 0x597   : > { %3916 = vmatprep.subr.bf16.mxu1 %v9658_v15  ;;  %v4349_v15 = vld [vmem:[%s12873_s13 + $0xd10] sm:$0xff] }
 0x598   : > { %v8970_v52 = vcombine.low %v4349_v15, %v4365_v13 }
 0x59a   : > { %3917 = vmatpush1.bf16.msra.mxu1 %v9656_v17  ;;  %v8971_v17 = vcombine.high %v4349_v15, %v4365_v13  ;;  %v4028_v13 = vld [vmem:[%s12873_s13 + $0x308] sm:$0xff] }
 0x59b   : > { %7253 = vmatprep.subr.bf16.mxu1 %v8555_v18  ;;  %v4379_v18 = vld [vmem:[%s12873_s13 + $0xe00] sm:$0xff] }
 0x59d   : > { %3919 = vmatmul.mubr.bf16.vlgmr.msra.gmra.mrb[16].mxu1 %v3447_v22  ;;  %v4397_v22 = vld [vmem:[%s12873_s13 + $0xe90] sm:$0xff] }
 0x59e   : > { %7254 = vmatpush1.bf16.msra.mxu1 %v8554_v21  ;;  %v8999_v21 = vcombine.high %v4379_v18, %v4395_v19  ;;  %v9002_v24 = vcombine.low %v4381_v20, %v4397_v22  ;;  %v9003_v25 = vcombine.high %v4381_v20, %v4397_v22  ;;  %v4060_v22 = vld [vmem:[%s12873_s13 + $0x408] sm:$0xff] }
 0x59f   : > { %7255 = vmatprep.subr.bf16.mxu1 %v8587_v23  ;;  %v8998_v23 = vcombine.low %v4379_v18, %v4395_v19 }
 0x5a0   : > { %7199 = vmatprep.subr.bf16.mxu0 %v8999_v21 }
 0x5a1   : > { %7200 = vmatpush1.bf16.msra.mxu0 %v8998_v23  ;;  %v4076_v23 = vld [vmem:[%s12873_s13 + $0x488] sm:$0xff] }
 0x5a2   : > { %7256 = vmatpush1.bf16.msra.mxu1 %v8586_v26  ;;  %v4411_v26 = vld [vmem:[%s12873_s13 + $0xf00] sm:$0xff] }
 0x5a3   : > { %7257 = vmatprep.subr.bf16.mxu1 %v8619_v27  ;;  %v4427_v27 = vld [vmem:[%s12873_s13 + $0xf80] sm:$0xff] }
 0x5a4   : > { %v9031_v29 = vcombine.high %v4411_v26, %v4427_v27 }
 0x5a6   : > { %7258 = vmatpush1.bf16.msra.mxu1 %v8618_v30  ;;  %v4429_v30 = vld [vmem:[%s12873_s13 + $0xf90] sm:$0xff]  ;;  %7201 = vmatprep.subr.bf16.mxu0 %v9031_v29 }
 0x5a7   : > { %7259 = vmatprep.subr.bf16.mxu1 %v8651_v31  ;;  %v9030_v31 = vcombine.low %v4411_v26, %v4427_v27  ;;  %v9034_v32 = vcombine.low %v4413_v28, %v4429_v30  ;;  %v9035_v33 = vcombine.high %v4413_v28, %v4429_v30  ;;  %v8681_v28 = vcombine.high %v4060_v22, %v4076_v23  ;;  %v4092_v30 = vld [vmem:[%s12873_s13 + $0x508] sm:$0xff] }
 0x5a9   : > { %7202 = vmatpush1.bf16.msra.mxu0 %v9030_v31  ;;  %v4108_v31 = vld [vmem:[%s12873_s13 + $0x588] sm:$0xff] }
 0x5aa   : > { %7260 = vmatpush1.bf16.msra.mxu1 %v8650_v34  ;;  %v3932_v34 = vld [vmem:[%s12873_s13 + $0x8] sm:$0xff] }
 0x5ab   : > { %7261 = vmatprep.subr.bf16.mxu1 %v8683_v35  ;;  %v3948_v35 = vld [vmem:[%s12873_s13 + $0x88] sm:$0xff] }
 0x5ac   : > { %v8553_v37 = vcombine.high %v3932_v34, %v3948_v35 }
 0x5ae   : > { %7262 = vmatpush1.bf16.msra.mxu1 %v8682_v38  ;;  %v3951_v38 = vld [vmem:[%s12873_s13 + $0xa0] sm:$0xff]  ;;  %7212 = vmatprep.subr.bf16.mxu0 %v8553_v37 }
 0x5af   : > { %7263 = vmatprep.subr.bf16.mxu1 %v8715_v39  ;;  %v8552_v39 = vcombine.low %v3932_v34, %v3948_v35  ;;  %v8558_v59 = vcombine.low %v3935_v36, %v3951_v38  ;;  %v8559_v41 = vcombine.high %v3935_v36, %v3951_v38  ;;  %v8680_v34 = vcombine.low %v4060_v22, %v4076_v23  ;;  %v4124_v38 = vld [vmem:[%s12873_s13 + $0x608] sm:$0xff] }
 0x5b0   : > { %v8713_v36 = vcombine.high %v4092_v30, %v4108_v31 }
 0x5b2   : > { %7264 = vmatpush1.bf16.msra.mxu1 %v8714_v42  ;;  %v3513_v42 = vld [vmem:[%s12872_s12] sm:$0x3] }
 0x5b3   : > { %7265 = vmatprep.subr.bf16.mxu1 %v8747_v43  ;;  %v3838_v43 = vrot.slane %v3513_v42, %v10234_v50  ;;  %v3842_v44 = vrot.slane %v3513_v42, %v10245_v53  ;;  %v8712_v42 = vcombine.low %v4092_v30, %v4108_v31 }
 0x5b6   : > { %7266 = vmatpush1.bf16.msra.mxu1 %v8746_v46 }
 0x5b7   : > { %7267 = vmatprep.subr.bf16.mxu1 %v8779_v58 }
 0x5ba   : > { %7268 = vmatpush1.bf16.msra.mxu1 %v8778_v62 }
 0x5bb   : > { %7269 = vmatprep.subr.bf16.mxu1 %v8811_v63 }
 0x5be   : > { %7270 = vmatpush1.bf16.msra.mxu1 %v8810_v1  ;;  %v3980_v1 = vld [vmem:[%s12873_s13 + $0x188] sm:$0xff] }
 0x5bf   : > { %7271 = vmatprep.subr.bf16.mxu1 %v8843_v2  ;;  %v3967_v2 = vld [vmem:[%s12873_s13 + $0x120] sm:$0xff]  ;;  %v8585_v6 = vcombine.high %v3964_v47, %v3980_v1  ;;  %v8584_v11 = vcombine.low %v3964_v47, %v3980_v1  ;;  %v4188_v1 = vld [vmem:[%s12873_s13 + $0x808] sm:$0xff] }
 0x5c0   : > { %v8591_v7 = vcombine.high %v3967_v2, %v3983_v3 }
 0x5c2   : > { %7272 = vmatpush1.bf16.msra.mxu1 %v8842_v4 }
 0x5c3   : > { %7273 = vmatprep.subr.bf16.mxu1 %v8875_v5  ;;  %v3996_v5 = vld [vmem:[%s12873_s13 + $0x208] sm:$0xff] }
 0x5c6   : > { %7274 = vmatpush1.bf16.msra.mxu1 %v8874_v8  ;;  %v4012_v8 = vld [vmem:[%s12873_s13 + $0x288] sm:$0xff] }
 0x5c7   : > { %7275 = vmatprep.subr.bf16.mxu1 %v8907_v9  ;;  %v3999_v9 = vld [vmem:[%s12873_s13 + $0x220] sm:$0xff]  ;;  %v8616_v18 = vcombine.low %v3996_v5, %v4012_v8 }
 0x5c8   : > { %v8623_v15 = vcombine.high %v3999_v9, %v4015_v10  ;;  %v8622_v19 = vcombine.low %v3999_v9, %v4015_v10  ;;  %v4220_v10 = vld [vmem:[%s12873_s13 + $0x908] sm:$0xff] }
 0x5ca   : > { %7276 = vmatpush1.bf16.msra.mxu1 %v8906_v12  ;;  %v8590_v12 = vcombine.low %v3967_v2, %v3983_v3  ;;  %v4204_v2 = vld [vmem:[%s12873_s13 + $0x888] sm:$0xff]  ;;  %v4191_v3 = vld [vmem:[%s12873_s13 + $0x820] sm:$0xff] }
 0x5cb   : > { %7277 = vmatprep.subr.bf16.mxu1 %v8939_v14  ;;  %v8617_v14 = vcombine.high %v3996_v5, %v4012_v8  ;;  %v4207_v5 = vld [vmem:[%s12873_s13 + $0x8a0] sm:$0xff]  ;;  %v8809_v8 = vcombine.high %v4188_v1, %v4204_v2 }
 0x5cc   : > { %v8815_v9 = vcombine.high %v4191_v3, %v4207_v5 }
 0x5ce   : > { %7278 = vmatpush1.bf16.msra.mxu1 %v8938_v16  ;;  %v4044_v16 = vld [vmem:[%s12873_s13 + $0x388] sm:$0xff] }
 0x5cf   : > { %7279 = vmatprep.subr.bf16.mxu1 %v8971_v17  ;;  %v4031_v17 = vld [vmem:[%s12873_s13 + $0x320] sm:$0xff]  ;;  %v8649_v20 = vcombine.high %v4028_v13, %v4044_v16  ;;  %v8648_v26 = vcombine.low %v4028_v13, %v4044_v16  ;;  %v8814_v13 = vcombine.low %v4191_v3, %v4207_v5  ;;  %v4412_v5 = vld [vmem:[%s12873_s13 + $0xf08] sm:$0xff] }
 0x5d2   : > { %7280 = vmatpush1.bf16.msra.mxu1 %v8970_v52  ;;  %v4047_v52 = vld [vmem:[%s12873_s13 + $0x3a0] sm:$0xff] }
 0x5d3   : > { %7281 = vmatprep.subr.bf16.mxu1 %v9003_v25  ;;  %v8655_v21 = vcombine.high %v4031_v17, %v4047_v52  ;;  %v4079_v25 = vld [vmem:[%s12873_s13 + $0x4a0] sm:$0xff]  ;;  %v8654_v27 = vcombine.low %v4031_v17, %v4047_v52  ;;  %v4252_v52 = vld [vmem:[%s12873_s13 + $0xa08] sm:$0xff] }
 0x5d6   : > { %7282 = vmatpush1.bf16.msra.mxu1 %v9002_v24  ;;  %v4063_v24 = vld [vmem:[%s12873_s13 + $0x420] sm:$0xff] }
 0x5d7   : > { %7283 = vmatprep.subr.bf16.mxu1 %v9035_v33  ;;  %v8687_v29 = vcombine.high %v4063_v24, %v4079_v25  ;;  %v4111_v33 = vld [vmem:[%s12873_s13 + $0x5a0] sm:$0xff]  ;;  %v8686_v35 = vcombine.low %v4063_v24, %v4079_v25  ;;  %v4284_v25 = vld [vmem:[%s12873_s13 + $0xb08] sm:$0xff] }
 0x5da   : > { %7284 = vmatpush1.bf16.msra.mxu1 %v9034_v32  ;;  %v4095_v32 = vld [vmem:[%s12873_s13 + $0x520] sm:$0xff] }
 0x5db   : > { %7335 = vmatprep.subr.bf16.mxu1 %v8559_v41  ;;  %v8719_v37 = vcombine.high %v4095_v32, %v4111_v33  ;;  %v4143_v41 = vld [vmem:[%s12873_s13 + $0x6a0] sm:$0xff] }
 0x670   : > { %v3920_v45 = vpop.f32.mrb[16].mxu1 }
 0x671   : > { %v9111_v46 = vadd.f32 %v3920_v45, %v3838_v43  ;;  %v3922_v58 = vpop.f32.mrb[17].mxu1  ;;  %v8718_v43 = vcombine.low %v4095_v32, %v4111_v33  ;;  %v4316_v33 = vld [vmem:[%s12873_s13 + $0xc08] sm:$0xff] }
 0x672   : > { %v9112_v60 = vadd.f32 %v3922_v58, %v3842_v44  ;;  %v3924_v61 = vpop.f32.mrb[18].mxu1  ;;  %v4172_v58 = vld [vmem:[%s12873_s13 + $0x788] sm:$0xff] }
 0x673   : > { %v3927_v62 = vmax.f32 %v9111_v46, 0.0  ;;  %v3925_v63 = vpop.f32.mrb[19].mxu1  ;;  %v4156_v46 = vld [vmem:[%s12873_s13 + $0x708] sm:$0xff]  ;;  %v4175_v61 = vld [vmem:[%s12873_s13 + $0x7a0] sm:$0xff] }
 0x674   : > { %v3928_v0 = vmax.f32 %v9112_v60, 0.0  ;;  %v4159_v60 = vld [vmem:[%s12873_s13 + $0x720] sm:$0xff] }
 0x675   : > { %v11306_v4 = vpack.c.bf16 %v3927_v62, %v3927_v62  ;;  %v8783_v47 = vcombine.high %v4159_v60, %v4175_v61 }
 0x676   : > { %v11304_v49 = vpack.c.bf16 %v3928_v0, %v3928_v0  ;;  %v8777_v0 = vcombine.high %v4156_v46, %v4172_v58 }
 0x678   : > { %7203 = vmatprep.mubr.bf16.mxu0 %v11304_v49  ;;  %7285 = vmatprep.mubr.bf16.mxu1 %v11304_v49 }
 0x679   : > { %7204 = vmatmul.mubr.bf16.vlgmr.msra.gmra.mrb[20].mxu0 %v11306_v4  ;;  %7286 = vmatmul.mubr.bf16.vlgmr.msra.gmra.mrb[20].mxu1 %v11306_v4 }
 0x67a   : > { %7213 = vmatpush1.bf16.msra.mxu0 %v8552_v39  ;;  %7336 = vmatpush1.bf16.msra.mxu1 %v8558_v59  ;;  %v4140_v39 = vld [vmem:[%s12873_s13 + $0x688] sm:$0xff]  ;;  %v4127_v59 = vld [vmem:[%s12873_s13 + $0x620] sm:$0xff] }
 0x67b   : > { %7244 = vmatprep.mubr.bf16.mxu0 %v11304_v49  ;;  %7367 = vmatprep.mubr.bf16.mxu1 %v11304_v49  ;;  %v8745_v44 = vcombine.high %v4124_v38, %v4140_v39  ;;  %v8751_v45 = vcombine.high %v4127_v59, %v4143_v41  ;;  %v8744_v62 = vcombine.low %v4124_v38, %v4140_v39 }
 0x67c   : > { %7214 = vmatprep.subr.bf16.mxu0 %v8585_v6  ;;  %7337 = vmatprep.subr.bf16.mxu1 %v8591_v7  ;;  %v8750_v63 = vcombine.low %v4127_v59, %v4143_v41  ;;  %v8776_v6 = vcombine.low %v4156_v46, %v4172_v58  ;;  %v8782_v7 = vcombine.low %v4159_v60, %v4175_v61  ;;  %v4348_v41 = vld [vmem:[%s12873_s13 + $0xd08] sm:$0xff] }
 0x67d   : > { %v4380_v61 = vld [vmem:[%s12873_s13 + $0xe08] sm:$0xff] }
 0x67e   : > { %7215 = vmatpush1.bf16.msra.mxu0 %v8584_v11  ;;  %7338 = vmatpush1.bf16.msra.mxu1 %v8590_v12  ;;  %v4236_v11 = vld [vmem:[%s12873_s13 + $0x988] sm:$0xff]  ;;  %v4223_v12 = vld [vmem:[%s12873_s13 + $0x920] sm:$0xff] }
 0x67f   : > { %7216 = vmatprep.subr.bf16.mxu0 %v8617_v14  ;;  %7339 = vmatprep.subr.bf16.mxu1 %v8623_v15  ;;  %v4239_v14 = vld [vmem:[%s12873_s13 + $0x9a0] sm:$0xff]  ;;  %v8808_v15 = vcombine.low %v4188_v1, %v4204_v2  ;;  %v8841_v16 = vcombine.high %v4220_v10, %v4236_v11 }
 0x680   : > { %v8847_v17 = vcombine.high %v4223_v12, %v4239_v14  ;;  %v8846_v22 = vcombine.low %v4223_v12, %v4239_v14  ;;  %v3934_v14 = vld [vmem:[%s12873_s13 + $0x18] sm:$0xff] }
 0x682   : > { %7217 = vmatpush1.bf16.msra.mxu0 %v8616_v18  ;;  %7340 = vmatpush1.bf16.msra.mxu1 %v8622_v19  ;;  %v4268_v18 = vld [vmem:[%s12873_s13 + $0xa88] sm:$0xff]  ;;  %v4255_v19 = vld [vmem:[%s12873_s13 + $0xa20] sm:$0xff] }
 0x683   : > { %7218 = vmatprep.subr.bf16.mxu0 %v8649_v20  ;;  %7341 = vmatprep.subr.bf16.mxu1 %v8655_v21  ;;  %v4271_v20 = vld [vmem:[%s12873_s13 + $0xaa0] sm:$0xff]  ;;  %v8840_v21 = vcombine.low %v4220_v10, %v4236_v11  ;;  %v8873_v23 = vcombine.high %v4252_v52, %v4268_v18 }
 0x684   : > { %v8879_v24 = vcombine.high %v4255_v19, %v4271_v20  ;;  %v8878_v30 = vcombine.low %v4255_v19, %v4271_v20  ;;  %v3966_v20 = vld [vmem:[%s12873_s13 + $0x118] sm:$0xff] }
 0x686   : > { %7219 = vmatpush1.bf16.msra.mxu0 %v8648_v26  ;;  %7342 = vmatpush1.bf16.msra.mxu1 %v8654_v27  ;;  %v4300_v26 = vld [vmem:[%s12873_s13 + $0xb88] sm:$0xff]  ;;  %v4287_v27 = vld [vmem:[%s12873_s13 + $0xb20] sm:$0xff] }
 0x687   : > { %7220 = vmatprep.subr.bf16.mxu0 %v8681_v28  ;;  %7343 = vmatprep.subr.bf16.mxu1 %v8687_v29  ;;  %v4303_v28 = vld [vmem:[%s12873_s13 + $0xba0] sm:$0xff]  ;;  %v8872_v29 = vcombine.low %v4252_v52, %v4268_v18  ;;  %v8905_v31 = vcombine.high %v4284_v25, %v4300_v26 }
 0x688   : > { %v8911_v32 = vcombine.high %v4287_v27, %v4303_v28  ;;  %v8910_v38 = vcombine.low %v4287_v27, %v4303_v28  ;;  %v3998_v28 = vld [vmem:[%s12873_s13 + $0x218] sm:$0xff] }
 0x68a   : > { %7221 = vmatpush1.bf16.msra.mxu0 %v8680_v34  ;;  %7344 = vmatpush1.bf16.msra.mxu1 %v8686_v35  ;;  %v4332_v34 = vld [vmem:[%s12873_s13 + $0xc88] sm:$0xff]  ;;  %v4319_v35 = vld [vmem:[%s12873_s13 + $0xc20] sm:$0xff] }
 0x68b   : > { %7222 = vmatprep.subr.bf16.mxu0 %v8713_v36  ;;  %7345 = vmatprep.subr.bf16.mxu1 %v8719_v37  ;;  %v4335_v36 = vld [vmem:[%s12873_s13 + $0xca0] sm:$0xff]  ;;  %v8904_v37 = vcombine.low %v4284_v25, %v4300_v26  ;;  %v8937_v39 = vcombine.high %v4316_v33, %v4332_v34 }
 0x68c   : > { %v8943_v59 = vcombine.high %v4319_v35, %v4335_v36  ;;  %v8942_v46 = vcombine.low %v4319_v35, %v4335_v36  ;;  %v4030_v36 = vld [vmem:[%s12873_s13 + $0x318] sm:$0xff] }
 0x68e   : > { %7223 = vmatpush1.bf16.msra.mxu0 %v8712_v42  ;;  %7346 = vmatpush1.bf16.msra.mxu1 %v8718_v43  ;;  %v4364_v42 = vld [vmem:[%s12873_s13 + $0xd88] sm:$0xff]  ;;  %v4351_v43 = vld [vmem:[%s12873_s13 + $0xd20] sm:$0xff] }
 0x68f   : > { %7224 = vmatprep.subr.bf16.mxu0 %v8745_v44  ;;  %7347 = vmatprep.subr.bf16.mxu1 %v8751_v45  ;;  %v4367_v44 = vld [vmem:[%s12873_s13 + $0xda0] sm:$0xff]  ;;  %v8936_v45 = vcombine.low %v4316_v33, %v4332_v34  ;;  %v8969_v58 = vcombine.high %v4348_v41, %v4364_v42 }
 0x690   : > { %v8975_v60 = vcombine.high %v4351_v43, %v4367_v44  ;;  %v8974_v1 = vcombine.low %v4351_v43, %v4367_v44  ;;  %v4062_v44 = vld [vmem:[%s12873_s13 + $0x418] sm:$0xff] }
 0x692   : > { %7225 = vmatpush1.bf16.msra.mxu0 %v8744_v62  ;;  %7348 = vmatpush1.bf16.msra.mxu1 %v8750_v63  ;;  %v4396_v62 = vld [vmem:[%s12873_s13 + $0xe88] sm:$0xff]  ;;  %v4383_v63 = vld [vmem:[%s12873_s13 + $0xe20] sm:$0xff] }
 0x693   : > { %7226 = vmatprep.subr.bf16.mxu0 %v8777_v0  ;;  %7349 = vmatprep.subr.bf16.mxu1 %v8783_v47  ;;  %v4399_v0 = vld [vmem:[%s12873_s13 + $0xea0] sm:$0xff]  ;;  %v8968_v47 = vcombine.low %v4348_v41, %v4364_v42  ;;  %v9001_v2 = vcombine.high %v4380_v61, %v4396_v62 }
 0x694   : > { %v9007_v3 = vcombine.high %v4383_v63, %v4399_v0  ;;  %v9006_v10 = vcombine.low %v4383_v63, %v4399_v0  ;;  %v4094_v0 = vld [vmem:[%s12873_s13 + $0x518] sm:$0xff] }
 0x696   : > { %7227 = vmatpush1.bf16.msra.mxu0 %v8776_v6  ;;  %7350 = vmatpush1.bf16.msra.mxu1 %v8782_v7  ;;  %v4428_v6 = vld [vmem:[%s12873_s13 + $0xf88] sm:$0xff]  ;;  %v4415_v7 = vld [vmem:[%s12873_s13 + $0xf20] sm:$0xff] }
 0x697   : > { %7228 = vmatprep.subr.bf16.mxu0 %v8809_v8  ;;  %7351 = vmatprep.subr.bf16.mxu1 %v8815_v9  ;;  %v4431_v8 = vld [vmem:[%s12873_s13 + $0xfa0] sm:$0xff]  ;;  %v9000_v9 = vcombine.low %v4380_v61, %v4396_v62  ;;  %v9033_v11 = vcombine.high %v4412_v5, %v4428_v6 }
 0x698   : > { %v9039_v12 = vcombine.high %v4415_v7, %v4431_v8  ;;  %v9038_v52 = vcombine.low %v4415_v7, %v4431_v8  ;;  %v4126_v8 = vld [vmem:[%s12873_s13 + $0x618] sm:$0xff] }
 0x69a   : > { %7229 = vmatpush1.bf16.msra.mxu0 %v8808_v15  ;;  %7352 = vmatpush1.bf16.msra.mxu1 %v8814_v13  ;;  %v3950_v15 = vld [vmem:[%s12873_s13 + $0x98] sm:$0xff]  ;;  %v3937_v13 = vld [vmem:[%s12873_s13 + $0x30] sm:$0xff] }
 0x69b   : > { %7230 = vmatprep.subr.bf16.mxu0 %v8841_v16  ;;  %7353 = vmatprep.subr.bf16.mxu1 %v8847_v17  ;;  %v3953_v16 = vld [vmem:[%s12873_s13 + $0xb0] sm:$0xff]  ;;  %v9032_v17 = vcombine.low %v4412_v5, %v4428_v6  ;;  %v8557_v18 = vcombine.high %v3934_v14, %v3950_v15 }
 0x69c   : > { %v8563_v19 = vcombine.high %v3937_v13, %v3953_v16  ;;  %v8562_v25 = vcombine.low %v3937_v13, %v3953_v16  ;;  %v4158_v16 = vld [vmem:[%s12873_s13 + $0x718] sm:$0xff] }
 0x69e   : > { %7231 = vmatpush1.bf16.msra.mxu0 %v8840_v21  ;;  %7354 = vmatpush1.bf16.msra.mxu1 %v8846_v22  ;;  %v3982_v21 = vld [vmem:[%s12873_s13 + $0x198] sm:$0xff]  ;;  %v3969_v22 = vld [vmem:[%s12873_s13 + $0x130] sm:$0xff] }
 0x69f   : > { %7232 = vmatprep.subr.bf16.mxu0 %v8873_v23  ;;  %7355 = vmatprep.subr.bf16.mxu1 %v8879_v24  ;;  %v3985_v23 = vld [vmem:[%s12873_s13 + $0x1b0] sm:$0xff]  ;;  %v8556_v24 = vcombine.low %v3934_v14, %v3950_v15  ;;  %v8589_v26 = vcombine.high %v3966_v20, %v3982_v21 }
 0x6a0   : > { %v8595_v27 = vcombine.high %v3969_v22, %v3985_v23  ;;  %v8594_v33 = vcombine.low %v3969_v22, %v3985_v23  ;;  %v4190_v23 = vld [vmem:[%s12873_s13 + $0x818] sm:$0xff] }
 0x6a2   : > { %7233 = vmatpush1.bf16.msra.mxu0 %v8872_v29  ;;  %7356 = vmatpush1.bf16.msra.mxu1 %v8878_v30  ;;  %v4014_v29 = vld [vmem:[%s12873_s13 + $0x298] sm:$0xff]  ;;  %v4001_v30 = vld [vmem:[%s12873_s13 + $0x230] sm:$0xff] }
 0x6a3   : > { %7234 = vmatprep.subr.bf16.mxu0 %v8905_v31  ;;  %7357 = vmatprep.subr.bf16.mxu1 %v8911_v32  ;;  %v4017_v31 = vld [vmem:[%s12873_s13 + $0x2b0] sm:$0xff]  ;;  %v8588_v32 = vcombine.low %v3966_v20, %v3982_v21  ;;  %v8621_v34 = vcombine.high %v3998_v28, %v4014_v29 }
 0x6a4   : > { %v8627_v35 = vcombine.high %v4001_v30, %v4017_v31  ;;  %v8626_v41 = vcombine.low %v4001_v30, %v4017_v31  ;;  %v4222_v31 = vld [vmem:[%s12873_s13 + $0x918] sm:$0xff] }
 0x6a6   : > { %7235 = vmatpush1.bf16.msra.mxu0 %v8904_v37  ;;  %7358 = vmatpush1.bf16.msra.mxu1 %v8910_v38  ;;  %v4046_v37 = vld [vmem:[%s12873_s13 + $0x398] sm:$0xff]  ;;  %v4033_v38 = vld [vmem:[%s12873_s13 + $0x330] sm:$0xff] }
 0x6a7   : > { %7236 = vmatprep.subr.bf16.mxu0 %v8937_v39  ;;  %7359 = vmatprep.subr.bf16.mxu1 %v8943_v59  ;;  %v4049_v39 = vld [vmem:[%s12873_s13 + $0x3b0] sm:$0xff]  ;;  %v8620_v59 = vcombine.low %v3998_v28, %v4014_v29  ;;  %v8653_v42 = vcombine.high %v4030_v36, %v4046_v37 }
 0x6a8   : > { %v8659_v43 = vcombine.high %v4033_v38, %v4049_v39  ;;  %v8658_v61 = vcombine.low %v4033_v38, %v4049_v39  ;;  %v4254_v39 = vld [vmem:[%s12873_s13 + $0xa18] sm:$0xff] }
 0x6aa   : > { %7237 = vmatpush1.bf16.msra.mxu0 %v8936_v45  ;;  %7360 = vmatpush1.bf16.msra.mxu1 %v8942_v46  ;;  %v4078_v45 = vld [vmem:[%s12873_s13 + $0x498] sm:$0xff]  ;;  %v4065_v46 = vld [vmem:[%s12873_s13 + $0x430] sm:$0xff] }
 0x6ab   : > { %7238 = vmatprep.subr.bf16.mxu0 %v8969_v58  ;;  %7361 = vmatprep.subr.bf16.mxu1 %v8975_v60  ;;  %v4081_v58 = vld [vmem:[%s12873_s13 + $0x4b0] sm:$0xff]  ;;  %v8652_v60 = vcombine.low %v4030_v36, %v4046_v37  ;;  %v8685_v62 = vcombine.high %v4062_v44, %v4078_v45 }
 0x6ac   : > { %v8691_v63 = vcombine.high %v4065_v46, %v4081_v58  ;;  %v8690_v5 = vcombine.low %v4065_v46, %v4081_v58  ;;  %v4286_v58 = vld [vmem:[%s12873_s13 + $0xb18] sm:$0xff] }
 0x6ae   : > { %7239 = vmatpush1.bf16.msra.mxu0 %v8968_v47  ;;  %7362 = vmatpush1.bf16.msra.mxu1 %v8974_v1  ;;  %v4110_v47 = vld [vmem:[%s12873_s13 + $0x598] sm:$0xff]  ;;  %v4097_v1 = vld [vmem:[%s12873_s13 + $0x530] sm:$0xff] }
 0x6af   : > { %7240 = vmatprep.subr.bf16.mxu0 %v9001_v2  ;;  %7363 = vmatprep.subr.bf16.mxu1 %v9007_v3  ;;  %v4113_v2 = vld [vmem:[%s12873_s13 + $0x5b0] sm:$0xff]  ;;  %v8684_v3 = vcombine.low %v4062_v44, %v4078_v45  ;;  %v8717_v6 = vcombine.high %v4094_v0, %v4110_v47 }
 0x6b0   : > { %v8723_v7 = vcombine.high %v4097_v1, %v4113_v2  ;;  %v8722_v14 = vcombine.low %v4097_v1, %v4113_v2  ;;  %v4318_v2 = vld [vmem:[%s12873_s13 + $0xc18] sm:$0xff] }
 0x6b2   : > { %7241 = vmatpush1.bf16.msra.mxu0 %v9000_v9  ;;  %7364 = vmatpush1.bf16.msra.mxu1 %v9006_v10  ;;  %v4142_v9 = vld [vmem:[%s12873_s13 + $0x698] sm:$0xff]  ;;  %v4129_v10 = vld [vmem:[%s12873_s13 + $0x630] sm:$0xff] }
 0x6b3   : > { %7242 = vmatprep.subr.bf16.mxu0 %v9033_v11  ;;  %7365 = vmatprep.subr.bf16.mxu1 %v9039_v12  ;;  %v4145_v11 = vld [vmem:[%s12873_s13 + $0x6b0] sm:$0xff]  ;;  %v8716_v12 = vcombine.low %v4094_v0, %v4110_v47  ;;  %v8749_v15 = vcombine.high %v4126_v8, %v4142_v9 }
 0x6b4   : > { %v8755_v13 = vcombine.high %v4129_v10, %v4145_v11  ;;  %v8754_v20 = vcombine.low %v4129_v10, %v4145_v11  ;;  %v4350_v11 = vld [vmem:[%s12873_s13 + $0xd18] sm:$0xff] }
 0x6b6   : > { %7243 = vmatpush1.bf16.msra.mxu0 %v9032_v17  ;;  %7366 = vmatpush1.bf16.msra.mxu1 %v9038_v52  ;;  %v4174_v17 = vld [vmem:[%s12873_s13 + $0x798] sm:$0xff]  ;;  %v4161_v52 = vld [vmem:[%s12873_s13 + $0x730] sm:$0xff] }
 0x6b7   : > { %7294 = vmatprep.subr.bf16.mxu0 %v8557_v18  ;;  %7417 = vmatprep.subr.bf16.mxu1 %v8563_v19  ;;  %v4177_v18 = vld [vmem:[%s12873_s13 + $0x7b0] sm:$0xff]  ;;  %v8748_v19 = vcombine.low %v4126_v8, %v4142_v9  ;;  %v8781_v21 = vcombine.high %v4158_v16, %v4174_v17 }
 0x6b8   : > { %v8787_v22 = vcombine.high %v4161_v52, %v4177_v18  ;;  %v8786_v28 = vcombine.low %v4161_v52, %v4177_v18  ;;  %v4382_v18 = vld [vmem:[%s12873_s13 + $0xe18] sm:$0xff] }
 0x6b9   : > { %7245 = vmatmul.mubr.bf16.vlgmr.msra.gmra.mrb[24].mxu0 %v11306_v4  ;;  %7368 = vmatmul.mubr.bf16.vlgmr.msra.gmra.mrb[24].mxu1 %v11306_v4 }
 0x6ba   : > { %7295 = vmatpush1.bf16.msra.mxu0 %v8556_v24  ;;  %7326 = vmatprep.mubr.bf16.mxu0 %v11304_v49  ;;  %v4206_v24 = vld [vmem:[%s12873_s13 + $0x898] sm:$0xff] }
 0x6bb   : > { %7418 = vmatpush1.bf16.msra.mxu1 %v8562_v25  ;;  %7449 = vmatprep.mubr.bf16.mxu1 %v11304_v49  ;;  %v4193_v25 = vld [vmem:[%s12873_s13 + $0x830] sm:$0xff]  ;;  %v8813_v29 = vcombine.high %v4190_v23, %v4206_v24 }
 0x6bc   : > { %7296 = vmatprep.subr.bf16.mxu0 %v8589_v26  ;;  %7419 = vmatprep.subr.bf16.mxu1 %v8595_v27  ;;  %v4209_v26 = vld [vmem:[%s12873_s13 + $0x8b0] sm:$0xff]  ;;  %v8780_v27 = vcombine.low %v4158_v16, %v4174_v17 }
 0x6bd   : > { %v8819_v30 = vcombine.high %v4193_v25, %v4209_v26  ;;  %v8818_v36 = vcombine.low %v4193_v25, %v4209_v26  ;;  %v4414_v26 = vld [vmem:[%s12873_s13 + $0xf18] sm:$0xff] }
 0x6be   : > { %7297 = vmatpush1.bf16.msra.mxu0 %v8588_v32  ;;  %v4238_v32 = vld [vmem:[%s12873_s13 + $0x998] sm:$0xff] }
 0x6bf   : > { %7420 = vmatpush1.bf16.msra.mxu1 %v8594_v33  ;;  %7298 = vmatprep.subr.bf16.mxu0 %v8621_v34  ;;  %v4225_v33 = vld [vmem:[%s12873_s13 + $0x930] sm:$0xff]  ;;  %v8845_v37 = vcombine.high %v4222_v31, %v4238_v32 }
 0x6c0   : > { %7421 = vmatprep.subr.bf16.mxu1 %v8627_v35  ;;  %v4241_v34 = vld [vmem:[%s12873_s13 + $0x9b0] sm:$0xff]  ;;  %v8812_v35 = vcombine.low %v4190_v23, %v4206_v24 }
 0x6c1   : > { %v8851_v38 = vcombine.high %v4225_v33, %v4241_v34  ;;  %v8850_v44 = vcombine.low %v4225_v33, %v4241_v34  ;;  %v3936_v34 = vld [vmem:[%s12873_s13 + $0x28] sm:$0xff] }
 0x6c2   : > { %7299 = vmatpush1.bf16.msra.mxu0 %v8620_v59  ;;  %v4270_v59 = vld [vmem:[%s12873_s13 + $0xa98] sm:$0xff] }
 0x6c3   : > { %7422 = vmatpush1.bf16.msra.mxu1 %v8626_v41  ;;  %7300 = vmatprep.subr.bf16.mxu0 %v8653_v42  ;;  %v4257_v41 = vld [vmem:[%s12873_s13 + $0xa30] sm:$0xff]  ;;  %v8877_v45 = vcombine.high %v4254_v39, %v4270_v59 }
 0x6c4   : > { %7423 = vmatprep.subr.bf16.mxu1 %v8659_v43  ;;  %v4273_v42 = vld [vmem:[%s12873_s13 + $0xab0] sm:$0xff]  ;;  %v8844_v43 = vcombine.low %v4222_v31, %v4238_v32 }
 0x6c5   : > { %v8883_v46 = vcombine.high %v4257_v41, %v4273_v42  ;;  %v8882_v0 = vcombine.low %v4257_v41, %v4273_v42  ;;  %v3968_v42 = vld [vmem:[%s12873_s13 + $0x128] sm:$0xff] }
 0x6c6   : > { %7301 = vmatpush1.bf16.msra.mxu0 %v8652_v60  ;;  %v4302_v60 = vld [vmem:[%s12873_s13 + $0xb98] sm:$0xff] }
 0x6c7   : > { %7424 = vmatpush1.bf16.msra.mxu1 %v8658_v61  ;;  %7302 = vmatprep.subr.bf16.mxu0 %v8685_v62  ;;  %v4289_v61 = vld [vmem:[%s12873_s13 + $0xb30] sm:$0xff]  ;;  %v8909_v47 = vcombine.high %v4286_v58, %v4302_v60 }
 0x6c8   : > { %7425 = vmatprep.subr.bf16.mxu1 %v8691_v63  ;;  %v4305_v62 = vld [vmem:[%s12873_s13 + $0xbb0] sm:$0xff]  ;;  %v8876_v63 = vcombine.low %v4254_v39, %v4270_v59 }
 0x6c9   : > { %v8915_v1 = vcombine.high %v4289_v61, %v4305_v62  ;;  %v8914_v8 = vcombine.low %v4289_v61, %v4305_v62  ;;  %v4000_v61 = vld [vmem:[%s12873_s13 + $0x228] sm:$0xff] }
 0x6ca   : > { %7303 = vmatpush1.bf16.msra.mxu0 %v8684_v3  ;;  %v4334_v3 = vld [vmem:[%s12873_s13 + $0xc98] sm:$0xff]  ;;  %v4016_v62 = vld [vmem:[%s12873_s13 + $0x2a8] sm:$0xff] }
 0x6cb   : > { %7426 = vmatpush1.bf16.msra.mxu1 %v8690_v5  ;;  %7304 = vmatprep.subr.bf16.mxu0 %v8717_v6  ;;  %v4321_v5 = vld [vmem:[%s12873_s13 + $0xc30] sm:$0xff]  ;;  %v8941_v9 = vcombine.high %v4318_v2, %v4334_v3 }
 0x6cc   : > { %7427 = vmatprep.subr.bf16.mxu1 %v8723_v7  ;;  %v4337_v6 = vld [vmem:[%s12873_s13 + $0xcb0] sm:$0xff]  ;;  %v8908_v7 = vcombine.low %v4286_v58, %v4302_v60 }
 0x6cd   : > { %v8947_v10 = vcombine.high %v4321_v5, %v4337_v6  ;;  %v8946_v16 = vcombine.low %v4321_v5, %v4337_v6  ;;  %v4032_v6 = vld [vmem:[%s12873_s13 + $0x328] sm:$0xff] }
 0x6ce   : > { %7305 = vmatpush1.bf16.msra.mxu0 %v8716_v12  ;;  %v4366_v12 = vld [vmem:[%s12873_s13 + $0xd98] sm:$0xff] }
 0x6cf   : > { %7428 = vmatpush1.bf16.msra.mxu1 %v8722_v14  ;;  %7306 = vmatprep.subr.bf16.mxu0 %v8749_v15  ;;  %v4353_v14 = vld [vmem:[%s12873_s13 + $0xd30] sm:$0xff]  ;;  %v8973_v17 = vcombine.high %v4350_v11, %v4366_v12 }
 0x6d0   : > { %7429 = vmatprep.subr.bf16.mxu1 %v8755_v13  ;;  %v4369_v15 = vld [vmem:[%s12873_s13 + $0xdb0] sm:$0xff]  ;;  %v8940_v13 = vcombine.low %v4318_v2, %v4334_v3  ;;  %v8625_v3 = vcombine.high %v4000_v61, %v4016_v62 }
 0x6d1   : > { %v8979_v52 = vcombine.high %v4353_v14, %v4369_v15  ;;  %v8978_v23 = vcombine.low %v4353_v14, %v4369_v15  ;;  %v4064_v15 = vld [vmem:[%s12873_s13 + $0x428] sm:$0xff] }
 0x6d2   : > { %7307 = vmatpush1.bf16.msra.mxu0 %v8748_v19  ;;  %v4398_v19 = vld [vmem:[%s12873_s13 + $0xe98] sm:$0xff] }
 0x6d3   : > { %7430 = vmatpush1.bf16.msra.mxu1 %v8754_v20  ;;  %7308 = vmatprep.subr.bf16.mxu0 %v8781_v21  ;;  %v4385_v20 = vld [vmem:[%s12873_s13 + $0xe30] sm:$0xff]  ;;  %v9005_v24 = vcombine.high %v4382_v18, %v4398_v19 }
 0x6d4   : > { %7431 = vmatprep.subr.bf16.mxu1 %v8787_v22  ;;  %v4401_v21 = vld [vmem:[%s12873_s13 + $0xeb0] sm:$0xff]  ;;  %v8972_v22 = vcombine.low %v4350_v11, %v4366_v12 }
 0x6d5   : > { %v9011_v25 = vcombine.high %v4385_v20, %v4401_v21  ;;  %v9010_v31 = vcombine.low %v4385_v20, %v4401_v21  ;;  %v4096_v21 = vld [vmem:[%s12873_s13 + $0x528] sm:$0xff] }
 0x6d6   : > { %7309 = vmatpush1.bf16.msra.mxu0 %v8780_v27  ;;  %v4430_v27 = vld [vmem:[%s12873_s13 + $0xf98] sm:$0xff] }
 0x6d7   : > { %7432 = vmatpush1.bf16.msra.mxu1 %v8786_v28  ;;  %7310 = vmatprep.subr.bf16.mxu0 %v8813_v29  ;;  %v4417_v28 = vld [vmem:[%s12873_s13 + $0xf30] sm:$0xff]  ;;  %v9037_v32 = vcombine.high %v4414_v26, %v4430_v27 }
 0x6d8   : > { %7433 = vmatprep.subr.bf16.mxu1 %v8819_v30  ;;  %v4433_v29 = vld [vmem:[%s12873_s13 + $0xfb0] sm:$0xff]  ;;  %v9004_v30 = vcombine.low %v4382_v18, %v4398_v19 }
 0x6d9   : > { %v9043_v33 = vcombine.high %v4417_v28, %v4433_v29  ;;  %v9042_v39 = vcombine.low %v4417_v28, %v4433_v29  ;;  %v4128_v29 = vld [vmem:[%s12873_s13 + $0x628] sm:$0xff] }
 0x6da   : > { %7311 = vmatpush1.bf16.msra.mxu0 %v8812_v35  ;;  %v3952_v35 = vld [vmem:[%s12873_s13 + $0xa8] sm:$0xff] }
 0x6db   : > { %7434 = vmatpush1.bf16.msra.mxu1 %v8818_v36  ;;  %7312 = vmatprep.subr.bf16.mxu0 %v8845_v37  ;;  %v3939_v36 = vld [vmem:[%s12873_s13 + $0x40] sm:$0xff]  ;;  %v8561_v59 = vcombine.high %v3936_v34, %v3952_v35 }
 0x6dc   : > { %7435 = vmatprep.subr.bf16.mxu1 %v8851_v38  ;;  %v3955_v37 = vld [vmem:[%s12873_s13 + $0xc0] sm:$0xff]  ;;  %v9036_v38 = vcombine.low %v4414_v26, %v4430_v27 }
 0x6dd   : > { %v8567_v41 = vcombine.high %v3939_v36, %v3955_v37  ;;  %v8566_v58 = vcombine.low %v3939_v36, %v3955_v37  ;;  %v4160_v37 = vld [vmem:[%s12873_s13 + $0x728] sm:$0xff] }
 0x6de   : > { %7313 = vmatpush1.bf16.msra.mxu0 %v8844_v43  ;;  %v3984_v43 = vld [vmem:[%s12873_s13 + $0x1a8] sm:$0xff] }
 0x6df   : > { %7436 = vmatpush1.bf16.msra.mxu1 %v8850_v44  ;;  %7314 = vmatprep.subr.bf16.mxu0 %v8877_v45  ;;  %v8560_v44 = vcombine.low %v3936_v34, %v3952_v35  ;;  %v3971_v45 = vld [vmem:[%s12873_s13 + $0x140] sm:$0xff]  ;;  %v8593_v60 = vcombine.high %v3968_v42, %v3984_v43 }
 0x6e0   : > { %7437 = vmatprep.subr.bf16.mxu1 %v8883_v46  ;;  %v3987_v46 = vld [vmem:[%s12873_s13 + $0x1c0] sm:$0xff] }
 0x6e1   : > { %v8598_v2 = vcombine.low %v3971_v45, %v3987_v46 }
 0x6e2   : > { %7315 = vmatpush1.bf16.msra.mxu0 %v8876_v63  ;;  %v8599_v63 = vcombine.high %v3971_v45, %v3987_v46  ;;  %v4192_v45 = vld [vmem:[%s12873_s13 + $0x828] sm:$0xff] }
 0x6e3   : > { %7438 = vmatpush1.bf16.msra.mxu1 %v8882_v0  ;;  %7316 = vmatprep.subr.bf16.mxu0 %v8909_v47  ;;  %v4003_v0 = vld [vmem:[%s12873_s13 + $0x240] sm:$0xff]  ;;  %v4208_v46 = vld [vmem:[%s12873_s13 + $0x8a8] sm:$0xff] }
 0x6e4   : > { %7439 = vmatprep.subr.bf16.mxu1 %v8915_v1  ;;  %v4019_v47 = vld [vmem:[%s12873_s13 + $0x2c0] sm:$0xff]  ;;  %v8592_v1 = vcombine.low %v3968_v42, %v3984_v43 }
 0x6e5   : > { %v8631_v5 = vcombine.high %v4003_v0, %v4019_v47  ;;  %v8630_v11 = vcombine.low %v4003_v0, %v4019_v47  ;;  %v4224_v47 = vld [vmem:[%s12873_s13 + $0x928] sm:$0xff] }
 0x6e6   : > { %7317 = vmatpush1.bf16.msra.mxu0 %v8908_v7  ;;  %v4048_v7 = vld [vmem:[%s12873_s13 + $0x3a8] sm:$0xff] }
 0x6e7   : > { %7440 = vmatpush1.bf16.msra.mxu1 %v8914_v8  ;;  %7318 = vmatprep.subr.bf16.mxu0 %v8941_v9  ;;  %v4035_v8 = vld [vmem:[%s12873_s13 + $0x340] sm:$0xff]  ;;  %v8657_v12 = vcombine.high %v4032_v6, %v4048_v7 }
 0x6e8   : > { %7441 = vmatprep.subr.bf16.mxu1 %v8947_v10  ;;  %v4051_v9 = vld [vmem:[%s12873_s13 + $0x3c0] sm:$0xff]  ;;  %v8624_v10 = vcombine.low %v4000_v61, %v4016_v62 }
 0x6e9   : > { %v8663_v14 = vcombine.high %v4035_v8, %v4051_v9  ;;  %v8662_v18 = vcombine.low %v4035_v8, %v4051_v9  ;;  %v4256_v9 = vld [vmem:[%s12873_s13 + $0xa28] sm:$0xff] }
 0x6ea   : > { %7319 = vmatpush1.bf16.msra.mxu0 %v8940_v13  ;;  %v4080_v13 = vld [vmem:[%s12873_s13 + $0x4a8] sm:$0xff] }
 0x6eb   : > { %7442 = vmatpush1.bf16.msra.mxu1 %v8946_v16  ;;  %7320 = vmatprep.subr.bf16.mxu0 %v8973_v17  ;;  %v4067_v16 = vld [vmem:[%s12873_s13 + $0x440] sm:$0xff]  ;;  %v8689_v19 = vcombine.high %v4064_v15, %v4080_v13 }
 0x6ec   : > { %7443 = vmatprep.subr.bf16.mxu1 %v8979_v52  ;;  %v4083_v17 = vld [vmem:[%s12873_s13 + $0x4c0] sm:$0xff]  ;;  %v8656_v52 = vcombine.low %v4032_v6, %v4048_v7 }
 0x6ed   : > { %v8695_v20 = vcombine.high %v4067_v16, %v4083_v17  ;;  %v8694_v26 = vcombine.low %v4067_v16, %v4083_v17  ;;  %v4288_v17 = vld [vmem:[%s12873_s13 + $0xb28] sm:$0xff] }
 0x6ee   : > { %7321 = vmatpush1.bf16.msra.mxu0 %v8972_v22  ;;  %v4112_v22 = vld [vmem:[%s12873_s13 + $0x5a8] sm:$0xff] }
 0x6ef   : > { %7444 = vmatpush1.bf16.msra.mxu1 %v8978_v23  ;;  %7322 = vmatprep.subr.bf16.mxu0 %v9005_v24  ;;  %v4099_v23 = vld [vmem:[%s12873_s13 + $0x540] sm:$0xff]  ;;  %v8721_v27 = vcombine.high %v4096_v21, %v4112_v22 }
 0x6f0   : > { %7445 = vmatprep.subr.bf16.mxu1 %v9011_v25  ;;  %v4115_v24 = vld [vmem:[%s12873_s13 + $0x5c0] sm:$0xff]  ;;  %v8688_v25 = vcombine.low %v4064_v15, %v4080_v13 }
 0x6f1   : > { %v8727_v28 = vcombine.high %v4099_v23, %v4115_v24  ;;  %v8726_v34 = vcombine.low %v4099_v23, %v4115_v24  ;;  %v4320_v24 = vld [vmem:[%s12873_s13 + $0xc28] sm:$0xff] }
 0x6f2   : > { %7323 = vmatpush1.bf16.msra.mxu0 %v9004_v30  ;;  %v4144_v30 = vld [vmem:[%s12873_s13 + $0x6a8] sm:$0xff] }
 0x6f3   : > { %7446 = vmatpush1.bf16.msra.mxu1 %v9010_v31  ;;  %7324 = vmatprep.subr.bf16.mxu0 %v9037_v32  ;;  %v4131_v31 = vld [vmem:[%s12873_s13 + $0x640] sm:$0xff]  ;;  %v8753_v35 = vcombine.high %v4128_v29, %v4144_v30 }
 0x6f4   : > { %7447 = vmatprep.subr.bf16.mxu1 %v9043_v33  ;;  %v4147_v32 = vld [vmem:[%s12873_s13 + $0x6c0] sm:$0xff]  ;;  %v8720_v33 = vcombine.low %v4096_v21, %v4112_v22 }
 0x6f5   : > { %v8759_v36 = vcombine.high %v4131_v31, %v4147_v32  ;;  %v8758_v42 = vcombine.low %v4131_v31, %v4147_v32  ;;  %v4352_v32 = vld [vmem:[%s12873_s13 + $0xd28] sm:$0xff] }
 0x6f6   : > { %7325 = vmatpush1.bf16.msra.mxu0 %v9036_v38  ;;  %v4176_v38 = vld [vmem:[%s12873_s13 + $0x7a8] sm:$0xff] }
 0x6f7   : > { %7448 = vmatpush1.bf16.msra.mxu1 %v9042_v39  ;;  %7376 = vmatprep.subr.bf16.mxu0 %v8561_v59  ;;  %v4163_v39 = vld [vmem:[%s12873_s13 + $0x740] sm:$0xff]  ;;  %v8785_v43 = vcombine.high %v4160_v37, %v4176_v38  ;;  %v8784_v61 = vcombine.low %v4160_v37, %v4176_v38 }
 0x6f8   : > { %7499 = vmatprep.subr.bf16.mxu1 %v8567_v41  ;;  %v4179_v59 = vld [vmem:[%s12873_s13 + $0x7c0] sm:$0xff]  ;;  %v8752_v41 = vcombine.low %v4128_v29, %v4144_v30 }
 0x6f9   : > { %7327 = vmatmul.mubr.bf16.vlgmr.msra.gmra.mrb[28].mxu0 %v11306_v4  ;;  %v8790_v62 = vcombine.low %v4163_v39, %v4179_v59 }
 0x6fa   : > { %7450 = vmatmul.mubr.bf16.vlgmr.msra.gmra.mrb[28].mxu1 %v11306_v4  ;;  %7377 = vmatpush1.bf16.msra.mxu0 %v8560_v44  ;;  %v8791_v44 = vcombine.high %v4163_v39, %v4179_v59  ;;  %v4384_v59 = vld [vmem:[%s12873_s13 + $0xe28] sm:$0xff] }
 0x6fb   : > { %7408 = vmatprep.mubr.bf16.mxu0 %v11304_v49  ;;  %7500 = vmatpush1.bf16.msra.mxu1 %v8566_v58  ;;  %v4195_v58 = vld [vmem:[%s12873_s13 + $0x840] sm:$0xff] }
 0x6fc   : > { %7531 = vmatprep.mubr.bf16.mxu1 %v11304_v49  ;;  %7378 = vmatprep.subr.bf16.mxu0 %v8593_v60  ;;  %v4211_v60 = vld [vmem:[%s12873_s13 + $0x8c0] sm:$0xff] }
 0x6fd   : > { %7501 = vmatprep.subr.bf16.mxu1 %v8599_v63  ;;  %v8817_v63 = vcombine.high %v4192_v45, %v4208_v46  ;;  %v8823_v0 = vcombine.high %v4195_v58, %v4211_v60  ;;  %v8822_v6 = vcombine.low %v4195_v58, %v4211_v60  ;;  %v4416_v60 = vld [vmem:[%s12873_s13 + $0xf28] sm:$0xff] }
 0x6fe   : > { %7379 = vmatpush1.bf16.msra.mxu0 %v8592_v1  ;;  %v4240_v1 = vld [vmem:[%s12873_s13 + $0x9a8] sm:$0xff] }
 0x6ff   : > { %7502 = vmatpush1.bf16.msra.mxu1 %v8598_v2  ;;  %7380 = vmatprep.subr.bf16.mxu0 %v8625_v3  ;;  %v4227_v2 = vld [vmem:[%s12873_s13 + $0x940] sm:$0xff]  ;;  %v8849_v7 = vcombine.high %v4224_v47, %v4240_v1 }
 0x700   : > { %7503 = vmatprep.subr.bf16.mxu1 %v8631_v5  ;;  %v4243_v3 = vld [vmem:[%s12873_s13 + $0x9c0] sm:$0xff]  ;;  %v8816_v5 = vcombine.low %v4192_v45, %v4208_v46 }
 0x701   : > { %v8855_v8 = vcombine.high %v4227_v2, %v4243_v3  ;;  %v8854_v15 = vcombine.low %v4227_v2, %v4243_v3  ;;  %v3938_v3 = vld [vmem:[%s12873_s13 + $0x38] sm:$0xff] }
 0x702   : > { %7381 = vmatpush1.bf16.msra.mxu0 %v8624_v10  ;;  %v4272_v10 = vld [vmem:[%s12873_s13 + $0xaa8] sm:$0xff] }
 0x703   : > { %7504 = vmatpush1.bf16.msra.mxu1 %v8630_v11  ;;  %7382 = vmatprep.subr.bf16.mxu0 %v8657_v12  ;;  %v4259_v11 = vld [vmem:[%s12873_s13 + $0xa40] sm:$0xff]  ;;  %v8881_v13 = vcombine.high %v4256_v9, %v4272_v10 }
 0x704   : > { %7505 = vmatprep.subr.bf16.mxu1 %v8663_v14  ;;  %v4275_v12 = vld [vmem:[%s12873_s13 + $0xac0] sm:$0xff]  ;;  %v8848_v14 = vcombine.low %v4224_v47, %v4240_v1 }
 0x705   : > { %v8887_v16 = vcombine.high %v4259_v11, %v4275_v12  ;;  %v8886_v21 = vcombine.low %v4259_v11, %v4275_v12  ;;  %v3970_v12 = vld [vmem:[%s12873_s13 + $0x138] sm:$0xff] }
 0x706   : > { %7383 = vmatpush1.bf16.msra.mxu0 %v8656_v52  ;;  %v4304_v52 = vld [vmem:[%s12873_s13 + $0xba8] sm:$0xff] }
 0x707   : > { %7506 = vmatpush1.bf16.msra.mxu1 %v8662_v18  ;;  %7384 = vmatprep.subr.bf16.mxu0 %v8689_v19  ;;  %v4291_v18 = vld [vmem:[%s12873_s13 + $0xb40] sm:$0xff]  ;;  %v8913_v22 = vcombine.high %v4288_v17, %v4304_v52 }
 0x708   : > { %7507 = vmatprep.subr.bf16.mxu1 %v8695_v20  ;;  %v4307_v19 = vld [vmem:[%s12873_s13 + $0xbc0] sm:$0xff]  ;;  %v8880_v20 = vcombine.low %v4256_v9, %v4272_v10 }
 0x709   : > { %v8919_v23 = vcombine.high %v4291_v18, %v4307_v19  ;;  %v8918_v29 = vcombine.low %v4291_v18, %v4307_v19  ;;  %v4002_v18 = vld [vmem:[%s12873_s13 + $0x238] sm:$0xff] }
 0x70a   : > { %7385 = vmatpush1.bf16.msra.mxu0 %v8688_v25  ;;  %v4336_v25 = vld [vmem:[%s12873_s13 + $0xca8] sm:$0xff]  ;;  %v4018_v19 = vld [vmem:[%s12873_s13 + $0x2b8] sm:$0xff] }
 0x70b   : > { %7508 = vmatpush1.bf16.msra.mxu1 %v8694_v26  ;;  %7386 = vmatprep.subr.bf16.mxu0 %v8721_v27  ;;  %v4323_v26 = vld [vmem:[%s12873_s13 + $0xc40] sm:$0xff]  ;;  %v8945_v30 = vcombine.high %v4320_v24, %v4336_v25 }
 0x70c   : > { %7509 = vmatprep.subr.bf16.mxu1 %v8727_v28  ;;  %v4339_v27 = vld [vmem:[%s12873_s13 + $0xcc0] sm:$0xff]  ;;  %v8912_v28 = vcombine.low %v4288_v17, %v4304_v52 }
 0x70d   : > { %v8951_v31 = vcombine.high %v4323_v26, %v4339_v27  ;;  %v8950_v37 = vcombine.low %v4323_v26, %v4339_v27  ;;  %v4034_v27 = vld [vmem:[%s12873_s13 + $0x338] sm:$0xff] }
 0x70e   : > { %7387 = vmatpush1.bf16.msra.mxu0 %v8720_v33  ;;  %v4368_v33 = vld [vmem:[%s12873_s13 + $0xda8] sm:$0xff] }
 0x70f   : > { %7510 = vmatpush1.bf16.msra.mxu1 %v8726_v34  ;;  %7388 = vmatprep.subr.bf16.mxu0 %v8753_v35  ;;  %v4355_v34 = vld [vmem:[%s12873_s13 + $0xd40] sm:$0xff]  ;;  %v8977_v38 = vcombine.high %v4352_v32, %v4368_v33 }
 0x710   : > { %7511 = vmatprep.subr.bf16.mxu1 %v8759_v36  ;;  %v4371_v35 = vld [vmem:[%s12873_s13 + $0xdc0] sm:$0xff]  ;;  %v8944_v36 = vcombine.low %v4320_v24, %v4336_v25  ;;  %v8629_v25 = vcombine.high %v4002_v18, %v4018_v19 }
 0x711   : > { %v8983_v39 = vcombine.high %v4355_v34, %v4371_v35  ;;  %v8982_v45 = vcombine.low %v4355_v34, %v4371_v35  ;;  %v4066_v35 = vld [vmem:[%s12873_s13 + $0x438] sm:$0xff] }
 0x712   : > { %7389 = vmatpush1.bf16.msra.mxu0 %v8752_v41  ;;  %v4400_v41 = vld [vmem:[%s12873_s13 + $0xea8] sm:$0xff] }
 0x713   : > { %7512 = vmatpush1.bf16.msra.mxu1 %v8758_v42  ;;  %7390 = vmatprep.subr.bf16.mxu0 %v8785_v43  ;;  %v4387_v42 = vld [vmem:[%s12873_s13 + $0xe40] sm:$0xff]  ;;  %v9009_v46 = vcombine.high %v4384_v59, %v4400_v41 }
 0x714   : > { %7513 = vmatprep.subr.bf16.mxu1 %v8791_v44  ;;  %v4403_v43 = vld [vmem:[%s12873_s13 + $0xec0] sm:$0xff]  ;;  %v8976_v44 = vcombine.low %v4352_v32, %v4368_v33 }
 0x715   : > { %v9015_v58 = vcombine.high %v4387_v42, %v4403_v43  ;;  %v9014_v47 = vcombine.low %v4387_v42, %v4403_v43  ;;  %v4098_v43 = vld [vmem:[%s12873_s13 + $0x538] sm:$0xff] }
 0x716   : > { %7391 = vmatpush1.bf16.msra.mxu0 %v8784_v61  ;;  %v4432_v61 = vld [vmem:[%s12873_s13 + $0xfa8] sm:$0xff] }
 0x717   : > { %7514 = vmatpush1.bf16.msra.mxu1 %v8790_v62  ;;  %7392 = vmatprep.subr.bf16.mxu0 %v8817_v63  ;;  %v4419_v62 = vld [vmem:[%s12873_s13 + $0xf40] sm:$0xff]  ;;  %v9041_v1 = vcombine.high %v4416_v60, %v4432_v61 }
 0x718   : > { %7515 = vmatprep.subr.bf16.mxu1 %v8823_v0  ;;  %v4435_v63 = vld [vmem:[%s12873_s13 + $0xfc0] sm:$0xff]  ;;  %v9008_v0 = vcombine.low %v4384_v59, %v4400_v41 }
 0x719   : > { %v9047_v2 = vcombine.high %v4419_v62, %v4435_v63  ;;  %v9046_v9 = vcombine.low %v4419_v62, %v4435_v63 }
 0x71a   : > { %7393 = vmatpush1.bf16.msra.mxu0 %v8816_v5  ;;  %v3954_v5 = vld [vmem:[%s12873_s13 + $0xb8] sm:$0xff] }
 0x71b   : > { %7516 = vmatpush1.bf16.msra.mxu1 %v8822_v6  ;;  %7394 = vmatprep.subr.bf16.mxu0 %v8849_v7  ;;  %v3941_v6 = vld [vmem:[%s12873_s13 + $0x50] sm:$0xff]  ;;  %v8565_v10 = vcombine.high %v3938_v3, %v3954_v5 }
 0x71c   : > { %7517 = vmatprep.subr.bf16.mxu1 %v8855_v8  ;;  %v3957_v7 = vld [vmem:[%s12873_s13 + $0xd0] sm:$0xff]  ;;  %v9040_v8 = vcombine.low %v4416_v60, %v4432_v61  ;;  %v11953_v60 = vld [vmem:[%s12874_s14] sm:$0xff] }
 0x71d   : > { %v8571_v11 = vcombine.high %v3941_v6, %v3957_v7  ;;  %v8570_v17 = vcombine.low %v3941_v6, %v3957_v7  ;;  %v7018_v7 = vrot.slane %v11953_v60, %v10245_v53 }
 0x71e   : > { %7395 = vmatpush1.bf16.msra.mxu0 %v8848_v14  ;;  %v3986_v14 = vld [vmem:[%s12873_s13 + $0x1b8] sm:$0xff] }
 0x71f   : > { %7518 = vmatpush1.bf16.msra.mxu1 %v8854_v15  ;;  %7396 = vmatprep.subr.bf16.mxu0 %v8881_v13  ;;  %v8564_v15 = vcombine.low %v3938_v3, %v3954_v5  ;;  %v3973_v13 = vld [vmem:[%s12873_s13 + $0x150] sm:$0xff]  ;;  %v8597_v52 = vcombine.high %v3970_v12, %v3986_v14 }
 0x720   : > { %7519 = vmatprep.subr.bf16.mxu1 %v8887_v16  ;;  %v3989_v16 = vld [vmem:[%s12873_s13 + $0x1d0] sm:$0xff] }
 0x721   : > { %v8602_v24 = vcombine.low %v3973_v13, %v3989_v16  ;;  %v4133_v3 = vld [vmem:[%s12873_s13 + $0x650] sm:$0xff] }
 0x722   : > { %7397 = vmatpush1.bf16.msra.mxu0 %v8880_v20  ;;  %v8603_v20 = vcombine.high %v3973_v13, %v3989_v16  ;;  %v4149_v5 = vld [vmem:[%s12873_s13 + $0x6d0] sm:$0xff]  ;;  %v4178_v13 = vld [vmem:[%s12873_s13 + $0x7b8] sm:$0xff] }
 0x723   : > { %7520 = vmatpush1.bf16.msra.mxu1 %v8886_v21  ;;  %7398 = vmatprep.subr.bf16.mxu0 %v8913_v22  ;;  %v4005_v21 = vld [vmem:[%s12873_s13 + $0x250] sm:$0xff] }
 0x724   : > { %7521 = vmatprep.subr.bf16.mxu1 %v8919_v23  ;;  %v4021_v22 = vld [vmem:[%s12873_s13 + $0x2d0] sm:$0xff]  ;;  %v8596_v23 = vcombine.low %v3970_v12, %v3986_v14  ;;  %v8763_v14 = vcombine.high %v4133_v3, %v4149_v5 }
 0x725   : > { %v8635_v26 = vcombine.high %v4005_v21, %v4021_v22  ;;  %v8634_v32 = vcombine.low %v4005_v21, %v4021_v22 }
 0x726   : > { %7399 = vmatpush1.bf16.msra.mxu0 %v8912_v28  ;;  %v4050_v28 = vld [vmem:[%s12873_s13 + $0x3b8] sm:$0xff] }
 0x727   : > { %7522 = vmatpush1.bf16.msra.mxu1 %v8918_v29  ;;  %7400 = vmatprep.subr.bf16.mxu0 %v8945_v30  ;;  %v4037_v29 = vld [vmem:[%s12873_s13 + $0x350] sm:$0xff]  ;;  %v8661_v33 = vcombine.high %v4034_v27, %v4050_v28 }
 0x728   : > { %7523 = vmatprep.subr.bf16.mxu1 %v8951_v31  ;;  %v4053_v30 = vld [vmem:[%s12873_s13 + $0x3d0] sm:$0xff]  ;;  %v8628_v31 = vcombine.low %v4002_v18, %v4018_v19 }
 0x729   : > { %v8667_v34 = vcombine.high %v4037_v29, %v4053_v30  ;;  %v8666_v59 = vcombine.low %v4037_v29, %v4053_v30  ;;  %v4165_v19 = vld [vmem:[%s12873_s13 + $0x750] sm:$0xff] }
 0x72a   : > { %7401 = vmatpush1.bf16.msra.mxu0 %v8944_v36  ;;  %v4082_v36 = vld [vmem:[%s12873_s13 + $0x4b8] sm:$0xff] }
 0x72b   : > { %7524 = vmatpush1.bf16.msra.mxu1 %v8950_v37  ;;  %7402 = vmatprep.subr.bf16.mxu0 %v8977_v38  ;;  %v4069_v37 = vld [vmem:[%s12873_s13 + $0x450] sm:$0xff]  ;;  %v8693_v41 = vcombine.high %v4066_v35, %v4082_v36 }
 0x72c   : > { %7525 = vmatprep.subr.bf16.mxu1 %v8983_v39  ;;  %v4085_v38 = vld [vmem:[%s12873_s13 + $0x4d0] sm:$0xff]  ;;  %v8660_v39 = vcombine.low %v4034_v27, %v4050_v28  ;;  %v8762_v28 = vcombine.low %v4133_v3, %v4149_v5 }
 0x72d   : > { %v8699_v42 = vcombine.high %v4069_v37, %v4085_v38  ;;  %v8698_v61 = vcombine.low %v4069_v37, %v4085_v38 }
 0x72e   : > { %7403 = vmatpush1.bf16.msra.mxu0 %v8976_v44  ;;  %v4114_v44 = vld [vmem:[%s12873_s13 + $0x5b8] sm:$0xff] }
 0x72f   : > { %7526 = vmatpush1.bf16.msra.mxu1 %v8982_v45  ;;  %7404 = vmatprep.subr.bf16.mxu0 %v9009_v46  ;;  %v4101_v45 = vld [vmem:[%s12873_s13 + $0x550] sm:$0xff]  ;;  %v8725_v62 = vcombine.high %v4098_v43, %v4114_v44  ;;  %v8724_v6 = vcombine.low %v4098_v43, %v4114_v44 }
 0x730   : > { %7527 = vmatprep.subr.bf16.mxu1 %v9015_v58  ;;  %v4117_v46 = vld [vmem:[%s12873_s13 + $0x5d0] sm:$0xff]  ;;  %v8692_v58 = vcombine.low %v4066_v35, %v4082_v36 }
 0x731   : > { %v8731_v63 = vcombine.high %v4101_v45, %v4117_v46  ;;  %v4197_v35 = vld [vmem:[%s12873_s13 + $0x850] sm:$0xff] }
 0x732   : > { %7405 = vmatpush1.bf16.msra.mxu0 %v9008_v0  ;;  %v4130_v0 = vld [vmem:[%s12873_s13 + $0x638] sm:$0xff]  ;;  %v4213_v36 = vld [vmem:[%s12873_s13 + $0x8d0] sm:$0xff] }
 0x733   : > { %7528 = vmatpush1.bf16.msra.mxu1 %v9014_v47  ;;  %7406 = vmatprep.subr.bf16.mxu0 %v9041_v1  ;;  %v4146_v47 = vld [vmem:[%s12873_s13 + $0x6b8] sm:$0xff]  ;;  %v7014_v1 = vrot.slane %v11953_v60, %v10234_v50  ;;  %v4229_v43 = vld [vmem:[%s12873_s13 + $0x950] sm:$0xff] }
 0x734   : > { %7529 = vmatprep.subr.bf16.mxu1 %v9047_v2  ;;  %v7030_v2 = vrot.slane %v11953_v60, %v10264_v48  ;;  %v4245_v44 = vld [vmem:[%s12873_s13 + $0x9d0] sm:$0xff] }
 0x736   : > { %7407 = vmatpush1.bf16.msra.mxu0 %v9040_v8  ;;  %v7034_v8 = vrot.slane %v11953_v60, %v10270_v56 }
 0x737   : > { %7530 = vmatpush1.bf16.msra.mxu1 %v9046_v9  ;;  %7458 = vmatprep.subr.bf16.mxu0 %v8565_v10  ;;  %v8730_v9 = vcombine.low %v4101_v45, %v4117_v46  ;;  %v8757_v10 = vcombine.high %v4130_v0, %v4146_v47  ;;  %v8826_v46 = vcombine.low %v4197_v35, %v4213_v36 }
 0x738   : > { %7581 = vmatprep.subr.bf16.mxu1 %v8571_v11 }
 0x739   : > { %7409 = vmatmul.mubr.bf16.vlgmr.msra.gmra.mrb[32].mxu0 %v11306_v4 }
 0x73a   : > { %7532 = vmatmul.mubr.bf16.vlgmr.msra.gmra.mrb[32].mxu1 %v11306_v4  ;;  %7459 = vmatpush1.bf16.msra.mxu0 %v8564_v15  ;;  %v4162_v15 = vld [vmem:[%s12873_s13 + $0x738] sm:$0xff] }
 0x73b   : > { %7490 = vmatprep.mubr.bf16.mxu0 %v11304_v49  ;;  %7582 = vmatpush1.bf16.msra.mxu1 %v8570_v17  ;;  %v8789_v29 = vcombine.high %v4162_v15, %v4178_v13  ;;  %v8788_v37 = vcombine.low %v4162_v15, %v4178_v13  ;;  %v4322_v15 = vld [vmem:[%s12873_s13 + $0xc38] sm:$0xff] }
 0x73c   : > { %7613 = vmatprep.mubr.bf16.mxu1 %v11304_v49  ;;  %7460 = vmatprep.subr.bf16.mxu0 %v8597_v52  ;;  %v4338_v13 = vld [vmem:[%s12873_s13 + $0xcb8] sm:$0xff] }
 0x73d   : > { %7583 = vmatprep.subr.bf16.mxu1 %v8603_v20  ;;  %v4181_v20 = vld [vmem:[%s12873_s13 + $0x7d0] sm:$0xff] }
 0x73e   : > { %7461 = vmatpush1.bf16.msra.mxu0 %v8596_v23  ;;  %v8794_v38 = vcombine.low %v4165_v19, %v4181_v20 }
 0x73f   : > { %7584 = vmatpush1.bf16.msra.mxu1 %v8602_v24  ;;  %7462 = vmatprep.subr.bf16.mxu0 %v8629_v25  ;;  %v8756_v25 = vcombine.low %v4130_v0, %v4146_v47  ;;  %v4261_v0 = vld [vmem:[%s12873_s13 + $0xa50] sm:$0xff] }
 0x740   : > { %7585 = vmatprep.subr.bf16.mxu1 %v8635_v26  ;;  %v4277_v47 = vld [vmem:[%s12873_s13 + $0xad0] sm:$0xff] }
 0x741   : > { %v8891_v5 = vcombine.high %v4261_v0, %v4277_v47 }
 0x742   : > { %7463 = vmatpush1.bf16.msra.mxu0 %v8628_v31 }
 0x743   : > { %7586 = vmatpush1.bf16.msra.mxu1 %v8634_v32  ;;  %7464 = vmatprep.subr.bf16.mxu0 %v8661_v33  ;;  %v8795_v32 = vcombine.high %v4165_v19, %v4181_v20  ;;  %v4194_v33 = vld [vmem:[%s12873_s13 + $0x838] sm:$0xff] }
 0x744   : > { %7587 = vmatprep.subr.bf16.mxu1 %v8667_v34  ;;  %v4210_v34 = vld [vmem:[%s12873_s13 + $0x8b8] sm:$0xff] }
 0x745   : > { %v8820_v45 = vcombine.low %v4194_v33, %v4210_v34 }
 0x746   : > { %7465 = vmatpush1.bf16.msra.mxu0 %v8660_v39  ;;  %v8821_v39 = vcombine.high %v4194_v33, %v4210_v34 }
 0x747   : > { %7588 = vmatpush1.bf16.msra.mxu1 %v8666_v59  ;;  %7466 = vmatprep.subr.bf16.mxu0 %v8693_v41  ;;  %v8827_v59 = vcombine.high %v4197_v35, %v4213_v36  ;;  %v4226_v41 = vld [vmem:[%s12873_s13 + $0x938] sm:$0xff] }
 0x748   : > { %7589 = vmatprep.subr.bf16.mxu1 %v8699_v42  ;;  %v4242_v42 = vld [vmem:[%s12873_s13 + $0x9b8] sm:$0xff] }
 0x749   : > { %v4386_v35 = vld [vmem:[%s12873_s13 + $0xe38] sm:$0xff] }
 0x74a   : > { %7467 = vmatpush1.bf16.msra.mxu0 %v8692_v58  ;;  %v8853_v58 = vcombine.high %v4226_v41, %v4242_v42  ;;  %v4402_v36 = vld [vmem:[%s12873_s13 + $0xeb8] sm:$0xff] }
 0x74b   : > { %7590 = vmatpush1.bf16.msra.mxu1 %v8698_v61  ;;  %7468 = vmatprep.subr.bf16.mxu0 %v8725_v62  ;;  %v8859_v61 = vcombine.high %v4229_v43, %v4245_v44  ;;  %v4258_v62 = vld [vmem:[%s12873_s13 + $0xa38] sm:$0xff] }
 0x74c   : > { %v7205_v11 = vpop.f32.mrb[20].mxu0  ;;  %v7287_v12 = vpop.f32.mrb[20].mxu1  ;;  %7591 = vmatprep.subr.bf16.mxu1 %v8731_v63  ;;  %v4274_v63 = vld [vmem:[%s12873_s13 + $0xab8] sm:$0xff] }
 0x74d   : > { %v11981_v16 = vadd.f32 %v7205_v11, %v7014_v1  ;;  %v11983_v17 = vadd.f32 %v7287_v12, %v7030_v2  ;;  %v7207_v52 = vpop.f32.mrb[21].mxu0  ;;  %v7289_v18 = vpop.f32.mrb[21].mxu1  ;;  %v8852_v1 = vcombine.low %v4226_v41, %v4242_v42  ;;  %v8858_v2 = vcombine.low %v4229_v43, %v4245_v44  ;;  %v4418_v43 = vld [vmem:[%s12873_s13 + $0xf38] sm:$0xff] }
 0x74e   : > { %v11991_v21 = vadd.f32 %v7207_v52, %v7018_v7  ;;  %v11993_v22 = vadd.f32 %v7289_v18, %v7034_v8  ;;  %7469 = vmatpush1.bf16.msra.mxu0 %v8724_v6  ;;  %v7209_v23 = vpop.f32.mrb[22].mxu0  ;;  %v7291_v24 = vpop.f32.mrb[22].mxu1  ;;  %v8885_v3 = vcombine.high %v4258_v62, %v4274_v63  ;;  %v4290_v6 = vld [vmem:[%s12873_s13 + $0xb38] sm:$0xff]  ;;  %v4293_v8 = vld [vmem:[%s12873_s13 + $0xb50] sm:$0xff]  ;;  %v8890_v11 = vcombine.low %v4261_v0, %v4277_v47  ;;  %v3940_v0 = vld [vmem:[%s12873_s13 + $0x48] sm:$0xff] }
 0x74f   : > { %7592 = vmatpush1.bf16.msra.mxu1 %v8730_v9  ;;  %v7210_v26 = vpop.f32.mrb[23].mxu0  ;;  %v7292_v27 = vpop.f32.mrb[23].mxu1  ;;  %7470 = vmatprep.subr.bf16.mxu0 %v8757_v10  ;;  %v4306_v7 = vld [vmem:[%s12873_s13 + $0xbb8] sm:$0xff]  ;;  %v4309_v9 = vld [vmem:[%s12873_s13 + $0xbd0] sm:$0xff]  ;;  %v8884_v10 = vcombine.low %v4258_v62, %v4274_v63  ;;  %v8949_v23 = vcombine.high %v4322_v15, %v4338_v13  ;;  %v9013_v41 = vcombine.high %v4386_v35, %v4402_v36  ;;  %v3956_v47 = vld [vmem:[%s12873_s13 + $0xc8] sm:$0xff] }
 0x750   : > { %v7859_v30 = vcombine.low %v11981_v16, %v11991_v21  ;;  %v7861_v31 = vcombine.low %v11983_v17, %v11993_v22  ;;  %7593 = vmatprep.subr.bf16.mxu1 %v8763_v14  ;;  %v8917_v12 = vcombine.high %v4290_v6, %v4306_v7  ;;  %v8923_v14 = vcombine.high %v4293_v8, %v4309_v9  ;;  %v4325_v52 = vld [vmem:[%s12873_s13 + $0xc50] sm:$0xff]  ;;  %v4370_v26 = vld [vmem:[%s12873_s13 + $0xdb8] sm:$0xff]  ;;  %v4228_v16 = vld [vmem:[%s12873_s13 + $0x948] sm:$0xff] }
 0x751   : > { %v4341_v18 = vld [vmem:[%s12873_s13 + $0xcd0] sm:$0xff]  ;;  %v8916_v19 = vcombine.low %v4290_v6, %v4306_v7  ;;  %v8922_v20 = vcombine.low %v4293_v8, %v4309_v9  ;;  %v4434_v44 = vld [vmem:[%s12873_s13 + $0xfb8] sm:$0xff]  ;;  %v8569_v6 = vcombine.high %v3940_v0, %v3956_v47  ;;  %v3972_v8 = vld [vmem:[%s12873_s13 + $0x148] sm:$0xff] }
 0x752   : > { %7471 = vmatpush1.bf16.msra.mxu0 %v8756_v25  ;;  %v8955_v24 = vcombine.high %v4325_v52, %v4341_v18  ;;  %v4354_v25 = vld [vmem:[%s12873_s13 + $0xd38] sm:$0xff]  ;;  %v4357_v27 = vld [vmem:[%s12873_s13 + $0xd50] sm:$0xff]  ;;  %v9045_v62 = vcombine.high %v4418_v43, %v4434_v44  ;;  %v3988_v9 = vld [vmem:[%s12873_s13 + $0x1c8] sm:$0xff] }
 0x753   : > { %7594 = vmatpush1.bf16.msra.mxu1 %v8762_v28  ;;  %7472 = vmatprep.subr.bf16.mxu0 %v8789_v29  ;;  %v4373_v28 = vld [vmem:[%s12873_s13 + $0xdd0] sm:$0xff]  ;;  %v8948_v29 = vcombine.low %v4322_v15, %v4338_v13  ;;  %v8981_v33 = vcombine.high %v4354_v25, %v4370_v26  ;;  %v8601_v15 = vcombine.high %v3972_v8, %v3988_v9  ;;  %v4004_v13 = vld [vmem:[%s12873_s13 + $0x248] sm:$0xff]  ;;  %v4246_v17 = vld [vmem:[%s12873_s13 + $0x9d8] sm:$0xff] }
 0x754   : > { %7595 = vmatprep.subr.bf16.mxu1 %v8795_v32  ;;  %v8954_v32 = vcombine.low %v4325_v52, %v4341_v18  ;;  %v8987_v34 = vcombine.high %v4357_v27, %v4373_v28  ;;  %v4020_v52 = vld [vmem:[%s12873_s13 + $0x2c8] sm:$0xff]  ;;  %v4233_v22 = vld [vmem:[%s12873_s13 + $0x970] sm:$0xff] }
 0x755   : > { %v4244_v21 = vld [vmem:[%s12873_s13 + $0x9c8] sm:$0xff] }
 0x756   : > { %7473 = vmatpush1.bf16.msra.mxu0 %v8788_v37  ;;  %v4389_v37 = vld [vmem:[%s12873_s13 + $0xe50] sm:$0xff] }
 0x757   : > { %7596 = vmatpush1.bf16.msra.mxu1 %v8794_v38  ;;  %7474 = vmatprep.subr.bf16.mxu0 %v8821_v39  ;;  %v4405_v38 = vld [vmem:[%s12873_s13 + $0xed0] sm:$0xff]  ;;  %v8980_v39 = vcombine.low %v4354_v25, %v4370_v26  ;;  %v8633_v25 = vcombine.high %v4004_v13, %v4020_v52 }
 0x758   : > { %7597 = vmatprep.subr.bf16.mxu1 %v8827_v59  ;;  %v8986_v59 = vcombine.low %v4357_v27, %v4373_v28  ;;  %v9019_v42 = vcombine.high %v4389_v37, %v4405_v38  ;;  %v4036_v27 = vld [vmem:[%s12873_s13 + $0x348] sm:$0xff] }
 0x759   : > { %v4052_v28 = vld [vmem:[%s12873_s13 + $0x3c8] sm:$0xff] }
 0x75a   : > { %7475 = vmatpush1.bf16.msra.mxu0 %v8820_v45  ;;  %v4421_v45 = vld [vmem:[%s12873_s13 + $0xf50] sm:$0xff] }
 0x75b   : > { %7598 = vmatpush1.bf16.msra.mxu1 %v8826_v46  ;;  %7476 = vmatprep.subr.bf16.mxu0 %v8853_v58  ;;  %v4437_v46 = vld [vmem:[%s12873_s13 + $0xfd0] sm:$0xff]  ;;  %v9012_v58 = vcombine.low %v4386_v35, %v4402_v36  ;;  %v8665_v35 = vcombine.high %v4036_v27, %v4052_v28 }
 0x75c   : > { %7599 = vmatprep.subr.bf16.mxu1 %v8859_v61  ;;  %v9018_v61 = vcombine.low %v4389_v37, %v4405_v38  ;;  %v9051_v63 = vcombine.high %v4421_v45, %v4437_v46  ;;  %v4068_v37 = vld [vmem:[%s12873_s13 + $0x448] sm:$0xff] }
 0x75d   : > { %v4084_v38 = vld [vmem:[%s12873_s13 + $0x4c8] sm:$0xff] }
 0x75e   : > { %7477 = vmatpush1.bf16.msra.mxu0 %v8852_v1  ;;  %v3943_v1 = vld [vmem:[%s12873_s13 + $0x60] sm:$0xff] }
 0x75f   : > { %7600 = vmatpush1.bf16.msra.mxu1 %v8858_v2  ;;  %7478 = vmatprep.subr.bf16.mxu0 %v8885_v3  ;;  %v3959_v2 = vld [vmem:[%s12873_s13 + $0xe0] sm:$0xff]  ;;  %v9044_v3 = vcombine.low %v4418_v43, %v4434_v44  ;;  %v8697_v43 = vcombine.high %v4068_v37, %v4084_v38 }
 0x760   : > { %7601 = vmatprep.subr.bf16.mxu1 %v8891_v5  ;;  %v9050_v5 = vcombine.low %v4421_v45, %v4437_v46  ;;  %v8575_v7 = vcombine.high %v3943_v1, %v3959_v2  ;;  %v4100_v45 = vld [vmem:[%s12873_s13 + $0x548] sm:$0xff] }
 0x761   : > { %v4116_v46 = vld [vmem:[%s12873_s13 + $0x5c8] sm:$0xff] }
 0x762   : > { %7479 = vmatpush1.bf16.msra.mxu0 %v8884_v10  ;;  %v8568_v10 = vcombine.low %v3940_v0, %v3956_v47  ;;  %v8729_v47 = vcombine.high %v4100_v45, %v4116_v46 }
 0x763   : > { %7602 = vmatpush1.bf16.msra.mxu1 %v8890_v11  ;;  %7480 = vmatprep.subr.bf16.mxu0 %v8917_v12  ;;  %v3975_v11 = vld [vmem:[%s12873_s13 + $0x160] sm:$0xff] }
 0x764   : > { %7603 = vmatprep.subr.bf16.mxu1 %v8923_v14  ;;  %v3991_v12 = vld [vmem:[%s12873_s13 + $0x1e0] sm:$0xff]  ;;  %v8574_v14 = vcombine.low %v3943_v1, %v3959_v2  ;;  %v4132_v2 = vld [vmem:[%s12873_s13 + $0x648] sm:$0xff] }
 0x765   : > { %v8607_v18 = vcombine.high %v3975_v11, %v3991_v12 }
 0x766   : > { %7481 = vmatpush1.bf16.msra.mxu0 %v8916_v19  ;;  %v4007_v19 = vld [vmem:[%s12873_s13 + $0x260] sm:$0xff] }
 0x767   : > { %7604 = vmatpush1.bf16.msra.mxu1 %v8922_v20  ;;  %7482 = vmatprep.subr.bf16.mxu0 %v8949_v23  ;;  %v4023_v20 = vld [vmem:[%s12873_s13 + $0x2e0] sm:$0xff]  ;;  %v8600_v23 = vcombine.low %v3972_v8, %v3988_v9  ;;  %v7026_v9 = vrot.slane %v11953_v60, %v10248_v54 }
 0x768   : > { %7605 = vmatprep.subr.bf16.mxu1 %v8955_v24  ;;  %v8606_v24 = vcombine.low %v3975_v11, %v3991_v12  ;;  %v8639_v26 = vcombine.high %v4007_v19, %v4023_v20  ;;  %v4151_v8 = vld [vmem:[%s12873_s13 + $0x6e0] sm:$0xff]  ;;  %v8728_v11 = vcombine.low %v4100_v45, %v4116_v46  ;;  %v12230_v46 = vrot.slane %v7859_v30, %v10259_v40 }
 0x769   : > { %v4215_v45 = vld [vmem:[%s12873_s13 + $0x8e0] sm:$0xff] }
 0x76a   : > { %7483 = vmatpush1.bf16.msra.mxu0 %v8948_v29  ;;  %v4039_v29 = vld [vmem:[%s12873_s13 + $0x360] sm:$0xff] }
 0x76b   : > { %7606 = vmatpush1.bf16.msra.mxu1 %v8954_v32  ;;  %7484 = vmatprep.subr.bf16.mxu0 %v8981_v33  ;;  %v4055_v32 = vld [vmem:[%s12873_s13 + $0x3e0] sm:$0xff]  ;;  %v8632_v33 = vcombine.low %v4004_v13, %v4020_v52 }
 0x76c   : > { %7607 = vmatprep.subr.bf16.mxu1 %v8987_v34  ;;  %v8638_v34 = vcombine.low %v4007_v19, %v4023_v20  ;;  %v8671_v36 = vcombine.high %v4039_v29, %v4055_v32  ;;  %v4180_v19 = vld [vmem:[%s12873_s13 + $0x7c8] sm:$0xff]  ;;  %v4231_v30 = vld [vmem:[%s12873_s13 + $0x960] sm:$0xff] }
 0x76e   : > { %7485 = vmatpush1.bf16.msra.mxu0 %v8980_v39  ;;  %v4071_v39 = vld [vmem:[%s12873_s13 + $0x460] sm:$0xff] }
 0x76f   : > { %7608 = vmatpush1.bf16.msra.mxu1 %v8986_v59  ;;  %7486 = vmatprep.subr.bf16.mxu0 %v9013_v41  ;;  %v4087_v59 = vld [vmem:[%s12873_s13 + $0x4e0] sm:$0xff]  ;;  %v8664_v41 = vcombine.low %v4036_v27, %v4052_v28 }
 0x770   : > { %7609 = vmatprep.subr.bf16.mxu1 %v9019_v42  ;;  %v8670_v42 = vcombine.low %v4039_v29, %v4055_v32  ;;  %v8703_v44 = vcombine.high %v4071_v39, %v4087_v59  ;;  %v8702_v0 = vcombine.low %v4071_v39, %v4087_v59  ;;  %v4183_v27 = vld [vmem:[%s12873_s13 + $0x7e0] sm:$0xff] }
 0x772   : > { %7487 = vmatpush1.bf16.msra.mxu0 %v9012_v58  ;;  %v4103_v58 = vld [vmem:[%s12873_s13 + $0x560] sm:$0xff] }
 0x773   : > { %7610 = vmatpush1.bf16.msra.mxu1 %v9018_v61  ;;  %7488 = vmatprep.subr.bf16.mxu0 %v9045_v62  ;;  %v4119_v61 = vld [vmem:[%s12873_s13 + $0x5e0] sm:$0xff]  ;;  %v8696_v62 = vcombine.low %v4068_v37, %v4084_v38 }
 0x774   : > { %7611 = vmatprep.subr.bf16.mxu1 %v9051_v63  ;;  %v12174_v63 = vld [vmem:[%s12874_s14 + $0x8] sm:$0xff]  ;;  %v8735_v1 = vcombine.high %v4103_v58, %v4119_v61  ;;  %v8734_v12 = vcombine.low %v4103_v58, %v4119_v61 }
 0x776   : > { %7489 = vmatpush1.bf16.msra.mxu0 %v9044_v3  ;;  %v4148_v3 = vld [vmem:[%s12873_s13 + $0x6c8] sm:$0xff] }
 0x777   : > { %7612 = vmatpush1.bf16.msra.mxu1 %v9050_v5  ;;  %7540 = vmatprep.subr.bf16.mxu0 %v8569_v6  ;;  %v7022_v5 = vrot.slane %v11953_v60, %v10237_v51  ;;  %v7046_v6 = vrot.slane %v12174_v63, %v10234_v50 }
 0x778   : > { %7663 = vmatprep.subr.bf16.mxu1 %v8575_v7  ;;  %v4135_v7 = vld [vmem:[%s12873_s13 + $0x660] sm:$0xff] }
 0x779   : > { %7491 = vmatmul.mubr.bf16.vlgmr.msra.gmra.mrb[36].mxu0 %v11306_v4  ;;  %v8767_v52 = vcombine.high %v4135_v7, %v4151_v8  ;;  %v8766_v37 = vcombine.low %v4135_v7, %v4151_v8  ;;  %v4260_v8 = vld [vmem:[%s12873_s13 + $0xa48] sm:$0xff] }
 0x77a   : > { %7614 = vmatmul.mubr.bf16.vlgmr.msra.gmra.mrb[36].mxu1 %v11306_v4  ;;  %7541 = vmatpush1.bf16.msra.mxu0 %v8568_v10  ;;  %v7050_v10 = vrot.slane %v12174_v63, %v10245_v53 }
 0x77b   : > { %7572 = vmatprep.mubr.bf16.mxu0 %v11304_v49  ;;  %7664 = vmatpush1.bf16.msra.mxu1 %v8574_v14  ;;  %v8761_v14 = vcombine.high %v4132_v2, %v4148_v3 }
 0x77c   : > { %7695 = vmatprep.mubr.bf16.mxu1 %v11304_v49  ;;  %7542 = vmatprep.subr.bf16.mxu0 %v8601_v15 }
 0x77d   : > { %7665 = vmatprep.subr.bf16.mxu1 %v8607_v18  ;;  %v4164_v18 = vld [vmem:[%s12873_s13 + $0x748] sm:$0xff] }
 0x77e   : > { %7543 = vmatpush1.bf16.msra.mxu0 %v8600_v23  ;;  %v8793_v38 = vcombine.high %v4164_v18, %v4180_v19  ;;  %v8792_v61 = vcombine.low %v4164_v18, %v4180_v19  ;;  %v4308_v18 = vld [vmem:[%s12873_s13 + $0xbc8] sm:$0xff]  ;;  %v4295_v19 = vld [vmem:[%s12873_s13 + $0xb60] sm:$0xff] }
 0x77f   : > { %7666 = vmatpush1.bf16.msra.mxu1 %v8606_v24  ;;  %7544 = vmatprep.subr.bf16.mxu0 %v8633_v25 }
 0x780   : > { %7667 = vmatprep.subr.bf16.mxu1 %v8639_v26  ;;  %v4167_v26 = vld [vmem:[%s12873_s13 + $0x760] sm:$0xff] }
 0x782   : > { %7545 = vmatpush1.bf16.msra.mxu0 %v8632_v33 }
 0x783   : > { %7668 = vmatpush1.bf16.msra.mxu1 %v8638_v34  ;;  %7546 = vmatprep.subr.bf16.mxu0 %v8665_v35  ;;  %v8760_v34 = vcombine.low %v4132_v2, %v4148_v3  ;;  %v4247_v2 = vld [vmem:[%s12873_s13 + $0x9e0] sm:$0xff] }
 0x784   : > { %7669 = vmatprep.subr.bf16.mxu1 %v8671_v36  ;;  %v8863_v7 = vcombine.high %v4231_v30, %v4247_v2 }
 0x786   : > { %7547 = vmatpush1.bf16.msra.mxu0 %v8664_v41  ;;  %v8799_v41 = vcombine.high %v4167_v26, %v4183_v27 }
 0x787   : > { %7670 = vmatpush1.bf16.msra.mxu1 %v8670_v42  ;;  %7548 = vmatprep.subr.bf16.mxu0 %v8697_v43  ;;  %v4196_v42 = vld [vmem:[%s12873_s13 + $0x848] sm:$0xff] }
 0x788   : > { %7671 = vmatprep.subr.bf16.mxu1 %v8703_v44  ;;  %v4212_v43 = vld [vmem:[%s12873_s13 + $0x8c8] sm:$0xff]  ;;  %v4199_v44 = vld [vmem:[%s12873_s13 + $0x860] sm:$0xff] }
 0x789   : > { %v8824_v3 = vcombine.low %v4196_v42, %v4212_v43 }
 0x78a   : > { %7549 = vmatpush1.bf16.msra.mxu0 %v8696_v62  ;;  %v8798_v62 = vcombine.low %v4167_v26, %v4183_v27 }
 0x78b   : > { %7672 = vmatpush1.bf16.msra.mxu1 %v8702_v0  ;;  %7550 = vmatprep.subr.bf16.mxu0 %v8729_v47  ;;  %v8825_v0 = vcombine.high %v4196_v42, %v4212_v43  ;;  %v4359_v42 = vld [vmem:[%s12873_s13 + $0xd60] sm:$0xff] }
 0x78c   : > { %v7246_v15 = vpop.f32.mrb[24].mxu0  ;;  %v7369_v13 = vpop.f32.mrb[24].mxu1  ;;  %7673 = vmatprep.subr.bf16.mxu1 %v8735_v1  ;;  %v8831_v1 = vcombine.high %v4199_v44, %v4215_v45  ;;  %v4375_v43 = vld [vmem:[%s12873_s13 + $0xde0] sm:$0xff] }
 0x78d   : > { %v7247_v20 = vadd.f32 %v7246_v15, %v7022_v5  ;;  %v12202_v23 = vadd.f32 %v7369_v13, %v7046_v6  ;;  %v7248_v24 = vpop.f32.mrb[25].mxu0  ;;  %v7371_v25 = vpop.f32.mrb[25].mxu1  ;;  %v8830_v5 = vcombine.low %v4199_v44, %v4215_v45  ;;  %v8857_v6 = vcombine.high %v4228_v16, %v4244_v21 }
 0x78e   : > { %v7249_v28 = vadd.f32 %v7248_v24, %v7026_v9  ;;  %v12210_v29 = vadd.f32 %v7371_v25, %v7050_v10  ;;  %v7250_v32 = vpop.f32.mrb[26].mxu0  ;;  %v7373_v33 = vpop.f32.mrb[26].mxu1  ;;  %7551 = vmatpush1.bf16.msra.mxu0 %v8728_v11  ;;  %v4276_v9 = vld [vmem:[%s12873_s13 + $0xac8] sm:$0xff]  ;;  %v4263_v10 = vld [vmem:[%s12873_s13 + $0xa60] sm:$0xff] }
 0x78f   : > { %7674 = vmatpush1.bf16.msra.mxu1 %v8734_v12  ;;  %v7251_v35 = vpop.f32.mrb[27].mxu0  ;;  %v7374_v36 = vpop.f32.mrb[27].mxu1  ;;  %7552 = vmatprep.subr.bf16.mxu0 %v8761_v14  ;;  %v4279_v11 = vld [vmem:[%s12873_s13 + $0xae0] sm:$0xff]  ;;  %v8856_v12 = vcombine.low %v4228_v16, %v4244_v21  ;;  %v8862_v14 = vcombine.low %v4231_v30, %v4247_v2  ;;  %v8889_v15 = vcombine.high %v4260_v8, %v4276_v9  ;;  %v4340_v32 = vld [vmem:[%s12873_s13 + $0xcc8] sm:$0xff] }
 0x790   : > { %v7860_v39 = vcombine.low %v7247_v20, %v7249_v28  ;;  %v7908_v59 = vcombine.low %v12202_v23, %v12210_v29  ;;  %7675 = vmatprep.subr.bf16.mxu1 %v8767_v52  ;;  %v8895_v13 = vcombine.high %v4263_v10, %v4279_v11  ;;  %v4292_v52 = vld [vmem:[%s12873_s13 + $0xb48] sm:$0xff]  ;;  %v4311_v20 = vld [vmem:[%s12873_s13 + $0xbe0] sm:$0xff]  ;;  %v8888_v24 = vcombine.low %v4260_v8, %v4276_v9 }
 0x791   : > { %v8894_v25 = vcombine.low %v4263_v10, %v4279_v11  ;;  %v8921_v26 = vcombine.high %v4292_v52, %v4308_v18  ;;  %v8927_v27 = vcombine.high %v4295_v19, %v4311_v20  ;;  %v4324_v28 = vld [vmem:[%s12873_s13 + $0xc48] sm:$0xff]  ;;  %v4327_v33 = vld [vmem:[%s12873_s13 + $0xc60] sm:$0xff]  ;;  %v8920_v35 = vcombine.low %v4292_v52, %v4308_v18  ;;  %v3945_v52 = vld [vmem:[%s12873_s13 + $0x70] sm:$0xff] }
 0x792   : > { %v12233_v58 = vrot.slane %v7860_v39, %v10259_v40  ;;  %7553 = vmatpush1.bf16.msra.mxu0 %v8760_v34  ;;  %v4343_v34 = vld [vmem:[%s12873_s13 + $0xce0] sm:$0xff]  ;;  %v8926_v36 = vcombine.low %v4295_v19, %v4311_v20  ;;  %v4356_v39 = vld [vmem:[%s12873_s13 + $0xd48] sm:$0xff]  ;;  %v8952_v44 = vcombine.low %v4324_v28, %v4340_v32  ;;  %v8990_v2 = vcombine.low %v4359_v42, %v4375_v43  ;;  %v3961_v18 = vld [vmem:[%s12873_s13 + $0xf0] sm:$0xff] }
 0x793   : > { %7676 = vmatpush1.bf16.msra.mxu1 %v8766_v37  ;;  %7554 = vmatprep.subr.bf16.mxu0 %v8793_v38  ;;  %v8953_v37 = vcombine.high %v4324_v28, %v4340_v32  ;;  %v8959_v38 = vcombine.high %v4327_v33, %v4343_v34  ;;  %v8958_v45 = vcombine.low %v4327_v33, %v4343_v34  ;;  %v4391_v16 = vld [vmem:[%s12873_s13 + $0xe60] sm:$0xff]  ;;  %v3977_v32 = vld [vmem:[%s12873_s13 + $0x170] sm:$0xff]  ;;  %v4248_v23 = vld [vmem:[%s12873_s13 + $0x9e8] sm:$0xff] }
 0x794   : > { %v7891_v47 = vcombine.low %v12230_v46, %v12233_v58  ;;  %7677 = vmatprep.subr.bf16.mxu1 %v8799_v41  ;;  %v4372_v41 = vld [vmem:[%s12873_s13 + $0xdc8] sm:$0xff]  ;;  %v4407_v21 = vld [vmem:[%s12873_s13 + $0xee0] sm:$0xff]  ;;  %v3993_v33 = vld [vmem:[%s12873_s13 + $0x1f0] sm:$0xff]  ;;  %v8578_v34 = vcombine.low %v3945_v52, %v3961_v18 }
 0x795   : > { %v8984_v30 = vcombine.low %v4356_v39, %v4372_v41  ;;  %v4423_v8 = vld [vmem:[%s12873_s13 + $0xf60] sm:$0xff]  ;;  %v9022_v11 = vcombine.low %v4391_v16, %v4407_v21  ;;  %v4262_v46 = vld [vmem:[%s12873_s13 + $0xa58] sm:$0xff] }
 0x796   : > { %7555 = vmatpush1.bf16.msra.mxu0 %v8792_v61  ;;  %v8985_v61 = vcombine.high %v4356_v39, %v4372_v41  ;;  %v4439_v9 = vld [vmem:[%s12873_s13 + $0xfe0] sm:$0xff]  ;;  %v4009_v39 = vld [vmem:[%s12873_s13 + $0x270] sm:$0xff]  ;;  %v4278_v58 = vld [vmem:[%s12873_s13 + $0xad8] sm:$0xff] }
 0x797   : > { %7678 = vmatpush1.bf16.msra.mxu1 %v8798_v62  ;;  %7556 = vmatprep.subr.bf16.mxu0 %v8825_v0  ;;  %v8991_v62 = vcombine.high %v4359_v42, %v4375_v43  ;;  %v4388_v0 = vld [vmem:[%s12873_s13 + $0xe48] sm:$0xff]  ;;  %v9054_v20 = vcombine.low %v4423_v8, %v4439_v9  ;;  %v4025_v41 = vld [vmem:[%s12873_s13 + $0x2f0] sm:$0xff]  ;;  %v8610_v43 = vcombine.low %v3977_v32, %v3993_v33 }
 0x798   : > { %7679 = vmatprep.subr.bf16.mxu1 %v8831_v1  ;;  %v4404_v1 = vld [vmem:[%s12873_s13 + $0xec8] sm:$0xff] }
 0x799   : > { %v9016_v10 = vcombine.low %v4388_v0, %v4404_v1 }
 0x79a   : > { %7557 = vmatpush1.bf16.msra.mxu0 %v8824_v3  ;;  %v9017_v3 = vcombine.high %v4388_v0, %v4404_v1  ;;  %v4041_v0 = vld [vmem:[%s12873_s13 + $0x370] sm:$0xff] }
 0x79b   : > { %7680 = vmatpush1.bf16.msra.mxu1 %v8830_v5  ;;  %7558 = vmatprep.subr.bf16.mxu0 %v8857_v6  ;;  %v9023_v5 = vcombine.high %v4391_v16, %v4407_v21  ;;  %v4420_v6 = vld [vmem:[%s12873_s13 + $0xf48] sm:$0xff]  ;;  %v4057_v1 = vld [vmem:[%s12873_s13 + $0x3f0] sm:$0xff]  ;;  %v8642_v21 = vcombine.low %v4009_v39, %v4025_v41 }
 0x79c   : > { %7681 = vmatprep.subr.bf16.mxu1 %v8863_v7  ;;  %v4436_v7 = vld [vmem:[%s12873_s13 + $0xfc8] sm:$0xff] }
 0x79d   : > { %v9048_v19 = vcombine.low %v4420_v6, %v4436_v7 }
 0x79e   : > { %7559 = vmatpush1.bf16.msra.mxu0 %v8856_v12  ;;  %v9049_v12 = vcombine.high %v4420_v6, %v4436_v7  ;;  %v4073_v6 = vld [vmem:[%s12873_s13 + $0x470] sm:$0xff] }
 0x79f   : > { %7682 = vmatpush1.bf16.msra.mxu1 %v8862_v14  ;;  %7560 = vmatprep.subr.bf16.mxu0 %v8889_v15  ;;  %v9055_v14 = vcombine.high %v4423_v8, %v4439_v9  ;;  %v3942_v15 = vld [vmem:[%s12873_s13 + $0x58] sm:$0xff]  ;;  %v4089_v7 = vld [vmem:[%s12873_s13 + $0x4f0] sm:$0xff]  ;;  %v8674_v9 = vcombine.low %v4041_v0, %v4057_v1 }
 0x7a0   : > { %7683 = vmatprep.subr.bf16.mxu1 %v8895_v13  ;;  %v3958_v13 = vld [vmem:[%s12873_s13 + $0xd8] sm:$0xff] }
 0x7a1   : > { %v8572_v28 = vcombine.low %v3942_v15, %v3958_v13 }
 0x7a2   : > { %7561 = vmatpush1.bf16.msra.mxu0 %v8888_v24  ;;  %v8573_v24 = vcombine.high %v3942_v15, %v3958_v13  ;;  %v4105_v15 = vld [vmem:[%s12873_s13 + $0x570] sm:$0xff] }
 0x7a3   : > { %7684 = vmatpush1.bf16.msra.mxu1 %v8894_v25  ;;  %7562 = vmatprep.subr.bf16.mxu0 %v8921_v26  ;;  %v8579_v25 = vcombine.high %v3945_v52, %v3961_v18  ;;  %v3974_v26 = vld [vmem:[%s12873_s13 + $0x158] sm:$0xff]  ;;  %v4121_v13 = vld [vmem:[%s12873_s13 + $0x5f0] sm:$0xff]  ;;  %v8706_v18 = vcombine.low %v4073_v6, %v4089_v7 }
 0x7a4   : > { %7685 = vmatprep.subr.bf16.mxu1 %v8927_v27  ;;  %v3990_v27 = vld [vmem:[%s12873_s13 + $0x1d8] sm:$0xff] }
 0x7a5   : > { %v8604_v42 = vcombine.low %v3974_v26, %v3990_v27 }
 0x7a6   : > { %7563 = vmatpush1.bf16.msra.mxu0 %v8920_v35  ;;  %v8605_v35 = vcombine.high %v3974_v26, %v3990_v27  ;;  %v7038_v26 = vrot.slane %v11953_v60, %v10267_v55  ;;  %v4137_v27 = vld [vmem:[%s12873_s13 + $0x670] sm:$0xff] }
 0x7a7   : > { %7686 = vmatpush1.bf16.msra.mxu1 %v8926_v36  ;;  %7564 = vmatprep.subr.bf16.mxu0 %v8953_v37  ;;  %v4006_v36 = vld [vmem:[%s12873_s13 + $0x258] sm:$0xff] }
 0x7a8   : > { %7687 = vmatprep.subr.bf16.mxu1 %v8959_v38  ;;  %v4022_v37 = vld [vmem:[%s12873_s13 + $0x2d8] sm:$0xff]  ;;  %v8611_v38 = vcombine.high %v3977_v32, %v3993_v33  ;;  %v7062_v32 = vrot.slane %v12174_v63, %v10264_v48  ;;  %v7042_v33 = vrot.slane %v11953_v60, %v10273_v57 }
 0x7a9   : > { %v8636_v16 = vcombine.low %v4006_v36, %v4022_v37 }
 0x7aa   : > { %7565 = vmatpush1.bf16.msra.mxu0 %v8952_v44  ;;  %v8637_v44 = vcombine.high %v4006_v36, %v4022_v37  ;;  %v8738_v36 = vcombine.low %v4105_v15, %v4121_v13 }
 0x7ab   : > { %7688 = vmatpush1.bf16.msra.mxu1 %v8958_v45  ;;  %7566 = vmatprep.subr.bf16.mxu0 %v8985_v61  ;;  %v8643_v45 = vcombine.high %v4009_v39, %v4025_v41  ;;  %v4038_v61 = vld [vmem:[%s12873_s13 + $0x358] sm:$0xff] }
 0x7ac   : > { %7689 = vmatprep.subr.bf16.mxu1 %v8991_v62  ;;  %v4054_v62 = vld [vmem:[%s12873_s13 + $0x3d8] sm:$0xff] }
 0x7ad   : > { %v8668_v8 = vcombine.low %v4038_v61, %v4054_v62  ;;  %v4166_v41 = vld [vmem:[%s12873_s13 + $0x758] sm:$0xff] }
 0x7ae   : > { %7567 = vmatpush1.bf16.msra.mxu0 %v8984_v30  ;;  %v8669_v30 = vcombine.high %v4038_v61, %v4054_v62  ;;  %v4185_v61 = vld [vmem:[%s12873_s13 + $0x7f0] sm:$0xff] }
 0x7af   : > { %7690 = vmatpush1.bf16.msra.mxu1 %v8990_v2  ;;  %7568 = vmatprep.subr.bf16.mxu0 %v9017_v3  ;;  %v8675_v2 = vcombine.high %v4041_v0, %v4057_v1  ;;  %v4070_v3 = vld [vmem:[%s12873_s13 + $0x458] sm:$0xff] }
 0x7b0   : > { %7691 = vmatprep.subr.bf16.mxu1 %v9023_v5  ;;  %v4086_v5 = vld [vmem:[%s12873_s13 + $0x4d8] sm:$0xff] }
 0x7b1   : > { %v8700_v52 = vcombine.low %v4070_v3, %v4086_v5 }
 0x7b2   : > { %7569 = vmatpush1.bf16.msra.mxu0 %v9016_v10  ;;  %v8701_v10 = vcombine.high %v4070_v3, %v4086_v5 }
 0x7b3   : > { %7692 = vmatpush1.bf16.msra.mxu1 %v9022_v11  ;;  %7570 = vmatprep.subr.bf16.mxu0 %v9049_v12  ;;  %v8707_v11 = vcombine.high %v4073_v6, %v4089_v7  ;;  %v4102_v12 = vld [vmem:[%s12873_s13 + $0x558] sm:$0xff] }
 0x7b4   : > { %7693 = vmatprep.subr.bf16.mxu1 %v9055_v14  ;;  %v4118_v14 = vld [vmem:[%s12873_s13 + $0x5d8] sm:$0xff] }
 0x7b6   : > { %7571 = vmatpush1.bf16.msra.mxu0 %v9048_v19  ;;  %v8733_v19 = vcombine.high %v4102_v12, %v4118_v14 }
 0x7b7   : > { %7694 = vmatpush1.bf16.msra.mxu1 %v9054_v20  ;;  %7622 = vmatprep.subr.bf16.mxu0 %v8573_v24  ;;  %v8739_v20 = vcombine.high %v4105_v15, %v4121_v13  ;;  %v4134_v24 = vld [vmem:[%s12873_s13 + $0x658] sm:$0xff]  ;;  %v4217_v15 = vld [vmem:[%s12873_s13 + $0x8f0] sm:$0xff]  ;;  %v7883_v13 = vrot.slane %v7861_v31, %v10259_v40 }
 0x7b8   : > { %7745 = vmatprep.subr.bf16.mxu1 %v8579_v25  ;;  %v4150_v25 = vld [vmem:[%s12873_s13 + $0x6d8] sm:$0xff]  ;;  %v4249_v31 = vld [vmem:[%s12873_s13 + $0x9f0] sm:$0xff] }
 0x7b9   : > { %7573 = vmatmul.mubr.bf16.vlgmr.msra.gmra.mrb[40].mxu0 %v11306_v4  ;;  %v8765_v37 = vcombine.high %v4134_v24, %v4150_v25 }
 0x7ba   : > { %7696 = vmatmul.mubr.bf16.vlgmr.msra.gmra.mrb[40].mxu1 %v11306_v4  ;;  %7623 = vmatpush1.bf16.msra.mxu0 %v8572_v28  ;;  %v4153_v28 = vld [vmem:[%s12873_s13 + $0x6f0] sm:$0xff] }
 0x7bb   : > { %7654 = vmatprep.mubr.bf16.mxu0 %v11304_v49  ;;  %7746 = vmatpush1.bf16.msra.mxu1 %v8578_v34  ;;  %v8732_v34 = vcombine.low %v4102_v12, %v4118_v14  ;;  %v8771_v39 = vcombine.high %v4137_v27, %v4153_v28  ;;  %v8770_v5 = vcombine.low %v4137_v27, %v4153_v28  ;;  %v4201_v14 = vld [vmem:[%s12873_s13 + $0x870] sm:$0xff] }
 0x7bc   : > { %7777 = vmatprep.mubr.bf16.mxu1 %v11304_v49  ;;  %7624 = vmatprep.subr.bf16.mxu0 %v8605_v35  ;;  %v7066_v35 = vrot.slane %v12174_v63, %v10270_v56  ;;  %v7899_v27 = vrot.slane %v7891_v47, %v10259_v40  ;;  %v4265_v47 = vld [vmem:[%s12873_s13 + $0xa70] sm:$0xff] }
 0x7bd   : > { %7747 = vmatprep.subr.bf16.mxu1 %v8611_v38 }
 0x7be   : > { %7625 = vmatpush1.bf16.msra.mxu0 %v8604_v42  ;;  %v4182_v42 = vld [vmem:[%s12873_s13 + $0x7d8] sm:$0xff] }
 0x7bf   : > { %7748 = vmatpush1.bf16.msra.mxu1 %v8610_v43  ;;  %7626 = vmatprep.subr.bf16.mxu0 %v8637_v44  ;;  %v8797_v6 = vcombine.high %v4166_v41, %v4182_v42 }
 0x7c0   : > { %7749 = vmatprep.subr.bf16.mxu1 %v8643_v45  ;;  %v4169_v45 = vld [vmem:[%s12873_s13 + $0x770] sm:$0xff] }
 0x7c2   : > { %7627 = vmatpush1.bf16.msra.mxu0 %v8636_v16 }
 0x7c3   : > { %7750 = vmatpush1.bf16.msra.mxu1 %v8642_v21  ;;  %7628 = vmatprep.subr.bf16.mxu0 %v8669_v30  ;;  %v8764_v21 = vcombine.low %v4134_v24, %v4150_v25  ;;  %v8835_v25 = vcombine.high %v4201_v14, %v4217_v15 }
 0x7c4   : > { %7751 = vmatprep.subr.bf16.mxu1 %v8675_v2 }
 0x7c6   : > { %7629 = vmatpush1.bf16.msra.mxu0 %v8668_v8 }
 0x7c7   : > { %7752 = vmatpush1.bf16.msra.mxu1 %v8674_v9  ;;  %7630 = vmatprep.subr.bf16.mxu0 %v8701_v10  ;;  %v8803_v9 = vcombine.high %v4169_v45, %v4185_v61  ;;  %v4198_v10 = vld [vmem:[%s12873_s13 + $0x858] sm:$0xff] }
 0x7c8   : > { %7753 = vmatprep.subr.bf16.mxu1 %v8707_v11  ;;  %v4214_v11 = vld [vmem:[%s12873_s13 + $0x8d8] sm:$0xff] }
 0x7ca   : > { %7631 = vmatpush1.bf16.msra.mxu0 %v8700_v52 }
 0x7cb   : > { %7754 = vmatpush1.bf16.msra.mxu1 %v8706_v18  ;;  %7632 = vmatprep.subr.bf16.mxu0 %v8733_v19  ;;  %v8796_v18 = vcombine.low %v4166_v41, %v4182_v42  ;;  %v8802_v19 = vcombine.low %v4169_v45, %v4185_v61  ;;  %v8893_v41 = vcombine.high %v4262_v46, %v4278_v58  ;;  %v4313_v45 = vld [vmem:[%s12873_s13 + $0xbf0] sm:$0xff] }
 0x7cc   : > { %v7328_v38 = vpop.f32.mrb[28].mxu0  ;;  %7755 = vmatprep.subr.bf16.mxu1 %v8739_v20  ;;  %v8829_v20 = vcombine.high %v4198_v10, %v4214_v11  ;;  %v8892_v61 = vcombine.low %v4262_v46, %v4278_v58 }
 0x7cd   : > { %v7329_v60 = vadd.f32 %v7328_v38, %v7038_v26  ;;  %v7451_v43 = vpop.f32.mrb[28].mxu1  ;;  %v7330_v44 = vpop.f32.mrb[29].mxu0  ;;  %v4230_v26 = vld [vmem:[%s12873_s13 + $0x958] sm:$0xff] }
 0x7ce   : > { %v12429_v62 = vadd.f32 %v7451_v43, %v7062_v32  ;;  %v7331_v0 = vadd.f32 %v7330_v44, %v7042_v33  ;;  %v7453_v1 = vpop.f32.mrb[29].mxu1  ;;  %v7332_v16 = vpop.f32.mrb[30].mxu0  ;;  %7633 = vmatpush1.bf16.msra.mxu0 %v8732_v34  ;;  %v8828_v32 = vcombine.low %v4198_v10, %v4214_v11  ;;  %v8834_v33 = vcombine.low %v4201_v14, %v4217_v15  ;;  %v4310_v43 = vld [vmem:[%s12873_s13 + $0xbd8] sm:$0xff]  ;;  %v4297_v44 = vld [vmem:[%s12873_s13 + $0xb70] sm:$0xff] }
 0x7cf   : > { %v12431_v30 = vadd.f32 %v7453_v1, %v7066_v35  ;;  %v7455_v2 = vpop.f32.mrb[30].mxu1  ;;  %7756 = vmatpush1.bf16.msra.mxu1 %v8738_v36  ;;  %v7333_v3 = vpop.f32.mrb[31].mxu0  ;;  %7634 = vmatprep.subr.bf16.mxu0 %v8765_v37  ;;  %v8861_v34 = vcombine.high %v4230_v26, %v4246_v17  ;;  %v8867_v36 = vcombine.high %v4233_v22, %v4249_v31  ;;  %v4281_v37 = vld [vmem:[%s12873_s13 + $0xaf0] sm:$0xff]  ;;  %v4358_v10 = vld [vmem:[%s12873_s13 + $0xd58] sm:$0xff] }
 0x7d0   : > { %v7862_v7 = vcombine.low %v7329_v60, %v7331_v0  ;;  %v7456_v8 = vpop.f32.mrb[31].mxu1  ;;  %7757 = vmatprep.subr.bf16.mxu1 %v8771_v39  ;;  %v8860_v38 = vcombine.low %v4230_v26, %v4246_v17  ;;  %v8866_v39 = vcombine.low %v4233_v22, %v4249_v31  ;;  %v8899_v42 = vcombine.high %v4265_v47, %v4281_v37  ;;  %v4294_v60 = vld [vmem:[%s12873_s13 + $0xb58] sm:$0xff]  ;;  %v4329_v3 = vld [vmem:[%s12873_s13 + $0xc70] sm:$0xff] }
 0x7d1   : > { %v7910_v12 = vcombine.low %v12429_v62, %v12431_v30  ;;  %v8898_v0 = vcombine.low %v4265_v47, %v4281_v37  ;;  %v8925_v1 = vcombine.high %v4294_v60, %v4310_v43  ;;  %v8931_v16 = vcombine.high %v4297_v44, %v4313_v45  ;;  %v4342_v2 = vld [vmem:[%s12873_s13 + $0xcd8] sm:$0xff]  ;;  %v4361_v14 = vld [vmem:[%s12873_s13 + $0xd70] sm:$0xff]  ;;  %v3944_v47 = vld [vmem:[%s12873_s13 + $0x68] sm:$0xff] }
 0x7d2   : > { %v7890_v52 = vrot.slane %v7862_v7, %v10259_v40  ;;  %7635 = vmatpush1.bf16.msra.mxu0 %v8764_v21  ;;  %v4326_v21 = vld [vmem:[%s12873_s13 + $0xc58] sm:$0xff]  ;;  %v8930_v7 = vcombine.low %v4297_v44, %v4313_v45  ;;  %v4377_v15 = vld [vmem:[%s12873_s13 + $0xdf0] sm:$0xff]  ;;  %v3960_v37 = vld [vmem:[%s12873_s13 + $0xe8] sm:$0xff] }
 0x7d3   : > { %7758 = vmatpush1.bf16.msra.mxu1 %v8770_v5  ;;  %7636 = vmatprep.subr.bf16.mxu0 %v8797_v6  ;;  %v4345_v5 = vld [vmem:[%s12873_s13 + $0xcf0] sm:$0xff]  ;;  %v8924_v6 = vcombine.low %v4294_v60, %v4310_v43  ;;  %v8957_v8 = vcombine.high %v4326_v21, %v4342_v2  ;;  %v4374_v11 = vld [vmem:[%s12873_s13 + $0xdd8] sm:$0xff]  ;;  %v8994_v22 = vcombine.low %v4361_v14, %v4377_v15  ;;  %v3992_v60 = vld [vmem:[%s12873_s13 + $0x1e8] sm:$0xff] }
 0x7d4   : > { %v7892_v24 = vcombine.low %v7883_v13, %v7890_v52  ;;  %7759 = vmatprep.subr.bf16.mxu1 %v8803_v9  ;;  %v8963_v9 = vcombine.high %v4329_v3, %v4345_v5  ;;  %v8956_v13 = vcombine.low %v4326_v21, %v4342_v2  ;;  %v8962_v52 = vcombine.low %v4329_v3, %v4345_v5  ;;  %v4409_v26 = vld [vmem:[%s12873_s13 + $0xef0] sm:$0xff]  ;;  %v4008_v45 = vld [vmem:[%s12873_s13 + $0x268] sm:$0xff] }
 0x7d5   : > { %v8988_v17 = vcombine.low %v4358_v10, %v4374_v11  ;;  %v8576_v43 = vcombine.low %v3944_v47, %v3960_v37  ;;  %v4056_v21 = vld [vmem:[%s12873_s13 + $0x3e8] sm:$0xff] }
 0x7d6   : > { %v7906_v28 = vrot.slane %v7892_v24, %v10259_v40  ;;  %7637 = vmatpush1.bf16.msra.mxu0 %v8796_v18  ;;  %v8989_v18 = vcombine.high %v4358_v10, %v4374_v11  ;;  %v4406_v24 = vld [vmem:[%s12873_s13 + $0xed8] sm:$0xff]  ;;  %v4072_v5 = vld [vmem:[%s12873_s13 + $0x468] sm:$0xff] }
 0x7d7   : > { %7760 = vmatpush1.bf16.msra.mxu1 %v8802_v19  ;;  %7638 = vmatprep.subr.bf16.mxu0 %v8829_v20  ;;  %v8995_v19 = vcombine.high %v4361_v14, %v4377_v15  ;;  %v4390_v20 = vld [vmem:[%s12873_s13 + $0xe58] sm:$0xff]  ;;  %v4120_v10 = vld [vmem:[%s12873_s13 + $0x5e8] sm:$0xff]  ;;  %v12590_v14 = vld [vmem:[%s12874_s14 + $0x10] sm:$0xff] }
 0x7d8   : > { %v7907_v35 = vcombine.low %v7899_v27, %v7906_v28  ;;  %7761 = vmatprep.subr.bf16.mxu1 %v8835_v25  ;;  %v4393_v25 = vld [vmem:[%s12873_s13 + $0xe70] sm:$0xff]  ;;  %v9021_v31 = vcombine.high %v4390_v20, %v4406_v24  ;;  %v4422_v28 = vld [vmem:[%s12873_s13 + $0xf58] sm:$0xff] }
 0x7d9   : > { %v9027_v27 = vcombine.high %v4393_v25, %v4409_v26 }
 0x7da   : > { %8059 = vst [vmem:[%s12473_s30] sm:$0xff] %v7907_v35  ;;  %7639 = vmatpush1.bf16.msra.mxu0 %v8828_v32  ;;  %v4438_v32 = vld [vmem:[%s12873_s13 + $0xfd8] sm:$0xff]  ;;  %v9020_v35 = vcombine.low %v4390_v20, %v4406_v24  ;;  %v7058_v20 = vrot.slane %v12174_v63, %v10248_v54 }
 0x7db   : > { %7762 = vmatpush1.bf16.msra.mxu1 %v8834_v33  ;;  %7640 = vmatprep.subr.bf16.mxu0 %v8861_v34  ;;  %v4425_v33 = vld [vmem:[%s12873_s13 + $0xf70] sm:$0xff]  ;;  %v9053_v46 = vcombine.high %v4422_v28, %v4438_v32 }
 0x7dc   : > { %7763 = vmatprep.subr.bf16.mxu1 %v8867_v36  ;;  %v4441_v34 = vld [vmem:[%s12873_s13 + $0xff0] sm:$0xff]  ;;  %v9026_v36 = vcombine.low %v4393_v25, %v4409_v26  ;;  %v7082_v25 = vrot.slane %v12590_v14, %v10245_v53 }
 0x7dd   : > { %v9059_v58 = vcombine.high %v4425_v33, %v4441_v34 }
 0x7de   : > { %7641 = vmatpush1.bf16.msra.mxu0 %v8860_v38  ;;  %v9052_v38 = vcombine.low %v4422_v28, %v4438_v32 }
 0x7df   : > { %7764 = vmatpush1.bf16.msra.mxu1 %v8866_v39  ;;  %7642 = vmatprep.subr.bf16.mxu0 %v8893_v41  ;;  %v9058_v39 = vcombine.low %v4425_v33, %v4441_v34  ;;  %v8577_v41 = vcombine.high %v3944_v47, %v3960_v37 }
 0x7e0   : > { %7765 = vmatprep.subr.bf16.mxu1 %v8899_v42  ;;  %v3976_v42 = vld [vmem:[%s12873_s13 + $0x168] sm:$0xff] }
 0x7e1   : > { %v8609_v44 = vcombine.high %v3976_v42, %v3992_v60 }
 0x7e2   : > { %7643 = vmatpush1.bf16.msra.mxu0 %v8892_v61  ;;  %v4024_v61 = vld [vmem:[%s12873_s13 + $0x2e8] sm:$0xff] }
 0x7e3   : > { %7766 = vmatpush1.bf16.msra.mxu1 %v8898_v0  ;;  %7644 = vmatprep.subr.bf16.mxu0 %v8925_v1  ;;  %v8608_v0 = vcombine.low %v3976_v42, %v3992_v60  ;;  %v8641_v1 = vcombine.high %v4008_v45, %v4024_v61  ;;  %v8640_v2 = vcombine.low %v4008_v45, %v4024_v61  ;;  %v4216_v42 = vld [vmem:[%s12873_s13 + $0x8e8] sm:$0xff] }
 0x7e4   : > { %7767 = vmatprep.subr.bf16.mxu1 %v8931_v16  ;;  %v4040_v16 = vld [vmem:[%s12873_s13 + $0x368] sm:$0xff] }
 0x7e5   : > { %v8673_v3 = vcombine.high %v4040_v16, %v4056_v21 }
 0x7e6   : > { %7645 = vmatpush1.bf16.msra.mxu0 %v8924_v6  ;;  %v4088_v6 = vld [vmem:[%s12873_s13 + $0x4e8] sm:$0xff] }
 0x7e7   : > { %7768 = vmatpush1.bf16.msra.mxu1 %v8930_v7  ;;  %7646 = vmatprep.subr.bf16.mxu0 %v8957_v8  ;;  %v8672_v7 = vcombine.low %v4040_v16, %v4056_v21  ;;  %v8705_v8 = vcombine.high %v4072_v5, %v4088_v6  ;;  %v8704_v11 = vcombine.low %v4072_v5, %v4088_v6  ;;  %v4264_v16 = vld [vmem:[%s12873_s13 + $0xa68] sm:$0xff] }
 0x7e8   : > { %7769 = vmatprep.subr.bf16.mxu1 %v8963_v9  ;;  %v4104_v9 = vld [vmem:[%s12873_s13 + $0x568] sm:$0xff] }
 0x7e9   : > { %v8737_v15 = vcombine.high %v4104_v9, %v4120_v10  ;;  %v8736_v24 = vcombine.low %v4104_v9, %v4120_v10  ;;  %v4280_v21 = vld [vmem:[%s12873_s13 + $0xae8] sm:$0xff] }
 0x7ea   : > { %7647 = vmatpush1.bf16.msra.mxu0 %v8956_v13  ;;  %v4136_v13 = vld [vmem:[%s12873_s13 + $0x668] sm:$0xff] }
 0x7eb   : > { %7770 = vmatpush1.bf16.msra.mxu1 %v8962_v52  ;;  %7648 = vmatprep.subr.bf16.mxu0 %v8989_v18  ;;  %v4152_v52 = vld [vmem:[%s12873_s13 + $0x6e8] sm:$0xff]  ;;  %v7054_v18 = vrot.slane %v12174_v63, %v10237_v51 }
 0x7ec   : > { %7771 = vmatprep.subr.bf16.mxu1 %v8995_v19  ;;  %v7078_v19 = vrot.slane %v12590_v14, %v10234_v50  ;;  %v8769_v26 = vcombine.high %v4136_v13, %v4152_v52  ;;  %v4296_v5 = vld [vmem:[%s12873_s13 + $0xb68] sm:$0xff] }
 0x7ed   : > { %v4312_v6 = vld [vmem:[%s12873_s13 + $0xbe8] sm:$0xff] }
 0x7ee   : > { %7649 = vmatpush1.bf16.msra.mxu0 %v8988_v17  ;;  %v4328_v9 = vld [vmem:[%s12873_s13 + $0xc68] sm:$0xff] }
 0x7ef   : > { %7772 = vmatpush1.bf16.msra.mxu1 %v8994_v22  ;;  %7650 = vmatprep.subr.bf16.mxu0 %v9021_v31  ;;  %v4168_v22 = vld [vmem:[%s12873_s13 + $0x768] sm:$0xff] }
 0x7f0   : > { %7773 = vmatprep.subr.bf16.mxu1 %v9027_v27  ;;  %v4184_v31 = vld [vmem:[%s12873_s13 + $0x7e8] sm:$0xff] }
 0x7f1   : > { %v8801_v37 = vcombine.high %v4168_v22, %v4184_v31  ;;  %v8800_v45 = vcombine.low %v4168_v22, %v4184_v31  ;;  %v4344_v10 = vld [vmem:[%s12873_s13 + $0xce8] sm:$0xff] }
 0x7f2   : > { %7651 = vmatpush1.bf16.msra.mxu0 %v9020_v35  ;;  %v4440_v22 = vld [vmem:[%s12873_s13 + $0xfe8] sm:$0xff] }
 0x7f3   : > { %7774 = vmatpush1.bf16.msra.mxu1 %v9026_v36  ;;  %7652 = vmatprep.subr.bf16.mxu0 %v9053_v46  ;;  %v8768_v36 = vcombine.low %v4136_v13, %v4152_v52  ;;  %v4360_v13 = vld [vmem:[%s12873_s13 + $0xd68] sm:$0xff] }
 0x7f4   : > { %7775 = vmatprep.subr.bf16.mxu1 %v9059_v58  ;;  %v4376_v52 = vld [vmem:[%s12873_s13 + $0xde8] sm:$0xff] }
 0x7f6   : > { %7653 = vmatpush1.bf16.msra.mxu0 %v9052_v38 }
 0x7f7   : > { %7776 = vmatpush1.bf16.msra.mxu1 %v9058_v39  ;;  %7704 = vmatprep.subr.bf16.mxu0 %v8577_v41  ;;  %v4200_v41 = vld [vmem:[%s12873_s13 + $0x868] sm:$0xff] }
 0x7f8   : > { %v8833_v61 = vcombine.high %v4200_v41, %v4216_v42  ;;  %v8832_v29 = vcombine.low %v4200_v41, %v4216_v42  ;;  %v4042_v42 = vld [vmem:[%s12873_s13 + $0x378] sm:$0xff] }
 0x7f9   : > { %7655 = vmatmul.mubr.bf16.vlgmr.msra.gmra.mrb[44].mxu0 %v11306_v4 }
 0x7fa   : > { %7778 = vmatmul.mubr.bf16.vlgmr.msra.gmra.mrb[44].mxu1 %v11306_v4  ;;  %7705 = vmatpush1.bf16.msra.mxu0 %v8576_v43  ;;  %v12628_v43 = vrot.slane %v7908_v59, %v10259_v40 }
 0x7fb   : > { %7736 = vmatprep.mubr.bf16.mxu0 %v11304_v49  ;;  %7706 = vmatprep.subr.bf16.mxu0 %v8609_v44 }
 0x7fe   : > { %7707 = vmatpush1.bf16.msra.mxu0 %v8608_v0 }
 0x7ff   : > { %7708 = vmatprep.subr.bf16.mxu0 %v8641_v1  ;;  %v4232_v1 = vld [vmem:[%s12873_s13 + $0x968] sm:$0xff] }
 0x800   : > { %v8865_v59 = vcombine.high %v4232_v1, %v4248_v23 }
 0x802   : > { %7709 = vmatpush1.bf16.msra.mxu0 %v8640_v2  ;;  %v8864_v2 = vcombine.low %v4232_v1, %v4248_v23  ;;  %v4074_v23 = vld [vmem:[%s12873_s13 + $0x478] sm:$0xff] }
 0x803   : > { %7710 = vmatprep.subr.bf16.mxu0 %v8673_v3  ;;  %v8897_v3 = vcombine.high %v4264_v16, %v4280_v21 }
 0x806   : > { %7711 = vmatpush1.bf16.msra.mxu0 %v8672_v7  ;;  %v8896_v7 = vcombine.low %v4264_v16, %v4280_v21  ;;  %v4106_v16 = vld [vmem:[%s12873_s13 + $0x578] sm:$0xff] }
 0x807   : > { %7712 = vmatprep.subr.bf16.mxu0 %v8705_v8  ;;  %v8929_v8 = vcombine.high %v4296_v5, %v4312_v6  ;;  %v4122_v21 = vld [vmem:[%s12873_s13 + $0x5f8] sm:$0xff] }
 0x80a   : > { %7713 = vmatpush1.bf16.msra.mxu0 %v8704_v11  ;;  %v8928_v11 = vcombine.low %v4296_v5, %v4312_v6  ;;  %v4138_v5 = vld [vmem:[%s12873_s13 + $0x678] sm:$0xff] }
 0x80b   : > { %7714 = vmatprep.subr.bf16.mxu0 %v8737_v15  ;;  %v8961_v15 = vcombine.high %v4328_v9, %v4344_v10  ;;  %v4154_v6 = vld [vmem:[%s12873_s13 + $0x6f8] sm:$0xff] }
 0x80c   : > { %v7410_v17 = vpop.f32.mrb[32].mxu0 }
 0x80d   : > { %v7411_v27 = vadd.f32 %v7410_v17, %v7054_v18  ;;  %v7533_v28 = vpop.f32.mrb[32].mxu1  ;;  %v7412_v32 = vpop.f32.mrb[33].mxu0  ;;  %v8960_v18 = vcombine.low %v4328_v9, %v4344_v10  ;;  %v4424_v17 = vld [vmem:[%s12873_s13 + $0xf68] sm:$0xff]  ;;  %v7094_v9 = vrot.slane %v12590_v14, %v10264_v48 }
 0x80e   : > { %v12612_v33 = vadd.f32 %v7533_v28, %v7078_v19  ;;  %v7413_v63 = vadd.f32 %v7412_v32, %v7058_v20  ;;  %v7535_v34 = vpop.f32.mrb[33].mxu1  ;;  %v7414_v35 = vpop.f32.mrb[34].mxu0  ;;  %7715 = vmatpush1.bf16.msra.mxu0 %v8736_v24  ;;  %v8993_v19 = vcombine.high %v4360_v13, %v4376_v52  ;;  %v4392_v20 = vld [vmem:[%s12873_s13 + $0xe68] sm:$0xff]  ;;  %v3946_v28 = vld [vmem:[%s12873_s13 + $0x78] sm:$0xff] }
 0x80f   : > { %v12614_v46 = vadd.f32 %v7535_v34, %v7082_v25  ;;  %v7537_v58 = vpop.f32.mrb[34].mxu1  ;;  %v7415_v47 = vpop.f32.mrb[35].mxu0  ;;  %7716 = vmatprep.subr.bf16.mxu0 %v8769_v26  ;;  %v4408_v24 = vld [vmem:[%s12873_s13 + $0xee8] sm:$0xff]  ;;  %v8992_v25 = vcombine.low %v4360_v13, %v4376_v52  ;;  %v3962_v32 = vld [vmem:[%s12873_s13 + $0xf8] sm:$0xff]  ;;  %v8773_v13 = vcombine.high %v4138_v5, %v4154_v6 }
 0x810   : > { %v7909_v38 = vcombine.low %v7411_v27, %v7413_v63  ;;  %v7538_v39 = vpop.f32.mrb[35].mxu1  ;;  %v9025_v26 = vcombine.high %v4392_v20, %v4408_v24  ;;  %v9024_v31 = vcombine.low %v4392_v20, %v4408_v24  ;;  %v9057_v27 = vcombine.high %v4424_v17, %v4440_v22  ;;  %v3978_v35 = vld [vmem:[%s12873_s13 + $0x178] sm:$0xff] }
 0x811   : > { %v7957_v60 = vcombine.low %v12612_v33, %v12614_v46  ;;  %v9056_v63 = vcombine.low %v4424_v17, %v4440_v22  ;;  %v8581_v34 = vcombine.high %v3946_v28, %v3962_v32  ;;  %v8580_v58 = vcombine.low %v3946_v28, %v3962_v32 }
 0x812   : > { %v12631_v44 = vrot.slane %v7909_v38, %v10259_v40  ;;  %7717 = vmatpush1.bf16.msra.mxu0 %v8768_v36  ;;  %v3994_v36 = vld [vmem:[%s12873_s13 + $0x1f8] sm:$0xff] }
 0x813   : > { %7718 = vmatprep.subr.bf16.mxu0 %v8801_v37  ;;  %v8613_v47 = vcombine.high %v3978_v35, %v3994_v36  ;;  %v4010_v37 = vld [vmem:[%s12873_s13 + $0x278] sm:$0xff]  ;;  %v8612_v39 = vcombine.low %v3978_v35, %v3994_v36 }
 0x814   : > { %v7940_v0 = vcombine.low %v12628_v43, %v12631_v44  ;;  %v4026_v38 = vld [vmem:[%s12873_s13 + $0x2f8] sm:$0xff] }
 0x815   : > { %v8645_v41 = vcombine.high %v4010_v37, %v4026_v38  ;;  %v4298_v44 = vld [vmem:[%s12873_s13 + $0xb78] sm:$0xff] }
 0x816   : > { %7719 = vmatpush1.bf16.msra.mxu0 %v8800_v45  ;;  %v4058_v45 = vld [vmem:[%s12873_s13 + $0x3f8] sm:$0xff]  ;;  %v7948_v62 = vrot.slane %v7940_v0, %v10259_v40 }
 0x817   : > { %7720 = vmatprep.subr.bf16.mxu0 %v8833_v61  ;;  %v8644_v61 = vcombine.low %v4010_v37, %v4026_v38  ;;  %v8677_v1 = vcombine.high %v4042_v42, %v4058_v45  ;;  %v7932_v38 = vrot.slane %v7910_v12, %v10259_v40  ;;  %v4314_v0 = vld [vmem:[%s12873_s13 + $0xbf8] sm:$0xff] }
 0x81a   : > { %7721 = vmatpush1.bf16.msra.mxu0 %v8832_v29  ;;  %v8676_v29 = vcombine.low %v4042_v42, %v4058_v45 }
 0x81b   : > { %7722 = vmatprep.subr.bf16.mxu0 %v8865_v59 }
 0x81e   : > { %7723 = vmatpush1.bf16.msra.mxu0 %v8864_v2 }
 0x81f   : > { %7724 = vmatprep.subr.bf16.mxu0 %v8897_v3  ;;  %v8741_v3 = vcombine.high %v4106_v16, %v4122_v21 }
 0x822   : > { %7725 = vmatpush1.bf16.msra.mxu0 %v8896_v7  ;;  %v9659_v7 = vld [vmem:[%s12874_s14 + $0x8] sm:$0xff] }
 0x823   : > { %7726 = vmatprep.subr.bf16.mxu0 %v8929_v8  ;;  %v7070_v8 = vrot.slane %v9659_v7, %v10267_v55  ;;  %v7074_v10 = vrot.slane %v9659_v7, %v10273_v57 }
 0x826   : > { %7727 = vmatpush1.bf16.msra.mxu0 %v8928_v11  ;;  %v8740_v11 = vcombine.low %v4106_v16, %v4122_v21 }
 0x827   : > { %7728 = vmatprep.subr.bf16.mxu0 %v8961_v15  ;;  %v7098_v15 = vrot.slane %v12590_v14, %v10270_v56 }
 0x82a   : > { %7729 = vmatpush1.bf16.msra.mxu0 %v8960_v18  ;;  %v4170_v18 = vld [vmem:[%s12873_s13 + $0x778] sm:$0xff] }
 0x82b   : > { %7730 = vmatprep.subr.bf16.mxu0 %v8993_v19  ;;  %v4186_v19 = vld [vmem:[%s12873_s13 + $0x7f8] sm:$0xff] }
 0x82e   : > { %7731 = vmatpush1.bf16.msra.mxu0 %v8992_v25 }
 0x82f   : > { %7732 = vmatprep.subr.bf16.mxu0 %v9025_v26 }
 0x832   : > { %7733 = vmatpush1.bf16.msra.mxu0 %v9024_v31 }
 0x833   : > { %7734 = vmatprep.subr.bf16.mxu0 %v9057_v27  ;;  %v8772_v27 = vcombine.low %v4138_v5, %v4154_v6  ;;  %v4346_v5 = vld [vmem:[%s12873_s13 + $0xcf8] sm:$0xff]  ;;  %v8932_v6 = vcombine.low %v4298_v44, %v4314_v0 }
 0x836   : > { %7735 = vmatpush1.bf16.msra.mxu0 %v9056_v63 }
 0x837   : > { %7786 = vmatprep.subr.bf16.mxu0 %v8581_v34  ;;  %v8805_v34 = vcombine.high %v4170_v18, %v4186_v19 }
 0x839   : > { %7737 = vmatmul.mubr.bf16.vlgmr.msra.gmra.mrb[48].mxu0 %v11306_v4 }
 0x83a   : > { %7787 = vmatpush1.bf16.msra.mxu0 %v8580_v58  ;;  %7818 = vmatprep.mubr.bf16.mxu0 %v11304_v49  ;;  %v4090_v49 = vld [vmem:[%s12873_s13 + $0x4f8] sm:$0xff] }
 0x83b   : > { %7788 = vmatprep.subr.bf16.mxu0 %v8613_v47  ;;  %v8709_v59 = vcombine.high %v4074_v23, %v4090_v49  ;;  %v8708_v2 = vcombine.low %v4074_v23, %v4090_v49  ;;  %v4202_v58 = vld [vmem:[%s12873_s13 + $0x878] sm:$0xff] }
 0x83c   : > { %v4218_v47 = vld [vmem:[%s12873_s13 + $0x8f8] sm:$0xff] }
 0x83d   : > { %v8837_v42 = vcombine.high %v4202_v58, %v4218_v47  ;;  %v8836_v12 = vcombine.low %v4202_v58, %v4218_v47 }
 0x83e   : > { %7789 = vmatpush1.bf16.msra.mxu0 %v8612_v39 }
 0x83f   : > { %7790 = vmatprep.subr.bf16.mxu0 %v8645_v41  ;;  %v8804_v41 = vcombine.low %v4170_v18, %v4186_v19  ;;  %v4426_v19 = vld [vmem:[%s12873_s13 + $0xf78] sm:$0xff] }
 0x842   : > { %7791 = vmatpush1.bf16.msra.mxu0 %v8644_v61  ;;  %v4234_v61 = vld [vmem:[%s12873_s13 + $0x978] sm:$0xff] }
 0x843   : > { %7792 = vmatprep.subr.bf16.mxu0 %v8677_v1  ;;  %v4250_v1 = vld [vmem:[%s12873_s13 + $0x9f8] sm:$0xff] }
 0x844   : > { %v8869_v23 = vcombine.high %v4234_v61, %v4250_v1  ;;  %v8868_v16 = vcombine.low %v4234_v61, %v4250_v1 }
 0x846   : > { %7793 = vmatpush1.bf16.msra.mxu0 %v8676_v29  ;;  %v4266_v29 = vld [vmem:[%s12873_s13 + $0xa78] sm:$0xff] }
 0x847   : > { %7794 = vmatprep.subr.bf16.mxu0 %v8709_v59  ;;  %v4282_v59 = vld [vmem:[%s12873_s13 + $0xaf8] sm:$0xff] }
 0x848   : > { %v8901_v43 = vcombine.high %v4266_v29, %v4282_v59  ;;  %v8900_v21 = vcombine.low %v4266_v29, %v4282_v59 }
 0x84a   : > { %7795 = vmatpush1.bf16.msra.mxu0 %v8708_v2  ;;  %v8933_v2 = vcombine.high %v4298_v44, %v4314_v0 }
 0x84b   : > { %7796 = vmatprep.subr.bf16.mxu0 %v8741_v3  ;;  %v4330_v3 = vld [vmem:[%s12873_s13 + $0xc78] sm:$0xff] }
 0x84c   : > { %v7492_v52 = vpop.f32.mrb[36].mxu0  ;;  %v8965_v7 = vcombine.high %v4330_v3, %v4346_v5 }
 0x84d   : > { %v7493_v20 = vadd.f32 %v7492_v52, %v7070_v8  ;;  %v7615_v24 = vpop.f32.mrb[36].mxu1  ;;  %v7494_v25 = vpop.f32.mrb[37].mxu0  ;;  %v4362_v8 = vld [vmem:[%s12873_s13 + $0xd78] sm:$0xff] }
 0x84e   : > { %v12736_v26 = vadd.f32 %v7615_v24, %v7094_v9  ;;  %v7495_v17 = vadd.f32 %v7494_v25, %v7074_v10  ;;  %v7617_v22 = vpop.f32.mrb[37].mxu1  ;;  %v7496_v31 = vpop.f32.mrb[38].mxu0  ;;  %7797 = vmatpush1.bf16.msra.mxu0 %v8740_v11  ;;  %v4378_v9 = vld [vmem:[%s12873_s13 + $0xdf8] sm:$0xff]  ;;  %v8964_v10 = vcombine.low %v4330_v3, %v4346_v5 }
 0x84f   : > { %v12738_v28 = vadd.f32 %v7617_v22, %v7098_v15  ;;  %v7619_v32 = vpop.f32.mrb[38].mxu1  ;;  %v7497_v63 = vpop.f32.mrb[39].mxu0  ;;  %7798 = vmatprep.subr.bf16.mxu0 %v8773_v13  ;;  %v8997_v11 = vcombine.high %v4362_v8, %v4378_v9  ;;  %v4394_v15 = vld [vmem:[%s12873_s13 + $0xe78] sm:$0xff]  ;;  %v8996_v52 = vcombine.low %v4362_v8, %v4378_v9  ;;  %v7086_v31 = vrot.slane %v12590_v14, %v10237_v51 }
 0x850   : > { %v7911_v35 = vcombine.low %v7493_v20, %v7495_v17  ;;  %v7620_v36 = vpop.f32.mrb[39].mxu1  ;;  %v4410_v13 = vld [vmem:[%s12873_s13 + $0xef8] sm:$0xff]  ;;  %v7090_v32 = vrot.slane %v12590_v14, %v10248_v54 }
 0x851   : > { %v7959_v37 = vcombine.low %v12736_v26, %v12738_v28  ;;  %v9029_v18 = vcombine.high %v4394_v15, %v4410_v13  ;;  %v4442_v20 = vld [vmem:[%s12873_s13 + $0xff8] sm:$0xff]  ;;  %v9028_v24 = vcombine.low %v4394_v15, %v4410_v13 }
 0x852   : > { %v7939_v39 = vrot.slane %v7911_v35, %v10259_v40  ;;  %7799 = vmatpush1.bf16.msra.mxu0 %v8772_v27  ;;  %v9061_v25 = vcombine.high %v4426_v19, %v4442_v20  ;;  %v9060_v17 = vcombine.low %v4426_v19, %v4442_v20  ;;  %v12805_v22 = vld [vmem:[%s12874_s14 + $0x18] sm:$0xff] }
 0x853   : > { %7800 = vmatprep.subr.bf16.mxu0 %v8805_v34  ;;  %v7110_v27 = vrot.slane %v12805_v22, %v10234_v50  ;;  %v7114_v63 = vrot.slane %v12805_v22, %v10245_v53  ;;  %v7130_v29 = vrot.slane %v12805_v22, %v10270_v56  ;;  %v7981_v56 = vrot.slane %v7959_v37, %v10259_v40 }
 0x854   : > { %v7941_v45 = vcombine.low %v7932_v38, %v7939_v39  ;;  %v7122_v15 = vrot.slane %v12805_v22, %v10248_v54 }
 0x856   : > { %v7955_v30 = vrot.slane %v7941_v45, %v10259_v40  ;;  %7801 = vmatpush1.bf16.msra.mxu0 %v8804_v41 }
 0x857   : > { %7802 = vmatprep.subr.bf16.mxu0 %v8837_v42 }
 0x858   : > { %v7956_v49 = vcombine.low %v7948_v62, %v7955_v30  ;;  %v7967_v62 = vrot.slane %v7957_v60, %v10259_v40 }
 0x85a   : > { %8060 = vst [vmem:[%s12473_s30 + $0x8] sm:$0xff] %v7956_v49  ;;  %7803 = vmatpush1.bf16.msra.mxu0 %v8836_v12  ;;  %v7102_v12 = vrot.slane %v12590_v14, %v10267_v55  ;;  %v7106_v49 = vrot.slane %v12590_v14, %v10273_v57 }
 0x85b   : > { %7804 = vmatprep.subr.bf16.mxu0 %v8869_v23  ;;  %v7126_v23 = vrot.slane %v12805_v22, %v10264_v48 }
 0x85e   : > { %7805 = vmatpush1.bf16.msra.mxu0 %v8868_v16 }
 0x85f   : > { %7806 = vmatprep.subr.bf16.mxu0 %v8901_v43 }
 0x862   : > { %7807 = vmatpush1.bf16.msra.mxu0 %v8900_v21 }
 0x863   : > { %7808 = vmatprep.subr.bf16.mxu0 %v8933_v2 }
 0x866   : > { %7809 = vmatpush1.bf16.msra.mxu0 %v8932_v6 }
 0x867   : > { %7810 = vmatprep.subr.bf16.mxu0 %v8965_v7 }
 0x86a   : > { %7811 = vmatpush1.bf16.msra.mxu0 %v8964_v10 }
 0x86b   : > { %7812 = vmatprep.subr.bf16.mxu0 %v8997_v11  ;;  %v7118_v11 = vrot.slane %v12805_v22, %v10237_v51  ;;  %v7138_v51 = vrot.slane %v12805_v22, %v10273_v57 }
 0x86e   : > { %7813 = vmatpush1.bf16.msra.mxu0 %v8996_v52 }
 0x86f   : > { %7814 = vmatprep.subr.bf16.mxu0 %v9029_v18 }
 0x872   : > { %7815 = vmatpush1.bf16.msra.mxu0 %v9028_v24 }
 0x873   : > { %7816 = vmatprep.subr.bf16.mxu0 %v9061_v25 }
 0x876   : > { %7817 = vmatpush1.bf16.msra.mxu0 %v9060_v17  ;;  %v7134_v17 = vrot.slane %v12805_v22, %v10267_v55 }
 0x879   : > { %7819 = vmatmul.mubr.bf16.vlgmr.msra.gmra.mrb[52].mxu0 %v11306_v4 }
 0x88c   : > { %v7574_v34 = vpop.f32.mrb[40].mxu0 }
 0x88d   : > { %v7575_v35 = vadd.f32 %v7574_v34, %v7086_v31  ;;  %v7697_v4 = vpop.f32.mrb[40].mxu1  ;;  %v7576_v36 = vpop.f32.mrb[41].mxu0 }
 0x88e   : > { %v7698_v58 = vadd.f32 %v7697_v4, %v7110_v27  ;;  %v7577_v47 = vadd.f32 %v7576_v36, %v7090_v32  ;;  %v7699_v38 = vpop.f32.mrb[41].mxu1  ;;  %v7578_v39 = vpop.f32.mrb[42].mxu0 }
 0x88f   : > { %v7700_v41 = vadd.f32 %v7699_v38, %v7114_v63  ;;  %v7701_v42 = vpop.f32.mrb[42].mxu1  ;;  %v7579_v45 = vpop.f32.mrb[43].mxu0 }
 0x890   : > { %v7958_v61 = vcombine.low %v7575_v35, %v7577_v47  ;;  %v7702_v1 = vpop.f32.mrb[43].mxu1 }
 0x891   : > { %v8006_v50 = vcombine.low %v7698_v58, %v7700_v41 }
 0x892   : > { %v7974_v53 = vrot.slane %v7958_v61, %v10259_v40 }
 0x893   : > { %v8016_v20 = vrot.slane %v8006_v50, %v10259_v40 }
 0x894   : > { %v7989_v30 = vcombine.low %v7967_v62, %v7974_v53 }
 0x896   : > { %v7997_v8 = vrot.slane %v7989_v30, %v10259_v40 }
 0x8cc   : > { %v7656_v59 = vpop.f32.mrb[44].mxu0 }
 0x8cd   : > { %v7657_v16 = vadd.f32 %v7656_v59, %v7102_v12  ;;  %v7779_v43 = vpop.f32.mrb[44].mxu1  ;;  %v7658_v33 = vpop.f32.mrb[45].mxu0 }
 0x8ce   : > { %v7780_v46 = vadd.f32 %v7779_v43, %v7126_v23  ;;  %v7659_v60 = vadd.f32 %v7658_v33, %v7106_v49  ;;  %v7781_v44 = vpop.f32.mrb[45].mxu1  ;;  %v7660_v0 = vpop.f32.mrb[46].mxu0 }
 0x8cf   : > { %v7782_v21 = vadd.f32 %v7781_v44, %v7130_v29  ;;  %v7783_v2 = vpop.f32.mrb[46].mxu1  ;;  %v7661_v3 = vpop.f32.mrb[47].mxu0 }
 0x8d0   : > { %v7960_v5 = vcombine.low %v7657_v16, %v7659_v60  ;;  %v7784_v48 = vpop.f32.mrb[47].mxu1 }
 0x8d1   : > { %v8008_v6 = vcombine.low %v7780_v46, %v7782_v21 }
 0x8d2   : > { %v7988_v14 = vrot.slane %v7960_v5, %v10259_v40 }
 0x8d3   : > { %v8030_v4 = vrot.slane %v8008_v6, %v10259_v40 }
 0x8d4   : > { %v7990_v7 = vcombine.low %v7981_v56, %v7988_v14 }
 0x8d6   : > { %v8004_v9 = vrot.slane %v7990_v7, %v10259_v40 }
 0x8d8   : > { %v8005_v10 = vcombine.low %v7997_v8, %v8004_v9 }
 0x8da   : > { %8061 = vst [vmem:[%s12473_s30 + $0x10] sm:$0xff] %v8005_v10 }
 0x90c   : > { %v7738_v13 = vpop.f32.mrb[48].mxu0 }
 0x90d   : > { %v7739_v52 = vadd.f32 %v7738_v13, %v7118_v11  ;;  %v7740_v18 = vpop.f32.mrb[49].mxu0 }
 0x90e   : > { %v7741_v26 = vadd.f32 %v7740_v18, %v7122_v15  ;;  %v7742_v28 = vpop.f32.mrb[50].mxu0 }
 0x90f   : > { %v7743_v37 = vpop.f32.mrb[51].mxu0 }
 0x910   : > { %v8007_v19 = vcombine.low %v7739_v52, %v7741_v26 }
 0x912   : > { %v8023_v24 = vrot.slane %v8007_v19, %v10259_v40 }
 0x914   : > { %v8038_v25 = vcombine.low %v8016_v20, %v8023_v24 }
 0x916   : > { %v8046_v47 = vrot.slane %v8038_v25, %v10259_v40 }
 0x94c   : > { %v7820_v54 = vpop.f32.mrb[52].mxu0 }
 0x94d   : > { %v7821_v31 = vadd.f32 %v7820_v54, %v7134_v17  ;;  %v7822_v27 = vpop.f32.mrb[53].mxu0 }
 0x94e   : > { %v7823_v32 = vadd.f32 %v7822_v27, %v7138_v51  ;;  %v7824_v63 = vpop.f32.mrb[54].mxu0 }
 0x94f   : > { %v7825_v34 = vpop.f32.mrb[55].mxu0 }
 0x950   : > { %v8009_v35 = vcombine.low %v7821_v31, %v7823_v32 }
 0x952   : > { %v8037_v36 = vrot.slane %v8009_v35, %v10259_v40 }
 0x954   : > { %v8039_v58 = vcombine.low %v8030_v4, %v8037_v36 }
 0x956   : > { %v8053_v38 = vrot.slane %v8039_v58, %v10259_v40 }
 0x958   : > { %v8054_v55 = vcombine.low %v8046_v47, %v8053_v38 }
 0x95a   : > { %8062 = vst [vmem:[%s12473_s30 + $0x18] sm:$0xff] %v8054_v55 }
 0x95b PF: > { %s25_s20 = sadd.s32 1, %s9682_s20   ;;  %s12876_s18 = smov %s9678_s19 }
 0x95c   : > { %p22_p5 = scmp.ge.s32.totalorder %s25_s20, 4   ;;  %s12877_s19 = smov %s12879_s21 }
 0x95e   :  { %24 = sbr.rel (!%p22_p5) target bundleno = 2 (0x2), region = 121 }

</bundles_post_ra>
